<compile_context>
chip_gen: v7x
topology: tpu7x:2x2x1
jax: 0.10.0
libtpu: 0.0.40
codegen_flags: <defaults>
</compile_context>

<pallas_src>
import math
from functools import partial

import jax
import jax.numpy as jnp
from jax.experimental import pallas as pl
from jax.experimental.pallas import tpu as pltpu


_PARAM_KEYS = ["wq", "wk", "wv", "bq", "bk", "bv", "wo", "bo",
               "ln1w", "ln1b", "w1", "b1", "w2", "b2", "ln2w", "ln2b"]


# ---------------------------------------------------------------------------
# Fused kernel: the whole encoder stack for one batch tile (params resident)
# ---------------------------------------------------------------------------
def _fused_encoder_kernel(x_ref,
                          wq_ref, wk_ref, wv_ref, bq_ref, bk_ref, bv_ref,
                          wo_ref, bo_ref, ln1w_ref, ln1b_ref,
                          w1_ref, b1_ref, w2_ref, b2_ref,
                          ln2w_ref, ln2b_ref,
                          o_ref, *,
                          depth, num_heads, batch, seq, matmul_dtype,
                          eps=1e-5):
    rows = batch * seq
    E = x_ref.shape[-1]
    H = num_heads
    d = E // H
    scale = 1.0 / math.sqrt(d)

    def layer_norm(y, g, b):
        mu = jnp.mean(y, axis=-1, keepdims=True)
        var = jnp.mean(jnp.square(y - mu), axis=-1, keepdims=True)
        return (y - mu) * jax.lax.rsqrt(var + eps) * g + b

    x = x_ref[...].astype(jnp.float32)                      # (rows, E) f32

    # Static unroll over layers: parameters are VMEM-resident and indexed
    # with static layer / head indices -> no per-layer DMA or grid overhead.
    for i in range(depth):
        xm = x.astype(matmul_dtype)

        # ---- multi-head self-attention (per-head weight slabs) -----------
        attn = None
        for h in range(H):
            q = (jnp.dot(xm, wq_ref[i, h], preferred_element_type=jnp.float32)
                 + bq_ref[i, h]) * scale                     # (rows, d)
            k = (jnp.dot(xm, wk_ref[i, h], preferred_element_type=jnp.float32)
                 + bk_ref[i, h])
            v = (jnp.dot(xm, wv_ref[i, h], preferred_element_type=jnp.float32)
                 + bv_ref[i, h])
            q3 = q.astype(matmul_dtype).reshape(batch, seq, d)
            k3 = k.astype(matmul_dtype).reshape(batch, seq, d)
            v3 = v.astype(matmul_dtype).reshape(batch, seq, d)

            s = jnp.einsum('bqd,bkd->bqk', q3, k3,
                           preferred_element_type=jnp.float32)   # (B, S, S)
            s = s - jnp.max(s, axis=-1, keepdims=True)
            p = jnp.exp(s)
            p = p * pl.reciprocal(jnp.sum(p, axis=-1, keepdims=True),
                                  approx=True)
            ctx = jnp.einsum('bqk,bkd->bqd', p.astype(matmul_dtype), v3,
                             preferred_element_type=jnp.float32)  # (B, S, d)

            # per-head output projection; head reduction folded into the sum
            ph = jnp.dot(ctx.reshape(rows, d).astype(matmul_dtype),
                         wo_ref[i, h],
                         preferred_element_type=jnp.float32)      # (rows, E)
            attn = ph if attn is None else attn + ph
        attn = attn + bo_ref[i]

        x = layer_norm(x + attn, ln1w_ref[i], ln1b_ref[i])        # post-norm 1

        # ---- feed forward -------------------------------------------------
        h1 = (jnp.dot(x.astype(matmul_dtype), w1_ref[i],
                      preferred_element_type=jnp.float32) + b1_ref[i])
        h1 = jnp.maximum(h1, 0.0)                                 # relu
        ff = (jnp.dot(h1.astype(matmul_dtype), w2_ref[i],
                      preferred_element_type=jnp.float32) + b2_ref[i])

        x = layer_norm(x + ff, ln2w_ref[i], ln2b_ref[i])          # post-norm 2

    o_ref[...] = x.astype(o_ref.dtype)


def fused_transformer_encoder(x, packed, num_heads, *, batch_tile=None,
                              matmul_dtype=jnp.bfloat16):
    """Apply the whole stack of encoder layers with one pallas_call.

    x: (B, S, E). packed: dict of depth-stacked, per-head re-packed params.
    batch_tile: rows-per-grid-step batch split. None (default, whole batch) is
    right on single-TensorCore chips (v5e/v6e); pass B//2 on v7x only when
    (B//2)*S >= ~128 rows so both TensorCores get non-trivial work.
    """
    B, S, E = x.shape
    depth = packed["wq"].shape[0]
    TB = B if batch_tile is None else batch_tile
    assert B % TB == 0, (B, TB)
    num_bt = B // TB
    rows = TB * S
    assert num_bt == 1 or rows % 8 == 0, "batch-tile rows must be 8-aligned"

    x2 = x.reshape(B * S, E)                                # lane-dense slab

    def resident_spec(a):
        # Full-array block, constant index_map -> DMA'd once, stays in VMEM.
        nd = a.ndim
        return pl.BlockSpec(a.shape, lambda bt, _nd=nd: (0,) * _nd)

    params = [packed[k] for k in _PARAM_KEYS]
    in_specs = [pl.BlockSpec((rows, E), lambda bt: (bt, 0))]
    in_specs += [resident_spec(a) for a in params]

    out = pl.pallas_call(
        partial(_fused_encoder_kernel, depth=depth, num_heads=num_heads,
                batch=TB, seq=S, matmul_dtype=matmul_dtype),
        out_shape=jax.ShapeDtypeStruct((B * S, E), x.dtype),
        grid=(num_bt,),
        in_specs=in_specs,
        out_specs=pl.BlockSpec((rows, E), lambda bt: (bt, 0)),
        compiler_params=pltpu.CompilerParams(
            dimension_semantics=("parallel",),
            vmem_limit_bytes=64 * 1024 * 1024),
    )(x2, *params)
    return out.reshape(B, S, E)


# ---------------------------------------------------------------------------
# Parameter construction (deterministic, synthetic) + host-side packing
# ---------------------------------------------------------------------------
def init_layer_params(key, embed_dim, dim_feedforward):
    """PyTorch-convention parameters for one nn.TransformerEncoderLayer."""
    ks = jax.random.split(key, 10)
    s = 0.05
    E, F = embed_dim, dim_feedforward
    return dict(
        wqkv=s * jax.random.normal(ks[0], (3 * E, E), jnp.float32),  # (out,in)
        bqkv=s * jax.random.normal(ks[1], (3 * E,), jnp.float32),
        wo=s * jax.random.normal(ks[2], (E, E), jnp.float32),
        bo=s * jax.random.normal(ks[3], (E,), jnp.float32),
        ln1w=1.0 + 0.01 * jax.random.normal(ks[4], (E,), jnp.float32),
        ln1b=0.01 * jax.random.normal(ks[5], (E,), jnp.float32),
        w1=s * jax.random.normal(ks[6], (F, E), jnp.float32),
        b1=s * jax.random.normal(ks[7], (F,), jnp.float32),
        w2=s * jax.random.normal(ks[8], (E, F), jnp.float32),
        b2=s * jax.random.normal(ks[9], (E,), jnp.float32),
        ln2w=jnp.ones((E,), jnp.float32),
        ln2b=jnp.zeros((E,), jnp.float32),
    )


def pack_layer_params(layers, embed_dim, num_heads, matmul_dtype):
    """Stack per-layer params along depth, split per head, pre-transpose."""
    E = embed_dim
    H = num_heads
    d = E // H

    def stack(fn, dtype=None):
        a = jnp.stack([fn(p) for p in layers], axis=0)
        return a.astype(dtype) if dtype is not None else a

    def per_head_in(w):          # w: (E, E) output-major slice of in_proj
        return jnp.stack([w[h * d:(h + 1) * d, :].T for h in range(H)], 0)  # (H,E,d)

    def per_head_bias(b):        # (E,) -> (H, 1, d)
        return b.reshape(H, 1, d)

    def per_head_out(wo):        # (E, E) out_proj.weight -> (H, d, E)
        return jnp.stack([wo[:, h * d:(h + 1) * d].T for h in range(H)], 0)

    return dict(
        wq=stack(lambda p: per_head_in(p["wqkv"][:E]), matmul_dtype),
        wk=stack(lambda p: per_head_in(p["wqkv"][E:2 * E]), matmul_dtype),
        wv=stack(lambda p: per_head_in(p["wqkv"][2 * E:]), matmul_dtype),
        bq=stack(lambda p: per_head_bias(p["bqkv"][:E])),
        bk=stack(lambda p: per_head_bias(p["bqkv"][E:2 * E])),
        bv=stack(lambda p: per_head_bias(p["bqkv"][2 * E:])),
        wo=stack(lambda p: per_head_out(p["wo"]), matmul_dtype),
        bo=stack(lambda p: p["bo"].reshape(1, E)),
        ln1w=stack(lambda p: p["ln1w"].reshape(1, E)),
        ln1b=stack(lambda p: p["ln1b"].reshape(1, E)),
        w1=stack(lambda p: p["w1"].T, matmul_dtype),          # (D, E, F)
        b1=stack(lambda p: p["b1"].reshape(1, -1)),
        w2=stack(lambda p: p["w2"].T, matmul_dtype),          # (D, F, E)
        b2=stack(lambda p: p["b2"].reshape(1, E)),
        ln2w=stack(lambda p: p["ln2w"].reshape(1, E)),
        ln2b=stack(lambda p: p["ln2b"].reshape(1, E)),
    )


# ---------------------------------------------------------------------------
# Pure-JAX f32 reference (PyTorch eval-mode semantics) for correctness check
# ---------------------------------------------------------------------------
def reference_transformer_encoder(x, layers, num_heads, eps=1e-5):
    B, S, E = x.shape
    H = num_heads
    d = E // H
    scale = 1.0 / math.sqrt(d)

    def ln(y, g, b):
        mu = y.mean(-1, keepdims=True)
        var = ((y - mu) ** 2).mean(-1, keepdims=True)
        return (y - mu) / jnp.sqrt(var + eps) * g + b

    for p in layers:
        qkv = jnp.einsum('bse,oe->bso', x, p["wqkv"]) + p["bqkv"]
        q, k, v = qkv[..., :E], qkv[..., E:2 * E], qkv[..., 2 * E:]
        q = q.reshape(B, S, H, d).transpose(0, 2, 1, 3) * scale
        k = k.reshape(B, S, H, d).transpose(0, 2, 1, 3)
        v = v.reshape(B, S, H, d).transpose(0, 2, 1, 3)
        s = jnp.einsum('bhqd,bhkd->bhqk', q, k)
        a = jax.nn.softmax(s, axis=-1)
        ctx = jnp.einsum('bhqk,bhkd->bhqd', a, v)
        ctx = ctx.transpose(0, 2, 1, 3).reshape(B, S, E)
        attn = jnp.einsum('bse,oe->bso', ctx, p["wo"]) + p["bo"]
        x = ln(x + attn, p["ln1w"], p["ln1b"])
        h1 = jax.nn.relu(jnp.einsum('bse,fe->bsf', x, p["w1"]) + p["b1"])
        ff = jnp.einsum('bsf,ef->bse', h1, p["w2"]) + p["b2"]
        x = ln(x + ff, p["ln2w"], p["ln2b"])
    return x


# ---------------------------------------------------------------------------
class FeatureReconstructionTransformer:
    """JAX/Pallas port of the PyTorch FeatureReconstructionTransformer."""

    def __init__(self, embed_dim, depth, num_heads, mlp_ratio=4.0,
                 num_patches=None, key=None, matmul_dtype=jnp.bfloat16):
        if key is None:
            key = jax.random.PRNGKey(0)
        assert embed_dim % num_heads == 0
        self.embed_dim = embed_dim
        self.num_heads = num_heads
        self.depth = depth
        self.num_patches_per_modality = num_patches
        self.matmul_dtype = matmul_dtype
        dff = int(embed_dim * mlp_ratio)
        keys = jax.random.split(key, depth + 1)
        self.layers = [init_layer_params(keys[i], embed_dim, dff)
                       for i in range(depth)]
        self.packed_params = pack_layer_params(self.layers, embed_dim,
                                               num_heads, matmul_dtype)
        if num_patches is not None:
            self.missing_tokens = jax.random.normal(
                keys[depth], (1, num_patches, embed_dim), jnp.float32)
        else:
            self.missing_tokens = None
            print("Warning: num_patches_per_modality not specified. "
                  "Missing tokens fall back to zeros.")

    def _build_queries(self, B, num_missing_modalities,
                       target_num_patches_per_modality, dtype):
        if (self.missing_tokens is not None and
                self.missing_tokens.shape[1] == target_num_patches_per_modality):
            single = jnp.broadcast_to(
                self.missing_tokens,
                (B, target_num_patches_per_modality, self.embed_dim))
            # torch.repeat_interleave(dim=1) == jnp.repeat(axis=1)
            return jnp.repeat(single, num_missing_modalities, axis=1).astype(dtype)
        print("Warning: Using zero tokens as queries for reconstruction.")
        return jnp.zeros(
            (B, num_missing_modalities * target_num_patches_per_modality,
             self.embed_dim), dtype)

    def __call__(self, available_features_cat, num_missing_modalities,
                 target_num_patches_per_modality, batch_tile=None):
        B, S_avail, E = available_features_cat.shape
        if num_missing_modalities == 0:
            return jnp.zeros((B, 0, E), available_features_cat.dtype)
        queries = self._build_queries(B, num_missing_modalities,
                                      target_num_patches_per_modality,
                                      available_features_cat.dtype)
        x = jnp.concatenate([available_features_cat, queries], axis=1)
        x = fused_transformer_encoder(x, self.packed_params, self.num_heads,
                                      batch_tile=batch_tile,
                                      matmul_dtype=self.matmul_dtype)
        return x[:, S_avail:]


# ---------------------------------------------------------------------------
if __name__ == "__main__":
    key = jax.random.PRNGKey(0)
    k_in, k_model = jax.random.split(key)

    embed_dim = 32
    depth = 2
    num_heads = 4
    num_patches = 8                      # patches per modality
    B = 2
    num_available_modalities = 2
    num_missing_modalities = 2
    S_avail = num_available_modalities * num_patches        # 16

    available_features_cat = jax.random.normal(
        k_in, (B, S_avail, embed_dim), jnp.float32)

    model = FeatureReconstructionTransformer(
        embed_dim=embed_dim, depth=depth, num_heads=num_heads,
        mlp_ratio=4.0, num_patches=num_patches, key=k_model)

    out = model(available_features_cat, num_missing_modalities, num_patches)
    out = jax.block_until_ready(out)

    expected_shape = (B, num_missing_modalities * num_patches, embed_dim)
    assert out.shape == expected_shape, (out.shape, expected_shape)
    assert bool(jnp.all(jnp.isfinite(out)))

    # Pure-JAX f32 reference (loose tolerance: kernel uses bf16 MXU operands
    # and an approximate softmax reciprocal).
    queries = model._build_queries(B, num_missing_modalities, num_patches,
                                   available_features_cat.dtype)
    x_full = jnp.concatenate([available_features_cat, queries], axis=1)
    ref = reference_transformer_encoder(x_full, model.layers,
                                        num_heads)[:, S_avail:]
    max_err = float(jnp.max(jnp.abs(out - ref)))
    assert max_err < 5e-2, f"max abs error vs reference too large: {max_err}"

    print("KERNEL_OK")
</pallas_src>

<mosaic_0001>
module attributes {stable_mosaic.version = 11 : i64} {
  func.func @_fused_encoder_kernel(%arg0: i32, %arg1: memref<64x32xf32, #tpu.memory_space<vmem>>, %arg2: memref<2x4x32x8xbf16, #tpu.memory_space<vmem>>, %arg3: memref<2x4x32x8xbf16, #tpu.memory_space<vmem>>, %arg4: memref<2x4x32x8xbf16, #tpu.memory_space<vmem>>, %arg5: memref<2x4x1x8xf32, #tpu.memory_space<vmem>>, %arg6: memref<2x4x1x8xf32, #tpu.memory_space<vmem>>, %arg7: memref<2x4x1x8xf32, #tpu.memory_space<vmem>>, %arg8: memref<2x4x8x32xbf16, #tpu.memory_space<vmem>>, %arg9: memref<2x1x32xf32, #tpu.memory_space<vmem>>, %arg10: memref<2x1x32xf32, #tpu.memory_space<vmem>>, %arg11: memref<2x1x32xf32, #tpu.memory_space<vmem>>, %arg12: memref<2x32x128xbf16, #tpu.memory_space<vmem>>, %arg13: memref<2x1x128xf32, #tpu.memory_space<vmem>>, %arg14: memref<2x128x32xbf16, #tpu.memory_space<vmem>>, %arg15: memref<2x1x32xf32, #tpu.memory_space<vmem>>, %arg16: memref<2x1x32xf32, #tpu.memory_space<vmem>>, %arg17: memref<2x1x32xf32, #tpu.memory_space<vmem>>, %arg18: memref<64x32xf32, #tpu.memory_space<vmem>>) attributes {dimension_semantics = [#tpu.dimension_semantics<parallel>], iteration_bounds = array<i64: 1>, scalar_prefetch = 0 : i64, scratch_operands = 0 : i64, tpu.core_type = #tpu.core_type<tc>, window_params = [{transform_indices = @transform_0, window_bounds = array<i64: 64, 32>}, {pipeline_mode = #tpu.pipeline_mode<synchronous>, transform_indices = @transform_1, window_bounds = array<i64: 2, 4, 32, 8>}, {pipeline_mode = #tpu.pipeline_mode<synchronous>, transform_indices = @transform_2, window_bounds = array<i64: 2, 4, 32, 8>}, {pipeline_mode = #tpu.pipeline_mode<synchronous>, transform_indices = @transform_3, window_bounds = array<i64: 2, 4, 32, 8>}, {pipeline_mode = #tpu.pipeline_mode<synchronous>, transform_indices = @transform_4, window_bounds = array<i64: 2, 4, 1, 8>}, {pipeline_mode = #tpu.pipeline_mode<synchronous>, transform_indices = @transform_5, window_bounds = array<i64: 2, 4, 1, 8>}, {pipeline_mode = #tpu.pipeline_mode<synchronous>, transform_indices = @transform_6, window_bounds = array<i64: 2, 4, 1, 8>}, {pipeline_mode = #tpu.pipeline_mode<synchronous>, transform_indices = @transform_7, window_bounds = array<i64: 2, 4, 8, 32>}, {pipeline_mode = #tpu.pipeline_mode<synchronous>, transform_indices = @transform_8, window_bounds = array<i64: 2, 1, 32>}, {pipeline_mode = #tpu.pipeline_mode<synchronous>, transform_indices = @transform_9, window_bounds = array<i64: 2, 1, 32>}, {pipeline_mode = #tpu.pipeline_mode<synchronous>, transform_indices = @transform_10, window_bounds = array<i64: 2, 1, 32>}, {pipeline_mode = #tpu.pipeline_mode<synchronous>, transform_indices = @transform_11, window_bounds = array<i64: 2, 32, 128>}, {pipeline_mode = #tpu.pipeline_mode<synchronous>, transform_indices = @transform_12, window_bounds = array<i64: 2, 1, 128>}, {pipeline_mode = #tpu.pipeline_mode<synchronous>, transform_indices = @transform_13, window_bounds = array<i64: 2, 128, 32>}, {pipeline_mode = #tpu.pipeline_mode<synchronous>, transform_indices = @transform_14, window_bounds = array<i64: 2, 1, 32>}, {pipeline_mode = #tpu.pipeline_mode<synchronous>, transform_indices = @transform_15, window_bounds = array<i64: 2, 1, 32>}, {pipeline_mode = #tpu.pipeline_mode<synchronous>, transform_indices = @transform_16, window_bounds = array<i64: 2, 1, 32>}, {transform_indices = @transform_17, window_bounds = array<i64: 64, 32>}]} {
    %c0 = arith.constant 0 : index
    %c0_0 = arith.constant 0 : index
    %0 = vector.load %arg1[%c0, %c0_0] : memref<64x32xf32, #tpu.memory_space<vmem>>, vector<64x32xf32>
    %1 = arith.truncf %0 : vector<64x32xf32> to vector<64x32xbf16>
    %c0_1 = arith.constant 0 : index
    %c0_2 = arith.constant 0 : index
    %c0_3 = arith.constant 0 : index
    %c0_4 = arith.constant 0 : index
    %2 = vector.load %arg2[%c0_1, %c0_2, %c0_3, %c0_4] : memref<2x4x32x8xbf16, #tpu.memory_space<vmem>>, vector<1x1x32x8xbf16>
    %3 = vector.shape_cast %2 : vector<1x1x32x8xbf16> to vector<32x8xbf16>
    %cst = arith.constant dense<0.000000e+00> : vector<64x8xf32>
    %4 = tpu.matmul %1, %3, %cst {dimension_numbers = #tpu.dot_dimension_numbers<[1], [0], [0], [1], [0, 0, 1, 1], [], []>} : vector<64x32xbf16>, vector<32x8xbf16>, vector<64x8xf32> -> vector<64x8xf32>
    %c0_5 = arith.constant 0 : index
    %c0_6 = arith.constant 0 : index
    %c0_7 = arith.constant 0 : index
    %c0_8 = arith.constant 0 : index
    %5 = vector.load %arg5[%c0_5, %c0_6, %c0_7, %c0_8] : memref<2x4x1x8xf32, #tpu.memory_space<vmem>>, vector<1x1x1x8xf32>
    %6 = vector.shape_cast %5 : vector<1x1x1x8xf32> to vector<1x8xf32>
    %7 = vector.broadcast %6 : vector<1x8xf32> to vector<64x8xf32>
    %8 = arith.addf %4, %7 : vector<64x8xf32>
    %cst_9 = arith.constant 0.353553385 : f32
    %9 = vector.broadcast %cst_9 : f32 to vector<64x8xf32>
    %10 = arith.mulf %8, %9 : vector<64x8xf32>
    %c0_10 = arith.constant 0 : index
    %c0_11 = arith.constant 0 : index
    %c0_12 = arith.constant 0 : index
    %c0_13 = arith.constant 0 : index
    %11 = vector.load %arg3[%c0_10, %c0_11, %c0_12, %c0_13] : memref<2x4x32x8xbf16, #tpu.memory_space<vmem>>, vector<1x1x32x8xbf16>
    %12 = vector.shape_cast %11 : vector<1x1x32x8xbf16> to vector<32x8xbf16>
    %cst_14 = arith.constant dense<0.000000e+00> : vector<64x8xf32>
    %13 = tpu.matmul %1, %12, %cst_14 {dimension_numbers = #tpu.dot_dimension_numbers<[1], [0], [0], [1], [0, 0, 1, 1], [], []>} : vector<64x32xbf16>, vector<32x8xbf16>, vector<64x8xf32> -> vector<64x8xf32>
    %c0_15 = arith.constant 0 : index
    %c0_16 = arith.constant 0 : index
    %c0_17 = arith.constant 0 : index
    %c0_18 = arith.constant 0 : index
    %14 = vector.load %arg6[%c0_15, %c0_16, %c0_17, %c0_18] : memref<2x4x1x8xf32, #tpu.memory_space<vmem>>, vector<1x1x1x8xf32>
    %15 = vector.shape_cast %14 : vector<1x1x1x8xf32> to vector<1x8xf32>
    %16 = vector.broadcast %15 : vector<1x8xf32> to vector<64x8xf32>
    %17 = arith.addf %13, %16 : vector<64x8xf32>
    %c0_19 = arith.constant 0 : index
    %c0_20 = arith.constant 0 : index
    %c0_21 = arith.constant 0 : index
    %c0_22 = arith.constant 0 : index
    %18 = vector.load %arg4[%c0_19, %c0_20, %c0_21, %c0_22] : memref<2x4x32x8xbf16, #tpu.memory_space<vmem>>, vector<1x1x32x8xbf16>
    %19 = vector.shape_cast %18 : vector<1x1x32x8xbf16> to vector<32x8xbf16>
    %cst_23 = arith.constant dense<0.000000e+00> : vector<64x8xf32>
    %20 = tpu.matmul %1, %19, %cst_23 {dimension_numbers = #tpu.dot_dimension_numbers<[1], [0], [0], [1], [0, 0, 1, 1], [], []>} : vector<64x32xbf16>, vector<32x8xbf16>, vector<64x8xf32> -> vector<64x8xf32>
    %c0_24 = arith.constant 0 : index
    %c0_25 = arith.constant 0 : index
    %c0_26 = arith.constant 0 : index
    %c0_27 = arith.constant 0 : index
    %21 = vector.load %arg7[%c0_24, %c0_25, %c0_26, %c0_27] : memref<2x4x1x8xf32, #tpu.memory_space<vmem>>, vector<1x1x1x8xf32>
    %22 = vector.shape_cast %21 : vector<1x1x1x8xf32> to vector<1x8xf32>
    %23 = vector.broadcast %22 : vector<1x8xf32> to vector<64x8xf32>
    %24 = arith.addf %20, %23 : vector<64x8xf32>
    %25 = arith.truncf %10 : vector<64x8xf32> to vector<64x8xbf16>
    %26 = vector.shape_cast %25 : vector<64x8xbf16> to vector<2x32x8xbf16>
    %27 = arith.truncf %17 : vector<64x8xf32> to vector<64x8xbf16>
    %28 = vector.shape_cast %27 : vector<64x8xbf16> to vector<2x32x8xbf16>
    %29 = arith.truncf %24 : vector<64x8xf32> to vector<64x8xbf16>
    %30 = vector.shape_cast %29 : vector<64x8xbf16> to vector<2x32x8xbf16>
    "tpu.trace_start"() <{level = 10 : i32, message = "bqd,bkd->bqk"}> : () -> ()
    %cst_28 = arith.constant dense<0.000000e+00> : vector<2x32x32xf32>
    %31 = tpu.matmul %26, %28, %cst_28 {dimension_numbers = #tpu.dot_dimension_numbers<[2], [2], [1], [1], [0, 0, 0, 1, 1, 1], [0], [0]>} : vector<2x32x8xbf16>, vector<2x32x8xbf16>, vector<2x32x32xf32> -> vector<2x32x32xf32>
    "tpu.trace_stop"() : () -> ()
    %cst_29 = arith.constant dense<0xFF800000> : vector<2x32xf32>
    %32 = vector.multi_reduction <maximumf>, %31, %cst_29 [2] : vector<2x32x32xf32> to vector<2x32xf32>
    %33 = vector.shape_cast %32 : vector<2x32xf32> to vector<2x32x1xf32>
    %34 = vector.broadcast %33 : vector<2x32x1xf32> to vector<2x32x32xf32>
    %35 = arith.subf %31, %34 : vector<2x32x32xf32>
    %36 = math.exp %35 : vector<2x32x32xf32>
    %cst_30 = arith.constant dense<0.000000e+00> : vector<2x32xf32>
    %37 = vector.multi_reduction <add>, %36, %cst_30 [2] : vector<2x32x32xf32> to vector<2x32xf32>
    %38 = vector.shape_cast %37 : vector<2x32xf32> to vector<2x32x1xf32>
    %39 = tpu.reciprocal %38 {approx = true} : vector<2x32x1xf32> -> vector<2x32x1xf32>
    %40 = vector.broadcast %39 : vector<2x32x1xf32> to vector<2x32x32xf32>
    %41 = arith.mulf %36, %40 : vector<2x32x32xf32>
    %42 = arith.truncf %41 : vector<2x32x32xf32> to vector<2x32x32xbf16>
    "tpu.trace_start"() <{level = 10 : i32, message = "bqk,bkd->bqd"}> : () -> ()
    %cst_31 = arith.constant dense<0.000000e+00> : vector<2x32x8xf32>
    %43 = tpu.matmul %42, %30, %cst_31 {dimension_numbers = #tpu.dot_dimension_numbers<[2], [1], [1], [2], [0, 0, 0, 1, 1, 2], [0], [0]>} : vector<2x32x32xbf16>, vector<2x32x8xbf16>, vector<2x32x8xf32> -> vector<2x32x8xf32>
    "tpu.trace_stop"() : () -> ()
    %44 = vector.shape_cast %43 : vector<2x32x8xf32> to vector<64x8xf32>
    %45 = arith.truncf %44 : vector<64x8xf32> to vector<64x8xbf16>
    %c0_32 = arith.constant 0 : index
    %c0_33 = arith.constant 0 : index
    %c0_34 = arith.constant 0 : index
    %c0_35 = arith.constant 0 : index
    %46 = vector.load %arg8[%c0_32, %c0_33, %c0_34, %c0_35] : memref<2x4x8x32xbf16, #tpu.memory_space<vmem>>, vector<1x1x8x32xbf16>
    %47 = vector.shape_cast %46 : vector<1x1x8x32xbf16> to vector<8x32xbf16>
    %cst_36 = arith.constant dense<0.000000e+00> : vector<64x32xf32>
    %48 = tpu.matmul %45, %47, %cst_36 {dimension_numbers = #tpu.dot_dimension_numbers<[1], [0], [0], [1], [0, 0, 1, 1], [], []>} : vector<64x8xbf16>, vector<8x32xbf16>, vector<64x32xf32> -> vector<64x32xf32>
    %c0_37 = arith.constant 0 : index
    %c1 = arith.constant 1 : index
    %c0_38 = arith.constant 0 : index
    %c0_39 = arith.constant 0 : index
    %49 = vector.load %arg2[%c0_37, %c1, %c0_38, %c0_39] : memref<2x4x32x8xbf16, #tpu.memory_space<vmem>>, vector<1x1x32x8xbf16>
    %50 = vector.shape_cast %49 : vector<1x1x32x8xbf16> to vector<32x8xbf16>
    %cst_40 = arith.constant dense<0.000000e+00> : vector<64x8xf32>
    %51 = tpu.matmul %1, %50, %cst_40 {dimension_numbers = #tpu.dot_dimension_numbers<[1], [0], [0], [1], [0, 0, 1, 1], [], []>} : vector<64x32xbf16>, vector<32x8xbf16>, vector<64x8xf32> -> vector<64x8xf32>
    %c0_41 = arith.constant 0 : index
    %c1_42 = arith.constant 1 : index
    %c0_43 = arith.constant 0 : index
    %c0_44 = arith.constant 0 : index
    %52 = vector.load %arg5[%c0_41, %c1_42, %c0_43, %c0_44] : memref<2x4x1x8xf32, #tpu.memory_space<vmem>>, vector<1x1x1x8xf32>
    %53 = vector.shape_cast %52 : vector<1x1x1x8xf32> to vector<1x8xf32>
    %54 = vector.broadcast %53 : vector<1x8xf32> to vector<64x8xf32>
    %55 = arith.addf %51, %54 : vector<64x8xf32>
    %cst_45 = arith.constant 0.353553385 : f32
    %56 = vector.broadcast %cst_45 : f32 to vector<64x8xf32>
    %57 = arith.mulf %55, %56 : vector<64x8xf32>
    %c0_46 = arith.constant 0 : index
    %c1_47 = arith.constant 1 : index
    %c0_48 = arith.constant 0 : index
    %c0_49 = arith.constant 0 : index
    %58 = vector.load %arg3[%c0_46, %c1_47, %c0_48, %c0_49] : memref<2x4x32x8xbf16, #tpu.memory_space<vmem>>, vector<1x1x32x8xbf16>
    %59 = vector.shape_cast %58 : vector<1x1x32x8xbf16> to vector<32x8xbf16>
    %cst_50 = arith.constant dense<0.000000e+00> : vector<64x8xf32>
    %60 = tpu.matmul %1, %59, %cst_50 {dimension_numbers = #tpu.dot_dimension_numbers<[1], [0], [0], [1], [0, 0, 1, 1], [], []>} : vector<64x32xbf16>, vector<32x8xbf16>, vector<64x8xf32> -> vector<64x8xf32>
    %c0_51 = arith.constant 0 : index
    %c1_52 = arith.constant 1 : index
    %c0_53 = arith.constant 0 : index
    %c0_54 = arith.constant 0 : index
    %61 = vector.load %arg6[%c0_51, %c1_52, %c0_53, %c0_54] : memref<2x4x1x8xf32, #tpu.memory_space<vmem>>, vector<1x1x1x8xf32>
    %62 = vector.shape_cast %61 : vector<1x1x1x8xf32> to vector<1x8xf32>
    %63 = vector.broadcast %62 : vector<1x8xf32> to vector<64x8xf32>
    %64 = arith.addf %60, %63 : vector<64x8xf32>
    %c0_55 = arith.constant 0 : index
    %c1_56 = arith.constant 1 : index
    %c0_57 = arith.constant 0 : index
    %c0_58 = arith.constant 0 : index
    %65 = vector.load %arg4[%c0_55, %c1_56, %c0_57, %c0_58] : memref<2x4x32x8xbf16, #tpu.memory_space<vmem>>, vector<1x1x32x8xbf16>
    %66 = vector.shape_cast %65 : vector<1x1x32x8xbf16> to vector<32x8xbf16>
    %cst_59 = arith.constant dense<0.000000e+00> : vector<64x8xf32>
    %67 = tpu.matmul %1, %66, %cst_59 {dimension_numbers = #tpu.dot_dimension_numbers<[1], [0], [0], [1], [0, 0, 1, 1], [], []>} : vector<64x32xbf16>, vector<32x8xbf16>, vector<64x8xf32> -> vector<64x8xf32>
    %c0_60 = arith.constant 0 : index
    %c1_61 = arith.constant 1 : index
    %c0_62 = arith.constant 0 : index
    %c0_63 = arith.constant 0 : index
    %68 = vector.load %arg7[%c0_60, %c1_61, %c0_62, %c0_63] : memref<2x4x1x8xf32, #tpu.memory_space<vmem>>, vector<1x1x1x8xf32>
    %69 = vector.shape_cast %68 : vector<1x1x1x8xf32> to vector<1x8xf32>
    %70 = vector.broadcast %69 : vector<1x8xf32> to vector<64x8xf32>
    %71 = arith.addf %67, %70 : vector<64x8xf32>
    %72 = arith.truncf %57 : vector<64x8xf32> to vector<64x8xbf16>
    %73 = vector.shape_cast %72 : vector<64x8xbf16> to vector<2x32x8xbf16>
    %74 = arith.truncf %64 : vector<64x8xf32> to vector<64x8xbf16>
    %75 = vector.shape_cast %74 : vector<64x8xbf16> to vector<2x32x8xbf16>
    %76 = arith.truncf %71 : vector<64x8xf32> to vector<64x8xbf16>
    %77 = vector.shape_cast %76 : vector<64x8xbf16> to vector<2x32x8xbf16>
    "tpu.trace_start"() <{level = 10 : i32, message = "bqd,bkd->bqk"}> : () -> ()
    %cst_64 = arith.constant dense<0.000000e+00> : vector<2x32x32xf32>
    %78 = tpu.matmul %73, %75, %cst_64 {dimension_numbers = #tpu.dot_dimension_numbers<[2], [2], [1], [1], [0, 0, 0, 1, 1, 1], [0], [0]>} : vector<2x32x8xbf16>, vector<2x32x8xbf16>, vector<2x32x32xf32> -> vector<2x32x32xf32>
    "tpu.trace_stop"() : () -> ()
    %cst_65 = arith.constant dense<0xFF800000> : vector<2x32xf32>
    %79 = vector.multi_reduction <maximumf>, %78, %cst_65 [2] : vector<2x32x32xf32> to vector<2x32xf32>
    %80 = vector.shape_cast %79 : vector<2x32xf32> to vector<2x32x1xf32>
    %81 = vector.broadcast %80 : vector<2x32x1xf32> to vector<2x32x32xf32>
    %82 = arith.subf %78, %81 : vector<2x32x32xf32>
    %83 = math.exp %82 : vector<2x32x32xf32>
    %cst_66 = arith.constant dense<0.000000e+00> : vector<2x32xf32>
    %84 = vector.multi_reduction <add>, %83, %cst_66 [2] : vector<2x32x32xf32> to vector<2x32xf32>
    %85 = vector.shape_cast %84 : vector<2x32xf32> to vector<2x32x1xf32>
    %86 = tpu.reciprocal %85 {approx = true} : vector<2x32x1xf32> -> vector<2x32x1xf32>
    %87 = vector.broadcast %86 : vector<2x32x1xf32> to vector<2x32x32xf32>
    %88 = arith.mulf %83, %87 : vector<2x32x32xf32>
    %89 = arith.truncf %88 : vector<2x32x32xf32> to vector<2x32x32xbf16>
    "tpu.trace_start"() <{level = 10 : i32, message = "bqk,bkd->bqd"}> : () -> ()
    %cst_67 = arith.constant dense<0.000000e+00> : vector<2x32x8xf32>
    %90 = tpu.matmul %89, %77, %cst_67 {dimension_numbers = #tpu.dot_dimension_numbers<[2], [1], [1], [2], [0, 0, 0, 1, 1, 2], [0], [0]>} : vector<2x32x32xbf16>, vector<2x32x8xbf16>, vector<2x32x8xf32> -> vector<2x32x8xf32>
    "tpu.trace_stop"() : () -> ()
    %91 = vector.shape_cast %90 : vector<2x32x8xf32> to vector<64x8xf32>
    %92 = arith.truncf %91 : vector<64x8xf32> to vector<64x8xbf16>
    %c0_68 = arith.constant 0 : index
    %c1_69 = arith.constant 1 : index
    %c0_70 = arith.constant 0 : index
    %c0_71 = arith.constant 0 : index
    %93 = vector.load %arg8[%c0_68, %c1_69, %c0_70, %c0_71] : memref<2x4x8x32xbf16, #tpu.memory_space<vmem>>, vector<1x1x8x32xbf16>
    %94 = vector.shape_cast %93 : vector<1x1x8x32xbf16> to vector<8x32xbf16>
    %cst_72 = arith.constant dense<0.000000e+00> : vector<64x32xf32>
    %95 = tpu.matmul %92, %94, %cst_72 {dimension_numbers = #tpu.dot_dimension_numbers<[1], [0], [0], [1], [0, 0, 1, 1], [], []>} : vector<64x8xbf16>, vector<8x32xbf16>, vector<64x32xf32> -> vector<64x32xf32>
    %96 = arith.addf %48, %95 : vector<64x32xf32>
    %c0_73 = arith.constant 0 : index
    %c2 = arith.constant 2 : index
    %c0_74 = arith.constant 0 : index
    %c0_75 = arith.constant 0 : index
    %97 = vector.load %arg2[%c0_73, %c2, %c0_74, %c0_75] : memref<2x4x32x8xbf16, #tpu.memory_space<vmem>>, vector<1x1x32x8xbf16>
    %98 = vector.shape_cast %97 : vector<1x1x32x8xbf16> to vector<32x8xbf16>
    %cst_76 = arith.constant dense<0.000000e+00> : vector<64x8xf32>
    %99 = tpu.matmul %1, %98, %cst_76 {dimension_numbers = #tpu.dot_dimension_numbers<[1], [0], [0], [1], [0, 0, 1, 1], [], []>} : vector<64x32xbf16>, vector<32x8xbf16>, vector<64x8xf32> -> vector<64x8xf32>
    %c0_77 = arith.constant 0 : index
    %c2_78 = arith.constant 2 : index
    %c0_79 = arith.constant 0 : index
    %c0_80 = arith.constant 0 : index
    %100 = vector.load %arg5[%c0_77, %c2_78, %c0_79, %c0_80] : memref<2x4x1x8xf32, #tpu.memory_space<vmem>>, vector<1x1x1x8xf32>
    %101 = vector.shape_cast %100 : vector<1x1x1x8xf32> to vector<1x8xf32>
    %102 = vector.broadcast %101 : vector<1x8xf32> to vector<64x8xf32>
    %103 = arith.addf %99, %102 : vector<64x8xf32>
    %cst_81 = arith.constant 0.353553385 : f32
    %104 = vector.broadcast %cst_81 : f32 to vector<64x8xf32>
    %105 = arith.mulf %103, %104 : vector<64x8xf32>
    %c0_82 = arith.constant 0 : index
    %c2_83 = arith.constant 2 : index
    %c0_84 = arith.constant 0 : index
    %c0_85 = arith.constant 0 : index
    %106 = vector.load %arg3[%c0_82, %c2_83, %c0_84, %c0_85] : memref<2x4x32x8xbf16, #tpu.memory_space<vmem>>, vector<1x1x32x8xbf16>
    %107 = vector.shape_cast %106 : vector<1x1x32x8xbf16> to vector<32x8xbf16>
    %cst_86 = arith.constant dense<0.000000e+00> : vector<64x8xf32>
    %108 = tpu.matmul %1, %107, %cst_86 {dimension_numbers = #tpu.dot_dimension_numbers<[1], [0], [0], [1], [0, 0, 1, 1], [], []>} : vector<64x32xbf16>, vector<32x8xbf16>, vector<64x8xf32> -> vector<64x8xf32>
    %c0_87 = arith.constant 0 : index
    %c2_88 = arith.constant 2 : index
    %c0_89 = arith.constant 0 : index
    %c0_90 = arith.constant 0 : index
    %109 = vector.load %arg6[%c0_87, %c2_88, %c0_89, %c0_90] : memref<2x4x1x8xf32, #tpu.memory_space<vmem>>, vector<1x1x1x8xf32>
    %110 = vector.shape_cast %109 : vector<1x1x1x8xf32> to vector<1x8xf32>
    %111 = vector.broadcast %110 : vector<1x8xf32> to vector<64x8xf32>
    %112 = arith.addf %108, %111 : vector<64x8xf32>
    %c0_91 = arith.constant 0 : index
    %c2_92 = arith.constant 2 : index
    %c0_93 = arith.constant 0 : index
    %c0_94 = arith.constant 0 : index
    %113 = vector.load %arg4[%c0_91, %c2_92, %c0_93, %c0_94] : memref<2x4x32x8xbf16, #tpu.memory_space<vmem>>, vector<1x1x32x8xbf16>
    %114 = vector.shape_cast %113 : vector<1x1x32x8xbf16> to vector<32x8xbf16>
    %cst_95 = arith.constant dense<0.000000e+00> : vector<64x8xf32>
    %115 = tpu.matmul %1, %114, %cst_95 {dimension_numbers = #tpu.dot_dimension_numbers<[1], [0], [0], [1], [0, 0, 1, 1], [], []>} : vector<64x32xbf16>, vector<32x8xbf16>, vector<64x8xf32> -> vector<64x8xf32>
    %c0_96 = arith.constant 0 : index
    %c2_97 = arith.constant 2 : index
    %c0_98 = arith.constant 0 : index
    %c0_99 = arith.constant 0 : index
    %116 = vector.load %arg7[%c0_96, %c2_97, %c0_98, %c0_99] : memref<2x4x1x8xf32, #tpu.memory_space<vmem>>, vector<1x1x1x8xf32>
    %117 = vector.shape_cast %116 : vector<1x1x1x8xf32> to vector<1x8xf32>
    %118 = vector.broadcast %117 : vector<1x8xf32> to vector<64x8xf32>
    %119 = arith.addf %115, %118 : vector<64x8xf32>
    %120 = arith.truncf %105 : vector<64x8xf32> to vector<64x8xbf16>
    %121 = vector.shape_cast %120 : vector<64x8xbf16> to vector<2x32x8xbf16>
    %122 = arith.truncf %112 : vector<64x8xf32> to vector<64x8xbf16>
    %123 = vector.shape_cast %122 : vector<64x8xbf16> to vector<2x32x8xbf16>
    %124 = arith.truncf %119 : vector<64x8xf32> to vector<64x8xbf16>
    %125 = vector.shape_cast %124 : vector<64x8xbf16> to vector<2x32x8xbf16>
    "tpu.trace_start"() <{level = 10 : i32, message = "bqd,bkd->bqk"}> : () -> ()
    %cst_100 = arith.constant dense<0.000000e+00> : vector<2x32x32xf32>
    %126 = tpu.matmul %121, %123, %cst_100 {dimension_numbers = #tpu.dot_dimension_numbers<[2], [2], [1], [1], [0, 0, 0, 1, 1, 1], [0], [0]>} : vector<2x32x8xbf16>, vector<2x32x8xbf16>, vector<2x32x32xf32> -> vector<2x32x32xf32>
    "tpu.trace_stop"() : () -> ()
    %cst_101 = arith.constant dense<0xFF800000> : vector<2x32xf32>
    %127 = vector.multi_reduction <maximumf>, %126, %cst_101 [2] : vector<2x32x32xf32> to vector<2x32xf32>
    %128 = vector.shape_cast %127 : vector<2x32xf32> to vector<2x32x1xf32>
    %129 = vector.broadcast %128 : vector<2x32x1xf32> to vector<2x32x32xf32>
    %130 = arith.subf %126, %129 : vector<2x32x32xf32>
    %131 = math.exp %130 : vector<2x32x32xf32>
    %cst_102 = arith.constant dense<0.000000e+00> : vector<2x32xf32>
    %132 = vector.multi_reduction <add>, %131, %cst_102 [2] : vector<2x32x32xf32> to vector<2x32xf32>
    %133 = vector.shape_cast %132 : vector<2x32xf32> to vector<2x32x1xf32>
    %134 = tpu.reciprocal %133 {approx = true} : vector<2x32x1xf32> -> vector<2x32x1xf32>
    %135 = vector.broadcast %134 : vector<2x32x1xf32> to vector<2x32x32xf32>
    %136 = arith.mulf %131, %135 : vector<2x32x32xf32>
    %137 = arith.truncf %136 : vector<2x32x32xf32> to vector<2x32x32xbf16>
    "tpu.trace_start"() <{level = 10 : i32, message = "bqk,bkd->bqd"}> : () -> ()
    %cst_103 = arith.constant dense<0.000000e+00> : vector<2x32x8xf32>
    %138 = tpu.matmul %137, %125, %cst_103 {dimension_numbers = #tpu.dot_dimension_numbers<[2], [1], [1], [2], [0, 0, 0, 1, 1, 2], [0], [0]>} : vector<2x32x32xbf16>, vector<2x32x8xbf16>, vector<2x32x8xf32> -> vector<2x32x8xf32>
    "tpu.trace_stop"() : () -> ()
    %139 = vector.shape_cast %138 : vector<2x32x8xf32> to vector<64x8xf32>
    %140 = arith.truncf %139 : vector<64x8xf32> to vector<64x8xbf16>
    %c0_104 = arith.constant 0 : index
    %c2_105 = arith.constant 2 : index
    %c0_106 = arith.constant 0 : index
    %c0_107 = arith.constant 0 : index
    %141 = vector.load %arg8[%c0_104, %c2_105, %c0_106, %c0_107] : memref<2x4x8x32xbf16, #tpu.memory_space<vmem>>, vector<1x1x8x32xbf16>
    %142 = vector.shape_cast %141 : vector<1x1x8x32xbf16> to vector<8x32xbf16>
    %cst_108 = arith.constant dense<0.000000e+00> : vector<64x32xf32>
    %143 = tpu.matmul %140, %142, %cst_108 {dimension_numbers = #tpu.dot_dimension_numbers<[1], [0], [0], [1], [0, 0, 1, 1], [], []>} : vector<64x8xbf16>, vector<8x32xbf16>, vector<64x32xf32> -> vector<64x32xf32>
    %144 = arith.addf %96, %143 : vector<64x32xf32>
    %c0_109 = arith.constant 0 : index
    %c3 = arith.constant 3 : index
    %c0_110 = arith.constant 0 : index
    %c0_111 = arith.constant 0 : index
    %145 = vector.load %arg2[%c0_109, %c3, %c0_110, %c0_111] : memref<2x4x32x8xbf16, #tpu.memory_space<vmem>>, vector<1x1x32x8xbf16>
    %146 = vector.shape_cast %145 : vector<1x1x32x8xbf16> to vector<32x8xbf16>
    %cst_112 = arith.constant dense<0.000000e+00> : vector<64x8xf32>
    %147 = tpu.matmul %1, %146, %cst_112 {dimension_numbers = #tpu.dot_dimension_numbers<[1], [0], [0], [1], [0, 0, 1, 1], [], []>} : vector<64x32xbf16>, vector<32x8xbf16>, vector<64x8xf32> -> vector<64x8xf32>
    %c0_113 = arith.constant 0 : index
    %c3_114 = arith.constant 3 : index
    %c0_115 = arith.constant 0 : index
    %c0_116 = arith.constant 0 : index
    %148 = vector.load %arg5[%c0_113, %c3_114, %c0_115, %c0_116] : memref<2x4x1x8xf32, #tpu.memory_space<vmem>>, vector<1x1x1x8xf32>
    %149 = vector.shape_cast %148 : vector<1x1x1x8xf32> to vector<1x8xf32>
    %150 = vector.broadcast %149 : vector<1x8xf32> to vector<64x8xf32>
    %151 = arith.addf %147, %150 : vector<64x8xf32>
    %cst_117 = arith.constant 0.353553385 : f32
    %152 = vector.broadcast %cst_117 : f32 to vector<64x8xf32>
    %153 = arith.mulf %151, %152 : vector<64x8xf32>
    %c0_118 = arith.constant 0 : index
    %c3_119 = arith.constant 3 : index
    %c0_120 = arith.constant 0 : index
    %c0_121 = arith.constant 0 : index
    %154 = vector.load %arg3[%c0_118, %c3_119, %c0_120, %c0_121] : memref<2x4x32x8xbf16, #tpu.memory_space<vmem>>, vector<1x1x32x8xbf16>
    %155 = vector.shape_cast %154 : vector<1x1x32x8xbf16> to vector<32x8xbf16>
    %cst_122 = arith.constant dense<0.000000e+00> : vector<64x8xf32>
    %156 = tpu.matmul %1, %155, %cst_122 {dimension_numbers = #tpu.dot_dimension_numbers<[1], [0], [0], [1], [0, 0, 1, 1], [], []>} : vector<64x32xbf16>, vector<32x8xbf16>, vector<64x8xf32> -> vector<64x8xf32>
    %c0_123 = arith.constant 0 : index
    %c3_124 = arith.constant 3 : index
    %c0_125 = arith.constant 0 : index
    %c0_126 = arith.constant 0 : index
    %157 = vector.load %arg6[%c0_123, %c3_124, %c0_125, %c0_126] : memref<2x4x1x8xf32, #tpu.memory_space<vmem>>, vector<1x1x1x8xf32>
    %158 = vector.shape_cast %157 : vector<1x1x1x8xf32> to vector<1x8xf32>
    %159 = vector.broadcast %158 : vector<1x8xf32> to vector<64x8xf32>
    %160 = arith.addf %156, %159 : vector<64x8xf32>
    %c0_127 = arith.constant 0 : index
    %c3_128 = arith.constant 3 : index
    %c0_129 = arith.constant 0 : index
    %c0_130 = arith.constant 0 : index
    %161 = vector.load %arg4[%c0_127, %c3_128, %c0_129, %c0_130] : memref<2x4x32x8xbf16, #tpu.memory_space<vmem>>, vector<1x1x32x8xbf16>
    %162 = vector.shape_cast %161 : vector<1x1x32x8xbf16> to vector<32x8xbf16>
    %cst_131 = arith.constant dense<0.000000e+00> : vector<64x8xf32>
    %163 = tpu.matmul %1, %162, %cst_131 {dimension_numbers = #tpu.dot_dimension_numbers<[1], [0], [0], [1], [0, 0, 1, 1], [], []>} : vector<64x32xbf16>, vector<32x8xbf16>, vector<64x8xf32> -> vector<64x8xf32>
    %c0_132 = arith.constant 0 : index
    %c3_133 = arith.constant 3 : index
    %c0_134 = arith.constant 0 : index
    %c0_135 = arith.constant 0 : index
    %164 = vector.load %arg7[%c0_132, %c3_133, %c0_134, %c0_135] : memref<2x4x1x8xf32, #tpu.memory_space<vmem>>, vector<1x1x1x8xf32>
    %165 = vector.shape_cast %164 : vector<1x1x1x8xf32> to vector<1x8xf32>
    %166 = vector.broadcast %165 : vector<1x8xf32> to vector<64x8xf32>
    %167 = arith.addf %163, %166 : vector<64x8xf32>
    %168 = arith.truncf %153 : vector<64x8xf32> to vector<64x8xbf16>
    %169 = vector.shape_cast %168 : vector<64x8xbf16> to vector<2x32x8xbf16>
    %170 = arith.truncf %160 : vector<64x8xf32> to vector<64x8xbf16>
    %171 = vector.shape_cast %170 : vector<64x8xbf16> to vector<2x32x8xbf16>
    %172 = arith.truncf %167 : vector<64x8xf32> to vector<64x8xbf16>
    %173 = vector.shape_cast %172 : vector<64x8xbf16> to vector<2x32x8xbf16>
    "tpu.trace_start"() <{level = 10 : i32, message = "bqd,bkd->bqk"}> : () -> ()
    %cst_136 = arith.constant dense<0.000000e+00> : vector<2x32x32xf32>
    %174 = tpu.matmul %169, %171, %cst_136 {dimension_numbers = #tpu.dot_dimension_numbers<[2], [2], [1], [1], [0, 0, 0, 1, 1, 1], [0], [0]>} : vector<2x32x8xbf16>, vector<2x32x8xbf16>, vector<2x32x32xf32> -> vector<2x32x32xf32>
    "tpu.trace_stop"() : () -> ()
    %cst_137 = arith.constant dense<0xFF800000> : vector<2x32xf32>
    %175 = vector.multi_reduction <maximumf>, %174, %cst_137 [2] : vector<2x32x32xf32> to vector<2x32xf32>
    %176 = vector.shape_cast %175 : vector<2x32xf32> to vector<2x32x1xf32>
    %177 = vector.broadcast %176 : vector<2x32x1xf32> to vector<2x32x32xf32>
    %178 = arith.subf %174, %177 : vector<2x32x32xf32>
    %179 = math.exp %178 : vector<2x32x32xf32>
    %cst_138 = arith.constant dense<0.000000e+00> : vector<2x32xf32>
    %180 = vector.multi_reduction <add>, %179, %cst_138 [2] : vector<2x32x32xf32> to vector<2x32xf32>
    %181 = vector.shape_cast %180 : vector<2x32xf32> to vector<2x32x1xf32>
    %182 = tpu.reciprocal %181 {approx = true} : vector<2x32x1xf32> -> vector<2x32x1xf32>
    %183 = vector.broadcast %182 : vector<2x32x1xf32> to vector<2x32x32xf32>
    %184 = arith.mulf %179, %183 : vector<2x32x32xf32>
    %185 = arith.truncf %184 : vector<2x32x32xf32> to vector<2x32x32xbf16>
    "tpu.trace_start"() <{level = 10 : i32, message = "bqk,bkd->bqd"}> : () -> ()
    %cst_139 = arith.constant dense<0.000000e+00> : vector<2x32x8xf32>
    %186 = tpu.matmul %185, %173, %cst_139 {dimension_numbers = #tpu.dot_dimension_numbers<[2], [1], [1], [2], [0, 0, 0, 1, 1, 2], [0], [0]>} : vector<2x32x32xbf16>, vector<2x32x8xbf16>, vector<2x32x8xf32> -> vector<2x32x8xf32>
    "tpu.trace_stop"() : () -> ()
    %187 = vector.shape_cast %186 : vector<2x32x8xf32> to vector<64x8xf32>
    %188 = arith.truncf %187 : vector<64x8xf32> to vector<64x8xbf16>
    %c0_140 = arith.constant 0 : index
    %c3_141 = arith.constant 3 : index
    %c0_142 = arith.constant 0 : index
    %c0_143 = arith.constant 0 : index
    %189 = vector.load %arg8[%c0_140, %c3_141, %c0_142, %c0_143] : memref<2x4x8x32xbf16, #tpu.memory_space<vmem>>, vector<1x1x8x32xbf16>
    %190 = vector.shape_cast %189 : vector<1x1x8x32xbf16> to vector<8x32xbf16>
    %cst_144 = arith.constant dense<0.000000e+00> : vector<64x32xf32>
    %191 = tpu.matmul %188, %190, %cst_144 {dimension_numbers = #tpu.dot_dimension_numbers<[1], [0], [0], [1], [0, 0, 1, 1], [], []>} : vector<64x8xbf16>, vector<8x32xbf16>, vector<64x32xf32> -> vector<64x32xf32>
    %192 = arith.addf %144, %191 : vector<64x32xf32>
    %c0_145 = arith.constant 0 : index
    %c0_146 = arith.constant 0 : index
    %c0_147 = arith.constant 0 : index
    %193 = vector.load %arg9[%c0_145, %c0_146, %c0_147] : memref<2x1x32xf32, #tpu.memory_space<vmem>>, vector<1x1x32xf32>
    %194 = vector.shape_cast %193 : vector<1x1x32xf32> to vector<1x32xf32>
    %195 = vector.broadcast %194 : vector<1x32xf32> to vector<64x32xf32>
    %196 = arith.addf %192, %195 : vector<64x32xf32>
    %197 = arith.addf %0, %196 : vector<64x32xf32>
    %c0_148 = arith.constant 0 : index
    %c0_149 = arith.constant 0 : index
    %c0_150 = arith.constant 0 : index
    %198 = vector.load %arg10[%c0_148, %c0_149, %c0_150] : memref<2x1x32xf32, #tpu.memory_space<vmem>>, vector<1x1x32xf32>
    %199 = vector.shape_cast %198 : vector<1x1x32xf32> to vector<1x32xf32>
    %c0_151 = arith.constant 0 : index
    %c0_152 = arith.constant 0 : index
    %c0_153 = arith.constant 0 : index
    %200 = vector.load %arg11[%c0_151, %c0_152, %c0_153] : memref<2x1x32xf32, #tpu.memory_space<vmem>>, vector<1x1x32xf32>
    %201 = vector.shape_cast %200 : vector<1x1x32xf32> to vector<1x32xf32>
    %cst_154 = arith.constant dense<0.000000e+00> : vector<64xf32>
    %202 = vector.multi_reduction <add>, %197, %cst_154 [1] : vector<64x32xf32> to vector<64xf32>
    %203 = vector.shape_cast %202 : vector<64xf32> to vector<64x1xf32>
    %cst_155 = arith.constant 3.200000e+01 : f32
    %204 = vector.broadcast %cst_155 : f32 to vector<64x1xf32>
    %205 = arith.divf %203, %204 : vector<64x1xf32>
    %206 = vector.broadcast %205 : vector<64x1xf32> to vector<64x32xf32>
    %207 = arith.subf %197, %206 : vector<64x32xf32>
    %208 = arith.mulf %207, %207 : vector<64x32xf32>
    %cst_156 = arith.constant dense<0.000000e+00> : vector<64xf32>
    %209 = vector.multi_reduction <add>, %208, %cst_156 [1] : vector<64x32xf32> to vector<64xf32>
    %210 = vector.shape_cast %209 : vector<64xf32> to vector<64x1xf32>
    %cst_157 = arith.constant 3.200000e+01 : f32
    %211 = vector.broadcast %cst_157 : f32 to vector<64x1xf32>
    %212 = arith.divf %210, %211 : vector<64x1xf32>
    %213 = vector.broadcast %205 : vector<64x1xf32> to vector<64x32xf32>
    %214 = arith.subf %197, %213 : vector<64x32xf32>
    %cst_158 = arith.constant 9.99999974E-6 : f32
    %215 = vector.broadcast %cst_158 : f32 to vector<64x1xf32>
    %216 = arith.addf %212, %215 : vector<64x1xf32>
    %217 = math.rsqrt %216 : vector<64x1xf32>
    %218 = vector.broadcast %217 : vector<64x1xf32> to vector<64x32xf32>
    %219 = arith.mulf %214, %218 : vector<64x32xf32>
    %220 = vector.broadcast %199 : vector<1x32xf32> to vector<64x32xf32>
    %221 = arith.mulf %219, %220 : vector<64x32xf32>
    %222 = vector.broadcast %201 : vector<1x32xf32> to vector<64x32xf32>
    %223 = arith.addf %221, %222 : vector<64x32xf32>
    %224 = arith.truncf %223 : vector<64x32xf32> to vector<64x32xbf16>
    %c0_159 = arith.constant 0 : index
    %c0_160 = arith.constant 0 : index
    %c0_161 = arith.constant 0 : index
    %225 = vector.load %arg12[%c0_159, %c0_160, %c0_161] : memref<2x32x128xbf16, #tpu.memory_space<vmem>>, vector<1x32x128xbf16>
    %226 = vector.shape_cast %225 : vector<1x32x128xbf16> to vector<32x128xbf16>
    %cst_162 = arith.constant dense<0.000000e+00> : vector<64x128xf32>
    %227 = tpu.matmul %224, %226, %cst_162 {dimension_numbers = #tpu.dot_dimension_numbers<[1], [0], [0], [1], [0, 0, 1, 1], [], []>} : vector<64x32xbf16>, vector<32x128xbf16>, vector<64x128xf32> -> vector<64x128xf32>
    %c0_163 = arith.constant 0 : index
    %c0_164 = arith.constant 0 : index
    %c0_165 = arith.constant 0 : index
    %228 = vector.load %arg13[%c0_163, %c0_164, %c0_165] : memref<2x1x128xf32, #tpu.memory_space<vmem>>, vector<1x1x128xf32>
    %229 = vector.shape_cast %228 : vector<1x1x128xf32> to vector<1x128xf32>
    %230 = vector.broadcast %229 : vector<1x128xf32> to vector<64x128xf32>
    %231 = arith.addf %227, %230 : vector<64x128xf32>
    %cst_166 = arith.constant 0.000000e+00 : f32
    %232 = vector.broadcast %cst_166 : f32 to vector<64x128xf32>
    %233 = arith.maximumf %231, %232 : vector<64x128xf32>
    %234 = arith.truncf %233 : vector<64x128xf32> to vector<64x128xbf16>
    %c0_167 = arith.constant 0 : index
    %c0_168 = arith.constant 0 : index
    %c0_169 = arith.constant 0 : index
    %235 = vector.load %arg14[%c0_167, %c0_168, %c0_169] : memref<2x128x32xbf16, #tpu.memory_space<vmem>>, vector<1x128x32xbf16>
    %236 = vector.shape_cast %235 : vector<1x128x32xbf16> to vector<128x32xbf16>
    %cst_170 = arith.constant dense<0.000000e+00> : vector<64x32xf32>
    %237 = tpu.matmul %234, %236, %cst_170 {dimension_numbers = #tpu.dot_dimension_numbers<[1], [0], [0], [1], [0, 0, 1, 1], [], []>} : vector<64x128xbf16>, vector<128x32xbf16>, vector<64x32xf32> -> vector<64x32xf32>
    %c0_171 = arith.constant 0 : index
    %c0_172 = arith.constant 0 : index
    %c0_173 = arith.constant 0 : index
    %238 = vector.load %arg15[%c0_171, %c0_172, %c0_173] : memref<2x1x32xf32, #tpu.memory_space<vmem>>, vector<1x1x32xf32>
    %239 = vector.shape_cast %238 : vector<1x1x32xf32> to vector<1x32xf32>
    %240 = vector.broadcast %239 : vector<1x32xf32> to vector<64x32xf32>
    %241 = arith.addf %237, %240 : vector<64x32xf32>
    %242 = arith.addf %223, %241 : vector<64x32xf32>
    %c0_174 = arith.constant 0 : index
    %c0_175 = arith.constant 0 : index
    %c0_176 = arith.constant 0 : index
    %243 = vector.load %arg16[%c0_174, %c0_175, %c0_176] : memref<2x1x32xf32, #tpu.memory_space<vmem>>, vector<1x1x32xf32>
    %244 = vector.shape_cast %243 : vector<1x1x32xf32> to vector<1x32xf32>
    %c0_177 = arith.constant 0 : index
    %c0_178 = arith.constant 0 : index
    %c0_179 = arith.constant 0 : index
    %245 = vector.load %arg17[%c0_177, %c0_178, %c0_179] : memref<2x1x32xf32, #tpu.memory_space<vmem>>, vector<1x1x32xf32>
    %246 = vector.shape_cast %245 : vector<1x1x32xf32> to vector<1x32xf32>
    %cst_180 = arith.constant dense<0.000000e+00> : vector<64xf32>
    %247 = vector.multi_reduction <add>, %242, %cst_180 [1] : vector<64x32xf32> to vector<64xf32>
    %248 = vector.shape_cast %247 : vector<64xf32> to vector<64x1xf32>
    %cst_181 = arith.constant 3.200000e+01 : f32
    %249 = vector.broadcast %cst_181 : f32 to vector<64x1xf32>
    %250 = arith.divf %248, %249 : vector<64x1xf32>
    %251 = vector.broadcast %250 : vector<64x1xf32> to vector<64x32xf32>
    %252 = arith.subf %242, %251 : vector<64x32xf32>
    %253 = arith.mulf %252, %252 : vector<64x32xf32>
    %cst_182 = arith.constant dense<0.000000e+00> : vector<64xf32>
    %254 = vector.multi_reduction <add>, %253, %cst_182 [1] : vector<64x32xf32> to vector<64xf32>
    %255 = vector.shape_cast %254 : vector<64xf32> to vector<64x1xf32>
    %cst_183 = arith.constant 3.200000e+01 : f32
    %256 = vector.broadcast %cst_183 : f32 to vector<64x1xf32>
    %257 = arith.divf %255, %256 : vector<64x1xf32>
    %258 = vector.broadcast %250 : vector<64x1xf32> to vector<64x32xf32>
    %259 = arith.subf %242, %258 : vector<64x32xf32>
    %cst_184 = arith.constant 9.99999974E-6 : f32
    %260 = vector.broadcast %cst_184 : f32 to vector<64x1xf32>
    %261 = arith.addf %257, %260 : vector<64x1xf32>
    %262 = math.rsqrt %261 : vector<64x1xf32>
    %263 = vector.broadcast %262 : vector<64x1xf32> to vector<64x32xf32>
    %264 = arith.mulf %259, %263 : vector<64x32xf32>
    %265 = vector.broadcast %244 : vector<1x32xf32> to vector<64x32xf32>
    %266 = arith.mulf %264, %265 : vector<64x32xf32>
    %267 = vector.broadcast %246 : vector<1x32xf32> to vector<64x32xf32>
    %268 = arith.addf %266, %267 : vector<64x32xf32>
    %269 = arith.truncf %268 : vector<64x32xf32> to vector<64x32xbf16>
    %c1_185 = arith.constant 1 : index
    %c0_186 = arith.constant 0 : index
    %c0_187 = arith.constant 0 : index
    %c0_188 = arith.constant 0 : index
    %270 = vector.load %arg2[%c1_185, %c0_186, %c0_187, %c0_188] : memref<2x4x32x8xbf16, #tpu.memory_space<vmem>>, vector<1x1x32x8xbf16>
    %271 = vector.shape_cast %270 : vector<1x1x32x8xbf16> to vector<32x8xbf16>
    %cst_189 = arith.constant dense<0.000000e+00> : vector<64x8xf32>
    %272 = tpu.matmul %269, %271, %cst_189 {dimension_numbers = #tpu.dot_dimension_numbers<[1], [0], [0], [1], [0, 0, 1, 1], [], []>} : vector<64x32xbf16>, vector<32x8xbf16>, vector<64x8xf32> -> vector<64x8xf32>
    %c1_190 = arith.constant 1 : index
    %c0_191 = arith.constant 0 : index
    %c0_192 = arith.constant 0 : index
    %c0_193 = arith.constant 0 : index
    %273 = vector.load %arg5[%c1_190, %c0_191, %c0_192, %c0_193] : memref<2x4x1x8xf32, #tpu.memory_space<vmem>>, vector<1x1x1x8xf32>
    %274 = vector.shape_cast %273 : vector<1x1x1x8xf32> to vector<1x8xf32>
    %275 = vector.broadcast %274 : vector<1x8xf32> to vector<64x8xf32>
    %276 = arith.addf %272, %275 : vector<64x8xf32>
    %cst_194 = arith.constant 0.353553385 : f32
    %277 = vector.broadcast %cst_194 : f32 to vector<64x8xf32>
    %278 = arith.mulf %276, %277 : vector<64x8xf32>
    %c1_195 = arith.constant 1 : index
    %c0_196 = arith.constant 0 : index
    %c0_197 = arith.constant 0 : index
    %c0_198 = arith.constant 0 : index
    %279 = vector.load %arg3[%c1_195, %c0_196, %c0_197, %c0_198] : memref<2x4x32x8xbf16, #tpu.memory_space<vmem>>, vector<1x1x32x8xbf16>
    %280 = vector.shape_cast %279 : vector<1x1x32x8xbf16> to vector<32x8xbf16>
    %cst_199 = arith.constant dense<0.000000e+00> : vector<64x8xf32>
    %281 = tpu.matmul %269, %280, %cst_199 {dimension_numbers = #tpu.dot_dimension_numbers<[1], [0], [0], [1], [0, 0, 1, 1], [], []>} : vector<64x32xbf16>, vector<32x8xbf16>, vector<64x8xf32> -> vector<64x8xf32>
    %c1_200 = arith.constant 1 : index
    %c0_201 = arith.constant 0 : index
    %c0_202 = arith.constant 0 : index
    %c0_203 = arith.constant 0 : index
    %282 = vector.load %arg6[%c1_200, %c0_201, %c0_202, %c0_203] : memref<2x4x1x8xf32, #tpu.memory_space<vmem>>, vector<1x1x1x8xf32>
    %283 = vector.shape_cast %282 : vector<1x1x1x8xf32> to vector<1x8xf32>
    %284 = vector.broadcast %283 : vector<1x8xf32> to vector<64x8xf32>
    %285 = arith.addf %281, %284 : vector<64x8xf32>
    %c1_204 = arith.constant 1 : index
    %c0_205 = arith.constant 0 : index
    %c0_206 = arith.constant 0 : index
    %c0_207 = arith.constant 0 : index
    %286 = vector.load %arg4[%c1_204, %c0_205, %c0_206, %c0_207] : memref<2x4x32x8xbf16, #tpu.memory_space<vmem>>, vector<1x1x32x8xbf16>
    %287 = vector.shape_cast %286 : vector<1x1x32x8xbf16> to vector<32x8xbf16>
    %cst_208 = arith.constant dense<0.000000e+00> : vector<64x8xf32>
    %288 = tpu.matmul %269, %287, %cst_208 {dimension_numbers = #tpu.dot_dimension_numbers<[1], [0], [0], [1], [0, 0, 1, 1], [], []>} : vector<64x32xbf16>, vector<32x8xbf16>, vector<64x8xf32> -> vector<64x8xf32>
    %c1_209 = arith.constant 1 : index
    %c0_210 = arith.constant 0 : index
    %c0_211 = arith.constant 0 : index
    %c0_212 = arith.constant 0 : index
    %289 = vector.load %arg7[%c1_209, %c0_210, %c0_211, %c0_212] : memref<2x4x1x8xf32, #tpu.memory_space<vmem>>, vector<1x1x1x8xf32>
    %290 = vector.shape_cast %289 : vector<1x1x1x8xf32> to vector<1x8xf32>
    %291 = vector.broadcast %290 : vector<1x8xf32> to vector<64x8xf32>
    %292 = arith.addf %288, %291 : vector<64x8xf32>
    %293 = arith.truncf %278 : vector<64x8xf32> to vector<64x8xbf16>
    %294 = vector.shape_cast %293 : vector<64x8xbf16> to vector<2x32x8xbf16>
    %295 = arith.truncf %285 : vector<64x8xf32> to vector<64x8xbf16>
    %296 = vector.shape_cast %295 : vector<64x8xbf16> to vector<2x32x8xbf16>
    %297 = arith.truncf %292 : vector<64x8xf32> to vector<64x8xbf16>
    %298 = vector.shape_cast %297 : vector<64x8xbf16> to vector<2x32x8xbf16>
    "tpu.trace_start"() <{level = 10 : i32, message = "bqd,bkd->bqk"}> : () -> ()
    %cst_213 = arith.constant dense<0.000000e+00> : vector<2x32x32xf32>
    %299 = tpu.matmul %294, %296, %cst_213 {dimension_numbers = #tpu.dot_dimension_numbers<[2], [2], [1], [1], [0, 0, 0, 1, 1, 1], [0], [0]>} : vector<2x32x8xbf16>, vector<2x32x8xbf16>, vector<2x32x32xf32> -> vector<2x32x32xf32>
    "tpu.trace_stop"() : () -> ()
    %cst_214 = arith.constant dense<0xFF800000> : vector<2x32xf32>
    %300 = vector.multi_reduction <maximumf>, %299, %cst_214 [2] : vector<2x32x32xf32> to vector<2x32xf32>
    %301 = vector.shape_cast %300 : vector<2x32xf32> to vector<2x32x1xf32>
    %302 = vector.broadcast %301 : vector<2x32x1xf32> to vector<2x32x32xf32>
    %303 = arith.subf %299, %302 : vector<2x32x32xf32>
    %304 = math.exp %303 : vector<2x32x32xf32>
    %cst_215 = arith.constant dense<0.000000e+00> : vector<2x32xf32>
    %305 = vector.multi_reduction <add>, %304, %cst_215 [2] : vector<2x32x32xf32> to vector<2x32xf32>
    %306 = vector.shape_cast %305 : vector<2x32xf32> to vector<2x32x1xf32>
    %307 = tpu.reciprocal %306 {approx = true} : vector<2x32x1xf32> -> vector<2x32x1xf32>
    %308 = vector.broadcast %307 : vector<2x32x1xf32> to vector<2x32x32xf32>
    %309 = arith.mulf %304, %308 : vector<2x32x32xf32>
    %310 = arith.truncf %309 : vector<2x32x32xf32> to vector<2x32x32xbf16>
    "tpu.trace_start"() <{level = 10 : i32, message = "bqk,bkd->bqd"}> : () -> ()
    %cst_216 = arith.constant dense<0.000000e+00> : vector<2x32x8xf32>
    %311 = tpu.matmul %310, %298, %cst_216 {dimension_numbers = #tpu.dot_dimension_numbers<[2], [1], [1], [2], [0, 0, 0, 1, 1, 2], [0], [0]>} : vector<2x32x32xbf16>, vector<2x32x8xbf16>, vector<2x32x8xf32> -> vector<2x32x8xf32>
    "tpu.trace_stop"() : () -> ()
    %312 = vector.shape_cast %311 : vector<2x32x8xf32> to vector<64x8xf32>
    %313 = arith.truncf %312 : vector<64x8xf32> to vector<64x8xbf16>
    %c1_217 = arith.constant 1 : index
    %c0_218 = arith.constant 0 : index
    %c0_219 = arith.constant 0 : index
    %c0_220 = arith.constant 0 : index
    %314 = vector.load %arg8[%c1_217, %c0_218, %c0_219, %c0_220] : memref<2x4x8x32xbf16, #tpu.memory_space<vmem>>, vector<1x1x8x32xbf16>
    %315 = vector.shape_cast %314 : vector<1x1x8x32xbf16> to vector<8x32xbf16>
    %cst_221 = arith.constant dense<0.000000e+00> : vector<64x32xf32>
    %316 = tpu.matmul %313, %315, %cst_221 {dimension_numbers = #tpu.dot_dimension_numbers<[1], [0], [0], [1], [0, 0, 1, 1], [], []>} : vector<64x8xbf16>, vector<8x32xbf16>, vector<64x32xf32> -> vector<64x32xf32>
    %c1_222 = arith.constant 1 : index
    %c1_223 = arith.constant 1 : index
    %c0_224 = arith.constant 0 : index
    %c0_225 = arith.constant 0 : index
    %317 = vector.load %arg2[%c1_222, %c1_223, %c0_224, %c0_225] : memref<2x4x32x8xbf16, #tpu.memory_space<vmem>>, vector<1x1x32x8xbf16>
    %318 = vector.shape_cast %317 : vector<1x1x32x8xbf16> to vector<32x8xbf16>
    %cst_226 = arith.constant dense<0.000000e+00> : vector<64x8xf32>
    %319 = tpu.matmul %269, %318, %cst_226 {dimension_numbers = #tpu.dot_dimension_numbers<[1], [0], [0], [1], [0, 0, 1, 1], [], []>} : vector<64x32xbf16>, vector<32x8xbf16>, vector<64x8xf32> -> vector<64x8xf32>
    %c1_227 = arith.constant 1 : index
    %c1_228 = arith.constant 1 : index
    %c0_229 = arith.constant 0 : index
    %c0_230 = arith.constant 0 : index
    %320 = vector.load %arg5[%c1_227, %c1_228, %c0_229, %c0_230] : memref<2x4x1x8xf32, #tpu.memory_space<vmem>>, vector<1x1x1x8xf32>
    %321 = vector.shape_cast %320 : vector<1x1x1x8xf32> to vector<1x8xf32>
    %322 = vector.broadcast %321 : vector<1x8xf32> to vector<64x8xf32>
    %323 = arith.addf %319, %322 : vector<64x8xf32>
    %cst_231 = arith.constant 0.353553385 : f32
    %324 = vector.broadcast %cst_231 : f32 to vector<64x8xf32>
    %325 = arith.mulf %323, %324 : vector<64x8xf32>
    %c1_232 = arith.constant 1 : index
    %c1_233 = arith.constant 1 : index
    %c0_234 = arith.constant 0 : index
    %c0_235 = arith.constant 0 : index
    %326 = vector.load %arg3[%c1_232, %c1_233, %c0_234, %c0_235] : memref<2x4x32x8xbf16, #tpu.memory_space<vmem>>, vector<1x1x32x8xbf16>
    %327 = vector.shape_cast %326 : vector<1x1x32x8xbf16> to vector<32x8xbf16>
    %cst_236 = arith.constant dense<0.000000e+00> : vector<64x8xf32>
    %328 = tpu.matmul %269, %327, %cst_236 {dimension_numbers = #tpu.dot_dimension_numbers<[1], [0], [0], [1], [0, 0, 1, 1], [], []>} : vector<64x32xbf16>, vector<32x8xbf16>, vector<64x8xf32> -> vector<64x8xf32>
    %c1_237 = arith.constant 1 : index
    %c1_238 = arith.constant 1 : index
    %c0_239 = arith.constant 0 : index
    %c0_240 = arith.constant 0 : index
    %329 = vector.load %arg6[%c1_237, %c1_238, %c0_239, %c0_240] : memref<2x4x1x8xf32, #tpu.memory_space<vmem>>, vector<1x1x1x8xf32>
    %330 = vector.shape_cast %329 : vector<1x1x1x8xf32> to vector<1x8xf32>
    %331 = vector.broadcast %330 : vector<1x8xf32> to vector<64x8xf32>
    %332 = arith.addf %328, %331 : vector<64x8xf32>
    %c1_241 = arith.constant 1 : index
    %c1_242 = arith.constant 1 : index
    %c0_243 = arith.constant 0 : index
    %c0_244 = arith.constant 0 : index
    %333 = vector.load %arg4[%c1_241, %c1_242, %c0_243, %c0_244] : memref<2x4x32x8xbf16, #tpu.memory_space<vmem>>, vector<1x1x32x8xbf16>
    %334 = vector.shape_cast %333 : vector<1x1x32x8xbf16> to vector<32x8xbf16>
    %cst_245 = arith.constant dense<0.000000e+00> : vector<64x8xf32>
    %335 = tpu.matmul %269, %334, %cst_245 {dimension_numbers = #tpu.dot_dimension_numbers<[1], [0], [0], [1], [0, 0, 1, 1], [], []>} : vector<64x32xbf16>, vector<32x8xbf16>, vector<64x8xf32> -> vector<64x8xf32>
    %c1_246 = arith.constant 1 : index
    %c1_247 = arith.constant 1 : index
    %c0_248 = arith.constant 0 : index
    %c0_249 = arith.constant 0 : index
    %336 = vector.load %arg7[%c1_246, %c1_247, %c0_248, %c0_249] : memref<2x4x1x8xf32, #tpu.memory_space<vmem>>, vector<1x1x1x8xf32>
    %337 = vector.shape_cast %336 : vector<1x1x1x8xf32> to vector<1x8xf32>
    %338 = vector.broadcast %337 : vector<1x8xf32> to vector<64x8xf32>
    %339 = arith.addf %335, %338 : vector<64x8xf32>
    %340 = arith.truncf %325 : vector<64x8xf32> to vector<64x8xbf16>
    %341 = vector.shape_cast %340 : vector<64x8xbf16> to vector<2x32x8xbf16>
    %342 = arith.truncf %332 : vector<64x8xf32> to vector<64x8xbf16>
    %343 = vector.shape_cast %342 : vector<64x8xbf16> to vector<2x32x8xbf16>
    %344 = arith.truncf %339 : vector<64x8xf32> to vector<64x8xbf16>
    %345 = vector.shape_cast %344 : vector<64x8xbf16> to vector<2x32x8xbf16>
    "tpu.trace_start"() <{level = 10 : i32, message = "bqd,bkd->bqk"}> : () -> ()
    %cst_250 = arith.constant dense<0.000000e+00> : vector<2x32x32xf32>
    %346 = tpu.matmul %341, %343, %cst_250 {dimension_numbers = #tpu.dot_dimension_numbers<[2], [2], [1], [1], [0, 0, 0, 1, 1, 1], [0], [0]>} : vector<2x32x8xbf16>, vector<2x32x8xbf16>, vector<2x32x32xf32> -> vector<2x32x32xf32>
    "tpu.trace_stop"() : () -> ()
    %cst_251 = arith.constant dense<0xFF800000> : vector<2x32xf32>
    %347 = vector.multi_reduction <maximumf>, %346, %cst_251 [2] : vector<2x32x32xf32> to vector<2x32xf32>
    %348 = vector.shape_cast %347 : vector<2x32xf32> to vector<2x32x1xf32>
    %349 = vector.broadcast %348 : vector<2x32x1xf32> to vector<2x32x32xf32>
    %350 = arith.subf %346, %349 : vector<2x32x32xf32>
    %351 = math.exp %350 : vector<2x32x32xf32>
    %cst_252 = arith.constant dense<0.000000e+00> : vector<2x32xf32>
    %352 = vector.multi_reduction <add>, %351, %cst_252 [2] : vector<2x32x32xf32> to vector<2x32xf32>
    %353 = vector.shape_cast %352 : vector<2x32xf32> to vector<2x32x1xf32>
    %354 = tpu.reciprocal %353 {approx = true} : vector<2x32x1xf32> -> vector<2x32x1xf32>
    %355 = vector.broadcast %354 : vector<2x32x1xf32> to vector<2x32x32xf32>
    %356 = arith.mulf %351, %355 : vector<2x32x32xf32>
    %357 = arith.truncf %356 : vector<2x32x32xf32> to vector<2x32x32xbf16>
    "tpu.trace_start"() <{level = 10 : i32, message = "bqk,bkd->bqd"}> : () -> ()
    %cst_253 = arith.constant dense<0.000000e+00> : vector<2x32x8xf32>
    %358 = tpu.matmul %357, %345, %cst_253 {dimension_numbers = #tpu.dot_dimension_numbers<[2], [1], [1], [2], [0, 0, 0, 1, 1, 2], [0], [0]>} : vector<2x32x32xbf16>, vector<2x32x8xbf16>, vector<2x32x8xf32> -> vector<2x32x8xf32>
    "tpu.trace_stop"() : () -> ()
    %359 = vector.shape_cast %358 : vector<2x32x8xf32> to vector<64x8xf32>
    %360 = arith.truncf %359 : vector<64x8xf32> to vector<64x8xbf16>
    %c1_254 = arith.constant 1 : index
    %c1_255 = arith.constant 1 : index
    %c0_256 = arith.constant 0 : index
    %c0_257 = arith.constant 0 : index
    %361 = vector.load %arg8[%c1_254, %c1_255, %c0_256, %c0_257] : memref<2x4x8x32xbf16, #tpu.memory_space<vmem>>, vector<1x1x8x32xbf16>
    %362 = vector.shape_cast %361 : vector<1x1x8x32xbf16> to vector<8x32xbf16>
    %cst_258 = arith.constant dense<0.000000e+00> : vector<64x32xf32>
    %363 = tpu.matmul %360, %362, %cst_258 {dimension_numbers = #tpu.dot_dimension_numbers<[1], [0], [0], [1], [0, 0, 1, 1], [], []>} : vector<64x8xbf16>, vector<8x32xbf16>, vector<64x32xf32> -> vector<64x32xf32>
    %364 = arith.addf %316, %363 : vector<64x32xf32>
    %c1_259 = arith.constant 1 : index
    %c2_260 = arith.constant 2 : index
    %c0_261 = arith.constant 0 : index
    %c0_262 = arith.constant 0 : index
    %365 = vector.load %arg2[%c1_259, %c2_260, %c0_261, %c0_262] : memref<2x4x32x8xbf16, #tpu.memory_space<vmem>>, vector<1x1x32x8xbf16>
    %366 = vector.shape_cast %365 : vector<1x1x32x8xbf16> to vector<32x8xbf16>
    %cst_263 = arith.constant dense<0.000000e+00> : vector<64x8xf32>
    %367 = tpu.matmul %269, %366, %cst_263 {dimension_numbers = #tpu.dot_dimension_numbers<[1], [0], [0], [1], [0, 0, 1, 1], [], []>} : vector<64x32xbf16>, vector<32x8xbf16>, vector<64x8xf32> -> vector<64x8xf32>
    %c1_264 = arith.constant 1 : index
    %c2_265 = arith.constant 2 : index
    %c0_266 = arith.constant 0 : index
    %c0_267 = arith.constant 0 : index
    %368 = vector.load %arg5[%c1_264, %c2_265, %c0_266, %c0_267] : memref<2x4x1x8xf32, #tpu.memory_space<vmem>>, vector<1x1x1x8xf32>
    %369 = vector.shape_cast %368 : vector<1x1x1x8xf32> to vector<1x8xf32>
    %370 = vector.broadcast %369 : vector<1x8xf32> to vector<64x8xf32>
    %371 = arith.addf %367, %370 : vector<64x8xf32>
    %cst_268 = arith.constant 0.353553385 : f32
    %372 = vector.broadcast %cst_268 : f32 to vector<64x8xf32>
    %373 = arith.mulf %371, %372 : vector<64x8xf32>
    %c1_269 = arith.constant 1 : index
    %c2_270 = arith.constant 2 : index
    %c0_271 = arith.constant 0 : index
    %c0_272 = arith.constant 0 : index
    %374 = vector.load %arg3[%c1_269, %c2_270, %c0_271, %c0_272] : memref<2x4x32x8xbf16, #tpu.memory_space<vmem>>, vector<1x1x32x8xbf16>
    %375 = vector.shape_cast %374 : vector<1x1x32x8xbf16> to vector<32x8xbf16>
    %cst_273 = arith.constant dense<0.000000e+00> : vector<64x8xf32>
    %376 = tpu.matmul %269, %375, %cst_273 {dimension_numbers = #tpu.dot_dimension_numbers<[1], [0], [0], [1], [0, 0, 1, 1], [], []>} : vector<64x32xbf16>, vector<32x8xbf16>, vector<64x8xf32> -> vector<64x8xf32>
    %c1_274 = arith.constant 1 : index
    %c2_275 = arith.constant 2 : index
    %c0_276 = arith.constant 0 : index
    %c0_277 = arith.constant 0 : index
    %377 = vector.load %arg6[%c1_274, %c2_275, %c0_276, %c0_277] : memref<2x4x1x8xf32, #tpu.memory_space<vmem>>, vector<1x1x1x8xf32>
    %378 = vector.shape_cast %377 : vector<1x1x1x8xf32> to vector<1x8xf32>
    %379 = vector.broadcast %378 : vector<1x8xf32> to vector<64x8xf32>
    %380 = arith.addf %376, %379 : vector<64x8xf32>
    %c1_278 = arith.constant 1 : index
    %c2_279 = arith.constant 2 : index
    %c0_280 = arith.constant 0 : index
    %c0_281 = arith.constant 0 : index
    %381 = vector.load %arg4[%c1_278, %c2_279, %c0_280, %c0_281] : memref<2x4x32x8xbf16, #tpu.memory_space<vmem>>, vector<1x1x32x8xbf16>
    %382 = vector.shape_cast %381 : vector<1x1x32x8xbf16> to vector<32x8xbf16>
    %cst_282 = arith.constant dense<0.000000e+00> : vector<64x8xf32>
    %383 = tpu.matmul %269, %382, %cst_282 {dimension_numbers = #tpu.dot_dimension_numbers<[1], [0], [0], [1], [0, 0, 1, 1], [], []>} : vector<64x32xbf16>, vector<32x8xbf16>, vector<64x8xf32> -> vector<64x8xf32>
    %c1_283 = arith.constant 1 : index
    %c2_284 = arith.constant 2 : index
    %c0_285 = arith.constant 0 : index
    %c0_286 = arith.constant 0 : index
    %384 = vector.load %arg7[%c1_283, %c2_284, %c0_285, %c0_286] : memref<2x4x1x8xf32, #tpu.memory_space<vmem>>, vector<1x1x1x8xf32>
    %385 = vector.shape_cast %384 : vector<1x1x1x8xf32> to vector<1x8xf32>
    %386 = vector.broadcast %385 : vector<1x8xf32> to vector<64x8xf32>
    %387 = arith.addf %383, %386 : vector<64x8xf32>
    %388 = arith.truncf %373 : vector<64x8xf32> to vector<64x8xbf16>
    %389 = vector.shape_cast %388 : vector<64x8xbf16> to vector<2x32x8xbf16>
    %390 = arith.truncf %380 : vector<64x8xf32> to vector<64x8xbf16>
    %391 = vector.shape_cast %390 : vector<64x8xbf16> to vector<2x32x8xbf16>
    %392 = arith.truncf %387 : vector<64x8xf32> to vector<64x8xbf16>
    %393 = vector.shape_cast %392 : vector<64x8xbf16> to vector<2x32x8xbf16>
    "tpu.trace_start"() <{level = 10 : i32, message = "bqd,bkd->bqk"}> : () -> ()
    %cst_287 = arith.constant dense<0.000000e+00> : vector<2x32x32xf32>
    %394 = tpu.matmul %389, %391, %cst_287 {dimension_numbers = #tpu.dot_dimension_numbers<[2], [2], [1], [1], [0, 0, 0, 1, 1, 1], [0], [0]>} : vector<2x32x8xbf16>, vector<2x32x8xbf16>, vector<2x32x32xf32> -> vector<2x32x32xf32>
    "tpu.trace_stop"() : () -> ()
    %cst_288 = arith.constant dense<0xFF800000> : vector<2x32xf32>
    %395 = vector.multi_reduction <maximumf>, %394, %cst_288 [2] : vector<2x32x32xf32> to vector<2x32xf32>
    %396 = vector.shape_cast %395 : vector<2x32xf32> to vector<2x32x1xf32>
    %397 = vector.broadcast %396 : vector<2x32x1xf32> to vector<2x32x32xf32>
    %398 = arith.subf %394, %397 : vector<2x32x32xf32>
    %399 = math.exp %398 : vector<2x32x32xf32>
    %cst_289 = arith.constant dense<0.000000e+00> : vector<2x32xf32>
    %400 = vector.multi_reduction <add>, %399, %cst_289 [2] : vector<2x32x32xf32> to vector<2x32xf32>
    %401 = vector.shape_cast %400 : vector<2x32xf32> to vector<2x32x1xf32>
    %402 = tpu.reciprocal %401 {approx = true} : vector<2x32x1xf32> -> vector<2x32x1xf32>
    %403 = vector.broadcast %402 : vector<2x32x1xf32> to vector<2x32x32xf32>
    %404 = arith.mulf %399, %403 : vector<2x32x32xf32>
    %405 = arith.truncf %404 : vector<2x32x32xf32> to vector<2x32x32xbf16>
    "tpu.trace_start"() <{level = 10 : i32, message = "bqk,bkd->bqd"}> : () -> ()
    %cst_290 = arith.constant dense<0.000000e+00> : vector<2x32x8xf32>
    %406 = tpu.matmul %405, %393, %cst_290 {dimension_numbers = #tpu.dot_dimension_numbers<[2], [1], [1], [2], [0, 0, 0, 1, 1, 2], [0], [0]>} : vector<2x32x32xbf16>, vector<2x32x8xbf16>, vector<2x32x8xf32> -> vector<2x32x8xf32>
    "tpu.trace_stop"() : () -> ()
    %407 = vector.shape_cast %406 : vector<2x32x8xf32> to vector<64x8xf32>
    %408 = arith.truncf %407 : vector<64x8xf32> to vector<64x8xbf16>
    %c1_291 = arith.constant 1 : index
    %c2_292 = arith.constant 2 : index
    %c0_293 = arith.constant 0 : index
    %c0_294 = arith.constant 0 : index
    %409 = vector.load %arg8[%c1_291, %c2_292, %c0_293, %c0_294] : memref<2x4x8x32xbf16, #tpu.memory_space<vmem>>, vector<1x1x8x32xbf16>
    %410 = vector.shape_cast %409 : vector<1x1x8x32xbf16> to vector<8x32xbf16>
    %cst_295 = arith.constant dense<0.000000e+00> : vector<64x32xf32>
    %411 = tpu.matmul %408, %410, %cst_295 {dimension_numbers = #tpu.dot_dimension_numbers<[1], [0], [0], [1], [0, 0, 1, 1], [], []>} : vector<64x8xbf16>, vector<8x32xbf16>, vector<64x32xf32> -> vector<64x32xf32>
    %412 = arith.addf %364, %411 : vector<64x32xf32>
    %c1_296 = arith.constant 1 : index
    %c3_297 = arith.constant 3 : index
    %c0_298 = arith.constant 0 : index
    %c0_299 = arith.constant 0 : index
    %413 = vector.load %arg2[%c1_296, %c3_297, %c0_298, %c0_299] : memref<2x4x32x8xbf16, #tpu.memory_space<vmem>>, vector<1x1x32x8xbf16>
    %414 = vector.shape_cast %413 : vector<1x1x32x8xbf16> to vector<32x8xbf16>
    %cst_300 = arith.constant dense<0.000000e+00> : vector<64x8xf32>
    %415 = tpu.matmul %269, %414, %cst_300 {dimension_numbers = #tpu.dot_dimension_numbers<[1], [0], [0], [1], [0, 0, 1, 1], [], []>} : vector<64x32xbf16>, vector<32x8xbf16>, vector<64x8xf32> -> vector<64x8xf32>
    %c1_301 = arith.constant 1 : index
    %c3_302 = arith.constant 3 : index
    %c0_303 = arith.constant 0 : index
    %c0_304 = arith.constant 0 : index
    %416 = vector.load %arg5[%c1_301, %c3_302, %c0_303, %c0_304] : memref<2x4x1x8xf32, #tpu.memory_space<vmem>>, vector<1x1x1x8xf32>
    %417 = vector.shape_cast %416 : vector<1x1x1x8xf32> to vector<1x8xf32>
    %418 = vector.broadcast %417 : vector<1x8xf32> to vector<64x8xf32>
    %419 = arith.addf %415, %418 : vector<64x8xf32>
    %cst_305 = arith.constant 0.353553385 : f32
    %420 = vector.broadcast %cst_305 : f32 to vector<64x8xf32>
    %421 = arith.mulf %419, %420 : vector<64x8xf32>
    %c1_306 = arith.constant 1 : index
    %c3_307 = arith.constant 3 : index
    %c0_308 = arith.constant 0 : index
    %c0_309 = arith.constant 0 : index
    %422 = vector.load %arg3[%c1_306, %c3_307, %c0_308, %c0_309] : memref<2x4x32x8xbf16, #tpu.memory_space<vmem>>, vector<1x1x32x8xbf16>
    %423 = vector.shape_cast %422 : vector<1x1x32x8xbf16> to vector<32x8xbf16>
    %cst_310 = arith.constant dense<0.000000e+00> : vector<64x8xf32>
    %424 = tpu.matmul %269, %423, %cst_310 {dimension_numbers = #tpu.dot_dimension_numbers<[1], [0], [0], [1], [0, 0, 1, 1], [], []>} : vector<64x32xbf16>, vector<32x8xbf16>, vector<64x8xf32> -> vector<64x8xf32>
    %c1_311 = arith.constant 1 : index
    %c3_312 = arith.constant 3 : index
    %c0_313 = arith.constant 0 : index
    %c0_314 = arith.constant 0 : index
    %425 = vector.load %arg6[%c1_311, %c3_312, %c0_313, %c0_314] : memref<2x4x1x8xf32, #tpu.memory_space<vmem>>, vector<1x1x1x8xf32>
    %426 = vector.shape_cast %425 : vector<1x1x1x8xf32> to vector<1x8xf32>
    %427 = vector.broadcast %426 : vector<1x8xf32> to vector<64x8xf32>
    %428 = arith.addf %424, %427 : vector<64x8xf32>
    %c1_315 = arith.constant 1 : index
    %c3_316 = arith.constant 3 : index
    %c0_317 = arith.constant 0 : index
    %c0_318 = arith.constant 0 : index
    %429 = vector.load %arg4[%c1_315, %c3_316, %c0_317, %c0_318] : memref<2x4x32x8xbf16, #tpu.memory_space<vmem>>, vector<1x1x32x8xbf16>
    %430 = vector.shape_cast %429 : vector<1x1x32x8xbf16> to vector<32x8xbf16>
    %cst_319 = arith.constant dense<0.000000e+00> : vector<64x8xf32>
    %431 = tpu.matmul %269, %430, %cst_319 {dimension_numbers = #tpu.dot_dimension_numbers<[1], [0], [0], [1], [0, 0, 1, 1], [], []>} : vector<64x32xbf16>, vector<32x8xbf16>, vector<64x8xf32> -> vector<64x8xf32>
    %c1_320 = arith.constant 1 : index
    %c3_321 = arith.constant 3 : index
    %c0_322 = arith.constant 0 : index
    %c0_323 = arith.constant 0 : index
    %432 = vector.load %arg7[%c1_320, %c3_321, %c0_322, %c0_323] : memref<2x4x1x8xf32, #tpu.memory_space<vmem>>, vector<1x1x1x8xf32>
    %433 = vector.shape_cast %432 : vector<1x1x1x8xf32> to vector<1x8xf32>
    %434 = vector.broadcast %433 : vector<1x8xf32> to vector<64x8xf32>
    %435 = arith.addf %431, %434 : vector<64x8xf32>
    %436 = arith.truncf %421 : vector<64x8xf32> to vector<64x8xbf16>
    %437 = vector.shape_cast %436 : vector<64x8xbf16> to vector<2x32x8xbf16>
    %438 = arith.truncf %428 : vector<64x8xf32> to vector<64x8xbf16>
    %439 = vector.shape_cast %438 : vector<64x8xbf16> to vector<2x32x8xbf16>
    %440 = arith.truncf %435 : vector<64x8xf32> to vector<64x8xbf16>
    %441 = vector.shape_cast %440 : vector<64x8xbf16> to vector<2x32x8xbf16>
    "tpu.trace_start"() <{level = 10 : i32, message = "bqd,bkd->bqk"}> : () -> ()
    %cst_324 = arith.constant dense<0.000000e+00> : vector<2x32x32xf32>
    %442 = tpu.matmul %437, %439, %cst_324 {dimension_numbers = #tpu.dot_dimension_numbers<[2], [2], [1], [1], [0, 0, 0, 1, 1, 1], [0], [0]>} : vector<2x32x8xbf16>, vector<2x32x8xbf16>, vector<2x32x32xf32> -> vector<2x32x32xf32>
    "tpu.trace_stop"() : () -> ()
    %cst_325 = arith.constant dense<0xFF800000> : vector<2x32xf32>
    %443 = vector.multi_reduction <maximumf>, %442, %cst_325 [2] : vector<2x32x32xf32> to vector<2x32xf32>
    %444 = vector.shape_cast %443 : vector<2x32xf32> to vector<2x32x1xf32>
    %445 = vector.broadcast %444 : vector<2x32x1xf32> to vector<2x32x32xf32>
    %446 = arith.subf %442, %445 : vector<2x32x32xf32>
    %447 = math.exp %446 : vector<2x32x32xf32>
    %cst_326 = arith.constant dense<0.000000e+00> : vector<2x32xf32>
    %448 = vector.multi_reduction <add>, %447, %cst_326 [2] : vector<2x32x32xf32> to vector<2x32xf32>
    %449 = vector.shape_cast %448 : vector<2x32xf32> to vector<2x32x1xf32>
    %450 = tpu.reciprocal %449 {approx = true} : vector<2x32x1xf32> -> vector<2x32x1xf32>
    %451 = vector.broadcast %450 : vector<2x32x1xf32> to vector<2x32x32xf32>
    %452 = arith.mulf %447, %451 : vector<2x32x32xf32>
    %453 = arith.truncf %452 : vector<2x32x32xf32> to vector<2x32x32xbf16>
    "tpu.trace_start"() <{level = 10 : i32, message = "bqk,bkd->bqd"}> : () -> ()
    %cst_327 = arith.constant dense<0.000000e+00> : vector<2x32x8xf32>
    %454 = tpu.matmul %453, %441, %cst_327 {dimension_numbers = #tpu.dot_dimension_numbers<[2], [1], [1], [2], [0, 0, 0, 1, 1, 2], [0], [0]>} : vector<2x32x32xbf16>, vector<2x32x8xbf16>, vector<2x32x8xf32> -> vector<2x32x8xf32>
    "tpu.trace_stop"() : () -> ()
    %455 = vector.shape_cast %454 : vector<2x32x8xf32> to vector<64x8xf32>
    %456 = arith.truncf %455 : vector<64x8xf32> to vector<64x8xbf16>
    %c1_328 = arith.constant 1 : index
    %c3_329 = arith.constant 3 : index
    %c0_330 = arith.constant 0 : index
    %c0_331 = arith.constant 0 : index
    %457 = vector.load %arg8[%c1_328, %c3_329, %c0_330, %c0_331] : memref<2x4x8x32xbf16, #tpu.memory_space<vmem>>, vector<1x1x8x32xbf16>
    %458 = vector.shape_cast %457 : vector<1x1x8x32xbf16> to vector<8x32xbf16>
    %cst_332 = arith.constant dense<0.000000e+00> : vector<64x32xf32>
    %459 = tpu.matmul %456, %458, %cst_332 {dimension_numbers = #tpu.dot_dimension_numbers<[1], [0], [0], [1], [0, 0, 1, 1], [], []>} : vector<64x8xbf16>, vector<8x32xbf16>, vector<64x32xf32> -> vector<64x32xf32>
    %460 = arith.addf %412, %459 : vector<64x32xf32>
    %c1_333 = arith.constant 1 : index
    %c0_334 = arith.constant 0 : index
    %c0_335 = arith.constant 0 : index
    %461 = vector.load %arg9[%c1_333, %c0_334, %c0_335] : memref<2x1x32xf32, #tpu.memory_space<vmem>>, vector<1x1x32xf32>
    %462 = vector.shape_cast %461 : vector<1x1x32xf32> to vector<1x32xf32>
    %463 = vector.broadcast %462 : vector<1x32xf32> to vector<64x32xf32>
    %464 = arith.addf %460, %463 : vector<64x32xf32>
    %465 = arith.addf %268, %464 : vector<64x32xf32>
    %c1_336 = arith.constant 1 : index
    %c0_337 = arith.constant 0 : index
    %c0_338 = arith.constant 0 : index
    %466 = vector.load %arg10[%c1_336, %c0_337, %c0_338] : memref<2x1x32xf32, #tpu.memory_space<vmem>>, vector<1x1x32xf32>
    %467 = vector.shape_cast %466 : vector<1x1x32xf32> to vector<1x32xf32>
    %c1_339 = arith.constant 1 : index
    %c0_340 = arith.constant 0 : index
    %c0_341 = arith.constant 0 : index
    %468 = vector.load %arg11[%c1_339, %c0_340, %c0_341] : memref<2x1x32xf32, #tpu.memory_space<vmem>>, vector<1x1x32xf32>
    %469 = vector.shape_cast %468 : vector<1x1x32xf32> to vector<1x32xf32>
    %cst_342 = arith.constant dense<0.000000e+00> : vector<64xf32>
    %470 = vector.multi_reduction <add>, %465, %cst_342 [1] : vector<64x32xf32> to vector<64xf32>
    %471 = vector.shape_cast %470 : vector<64xf32> to vector<64x1xf32>
    %cst_343 = arith.constant 3.200000e+01 : f32
    %472 = vector.broadcast %cst_343 : f32 to vector<64x1xf32>
    %473 = arith.divf %471, %472 : vector<64x1xf32>
    %474 = vector.broadcast %473 : vector<64x1xf32> to vector<64x32xf32>
    %475 = arith.subf %465, %474 : vector<64x32xf32>
    %476 = arith.mulf %475, %475 : vector<64x32xf32>
    %cst_344 = arith.constant dense<0.000000e+00> : vector<64xf32>
    %477 = vector.multi_reduction <add>, %476, %cst_344 [1] : vector<64x32xf32> to vector<64xf32>
    %478 = vector.shape_cast %477 : vector<64xf32> to vector<64x1xf32>
    %cst_345 = arith.constant 3.200000e+01 : f32
    %479 = vector.broadcast %cst_345 : f32 to vector<64x1xf32>
    %480 = arith.divf %478, %479 : vector<64x1xf32>
    %481 = vector.broadcast %473 : vector<64x1xf32> to vector<64x32xf32>
    %482 = arith.subf %465, %481 : vector<64x32xf32>
    %cst_346 = arith.constant 9.99999974E-6 : f32
    %483 = vector.broadcast %cst_346 : f32 to vector<64x1xf32>
    %484 = arith.addf %480, %483 : vector<64x1xf32>
    %485 = math.rsqrt %484 : vector<64x1xf32>
    %486 = vector.broadcast %485 : vector<64x1xf32> to vector<64x32xf32>
    %487 = arith.mulf %482, %486 : vector<64x32xf32>
    %488 = vector.broadcast %467 : vector<1x32xf32> to vector<64x32xf32>
    %489 = arith.mulf %487, %488 : vector<64x32xf32>
    %490 = vector.broadcast %469 : vector<1x32xf32> to vector<64x32xf32>
    %491 = arith.addf %489, %490 : vector<64x32xf32>
    %492 = arith.truncf %491 : vector<64x32xf32> to vector<64x32xbf16>
    %c1_347 = arith.constant 1 : index
    %c0_348 = arith.constant 0 : index
    %c0_349 = arith.constant 0 : index
    %493 = vector.load %arg12[%c1_347, %c0_348, %c0_349] : memref<2x32x128xbf16, #tpu.memory_space<vmem>>, vector<1x32x128xbf16>
    %494 = vector.shape_cast %493 : vector<1x32x128xbf16> to vector<32x128xbf16>
    %cst_350 = arith.constant dense<0.000000e+00> : vector<64x128xf32>
    %495 = tpu.matmul %492, %494, %cst_350 {dimension_numbers = #tpu.dot_dimension_numbers<[1], [0], [0], [1], [0, 0, 1, 1], [], []>} : vector<64x32xbf16>, vector<32x128xbf16>, vector<64x128xf32> -> vector<64x128xf32>
    %c1_351 = arith.constant 1 : index
    %c0_352 = arith.constant 0 : index
    %c0_353 = arith.constant 0 : index
    %496 = vector.load %arg13[%c1_351, %c0_352, %c0_353] : memref<2x1x128xf32, #tpu.memory_space<vmem>>, vector<1x1x128xf32>
    %497 = vector.shape_cast %496 : vector<1x1x128xf32> to vector<1x128xf32>
    %498 = vector.broadcast %497 : vector<1x128xf32> to vector<64x128xf32>
    %499 = arith.addf %495, %498 : vector<64x128xf32>
    %cst_354 = arith.constant 0.000000e+00 : f32
    %500 = vector.broadcast %cst_354 : f32 to vector<64x128xf32>
    %501 = arith.maximumf %499, %500 : vector<64x128xf32>
    %502 = arith.truncf %501 : vector<64x128xf32> to vector<64x128xbf16>
    %c1_355 = arith.constant 1 : index
    %c0_356 = arith.constant 0 : index
    %c0_357 = arith.constant 0 : index
    %503 = vector.load %arg14[%c1_355, %c0_356, %c0_357] : memref<2x128x32xbf16, #tpu.memory_space<vmem>>, vector<1x128x32xbf16>
    %504 = vector.shape_cast %503 : vector<1x128x32xbf16> to vector<128x32xbf16>
    %cst_358 = arith.constant dense<0.000000e+00> : vector<64x32xf32>
    %505 = tpu.matmul %502, %504, %cst_358 {dimension_numbers = #tpu.dot_dimension_numbers<[1], [0], [0], [1], [0, 0, 1, 1], [], []>} : vector<64x128xbf16>, vector<128x32xbf16>, vector<64x32xf32> -> vector<64x32xf32>
    %c1_359 = arith.constant 1 : index
    %c0_360 = arith.constant 0 : index
    %c0_361 = arith.constant 0 : index
    %506 = vector.load %arg15[%c1_359, %c0_360, %c0_361] : memref<2x1x32xf32, #tpu.memory_space<vmem>>, vector<1x1x32xf32>
    %507 = vector.shape_cast %506 : vector<1x1x32xf32> to vector<1x32xf32>
    %508 = vector.broadcast %507 : vector<1x32xf32> to vector<64x32xf32>
    %509 = arith.addf %505, %508 : vector<64x32xf32>
    %510 = arith.addf %491, %509 : vector<64x32xf32>
    %c1_362 = arith.constant 1 : index
    %c0_363 = arith.constant 0 : index
    %c0_364 = arith.constant 0 : index
    %511 = vector.load %arg16[%c1_362, %c0_363, %c0_364] : memref<2x1x32xf32, #tpu.memory_space<vmem>>, vector<1x1x32xf32>
    %512 = vector.shape_cast %511 : vector<1x1x32xf32> to vector<1x32xf32>
    %c1_365 = arith.constant 1 : index
    %c0_366 = arith.constant 0 : index
    %c0_367 = arith.constant 0 : index
    %513 = vector.load %arg17[%c1_365, %c0_366, %c0_367] : memref<2x1x32xf32, #tpu.memory_space<vmem>>, vector<1x1x32xf32>
    %514 = vector.shape_cast %513 : vector<1x1x32xf32> to vector<1x32xf32>
    %cst_368 = arith.constant dense<0.000000e+00> : vector<64xf32>
    %515 = vector.multi_reduction <add>, %510, %cst_368 [1] : vector<64x32xf32> to vector<64xf32>
    %516 = vector.shape_cast %515 : vector<64xf32> to vector<64x1xf32>
    %cst_369 = arith.constant 3.200000e+01 : f32
    %517 = vector.broadcast %cst_369 : f32 to vector<64x1xf32>
    %518 = arith.divf %516, %517 : vector<64x1xf32>
    %519 = vector.broadcast %518 : vector<64x1xf32> to vector<64x32xf32>
    %520 = arith.subf %510, %519 : vector<64x32xf32>
    %521 = arith.mulf %520, %520 : vector<64x32xf32>
    %cst_370 = arith.constant dense<0.000000e+00> : vector<64xf32>
    %522 = vector.multi_reduction <add>, %521, %cst_370 [1] : vector<64x32xf32> to vector<64xf32>
    %523 = vector.shape_cast %522 : vector<64xf32> to vector<64x1xf32>
    %cst_371 = arith.constant 3.200000e+01 : f32
    %524 = vector.broadcast %cst_371 : f32 to vector<64x1xf32>
    %525 = arith.divf %523, %524 : vector<64x1xf32>
    %526 = vector.broadcast %518 : vector<64x1xf32> to vector<64x32xf32>
    %527 = arith.subf %510, %526 : vector<64x32xf32>
    %cst_372 = arith.constant 9.99999974E-6 : f32
    %528 = vector.broadcast %cst_372 : f32 to vector<64x1xf32>
    %529 = arith.addf %525, %528 : vector<64x1xf32>
    %530 = math.rsqrt %529 : vector<64x1xf32>
    %531 = vector.broadcast %530 : vector<64x1xf32> to vector<64x32xf32>
    %532 = arith.mulf %527, %531 : vector<64x32xf32>
    %533 = vector.broadcast %512 : vector<1x32xf32> to vector<64x32xf32>
    %534 = arith.mulf %532, %533 : vector<64x32xf32>
    %535 = vector.broadcast %514 : vector<1x32xf32> to vector<64x32xf32>
    %536 = arith.addf %534, %535 : vector<64x32xf32>
    %c0_373 = arith.constant 0 : index
    %c0_374 = arith.constant 0 : index
    %537 = vector.load %arg18[%c0_373, %c0_374] : memref<64x32xf32, #tpu.memory_space<vmem>>, vector<64x32xf32>
    tpu.vector_store %arg18[%c0_373, %c0_374], %536 {strides = array<i32>} : memref<64x32xf32, #tpu.memory_space<vmem>>, vector<64x32xf32>,
    return
  }
  func.func @transform_0(%arg0: i32) -> (i32, i32) {
    %c0_i32 = arith.constant 0 : i32
    %c0_i32_0 = arith.constant 0 : i32
    return %arg0, %c0_i32 : i32, i32
  }
  func.func @transform_1(%arg0: i32) -> (i32, i32, i32, i32) {
    %c0_i32 = arith.constant 0 : i32
    %c0_i32_0 = arith.constant 0 : i32
    %c0_i32_1 = arith.constant 0 : i32
    %c0_i32_2 = arith.constant 0 : i32
    %c0_i32_3 = arith.constant 0 : i32
    return %c0_i32, %c0_i32_0, %c0_i32_1, %c0_i32_2 : i32, i32, i32, i32
  }
  func.func @transform_2(%arg0: i32) -> (i32, i32, i32, i32) {
    %c0_i32 = arith.constant 0 : i32
    %c0_i32_0 = arith.constant 0 : i32
    %c0_i32_1 = arith.constant 0 : i32
    %c0_i32_2 = arith.constant 0 : i32
    %c0_i32_3 = arith.constant 0 : i32
    return %c0_i32, %c0_i32_0, %c0_i32_1, %c0_i32_2 : i32, i32, i32, i32
  }
  func.func @transform_3(%arg0: i32) -> (i32, i32, i32, i32) {
    %c0_i32 = arith.constant 0 : i32
    %c0_i32_0 = arith.constant 0 : i32
    %c0_i32_1 = arith.constant 0 : i32
    %c0_i32_2 = arith.constant 0 : i32
    %c0_i32_3 = arith.constant 0 : i32
    return %c0_i32, %c0_i32_0, %c0_i32_1, %c0_i32_2 : i32, i32, i32, i32
  }
  func.func @transform_4(%arg0: i32) -> (i32, i32, i32, i32) {
    %c0_i32 = arith.constant 0 : i32
    %c0_i32_0 = arith.constant 0 : i32
    %c0_i32_1 = arith.constant 0 : i32
    %c0_i32_2 = arith.constant 0 : i32
    %c0_i32_3 = arith.constant 0 : i32
    return %c0_i32, %c0_i32_0, %c0_i32_1, %c0_i32_2 : i32, i32, i32, i32
  }
  func.func @transform_5(%arg0: i32) -> (i32, i32, i32, i32) {
    %c0_i32 = arith.constant 0 : i32
    %c0_i32_0 = arith.constant 0 : i32
    %c0_i32_1 = arith.constant 0 : i32
    %c0_i32_2 = arith.constant 0 : i32
    %c0_i32_3 = arith.constant 0 : i32
    return %c0_i32, %c0_i32_0, %c0_i32_1, %c0_i32_2 : i32, i32, i32, i32
  }
  func.func @transform_6(%arg0: i32) -> (i32, i32, i32, i32) {
    %c0_i32 = arith.constant 0 : i32
    %c0_i32_0 = arith.constant 0 : i32
    %c0_i32_1 = arith.constant 0 : i32
    %c0_i32_2 = arith.constant 0 : i32
    %c0_i32_3 = arith.constant 0 : i32
    return %c0_i32, %c0_i32_0, %c0_i32_1, %c0_i32_2 : i32, i32, i32, i32
  }
  func.func @transform_7(%arg0: i32) -> (i32, i32, i32, i32) {
    %c0_i32 = arith.constant 0 : i32
    %c0_i32_0 = arith.constant 0 : i32
    %c0_i32_1 = arith.constant 0 : i32
    %c0_i32_2 = arith.constant 0 : i32
    %c0_i32_3 = arith.constant 0 : i32
    return %c0_i32, %c0_i32_0, %c0_i32_1, %c0_i32_2 : i32, i32, i32, i32
  }
  func.func @transform_8(%arg0: i32) -> (i32, i32, i32) {
    %c0_i32 = arith.constant 0 : i32
    %c0_i32_0 = arith.constant 0 : i32
    %c0_i32_1 = arith.constant 0 : i32
    %c0_i32_2 = arith.constant 0 : i32
    return %c0_i32, %c0_i32_0, %c0_i32_1 : i32, i32, i32
  }
  func.func @transform_9(%arg0: i32) -> (i32, i32, i32) {
    %c0_i32 = arith.constant 0 : i32
    %c0_i32_0 = arith.constant 0 : i32
    %c0_i32_1 = arith.constant 0 : i32
    %c0_i32_2 = arith.constant 0 : i32
    return %c0_i32, %c0_i32_0, %c0_i32_1 : i32, i32, i32
  }
  func.func @transform_10(%arg0: i32) -> (i32, i32, i32) {
    %c0_i32 = arith.constant 0 : i32
    %c0_i32_0 = arith.constant 0 : i32
    %c0_i32_1 = arith.constant 0 : i32
    %c0_i32_2 = arith.constant 0 : i32
    return %c0_i32, %c0_i32_0, %c0_i32_1 : i32, i32, i32
  }
  func.func @transform_11(%arg0: i32) -> (i32, i32, i32) {
    %c0_i32 = arith.constant 0 : i32
    %c0_i32_0 = arith.constant 0 : i32
    %c0_i32_1 = arith.constant 0 : i32
    %c0_i32_2 = arith.constant 0 : i32
    return %c0_i32, %c0_i32_0, %c0_i32_1 : i32, i32, i32
  }
  func.func @transform_12(%arg0: i32) -> (i32, i32, i32) {
    %c0_i32 = arith.constant 0 : i32
    %c0_i32_0 = arith.constant 0 : i32
    %c0_i32_1 = arith.constant 0 : i32
    %c0_i32_2 = arith.constant 0 : i32
    return %c0_i32, %c0_i32_0, %c0_i32_1 : i32, i32, i32
  }
  func.func @transform_13(%arg0: i32) -> (i32, i32, i32) {
    %c0_i32 = arith.constant 0 : i32
    %c0_i32_0 = arith.constant 0 : i32
    %c0_i32_1 = arith.constant 0 : i32
    %c0_i32_2 = arith.constant 0 : i32
    return %c0_i32, %c0_i32_0, %c0_i32_1 : i32, i32, i32
  }
  func.func @transform_14(%arg0: i32) -> (i32, i32, i32) {
    %c0_i32 = arith.constant 0 : i32
    %c0_i32_0 = arith.constant 0 : i32
    %c0_i32_1 = arith.constant 0 : i32
    %c0_i32_2 = arith.constant 0 : i32
    return %c0_i32, %c0_i32_0, %c0_i32_1 : i32, i32, i32
  }
  func.func @transform_15(%arg0: i32) -> (i32, i32, i32) {
    %c0_i32 = arith.constant 0 : i32
    %c0_i32_0 = arith.constant 0 : i32
    %c0_i32_1 = arith.constant 0 : i32
    %c0_i32_2 = arith.constant 0 : i32
    return %c0_i32, %c0_i32_0, %c0_i32_1 : i32, i32, i32
  }
  func.func @transform_16(%arg0: i32) -> (i32, i32, i32) {
    %c0_i32 = arith.constant 0 : i32
    %c0_i32_0 = arith.constant 0 : i32
    %c0_i32_1 = arith.constant 0 : i32
    %c0_i32_2 = arith.constant 0 : i32
    return %c0_i32, %c0_i32_0, %c0_i32_1 : i32, i32, i32
  }
  func.func @transform_17(%arg0: i32) -> (i32, i32) {
    %c0_i32 = arith.constant 0 : i32
    %c0_i32_0 = arith.constant 0 : i32
    return %arg0, %c0_i32 : i32, i32
  }
}

</mosaic_0001>

<bundles_post_ra>
// kernel: tpu_custom_call.1
= control target key start
LH: loop header
LB: loop body
LE: loop exit
PB: predicated region body
PF: predicated region fallthrough
CT: control target
= control target key end

     0   :  { %s10873_s0 = inlined_call_operand.hbm [shape: f32[64,32], index: 0, kind: input, shape index: {}]   ;;  %s10874_s1 = inlined_call_operand.hbm [shape: bf16[2,4,32,8], index: 1, kind: input, shape index: {}]   ;;  %s10875_s2 = inlined_call_operand.hbm [shape: bf16[2,4,32,8], index: 2, kind: input, shape index: {}]   ;;  %s10876_s3 = inlined_call_operand.hbm [shape: bf16[2,4,32,8], index: 3, kind: input, shape index: {}]   ;;  %s10877_s4 = inlined_call_operand.hbm [shape: f32[2,4,1,8], index: 4, kind: input, shape index: {}]   ;;  %s10878_s5 = inlined_call_operand.hbm [shape: f32[2,4,1,8], index: 5, kind: input, shape index: {}]   ;;  %s10879_s6 = inlined_call_operand.hbm [shape: f32[2,4,1,8], index: 6, kind: input, shape index: {}]   ;;  %s10880_s7 = inlined_call_operand.hbm [shape: bf16[2,4,8,32], index: 7, kind: input, shape index: {}]   ;;  %s10881_s8 = inlined_call_operand.hbm [shape: f32[2,1,32], index: 8, kind: input, shape index: {}]   ;;  %s10882_s9 = inlined_call_operand.hbm [shape: f32[2,1,32], index: 9, kind: input, shape index: {}]   ;;  %s10883_s10 = inlined_call_operand.hbm [shape: f32[2,1,32], index: 10, kind: input, shape index: {}]   ;;  %s10884_s11 = inlined_call_operand.hbm [shape: bf16[2,32,128], index: 11, kind: input, shape index: {}]   ;;  %s10885_s12 = inlined_call_operand.hbm [shape: f32[2,1,128], index: 12, kind: input, shape index: {}]   ;;  %s10886_s13 = inlined_call_operand.hbm [shape: bf16[2,128,32], index: 13, kind: input, shape index: {}]   ;;  %s10887_s14 = inlined_call_operand.hbm [shape: f32[2,1,32], index: 14, kind: input, shape index: {}]   ;;  %s10888_s15 = inlined_call_operand.hbm [shape: f32[2,1,32], index: 15, kind: input, shape index: {}]   ;;  %s10889_s16 = inlined_call_operand.hbm [shape: f32[2,1,32], index: 16, kind: input, shape index: {}]   ;;  %s10890_s17 = inlined_call_operand.hbm [shape: f32[64,32], index: 17, kind: output, shape index: {}]  }
   0x1   :  { %10894 = sst [smem:[#allocation40_spill]] %s10873_s0 }
   0x2   :  { %10895 = sst [smem:[#allocation41_spill]] %s10874_s1 }
   0x3   :  { %10896 = sst [smem:[#allocation42_spill]] %s10890_s17 }
   0x4   :  { %22 = vsyncpa [#allocation3], 0 }
   0x5   :  { %23 = vsyncpa [#allocation6], 0 }
   0x6   :  { %24 = vsyncpa [#allocation9], 0 }
   0x7   :  { %25 = vsyncpa [#allocation12], 0 }
   0x8   :  { %26 = vsyncpa [#allocation15], 0 }
   0x9   :  { %27 = vsyncpa [#allocation18], 0 }
   0xa   :  { %28 = vsyncpa [#allocation21], 0 }
   0xb   :  { %29 = vsyncpa [#allocation24], 0 }
   0xc   :  { %30 = vsyncpa [#allocation27], 0 }
   0xd   :  { %31 = vsyncpa [#allocation4], 0  ;;  %s9375_s24 = smov [#allocation5]   ;;  %s10897_s28 = sld [smem:[#allocation41_spill]] }
   0xe   :  { %s49_s25 = sshll.u32 %s9375_s24, 4  ;;  %s50_s25 = int_to_ptr.vmem [resolvable:$true] %s49_s25 }
  0x13   :  { %s8959_s29 = scalar_lea.hbm %s10897_s28, 2048 }
  0x14   :  { %p8960_p0 = scmp.ne.s32.totalorder %s10897_s28, %s8959_s29  ;;  %p8963_p1 = scmp.lt.u32.totalorder %s8959_s29, %s10897_s28 }
  0x16   :  { %p8965_p2 = pnand %p8963_p1, %p8960_p0 }
  0x18   :  { %8968 = shalt.err (!%p8965_p2)
}
  0x19   :  { %s8969_s1 = scalar_lea.vmem %s50_s25, 2048  ;;  %p8974_p4 = scmp.lt.s32.totalorder %s50_s25, %s50_s25 }
  0x1a   :  { %p8970_p3 = scmp.ne.s32.totalorder %s50_s25, %s8969_s1  ;;  %p8975_p5 = scmp.lt.s32.totalorder %s8969_s1, %s8969_s1 }
  0x1c   :  { %p8976_p6 = por %p8975_p5, %p8974_p4 }
  0x1e   :  { %p8977_p7 = pnand %p8976_p6, %p8970_p3 }
  0x20   :  { %8980 = shalt.err (!%p8977_p7)
}
  0x21   :  { %s9376_s20 = smov 64   ;;  %s9377_s21 = smov 4  }
  0x22   :  { %55 = dma.hbm_to_vmem [thread:$0]  %s10897_s28, 2048, %s50_s25, [#allocation6], %s9376_s20, %s9376_s20, %s9377_s21  }
  0x23   :  { %s9378_s24 = smov [#allocation8]   ;;  %s8981_s0 = scalar_lea.hbm %s10876_s3, 2048 }
  0x24   :  { %s73_s26 = sshll.u32 %s9378_s24, 4  ;;  %p8982_p8 = scmp.ne.s32.totalorder %s10876_s3, %s8981_s0  ;;  %s74_s26 = int_to_ptr.vmem [resolvable:$true] %s73_s26 }
  0x25   :  { %p8985_p9 = scmp.lt.u32.totalorder %s8981_s0, %s10876_s3 }
  0x27   :  { %p8987_p10 = pnand %p8985_p9, %p8982_p8 }
  0x29   :  { %8990 = shalt.err (!%p8987_p10)
}
  0x2a   :  { %s8991_s17 = scalar_lea.vmem %s74_s26, 2048  ;;  %p8996_p12 = scmp.lt.s32.totalorder %s74_s26, %s74_s26 }
  0x2b   :  { %p8992_p11 = scmp.ne.s32.totalorder %s74_s26, %s8991_s17  ;;  %p8997_p13 = scmp.lt.s32.totalorder %s8991_s17, %s8991_s17 }
  0x2d   :  { %p8998_p0 = por %p8997_p13, %p8996_p12 }
  0x2f   :  { %p8999_p1 = pnand %p8998_p0, %p8992_p11 }
  0x31   :  { %9002 = shalt.err (!%p8999_p1)
}
  0x32   :  { %79 = dma.hbm_to_vmem [thread:$0]  %s10876_s3, 2048, %s74_s26, [#allocation9], %s9376_s20, %s9376_s20, %s9377_s21  }
  0x33   :  { %s9379_s22 = smov [#allocation11]   ;;  %s9380_s24 = smov [#allocation14]  }
  0x34   :  { %s97_s23 = sshll.u32 %s9379_s22, 4  ;;  %s121_s27 = sshll.u32 %s9380_s24, 4  ;;  %s98_s23 = int_to_ptr.vmem [resolvable:$true] %s97_s23  ;;  %s9519_s27 = int_to_ptr.vmem [resolvable:$true] %s121_s27 }
  0x35   :  { %s9003_s17 = scalar_lea.hbm %s10878_s5, 128 }
  0x36   :  { %p9004_p2 = scmp.ne.s32.totalorder %s10878_s5, %s9003_s17  ;;  %p9007_p3 = scmp.lt.u32.totalorder %s9003_s17, %s10878_s5 }
  0x38   :  { %p9009_p4 = pnand %p9007_p3, %p9004_p2 }
  0x3a   :  { %9012 = shalt.err (!%p9009_p4)
}
  0x3b   :  { %s9013_s3 = scalar_lea.vmem %s98_s23, 128  ;;  %p9018_p6 = scmp.lt.s32.totalorder %s98_s23, %s98_s23 }
  0x3c   :  { %p9014_p5 = scmp.ne.s32.totalorder %s98_s23, %s9013_s3  ;;  %p9019_p7 = scmp.lt.s32.totalorder %s9013_s3, %s9013_s3 }
  0x3e   :  { %p9020_p8 = por %p9019_p7, %p9018_p6 }
  0x40   :  { %p9021_p9 = pnand %p9020_p8, %p9014_p5 }
  0x42   :  { %9024 = shalt.err (!%p9021_p9)
}
  0x43   :  { %s9381_s26 = smov 16   ;;  %s9382_s25 = smov 1  }
  0x44   :  { %103 = dma.hbm_to_vmem [thread:$0]  %s10878_s5, 128, %s98_s23, [#allocation12], %s9381_s26, %s9381_s26, %s9382_s25  }
  0x45   :  { %s9025_s0 = scalar_lea.hbm %s10880_s7, 512 }
  0x46   :  { %p9026_p10 = scmp.ne.s32.totalorder %s10880_s7, %s9025_s0  ;;  %p9029_p11 = scmp.lt.u32.totalorder %s9025_s0, %s10880_s7 }
  0x48   :  { %p9031_p12 = pnand %p9029_p11, %p9026_p10 }
  0x4a   :  { %9034 = shalt.err (!%p9031_p12)
}
  0x4b   :  { %s9035_s1 = scalar_lea.vmem %s9519_s27, 512  ;;  %p9040_p0 = scmp.lt.s32.totalorder %s9519_s27, %s9519_s27 }
  0x4c   :  { %p9036_p13 = scmp.ne.s32.totalorder %s9519_s27, %s9035_s1  ;;  %p9041_p1 = scmp.lt.s32.totalorder %s9035_s1, %s9035_s1 }
  0x4e   :  { %p9042_p2 = por %p9041_p1, %p9040_p0 }
  0x50   :  { %p9043_p3 = pnand %p9042_p2, %p9036_p13 }
  0x52   :  { %9046 = shalt.err (!%p9043_p3)
}
  0x53   :  { %127 = dma.hbm_to_vmem [thread:$0]  %s10880_s7, 512, %s9519_s27, [#allocation15], %s9376_s20, %s9376_s20, %s9377_s21  }
  0x54   :  { %s9383_s3 = smov [#allocation17]   ;;  %s9384_s22 = smov [#allocation20]  }
  0x55   :  { %s145_s28 = sshll.u32 %s9383_s3, 4  ;;  %s169_s24 = sshll.u32 %s9384_s22, 4  ;;  %s146_s28 = int_to_ptr.vmem [resolvable:$true] %s145_s28  ;;  %s9556_s24 = int_to_ptr.vmem [resolvable:$true] %s169_s24 }
  0x56   :  { %s9047_s17 = scalar_lea.hbm %s10882_s9, 32 }
  0x57   :  { %p9048_p4 = scmp.ne.s32.totalorder %s10882_s9, %s9047_s17  ;;  %p9051_p5 = scmp.lt.u32.totalorder %s9047_s17, %s10882_s9 }
  0x59   :  { %p9053_p6 = pnand %p9051_p5, %p9048_p4 }
  0x5b   :  { %9056 = shalt.err (!%p9053_p6)
}
  0x5c   :  { %s9057_s7 = scalar_lea.vmem %s146_s28, 32  ;;  %p9062_p8 = scmp.lt.s32.totalorder %s146_s28, %s146_s28 }
  0x5d   :  { %p9058_p7 = scmp.ne.s32.totalorder %s146_s28, %s9057_s7  ;;  %p9063_p9 = scmp.lt.s32.totalorder %s9057_s7, %s9057_s7 }
  0x5f   :  { %p9064_p10 = por %p9063_p9, %p9062_p8 }
  0x61   :  { %p9065_p11 = pnand %p9064_p10, %p9058_p7 }
  0x63   :  { %9068 = shalt.err (!%p9065_p11)
}
  0x64   :  { %151 = dma.hbm_to_vmem [thread:$0]  %s10882_s9, 32, %s146_s28, [#allocation18], %s9381_s26, %s9381_s26, %s9382_s25  }
  0x65   :  { %s9069_s22 = scalar_lea.hbm %s10884_s11, 512 }
  0x66   :  { %p9070_p12 = scmp.ne.s32.totalorder %s10884_s11, %s9069_s22  ;;  %p9073_p13 = scmp.lt.u32.totalorder %s9069_s22, %s10884_s11 }
  0x68   :  { %p9075_p0 = pnand %p9073_p13, %p9070_p12 }
  0x6a   :  { %9078 = shalt.err (!%p9075_p0)
}
  0x6b   :  { %s9079_s18 = scalar_lea.vmem %s9556_s24, 512  ;;  %p9084_p2 = scmp.lt.s32.totalorder %s9556_s24, %s9556_s24 }
  0x6c   :  { %p9080_p1 = scmp.ne.s32.totalorder %s9556_s24, %s9079_s18  ;;  %p9085_p3 = scmp.lt.s32.totalorder %s9079_s18, %s9079_s18 }
  0x6e   :  { %p9086_p4 = por %p9085_p3, %p9084_p2 }
  0x70   :  { %p9087_p5 = pnand %p9086_p4, %p9080_p1 }
  0x72   :  { %9090 = shalt.err (!%p9087_p5)
}
  0x73   :  { %175 = dma.hbm_to_vmem [thread:$0]  %s10884_s11, 512, %s9556_s24, [#allocation21], %s9376_s20, %s9376_s20, %s9377_s21  }
  0x74   :  { %s9385_s19 = smov [#allocation23]   ;;  %s9386_s7 = smov [#allocation26]  }
  0x75   :  { %s193_s1 = sshll.u32 %s9385_s19, 4  ;;  %s217_s27 = sshll.u32 %s9386_s7, 4  ;;  %s194_s1 = int_to_ptr.vmem [resolvable:$true] %s193_s1  ;;  %s9593_s27 = int_to_ptr.vmem [resolvable:$true] %s217_s27 }
  0x76   :  { %s9091_s3 = scalar_lea.hbm %s10886_s13, 2048 }
  0x77   :  { %p9092_p6 = scmp.ne.s32.totalorder %s10886_s13, %s9091_s3  ;;  %p9095_p7 = scmp.lt.u32.totalorder %s9091_s3, %s10886_s13 }
  0x79   :  { %p9097_p8 = pnand %p9095_p7, %p9092_p6 }
  0x7b   :  { %9100 = shalt.err (!%p9097_p8)
}
  0x7c   :  { %s9101_s11 = scalar_lea.vmem %s194_s1, 2048  ;;  %p9106_p10 = scmp.lt.s32.totalorder %s194_s1, %s194_s1 }
  0x7d   :  { %p9102_p9 = scmp.ne.s32.totalorder %s194_s1, %s9101_s11  ;;  %p9107_p11 = scmp.lt.s32.totalorder %s9101_s11, %s9101_s11 }
  0x7f   :  { %p9108_p12 = por %p9107_p11, %p9106_p10 }
  0x81   :  { %p9109_p13 = pnand %p9108_p12, %p9102_p9 }
  0x83   :  { %9112 = shalt.err (!%p9109_p13)
}
  0x84   :  { %199 = dma.hbm_to_vmem [thread:$0]  %s10886_s13, 2048, %s194_s1, [#allocation24], %s9376_s20, %s9376_s20, %s9377_s21  }
  0x85   :  { %s9113_s28 = scalar_lea.hbm %s10888_s15, 32 }
  0x86   :  { %p9114_p0 = scmp.ne.s32.totalorder %s10888_s15, %s9113_s28  ;;  %p9117_p1 = scmp.lt.u32.totalorder %s9113_s28, %s10888_s15 }
  0x88   :  { %p9119_p2 = pnand %p9117_p1, %p9114_p0 }
  0x8a   :  { %9122 = shalt.err (!%p9119_p2)
}
  0x8b   :  { %s9123_s3 = scalar_lea.vmem %s9593_s27, 32  ;;  %p9128_p4 = scmp.lt.s32.totalorder %s9593_s27, %s9593_s27 }
  0x8c   :  { %p9124_p3 = scmp.ne.s32.totalorder %s9593_s27, %s9123_s3  ;;  %p9129_p5 = scmp.lt.s32.totalorder %s9123_s3, %s9123_s3 }
  0x8e   :  { %p9130_p6 = por %p9129_p5, %p9128_p4 }
  0x90   :  { %p9131_p7 = pnand %p9130_p6, %p9124_p3 }
  0x92   :  { %9134 = shalt.err (!%p9131_p7)
}
  0x93   :  { %223 = dma.hbm_to_vmem [thread:$0]  %s10888_s15, 32, %s9593_s27, [#allocation27], %s9381_s26, %s9381_s26, %s9382_s25  }
  0x94   :  { %s9387_s22 = smov [#allocation2]   ;;  %s10898_s11 = sld [smem:[#allocation40_spill]] }
  0x95   :  { %s37_s29 = sshll.u32 %s9387_s22, 4  ;;  %s38_s29 = int_to_ptr.vmem [resolvable:$true] %s37_s29 }
  0x9a   :  { %s9135_s24 = scalar_lea.hbm %s10898_s11, 1024 }
  0x9b   :  { %p9136_p8 = scmp.ne.s32.totalorder %s10898_s11, %s9135_s24  ;;  %p9139_p9 = scmp.lt.u32.totalorder %s9135_s24, %s10898_s11 }
  0x9d   :  { %p9141_p10 = pnand %p9139_p9, %p9136_p8 }
  0x9f   :  { %9144 = shalt.err (!%p9141_p10)
}
  0xa0   :  { %s9145_s19 = scalar_lea.vmem %s38_s29, 1024  ;;  %p9150_p12 = scmp.lt.s32.totalorder %s38_s29, %s38_s29 }
  0xa1   :  { %p9146_p11 = scmp.ne.s32.totalorder %s38_s29, %s9145_s19  ;;  %p9151_p13 = scmp.lt.s32.totalorder %s9145_s19, %s9145_s19 }
  0xa3   :  { %p9152_p0 = por %p9151_p13, %p9150_p12 }
  0xa5   :  { %p9153_p1 = pnand %p9152_p0, %p9146_p11 }
  0xa7   :  { %9156 = shalt.err (!%p9153_p1)
}
  0xa8   :  { %s9388_s15 = smov 128   ;;  %s9389_s27 = smov 8  }
  0xa9   :  { %43 = dma.hbm_to_vmem [thread:$0]  %s10898_s11, 1024, %s38_s29, [#allocation3], %s9388_s15, %s9388_s15, %s9389_s27  }
  0xaa   :  { %s9390_s23 = smov [#allocation7]   ;;  %s9391_s13 = smov [#allocation10]  }
  0xab   :  { %s61_s3 = sshll.u32 %s9390_s23, 4  ;;  %s85_s1 = sshll.u32 %s9391_s13, 4  ;;  %s62_s3 = int_to_ptr.vmem [resolvable:$true] %s61_s3  ;;  %s86_s1 = int_to_ptr.vmem [resolvable:$true] %s85_s1 }
  0xac   :  { %s9157_s17 = scalar_lea.hbm %s10875_s2, 2048 }
  0xad   :  { %p9158_p2 = scmp.ne.s32.totalorder %s10875_s2, %s9157_s17  ;;  %p9161_p3 = scmp.lt.u32.totalorder %s9157_s17, %s10875_s2 }
  0xaf   :  { %p9163_p4 = pnand %p9161_p3, %p9158_p2 }
  0xb1   :  { %9166 = shalt.err (!%p9163_p4)
}
  0xb2   :  { %s9167_s29 = scalar_lea.vmem %s62_s3, 2048  ;;  %p9172_p6 = scmp.lt.s32.totalorder %s62_s3, %s62_s3 }
  0xb3   :  { %p9168_p5 = scmp.ne.s32.totalorder %s62_s3, %s9167_s29  ;;  %p9173_p7 = scmp.lt.s32.totalorder %s9167_s29, %s9167_s29 }
  0xb5   :  { %p9174_p8 = por %p9173_p7, %p9172_p6 }
  0xb7   :  { %p9175_p9 = pnand %p9174_p8, %p9168_p5 }
  0xb9   :  { %9178 = shalt.err (!%p9175_p9)
}
  0xba   :  { %67 = dma.hbm_to_vmem [thread:$0]  %s10875_s2, 2048, %s62_s3, [#allocation6], %s9376_s20, %s9376_s20, %s9377_s21  }
  0xbb   :  { %s9179_s5 = scalar_lea.hbm %s10877_s4, 128 }
  0xbc   :  { %p9180_p10 = scmp.ne.s32.totalorder %s10877_s4, %s9179_s5  ;;  %p9183_p11 = scmp.lt.u32.totalorder %s9179_s5, %s10877_s4 }
  0xbe   :  { %p9185_p12 = pnand %p9183_p11, %p9180_p10 }
  0xc0   :  { %9188 = shalt.err (!%p9185_p12)
}
  0xc1   :  { %s9189_s17 = scalar_lea.vmem %s86_s1, 128  ;;  %p9194_p0 = scmp.lt.s32.totalorder %s86_s1, %s86_s1 }
  0xc2   :  { %p9190_p13 = scmp.ne.s32.totalorder %s86_s1, %s9189_s17  ;;  %p9195_p1 = scmp.lt.s32.totalorder %s9189_s17, %s9189_s17 }
  0xc4   :  { %p9196_p2 = por %p9195_p1, %p9194_p0 }
  0xc6   :  { %p9197_p3 = pnand %p9196_p2, %p9190_p13 }
  0xc8   :  { %9200 = shalt.err (!%p9197_p3)
}
  0xc9   :  { %91 = dma.hbm_to_vmem [thread:$0]  %s10877_s4, 128, %s86_s1, [#allocation9], %s9381_s26, %s9381_s26, %s9382_s25  }
  0xca   :  { %s9392_s21 = smov [#allocation13]   ;;  %s9393_s24 = smov [#allocation16]  }
  0xcb   :  { %s109_s3 = sshll.u32 %s9392_s21, 4  ;;  %s133_s30 = sshll.u32 %s9393_s24, 4  ;;  %s110_s3 = int_to_ptr.vmem [resolvable:$true] %s109_s3  ;;  %s134_s30 = int_to_ptr.vmem [resolvable:$true] %s133_s30 }
  0xcc   :  { %s9201_s29 = scalar_lea.hbm %s10879_s6, 128 }
  0xcd   :  { %p9202_p4 = scmp.ne.s32.totalorder %s10879_s6, %s9201_s29  ;;  %p9205_p5 = scmp.lt.u32.totalorder %s9201_s29, %s10879_s6 }
  0xcf   :  { %p9207_p6 = pnand %p9205_p5, %p9202_p4 }
  0xd1   :  { %9210 = shalt.err (!%p9207_p6)
}
  0xd2   :  { %s9211_s4 = scalar_lea.vmem %s110_s3, 128  ;;  %p9216_p8 = scmp.lt.s32.totalorder %s110_s3, %s110_s3 }
  0xd3   :  { %p9212_p7 = scmp.ne.s32.totalorder %s110_s3, %s9211_s4  ;;  %p9217_p9 = scmp.lt.s32.totalorder %s9211_s4, %s9211_s4 }
  0xd5   :  { %p9218_p10 = por %p9217_p9, %p9216_p8 }
  0xd7   :  { %p9219_p11 = pnand %p9218_p10, %p9212_p7 }
  0xd9   :  { %9222 = shalt.err (!%p9219_p11)
}
  0xda   :  { %115 = dma.hbm_to_vmem [thread:$0]  %s10879_s6, 128, %s110_s3, [#allocation12], %s9381_s26, %s9381_s26, %s9382_s25  }
  0xdb   :  { %s9223_s22 = scalar_lea.hbm %s10881_s8, 32 }
  0xdc   :  { %p9224_p12 = scmp.ne.s32.totalorder %s10881_s8, %s9223_s22  ;;  %p9227_p13 = scmp.lt.u32.totalorder %s9223_s22, %s10881_s8 }
  0xde   :  { %p9229_p0 = pnand %p9227_p13, %p9224_p12 }
  0xe0   :  { %9232 = shalt.err (!%p9229_p0)
}
  0xe1   :  { %s9233_s21 = scalar_lea.vmem %s134_s30, 32  ;;  %p9238_p2 = scmp.lt.s32.totalorder %s134_s30, %s134_s30 }
  0xe2   :  { %p9234_p1 = scmp.ne.s32.totalorder %s134_s30, %s9233_s21  ;;  %p9239_p3 = scmp.lt.s32.totalorder %s9233_s21, %s9233_s21 }
  0xe4   :  { %p9240_p4 = por %p9239_p3, %p9238_p2 }
  0xe6   :  { %p9241_p5 = pnand %p9240_p4, %p9234_p1 }
  0xe8   :  { %9244 = shalt.err (!%p9241_p5)
}
  0xe9   :  { %139 = dma.hbm_to_vmem [thread:$0]  %s10881_s8, 32, %s134_s30, [#allocation15], %s9381_s26, %s9381_s26, %s9382_s25  }
  0xea   :  { %s9394_s24 = smov [#allocation19]   ;;  %s9395_s9 = smov [#allocation22]  }
  0xeb   :  { %s157_s18 = sshll.u32 %s9394_s24, 4  ;;  %s181_s29 = sshll.u32 %s9395_s9, 4  ;;  %s158_s18 = int_to_ptr.vmem [resolvable:$true] %s157_s18  ;;  %s182_s29 = int_to_ptr.vmem [resolvable:$true] %s181_s29 }
  0xec   :  { %s9245_s19 = scalar_lea.hbm %s10883_s10, 32 }
  0xed   :  { %p9246_p6 = scmp.ne.s32.totalorder %s10883_s10, %s9245_s19  ;;  %p9249_p7 = scmp.lt.u32.totalorder %s9245_s19, %s10883_s10 }
  0xef   :  { %p9251_p8 = pnand %p9249_p7, %p9246_p6 }
  0xf1   :  { %9254 = shalt.err (!%p9251_p8)
}
  0xf2   :  { %s9255_s8 = scalar_lea.vmem %s158_s18, 32  ;;  %p9260_p10 = scmp.lt.s32.totalorder %s158_s18, %s158_s18 }
  0xf3   :  { %p9256_p9 = scmp.ne.s32.totalorder %s158_s18, %s9255_s8  ;;  %p9261_p11 = scmp.lt.s32.totalorder %s9255_s8, %s9255_s8 }
  0xf5   :  { %p9262_p12 = por %p9261_p11, %p9260_p10 }
  0xf7   :  { %p9263_p13 = pnand %p9262_p12, %p9256_p9 }
  0xf9   :  { %9266 = shalt.err (!%p9263_p13)
}
  0xfa   :  { %163 = dma.hbm_to_vmem [thread:$0]  %s10883_s10, 32, %s158_s18, [#allocation18], %s9381_s26, %s9381_s26, %s9382_s25  }
  0xfb   :  { %s9267_s0 = scalar_lea.hbm %s10885_s12, 32 }
  0xfc   :  { %p9268_p0 = scmp.ne.s32.totalorder %s10885_s12, %s9267_s0  ;;  %p9271_p1 = scmp.lt.u32.totalorder %s9267_s0, %s10885_s12 }
  0xfe   :  { %p9273_p2 = pnand %p9271_p1, %p9268_p0 }
 0x100   :  { %9276 = shalt.err (!%p9273_p2)
}
 0x101   :  { %s9277_s6 = scalar_lea.vmem %s182_s29, 32  ;;  %p9282_p4 = scmp.lt.s32.totalorder %s182_s29, %s182_s29 }
 0x102   :  { %p9278_p3 = scmp.ne.s32.totalorder %s182_s29, %s9277_s6  ;;  %p9283_p5 = scmp.lt.s32.totalorder %s9277_s6, %s9277_s6 }
 0x104   :  { %p9284_p6 = por %p9283_p5, %p9282_p4 }
 0x106   :  { %p9285_p7 = pnand %p9284_p6, %p9278_p3 }
 0x108   :  { %9288 = shalt.err (!%p9285_p7)
}
 0x109   :  { %187 = dma.hbm_to_vmem [thread:$0]  %s10885_s12, 32, %s182_s29, [#allocation21], %s9381_s26, %s9381_s26, %s9382_s25  }
 0x10a   :  { %s9396_s24 = smov [#allocation25]   ;;  %s9397_s9 = smov [#allocation28]  }
 0x10b   :  { %s205_s18 = sshll.u32 %s9396_s24, 4  ;;  %s229_s11 = sshll.u32 %s9397_s9, 4  ;;  %s206_s18 = int_to_ptr.vmem [resolvable:$true] %s205_s18  ;;  %s230_s11 = int_to_ptr.vmem [resolvable:$true] %s229_s11 }
 0x10c   :  { %s9289_s7 = scalar_lea.hbm %s10887_s14, 32 }
 0x10d   :  { %p9290_p8 = scmp.ne.s32.totalorder %s10887_s14, %s9289_s7  ;;  %p9293_p9 = scmp.lt.u32.totalorder %s9289_s7, %s10887_s14 }
 0x10f   :  { %p9295_p10 = pnand %p9293_p9, %p9290_p8 }
 0x111   :  { %9298 = shalt.err (!%p9295_p10)
}
 0x112   :  { %s9299_s12 = scalar_lea.vmem %s206_s18, 32  ;;  %p9304_p12 = scmp.lt.s32.totalorder %s206_s18, %s206_s18 }
 0x113   :  { %p9300_p11 = scmp.ne.s32.totalorder %s206_s18, %s9299_s12  ;;  %p9305_p13 = scmp.lt.s32.totalorder %s9299_s12, %s9299_s12 }
 0x115   :  { %p9306_p0 = por %p9305_p13, %p9304_p12 }
 0x117   :  { %p9307_p1 = pnand %p9306_p0, %p9300_p11 }
 0x119   :  { %9310 = shalt.err (!%p9307_p1)
}
 0x11a   :  { %211 = dma.hbm_to_vmem [thread:$0]  %s10887_s14, 32, %s206_s18, [#allocation24], %s9381_s26, %s9381_s26, %s9382_s25  }
 0x11b   :  { %s9311_s22 = scalar_lea.hbm %s10889_s16, 32 }
 0x11c   :  { %p9312_p2 = scmp.ne.s32.totalorder %s10889_s16, %s9311_s22  ;;  %p9315_p3 = scmp.lt.u32.totalorder %s9311_s22, %s10889_s16 }
 0x11e   :  { %p9317_p4 = pnand %p9315_p3, %p9312_p2 }
 0x120   :  { %9320 = shalt.err (!%p9317_p4)
}
 0x121   :  { %s9321_s21 = scalar_lea.vmem %s230_s11, 32  ;;  %p9326_p6 = scmp.lt.s32.totalorder %s230_s11, %s230_s11 }
 0x122   :  { %p9322_p5 = scmp.ne.s32.totalorder %s230_s11, %s9321_s21  ;;  %p9327_p7 = scmp.lt.s32.totalorder %s9321_s21, %s9321_s21 }
 0x124   :  { %p9328_p8 = por %p9327_p7, %p9326_p6 }
 0x126   :  { %p9329_p9 = pnand %p9328_p8, %p9322_p5 }
 0x128   :  { %9332 = shalt.err (!%p9329_p9)
}
 0x129   :  { %235 = dma.hbm_to_vmem [thread:$0]  %s10889_s16, 32, %s230_s11, [#allocation27], %s9381_s26, %s9381_s26, %s9382_s25  }
 0x12a   :  { %9355 = dma.done.wait [#allocation3], 1024  }
 0x12b   :  { %9356 = vsyncadd [#allocation3], 4294966272 }
 0x12c   :  { %9357 = dma.done.wait [#allocation6], 4096  }
 0x12d   :  { %9358 = vsyncadd [#allocation6], 4294963200 }
 0x12e   :  { %9359 = dma.done.wait [#allocation9], 2176  }
 0x12f   :  { %9360 = vsyncadd [#allocation9], 4294965120 }
 0x130   :  { %9361 = dma.done.wait [#allocation12], 256  }
 0x131   :  { %9362 = vsyncadd [#allocation12], 4294967040 }
 0x132   :  { %9363 = dma.done.wait [#allocation15], 544  }
 0x133   :  { %9364 = vsyncadd [#allocation15], 4294966752 }
 0x134   :  { %9365 = dma.done.wait [#allocation18], 64  }
 0x135   :  { %9366 = vsyncadd [#allocation18], 4294967232 }
 0x136   :  { %9367 = dma.done.wait [#allocation21], 544  }
 0x137   :  { %9368 = vsyncadd [#allocation21], 4294966752 }
 0x138   :  { %9369 = dma.done.wait [#allocation24], 2080  }
 0x139   :  { %9370 = vsyncadd [#allocation24], 4294965216 }
 0x13a   :  { %9371 = dma.done.wait [#allocation27], 64  }
 0x13b   :  { %9372 = vsyncadd [#allocation27], 4294967232  ;;  %v8563_v0 = vld [vmem:[#allocation5] sm:$0xff]   ;;  %v8564_v1 = vld [vmem:[#allocation5 + $0x8] sm:$0xff]   ;;  %vm323_vm0 = vcmask 261120   ;;  %vm597_vm1 = vcmask 64512  }
 0x13c   :  { %7755 = vmatprep.subr.bf16.mxu1 %v8563_v0  ;;  %v288_v2 = vld [vmem:[#allocation2] sm:$0xff]  ;;  %v289_v3 = vld [vmem:[#allocation2 + $0x8] sm:$0xff]  ;;  %v290_v4 = vld [vmem:[#allocation2 + $0x10] sm:$0xff]  ;;  %vm1559_vm2 = vcmask 1043456   ;;  %s9398_s16 = smov [#allocation29]  }
 0x13d   :  { %7756 = vmatpush3.bf16.msra.mxu1 %v8563_v0  ;;  %v9765_v5 = vpack.c.bf16 %v289_v3, %v288_v2  ;;  %v291_v6 = vld [vmem:[#allocation2 + $0x18] sm:$0xff]  ;;  %v8565_v7 = vld [vmem:[#allocation7] sm:$0xff]   ;;  %v293_v9 = vld [vmem:[#allocation2 + $0x28] sm:$0xff]  ;;  %s7081_s26 = sshll.u32 %s9398_s16, 4  ;;  %s7082_s26 = int_to_ptr.vmem [resolvable:$true] %s7081_s26 }
 0x13e   :  { %7757 = vmatprep.subr.bf16.mxu1 %v8564_v1  ;;  %v292_v8 = vld [vmem:[#allocation2 + $0x20] sm:$0xff]  ;;  %v9771_v10 = vpack.c.bf16 %v291_v6, %v290_v4  ;;  %v8566_v11 = vld [vmem:[#allocation7 + $0x8] sm:$0xff]   ;;  %v294_v13 = vld [vmem:[#allocation2 + $0x30] sm:$0xff]  ;;  %s9333_s25 = scalar_lea.vmem %s7082_s26, 1024  ;;  %p9338_p11 = scmp.lt.s32.totalorder %s7082_s26, %s7082_s26 }
 0x13f   :  { %7759 = vmatprep.mubr.msk.bf16.mxu1 %vm323_vm0, %v9765_v5  ;;  %7783 = vmatprep.mubr.msk.bf16.mxu0 %vm323_vm0, %v9765_v5  ;;  %v9773_v12 = vpack.c.bf16 %v293_v9, %v292_v8  ;;  %v295_v14 = vld [vmem:[#allocation2 + $0x38] sm:$0xff]  ;;  %v8567_v16 = vld [vmem:[#allocation8] sm:$0xff]   ;;  %v8568_v17 = vld [vmem:[#allocation8 + $0x8] sm:$0xff]   ;;  %p9334_p10 = scmp.ne.s32.totalorder %s7082_s26, %s9333_s25  ;;  %p9339_p12 = scmp.lt.s32.totalorder %s9333_s25, %s9333_s25 }
 0x140   :  { %v9779_v15 = vpack.c.bf16 %v295_v14, %v294_v13  ;;  %7779 = vmatprep.subr.bf16.mxu0 %v8567_v16  ;;  %v7101_v18 = vld [vmem:[#allocation10] ss:$0 sm:$0xff]  ;;  %v7108_v48 = vld [vmem:[#allocation11] ss:$0 sm:$0xff]  ;;  %v7115_v9 = vld [vmem:[#allocation13] ss:$0 sm:$0xff] }
 0x141   :  { %7758 = vmatpush3.bf16.msra.mxu1 %v8564_v1  ;;  %7780 = vmatpush3.bf16.msra.mxu0 %v8567_v16  ;;  %p9340_p13 = por %p9339_p12, %p9338_p11 }
 0x142   :  { %7767 = vmatprep.subr.bf16.mxu1 %v8565_v7  ;;  %7781 = vmatprep.subr.bf16.mxu0 %v8568_v17 }
 0x143   :  { %p9341_p0 = pnand %p9340_p13, %p9334_p10 }
 0x144   :  { %7760 = vmatmul.mubr.msk.bf16.vlgmr.msra.gmra.mrb[0].mxu1 %vm323_vm0, %v9771_v10 }
 0x145   :  { %7768 = vmatpush3.bf16.msra.mxu1 %v8565_v7  ;;  %7763 = vmatprep.mubr.msk.bf16.mxu1 %vm323_vm0, %v9773_v12 }
 0x146   :  { %7769 = vmatprep.subr.bf16.mxu1 %v8566_v11  ;;  %7782 = vmatpush3.bf16.msra.mxu0 %v8568_v17 }
 0x149   :  { %7770 = vmatpush3.bf16.msra.mxu1 %v8566_v11  ;;  %7784 = vmatmul.mubr.msk.bf16.vlgmr.msra.gmra.mrb[0].mxu0 %vm323_vm0, %v9771_v10 }
 0x14a   :  { %7787 = vmatprep.mubr.msk.bf16.mxu0 %vm323_vm0, %v9773_v12 }
 0x14c   :  { %7764 = vmatmul.mubr.msk.bf16.gmra.mrb[4].mxu1 %vm323_vm0, %v9779_v15 }
 0x14d   :  { %7771 = vmatprep.mubr.msk.bf16.mxu1 %vm323_vm0, %v9765_v5 }
 0x151   :  { %7788 = vmatmul.mubr.msk.bf16.gmra.mrb[4].mxu0 %vm323_vm0, %v9779_v15 }
 0x154   :  { %7772 = vmatmul.mubr.msk.bf16.vlgmr.msra.gmra.mrb[8].mxu1 %vm323_vm0, %v9771_v10 }
 0x155   :  { %7775 = vmatprep.mubr.msk.bf16.mxu1 %vm323_vm0, %v9773_v12 }
 0x15c   :  { %7776 = vmatmul.mubr.msk.bf16.gmra.mrb[12].mxu1 %vm323_vm0, %v9779_v15 }
 0x217   :  { %v7761_v19 = vpop.f32.mrb[0].mxu1 }
 0x218   :  { %v379_v20 = vadd.f32 %v7761_v19, %v7101_v18  ;;  %v370_v21 = vpop.f32.mrb[1].mxu1 }
 0x219   :  { %v371_v22 = vadd.f32 %v7101_v18, %v370_v21  ;;  %v7762_v23 = vpop.f32.mrb[2].mxu1 }
 0x21a   :  { %v382_v24 = vadd.f32 %v7762_v23, %v7101_v18  ;;  %v373_v25 = vpop.f32.mrb[3].mxu1  ;;  %v403_v27 = vmul.f32 0.35355338, %v379_v20 }
 0x21b   :  { %v374_v26 = vadd.f32 %v7101_v18, %v373_v25  ;;  %v401_v29 = vmul.f32 0.35355338, %v371_v22 }
 0x21c   :  { %v404_v28 = vmul.f32 0.35355338, %v382_v24  ;;  %v7785_v11 = vpop.f32.mrb[0].mxu0 }
 0x21d   :  { %v402_v30 = vmul.f32 0.35355338, %v374_v26  ;;  %v563_v13 = vadd.f32 %v7785_v11, %v7115_v9  ;;  %v554_v14 = vpop.f32.mrb[1].mxu0 }
 0x21e   :  { %v586_v31 = vpack.c.bf16 %v404_v28, %v403_v27  ;;  %v555_v16 = vadd.f32 %v7115_v9, %v554_v14  ;;  %v7786_v17 = vpop.f32.mrb[2].mxu0 }
 0x21f   :  { %v585_v32 = vpack.c.bf16 %v402_v30, %v401_v29  ;;  %v7765_v33 = vpop.f32.mrb[4].mxu1  ;;  %v557_v19 = vpop.f32.mrb[3].mxu0 }
 0x220   :  { %v395_v34 = vadd.f32 %v7765_v33, %v7101_v18  ;;  %v386_v35 = vpop.f32.mrb[5].mxu1  ;;  %v558_v20 = vadd.f32 %v7115_v9, %v557_v19 }
 0x221   :  { %v387_v36 = vadd.f32 %v7101_v18, %v386_v35  ;;  %v7766_v37 = vpop.f32.mrb[6].mxu1  ;;  %7795 = vmatprep.mubr.msk.bf16.mxu1 %vm597_vm1, %v585_v32 }
 0x222   :  { %v398_v38 = vadd.f32 %v7766_v37, %v7101_v18  ;;  %v389_v39 = vpop.f32.mrb[7].mxu1  ;;  %v407_v41 = vmul.f32 0.35355338, %v395_v34  ;;  %v593_v22 = vpack.c.bf16 %v558_v20, %v555_v16 }
 0x223   :  { %v390_v40 = vadd.f32 %v7101_v18, %v389_v39  ;;  %v405_v43 = vmul.f32 0.35355338, %v387_v36  ;;  %v566_v18 = vadd.f32 %v7786_v17, %v7115_v9 }
 0x224   :  { %v408_v42 = vmul.f32 0.35355338, %v398_v38  ;;  %v7789_v23 = vpop.f32.mrb[4].mxu0 }
 0x225   :  { %v406_v44 = vmul.f32 0.35355338, %v390_v40  ;;  %v594_v21 = vpack.c.bf16 %v566_v18, %v563_v13  ;;  %v579_v24 = vadd.f32 %v7789_v23, %v7115_v9  ;;  %v570_v25 = vpop.f32.mrb[5].mxu0 }
 0x226   :  { %v588_v45 = vpack.c.bf16 %v408_v42, %v407_v41  ;;  %v571_v26 = vadd.f32 %v7115_v9, %v570_v25  ;;  %v7790_v27 = vpop.f32.mrb[6].mxu0 }
 0x227   :  { %v587_v46 = vpack.c.bf16 %v406_v44, %v405_v43  ;;  %v7773_v47 = vpop.f32.mrb[8].mxu1  ;;  %v582_v28 = vadd.f32 %v7790_v27, %v7115_v9  ;;  %v573_v29 = vpop.f32.mrb[7].mxu0 }
 0x228   :  { %v466_v49 = vpop.f32.mrb[9].mxu1  ;;  %v475_v51 = vadd.f32 %v7773_v47, %v7108_v48  ;;  %v574_v30 = vadd.f32 %v7115_v9, %v573_v29  ;;  %v8571_v29 = vld [vmem:[#allocation5 + $0x10] sm:$0xff]  }
 0x229   :  { %v7774_v50 = vpop.f32.mrb[10].mxu1  ;;  %7803 = vmatprep.mubr.msk.bf16.mxu0 %vm597_vm1, %v587_v46  ;;  %v467_v54 = vadd.f32 %v7108_v48, %v466_v49 }
 0x22a   :  { %v478_v52 = vadd.f32 %v7774_v50, %v7108_v48  ;;  %v469_v53 = vpop.f32.mrb[11].mxu1  ;;  %v9813_v32 = vpack.c.bf16 %v574_v30, %v571_v26  ;;  %v8572_v30 = vld [vmem:[#allocation5 + $0x18] sm:$0xff]  }
 0x22b   :  { %v470_v55 = vadd.f32 %v7108_v48, %v469_v53 }
 0x22c   :  { %v590_v56 = vpack.c.bf16 %v478_v52, %v475_v51 }
 0x22d   :  { %v589_v57 = vpack.c.bf16 %v470_v55, %v467_v54 }
 0x22e   :  { %v608_v6 = vsel %vm597_vm1, %v590_v56, 0 }
 0x22f   :  { %v7777_v58 = vpop.f32.mrb[12].mxu1  ;;  %8499 = vmatprep.subr.msk.bf16.mxu1 %vm597_vm1, %v589_v57  ;;  %v605_v59 = vsel %vm597_vm1, %v589_v57, 0 }
 0x230   :  { %v491_v60 = vadd.f32 %v7777_v58, %v7108_v48  ;;  %v482_v61 = vpop.f32.mrb[13].mxu1  ;;  %7792 = vmatpush3.bf16.xpose.msra.mxu1 %v605_v59 }
 0x231   :  { %v483_v62 = vadd.f32 %v7108_v48, %v482_v61  ;;  %v7778_v63 = vpop.f32.mrb[14].mxu1  ;;  %8500 = vmatprep.subr.msk.bf16.mxu1 %vm597_vm1, %v590_v56 }
 0x232   :  { %v494_v0 = vadd.f32 %v7778_v63, %v7108_v48  ;;  %v485_v1 = vpop.f32.mrb[15].mxu1 }
 0x233   :  { %v486_v2 = vadd.f32 %v7108_v48, %v485_v1 }
 0x234   :  { %v592_v3 = vpack.c.bf16 %v494_v0, %v491_v60 }
 0x235   :  { %v591_v4 = vpack.c.bf16 %v486_v2, %v483_v62 }
 0x236   :  { %v669_v8 = vsel %vm597_vm1, %v592_v3, 0 }
 0x237   :  { %8501 = vmatprep.subr.msk.bf16.mxu0 %vm597_vm1, %v591_v4  ;;  %v666_v7 = vsel %vm597_vm1, %v591_v4, 0 }
 0x238   :  { %7794 = vmatpush3.bf16.xpose.msra.mxu1 %v608_v6  ;;  %7800 = vmatpush3.bf16.xpose.msra.mxu0 %v666_v7 }
 0x239   :  { %8502 = vmatprep.subr.msk.bf16.mxu0 %vm597_vm1, %v592_v3  ;;  %7807 = vmatprep.subr.bf16.mxu1 %v593_v22 }
 0x23f   :  { %7796 = vmatmul.mubr.msk.bf16.vlgmr.msra.gmra.mrb[16].mxu1 %vm597_vm1, %v586_v31  ;;  %v9811_v31 = vpack.c.bf16 %v582_v28, %v579_v24 }
 0x240   :  { %7802 = vmatpush3.bf16.xpose.msra.mxu0 %v669_v8  ;;  %7808 = vmatpush3.bf16.msra.mxu1 %v593_v22 }
 0x241   :  { %7809 = vmatprep.subr.bf16.mxu1 %v594_v21  ;;  %7823 = vmatprep.subr.bf16.mxu0 %v8571_v29 }
 0x244   :  { %7810 = vmatpush3.bf16.msra.mxu1 %v594_v21 }
 0x245   :  { %7815 = vmatprep.subr.bf16.mxu1 %v9813_v32 }
 0x247   :  { %7804 = vmatmul.mubr.msk.bf16.vlgmr.msra.gmra.mrb[8].mxu0 %vm597_vm1, %v588_v45 }
 0x248   :  { %7827 = vmatprep.mubr.msk.bf16.mxu0 %vm323_vm0, %v9765_v5  ;;  %7824 = vmatpush3.bf16.msra.mxu0 %v8571_v29 }
 0x249   :  { %7825 = vmatprep.subr.bf16.mxu0 %v8572_v30 }
 0x24c   :  { %7826 = vmatpush3.bf16.msra.mxu0 %v8572_v30 }
 0x24f   :  { %7828 = vmatmul.mubr.msk.bf16.vlgmr.msra.gmra.mrb[12].mxu0 %vm323_vm0, %v9771_v10 }
 0x250   :  { %7831 = vmatprep.mubr.msk.bf16.mxu0 %vm323_vm0, %v9773_v12 }
 0x257   :  { %7832 = vmatmul.mubr.msk.bf16.gmra.mrb[16].mxu0 %vm323_vm0, %v9779_v15 }
 0x258   :  { %7851 = vmatprep.mubr.msk.bf16.mxu0 %vm323_vm0, %v9765_v5 }
 0x312   :  { %v7797_v33 = vpop.f32.mrb[16].mxu1 }
 0x313   :  { %v644_v34 = vpop.f32.mrb[17].mxu1  ;;  %v726_v35 = vsel %vm323_vm0, %v7797_v33, -inf }
 0x314   :  { %727 = vmax.xlane.f32.xlu1 %v726_v35  ;;  %v7798_v36 = vpop.f32.mrb[18].mxu1  ;;  %v720_v37 = vsel %vm323_vm0, %v644_v34, -inf }
 0x315   :  { %721 = vmax.xlane.f32.xlu0 %v720_v37  ;;  %v647_v38 = vpop.f32.mrb[19].mxu1  ;;  %v729_v39 = vsel %vm323_vm0, %v7798_v36, -inf }
 0x316   :  { %v723_v40 = vsel %vm323_vm0, %v647_v38, -inf }
 0x318   :  { %730 = vmax.xlane.f32.xlu1 %v729_v39 }
 0x319   :  { %724 = vmax.xlane.f32.xlu0 %v723_v40 }
 0x31a   :  { %v7805_v41 = vpop.f32.mrb[8].mxu0 }
 0x31b   :  { %v705_v42 = vpop.f32.mrb[9].mxu0  ;;  %v738_v47 = vsel %vm323_vm0, %v7805_v41, -inf }
 0x31c   :  { %v7806_v43 = vpop.f32.mrb[10].mxu0  ;;  %v732_v44 = vsel %vm323_vm0, %v705_v42, -inf }
 0x31d   :  { %v708_v45 = vpop.f32.mrb[11].mxu0  ;;  %733 = vmax.xlane.f32.xlu0 %v732_v44  ;;  %v741_v48 = vsel %vm323_vm0, %v7806_v43, -inf }
 0x31e   :  { %v735_v46 = vsel %vm323_vm0, %v708_v45, -inf }
 0x31f   :  { %736 = vmax.xlane.f32.xlu1 %v735_v46 }
 0x321   :  { %739 = vmax.xlane.f32.xlu0 %v738_v47 }
 0x323   :  { %742 = vmax.xlane.f32.xlu1 %v741_v48 }
 0x3a1   :  { %v728_v49 = vpop.xlane.xlu1 %727 }
 0x3a2   :  { %v746_v50 = vsub.f32 %v7797_v33, %v728_v49  ;;  %v722_v51 = vpop.xlane.xlu0 %721 }
 0x3a3   :  { %v744_v52 = vsub.f32 %v644_v34, %v722_v51 }
 0x3a4   :  { %v756_v53 = vmul.f32 1.442695, %v746_v50 }
 0x3a5   :  { %v752_v54 = vmul.f32 1.442695, %v744_v52  ;;  %v731_v55 = vpop.xlane.xlu1 %730 }
 0x3a6   :  { %v747_v56 = vsub.f32 %v7798_v36, %v731_v55  ;;  %v725_v57 = vpop.xlane.xlu0 %724 }
 0x3a7   :  { %8631 = vpow2.f32 %v752_v54  ;;  %v745_v58 = vsub.f32 %v647_v38, %v725_v57  ;;  %v8569_v57 = vld [vmem:[#allocation7 + $0x10] sm:$0xff]  }
 0x3a8   :  { %8633 = vpow2.f32 %v756_v53  ;;  %v758_v59 = vmul.f32 1.442695, %v747_v56 }
 0x3a9   :  { %v754_v60 = vmul.f32 1.442695, %v745_v58 }
 0x3aa   :  { %v734_v61 = vpop.xlane.xlu0 %733 }
 0x3ab   :  { %8635 = vpow2.f32 %v754_v60  ;;  %v748_v62 = vsub.f32 %v705_v42, %v734_v61 }
 0x3ac   :  { %v737_v63 = vpop.xlane.xlu1 %736  ;;  %8637 = vpow2.f32 %v758_v59 }
 0x3ad   :  { %v760_v0 = vmul.f32 1.442695, %v748_v62  ;;  %v749_v1 = vsub.f32 %v708_v45, %v737_v63  ;;  %v8570_v62 = vld [vmem:[#allocation7 + $0x18] sm:$0xff]   ;;  %v7829_v63 = vpop.f32.mrb[12].mxu0 }
 0x3ae   :  { %v740_v2 = vpop.xlane.xlu0 %739 }
 0x3af   :  { %8639 = vpow2.f32 %v760_v0  ;;  %v762_v3 = vmul.f32 1.442695, %v749_v1  ;;  %v750_v4 = vsub.f32 %v7805_v41, %v740_v2  ;;  %v7130_v0 = vld [vmem:[#allocation10 + $0x1] ss:$0 sm:$0xff]  ;;  %v986_v2 = vpop.f32.mrb[13].mxu0 }
 0x3b0   :  { %v743_v6 = vpop.xlane.xlu1 %742  ;;  %v995_v1 = vadd.f32 %v7829_v63, %v7130_v0 }
 0x3b1   :  { %v8632_v7 = vpop.eup %8631  ;;  %8641 = vpow2.f32 %v762_v3  ;;  %v764_v8 = vmul.f32 1.442695, %v750_v4  ;;  %v751_v9 = vsub.f32 %v7806_v43, %v743_v6  ;;  %v987_v3 = vadd.f32 %v7130_v0, %v986_v2  ;;  %v7830_v4 = vpop.f32.mrb[14].mxu0 }
 0x3b2   :  { %v768_v11 = vsel %vm323_vm0, %v8632_v7, 0.0  ;;  %v8634_v13 = vpop.eup %8633  ;;  %v9859_v6 = vmul.f32 0.35355338, %v995_v1 }
 0x3b3   :  { %8643 = vpow2.f32 %v764_v8  ;;  %v766_v14 = vmul.f32 1.442695, %v751_v9  ;;  %769 = vadd.xlane.f32.xlu0 %v768_v11  ;;  %v774_v17 = vsel %vm323_vm0, %v8634_v13, 0.0  ;;  %v989_v8 = vpop.f32.mrb[15].mxu0  ;;  %v1017_v9 = vmul.f32 0.35355338, %v987_v3 }
 0x3b4   :  { %v990_v11 = vadd.f32 %v7130_v0, %v989_v8 }
 0x3b5   :  { %v8636_v16 = vpop.eup %8635  ;;  %8645 = vpow2.f32 %v766_v14 }
 0x3b6   :  { %v771_v18 = vsel %vm323_vm0, %v8636_v16, 0.0  ;;  %v8638_v19 = vpop.eup %8637  ;;  %v1018_v14 = vmul.f32 0.35355338, %v990_v11 }
 0x3b7   :  { %775 = vadd.xlane.f32.xlu0 %v774_v17  ;;  %772 = vadd.xlane.f32.xlu1 %v771_v18  ;;  %v777_v21 = vsel %vm323_vm0, %v8638_v19, 0.0  ;;  %v7833_v17 = vpop.f32.mrb[16].mxu0 }
 0x3b8   :  { %v1205_v18 = vpack.c.bf16 %v1018_v14, %v1017_v9 }
 0x3b9   :  { %v8640_v20 = vpop.eup %8639 }
 0x3ba   :  { %v780_v22 = vsel %vm323_vm0, %v8640_v20, 0.0 }
 0x3bb   :  { %v8642_v23 = vpop.eup %8641  ;;  %778 = vadd.xlane.f32.xlu1 %v777_v21  ;;  %781 = vadd.xlane.f32.xlu0 %v780_v22 }
 0x3bc   :  { %v783_v25 = vsel %vm323_vm0, %v8642_v23, 0.0 }
 0x3bd   :  { %v8644_v24 = vpop.eup %8643 }
 0x3be   :  { %v786_v26 = vsel %vm323_vm0, %v8644_v24, 0.0 }
 0x3bf   :  { %v8646_v27 = vpop.eup %8645  ;;  %784 = vadd.xlane.f32.xlu1 %v783_v25  ;;  %787 = vadd.xlane.f32.xlu0 %v786_v26 }
 0x3c0   :  { %v789_v28 = vsel %vm323_vm0, %v8646_v27, 0.0 }
 0x3c3   :  { %790 = vadd.xlane.f32.xlu1 %v789_v28 }
 0x440   :  { %v770_v33 = vpop.xlane.xlu0 %769 }
 0x441   :  { %8647 = vrcp.f32 %v770_v33 }
 0x444   :  { %v773_v34 = vpop.xlane.xlu1 %772  ;;  %v776_v35 = vpop.xlane.xlu0 %775 }
 0x445   :  { %8649 = vrcp.f32 %v773_v34 }
 0x446   :  { %8651 = vrcp.f32 %v776_v35 }
 0x448   :  { %v779_v36 = vpop.xlane.xlu1 %778  ;;  %v782_v37 = vpop.xlane.xlu0 %781 }
 0x449   :  { %8653 = vrcp.f32 %v779_v36 }
 0x44a   :  { %8655 = vrcp.f32 %v782_v37 }
 0x44b   :  { %v8648_v40 = vpop.eup %8647 }
 0x44c   :  { %v785_v38 = vpop.xlane.xlu1 %784  ;;  %v788_v39 = vpop.xlane.xlu0 %787  ;;  %v800_v43 = vmul.f32 %v8648_v40, %v8632_v7  ;;  %v998_v7 = vadd.f32 %v7830_v4, %v7130_v0 }
 0x44d   :  { %8657 = vrcp.f32 %v785_v38 }
 0x44e   :  { %8659 = vrcp.f32 %v788_v39 }
 0x44f   :  { %v8650_v41 = vpop.eup %8649 }
 0x450   :  { %v791_v42 = vpop.xlane.xlu1 %790  ;;  %v801_v44 = vmul.f32 %v8650_v41, %v8636_v16  ;;  %v8652_v45 = vpop.eup %8651 }
 0x451   :  { %8661 = vrcp.f32 %v791_v42  ;;  %v802_v48 = vmul.f32 %v8652_v45, %v8634_v13  ;;  %v9861_v13 = vmul.f32 0.35355338, %v998_v7 }
 0x452   :  { %v808_v46 = vpack.c.bf16 %v801_v44, %v800_v43 }
 0x453   :  { %v8654_v47 = vpop.eup %8653  ;;  %v1206_v16 = vpack.c.bf16 %v9861_v13, %v9859_v6  ;;  %v7144_v6 = vld [vmem:[#allocation13 + $0x1] ss:$0 sm:$0xff] }
 0x454   :  { %v803_v49 = vmul.f32 %v8654_v47, %v8638_v19  ;;  %7811 = vmatprep.mubr.msk.bf16.mxu1 %vm323_vm0, %v808_v46  ;;  %v8656_v50 = vpop.eup %8655  ;;  %v1011_v19 = vadd.f32 %v7833_v17, %v7130_v0  ;;  %v7137_v47 = vld [vmem:[#allocation11 + $0x1] ss:$0 sm:$0xff] }
 0x455   :  { %v804_v53 = vmul.f32 %v8656_v50, %v8640_v20  ;;  %v1002_v20 = vpop.f32.mrb[17].mxu0 }
 0x456   :  { %v809_v51 = vpack.c.bf16 %v803_v49, %v802_v48  ;;  %v1003_v21 = vadd.f32 %v7130_v0, %v1002_v20  ;;  %v7834_v22 = vpop.f32.mrb[18].mxu0 }
 0x457   :  { %v8658_v52 = vpop.eup %8657  ;;  %v1005_v25 = vpop.f32.mrb[19].mxu0 }
 0x458   :  { %7812 = vmatmul.mubr.msk.bf16.vlgmr.msra.gmra.mrb[20].mxu1 %vm323_vm0, %v809_v51  ;;  %v805_v54 = vmul.f32 %v8658_v52, %v8642_v23  ;;  %v8660_v55 = vpop.eup %8659  ;;  %v1023_v23 = vmul.f32 0.35355338, %v1011_v19  ;;  %v1021_v26 = vmul.f32 0.35355338, %v1003_v21 }
 0x459   :  { %7816 = vmatpush3.bf16.msra.mxu1 %v9813_v32  ;;  %v806_v59 = vmul.f32 %v8660_v55, %v8644_v24  ;;  %v8574_v32 = vld [vmem:[#allocation8 + $0x18] sm:$0xff]   ;;  %v1014_v24 = vadd.f32 %v7834_v22, %v7130_v0 }
 0x45a   :  { %7817 = vmatprep.subr.bf16.mxu1 %v9811_v31  ;;  %v810_v56 = vpack.c.bf16 %v805_v54, %v804_v53 }
 0x45b   :  { %v8662_v58 = vpop.eup %8661  ;;  %v1024_v28 = vmul.f32 0.35355338, %v1014_v24 }
 0x45c   :  { %v807_v60 = vmul.f32 %v8662_v58, %v8646_v27  ;;  %7819 = vmatprep.mubr.msk.bf16.mxu1 %vm323_vm0, %v810_v56  ;;  %v1006_v27 = vadd.f32 %v7130_v0, %v1005_v25 }
 0x45d   :  { %7818 = vmatpush3.bf16.msra.mxu1 %v9811_v31  ;;  %v8573_v31 = vld [vmem:[#allocation8 + $0x10] sm:$0xff]   ;;  %v1208_v30 = vpack.c.bf16 %v1024_v28, %v1023_v23 }
 0x45e   :  { %v811_v61 = vpack.c.bf16 %v807_v60, %v806_v59  ;;  %7835 = vmatprep.subr.bf16.mxu1 %v8569_v57  ;;  %7847 = vmatprep.subr.bf16.mxu0 %v8573_v31  ;;  %v1022_v29 = vmul.f32 0.35355338, %v1006_v27 }
 0x45f   :  { %7848 = vmatpush3.bf16.msra.mxu0 %v8573_v31 }
 0x460   :  { %7820 = vmatmul.mubr.msk.bf16.vlgmr.msra.gmra.mrb[24].mxu1 %vm323_vm0, %v811_v61  ;;  %7849 = vmatprep.subr.bf16.mxu0 %v8574_v32  ;;  %v1207_v33 = vpack.c.bf16 %v1022_v29, %v1021_v26 }
 0x461   :  { %7836 = vmatpush3.bf16.msra.mxu1 %v8569_v57  ;;  %7839 = vmatprep.mubr.msk.bf16.mxu1 %vm323_vm0, %v9765_v5 }
 0x462   :  { %7837 = vmatprep.subr.bf16.mxu1 %v8570_v62 }
 0x463   :  { %7850 = vmatpush3.bf16.msra.mxu0 %v8574_v32 }
 0x465   :  { %7838 = vmatpush3.bf16.msra.mxu1 %v8570_v62 }
 0x466   :  { %7852 = vmatmul.mubr.msk.bf16.vlgmr.msra.gmra.mrb[20].mxu0 %vm323_vm0, %v9771_v10 }
 0x467   :  { %7855 = vmatprep.mubr.msk.bf16.mxu0 %vm323_vm0, %v9773_v12 }
 0x468   :  { %7840 = vmatmul.mubr.msk.bf16.vlgmr.msra.gmra.mrb[28].mxu1 %vm323_vm0, %v9771_v10 }
 0x469   :  { %7843 = vmatprep.mubr.msk.bf16.mxu1 %vm323_vm0, %v9773_v12 }
 0x46e   :  { %7856 = vmatmul.mubr.msk.bf16.gmra.mrb[24].mxu0 %vm323_vm0, %v9779_v15 }
 0x46f   :  { %7871 = vmatprep.mubr.msk.bf16.mxu0 %vm597_vm1, %v1207_v33 }
 0x470   :  { %7844 = vmatmul.mubr.msk.bf16.gmra.mrb[32].mxu1 %vm323_vm0, %v9779_v15 }
 0x471   :  { %7863 = vmatprep.mubr.msk.bf16.mxu1 %vm597_vm1, %v1205_v18 }
 0x52b   :  { %v9869_v34 = vpop.f32.mrb[20].mxu1 }
 0x52c   :  { %v9871_v35 = vpop.f32.mrb[21].mxu1 }
 0x52d   :  { %v9873_v36 = vpop.f32.mrb[22].mxu1 }
 0x52e   :  { %v923_v37 = vpack.c.bf16 %v9873_v36, %v9869_v34  ;;  %v9877_v38 = vpop.f32.mrb[23].mxu1 }
 0x52f   :  { %v922_v39 = vpack.c.bf16 %v9877_v38, %v9871_v35 }
 0x533   :  { %v9881_v40 = vpop.f32.mrb[24].mxu1 }
 0x534   :  { %v9883_v41 = vpop.f32.mrb[25].mxu1 }
 0x535   :  { %v9885_v42 = vpop.f32.mrb[26].mxu1 }
 0x536   :  { %v925_v43 = vpack.c.bf16 %v9885_v42, %v9881_v40  ;;  %v9889_v44 = vpop.f32.mrb[27].mxu1 }
 0x537   :  { %v924_v45 = vpack.c.bf16 %v9889_v44, %v9883_v41 }
 0x539   :  { %v7853_v7 = vpop.f32.mrb[20].mxu0 }
 0x53a   :  { %v1183_v8 = vadd.f32 %v7853_v7, %v7144_v6  ;;  %v1174_v9 = vpop.f32.mrb[21].mxu0 }
 0x53b   :  { %v7841_v46 = vpop.f32.mrb[28].mxu1  ;;  %v1175_v11 = vadd.f32 %v7144_v6, %v1174_v9  ;;  %v7854_v13 = vpop.f32.mrb[22].mxu0 }
 0x53c   :  { %v1084_v48 = vpop.f32.mrb[29].mxu1  ;;  %v1093_v50 = vadd.f32 %v7841_v46, %v7137_v47  ;;  %v1186_v14 = vadd.f32 %v7854_v13, %v7144_v6  ;;  %v1177_v17 = vpop.f32.mrb[23].mxu0 }
 0x53d   :  { %v7842_v49 = vpop.f32.mrb[30].mxu1  ;;  %v1085_v53 = vadd.f32 %v7137_v47, %v1084_v48  ;;  %v1178_v18 = vadd.f32 %v7144_v6, %v1177_v17 }
 0x53e   :  { %v1096_v51 = vadd.f32 %v7842_v49, %v7137_v47  ;;  %v1087_v52 = vpop.f32.mrb[31].mxu1  ;;  %v1214_v19 = vpack.c.bf16 %v1186_v14, %v1183_v8 }
 0x53f   :  { %v1088_v54 = vadd.f32 %v7137_v47, %v1087_v52  ;;  %v1213_v20 = vpack.c.bf16 %v1178_v18, %v1175_v11 }
 0x540   :  { %v1210_v55 = vpack.c.bf16 %v1096_v51, %v1093_v50 }
 0x541   :  { %v1209_v56 = vpack.c.bf16 %v1088_v54, %v1085_v53  ;;  %v7857_v21 = vpop.f32.mrb[24].mxu0 }
 0x542   :  { %v1227_v2 = vsel %vm597_vm1, %v1210_v55, 0  ;;  %v1190_v22 = vpop.f32.mrb[25].mxu0 }
 0x543   :  { %v7845_v57 = vpop.f32.mrb[32].mxu1  ;;  %8503 = vmatprep.subr.msk.bf16.mxu1 %vm597_vm1, %v1209_v56  ;;  %v1224_v58 = vsel %vm597_vm1, %v1209_v56, 0  ;;  %v1191_v23 = vadd.f32 %v7144_v6, %v1190_v22  ;;  %v7858_v24 = vpop.f32.mrb[26].mxu0 }
 0x544   :  { %v1100_v59 = vpop.f32.mrb[33].mxu1  ;;  %7860 = vmatpush3.bf16.xpose.msra.mxu1 %v1224_v58  ;;  %v1109_v61 = vadd.f32 %v7845_v57, %v7137_v47  ;;  %v1202_v25 = vadd.f32 %v7858_v24, %v7144_v6  ;;  %v1193_v26 = vpop.f32.mrb[27].mxu0 }
 0x545   :  { %v7846_v60 = vpop.f32.mrb[34].mxu1  ;;  %8504 = vmatprep.subr.msk.bf16.mxu1 %vm597_vm1, %v1210_v55  ;;  %v1101_v32 = vadd.f32 %v7137_v47, %v1100_v59  ;;  %v1194_v27 = vadd.f32 %v7144_v6, %v1193_v26 }
 0x546   :  { %v1112_v62 = vadd.f32 %v7846_v60, %v7137_v47  ;;  %v1103_v31 = vpop.f32.mrb[35].mxu1 }
 0x547   :  { %v1104_v63 = vadd.f32 %v7137_v47, %v1103_v31  ;;  %v9905_v29 = vpack.c.bf16 %v1194_v27, %v1191_v23 }
 0x548   :  { %v1212_v0 = vpack.c.bf16 %v1112_v62, %v1109_v61 }
 0x549   :  { %v1211_v1 = vpack.c.bf16 %v1104_v63, %v1101_v32 }
 0x54a   :  { %v1288_v4 = vsel %vm597_vm1, %v1212_v0, 0 }
 0x54b   :  { %8505 = vmatprep.subr.msk.bf16.mxu0 %vm597_vm1, %v1211_v1  ;;  %v1285_v3 = vsel %vm597_vm1, %v1211_v1, 0 }
 0x54c   :  { %7862 = vmatpush3.bf16.xpose.msra.mxu1 %v1227_v2  ;;  %7868 = vmatpush3.bf16.xpose.msra.mxu0 %v1285_v3 }
 0x54d   :  { %8506 = vmatprep.subr.msk.bf16.mxu0 %vm597_vm1, %v1212_v0  ;;  %7875 = vmatprep.subr.bf16.mxu1 %v1213_v20 }
 0x553   :  { %7864 = vmatmul.mubr.msk.bf16.vlgmr.msra.gmra.mrb[36].mxu1 %vm597_vm1, %v1206_v16  ;;  %v1199_v16 = vadd.f32 %v7857_v21, %v7144_v6 }
 0x554   :  { %7870 = vmatpush3.bf16.xpose.msra.mxu0 %v1288_v4  ;;  %7876 = vmatpush3.bf16.msra.mxu1 %v1213_v20 }
 0x555   :  { %7877 = vmatprep.subr.bf16.mxu1 %v1214_v19  ;;  %v9903_v28 = vpack.c.bf16 %v1202_v25, %v1199_v16 }
 0x558   :  { %7878 = vmatpush3.bf16.msra.mxu1 %v1214_v19 }
 0x559   :  { %7883 = vmatprep.subr.bf16.mxu1 %v9905_v29 }
 0x55b   :  { %7872 = vmatmul.mubr.msk.bf16.vlgmr.msra.gmra.mrb[28].mxu0 %vm597_vm1, %v1208_v30 }
 0x626   :  { %v7865_v30 = vpop.f32.mrb[36].mxu1 }
 0x627   :  { %v1263_v33 = vpop.f32.mrb[37].mxu1  ;;  %v1345_v50 = vsel %vm323_vm0, %v7865_v30, -inf }
 0x628   :  { %v7866_v46 = vpop.f32.mrb[38].mxu1  ;;  %v1339_v47 = vsel %vm323_vm0, %v1263_v33, -inf }
 0x629   :  { %1340 = vmax.xlane.f32.xlu0 %v1339_v47  ;;  %v1266_v48 = vpop.f32.mrb[39].mxu1  ;;  %v1348_v52 = vsel %vm323_vm0, %v7866_v46, -inf }
 0x62a   :  { %v1342_v49 = vsel %vm323_vm0, %v1266_v48, -inf }
 0x62b   :  { %1343 = vmax.xlane.f32.xlu1 %v1342_v49 }
 0x62d   :  { %1346 = vmax.xlane.f32.xlu0 %v1345_v50 }
 0x62e   :  { %v7873_v51 = vpop.f32.mrb[28].mxu0 }
 0x62f   :  { %v1324_v53 = vpop.f32.mrb[29].mxu0  ;;  %1349 = vmax.xlane.f32.xlu1 %v1348_v52  ;;  %v1357_v58 = vsel %vm323_vm0, %v7873_v51, -inf }
 0x630   :  { %v7874_v54 = vpop.f32.mrb[30].mxu0  ;;  %v1351_v55 = vsel %vm323_vm0, %v1324_v53, -inf }
 0x631   :  { %v1327_v56 = vpop.f32.mrb[31].mxu0  ;;  %1352 = vmax.xlane.f32.xlu0 %v1351_v55  ;;  %v1360_v59 = vsel %vm323_vm0, %v7874_v54, -inf }
 0x632   :  { %v1354_v57 = vsel %vm323_vm0, %v1327_v56, -inf }
 0x633   :  { %1355 = vmax.xlane.f32.xlu1 %v1354_v57 }
 0x635   :  { %1358 = vmax.xlane.f32.xlu0 %v1357_v58 }
 0x637   :  { %1361 = vmax.xlane.f32.xlu1 %v1360_v59 }
 0x6b6   :  { %v1341_v60 = vpop.xlane.xlu0 %1340 }
 0x6b7   :  { %v1363_v61 = vsub.f32 %v1263_v33, %v1341_v60 }
 0x6b8   :  { %v1344_v62 = vpop.xlane.xlu1 %1343 }
 0x6b9   :  { %v1371_v31 = vmul.f32 1.442695, %v1363_v61  ;;  %v1364_v32 = vsub.f32 %v1266_v48, %v1344_v62 }
 0x6ba   :  { %v1347_v63 = vpop.xlane.xlu0 %1346 }
 0x6bb   :  { %8663 = vpow2.f32 %v1371_v31  ;;  %v1373_v0 = vmul.f32 1.442695, %v1364_v32  ;;  %v1365_v1 = vsub.f32 %v7865_v30, %v1347_v63 }
 0x6bc   :  { %v1350_v2 = vpop.xlane.xlu1 %1349 }
 0x6bd   :  { %8665 = vpow2.f32 %v1373_v0  ;;  %v1375_v3 = vmul.f32 1.442695, %v1365_v1  ;;  %v1366_v4 = vsub.f32 %v7866_v46, %v1350_v2 }
 0x6be   :  { %v1353_v6 = vpop.xlane.xlu0 %1352 }
 0x6bf   :  { %8667 = vpow2.f32 %v1375_v3  ;;  %v1377_v7 = vmul.f32 1.442695, %v1366_v4  ;;  %v1367_v8 = vsub.f32 %v1324_v53, %v1353_v6 }
 0x6c0   :  { %v1356_v9 = vpop.xlane.xlu1 %1355 }
 0x6c1   :  { %8669 = vpow2.f32 %v1377_v7  ;;  %v1379_v11 = vmul.f32 1.442695, %v1367_v8  ;;  %v1368_v13 = vsub.f32 %v1327_v56, %v1356_v9 }
 0x6c2   :  { %v1359_v14 = vpop.xlane.xlu0 %1358 }
 0x6c3   :  { %8671 = vpow2.f32 %v1379_v11  ;;  %v1381_v17 = vmul.f32 1.442695, %v1368_v13  ;;  %v1369_v18 = vsub.f32 %v7873_v51, %v1359_v14 }
 0x6c4   :  { %v1362_v19 = vpop.xlane.xlu1 %1361 }
 0x6c5   :  { %v8664_v20 = vpop.eup %8663  ;;  %8673 = vpow2.f32 %v1381_v17  ;;  %v1383_v21 = vmul.f32 1.442695, %v1369_v18  ;;  %v1370_v16 = vsub.f32 %v7874_v54, %v1362_v19  ;;  %v8575_v17 = vld [vmem:[#allocation5 + $0x20] sm:$0xff]  }
 0x6c6   :  { %v1387_v22 = vsel %vm323_vm0, %v8664_v20, 0.0 }
 0x6c7   :  { %v8666_v23 = vpop.eup %8665  ;;  %8675 = vpow2.f32 %v1383_v21  ;;  %v1385_v24 = vmul.f32 1.442695, %v1370_v16  ;;  %1388 = vadd.xlane.f32.xlu0 %v1387_v22  ;;  %v8576_v16 = vld [vmem:[#allocation5 + $0x28] sm:$0xff]  }
 0x6c8   :  { %v1390_v25 = vsel %vm323_vm0, %v8666_v23, 0.0  ;;  %v8578_v22 = vld [vmem:[#allocation7 + $0x28] sm:$0xff]  }
 0x6c9   :  { %v8668_v26 = vpop.eup %8667  ;;  %8677 = vpow2.f32 %v1385_v24  ;;  %1391 = vadd.xlane.f32.xlu1 %v1390_v25  ;;  %v926_v24 = vld [vmem:[#allocation14] sm:$0xf] }
 0x6ca   :  { %v1393_v27 = vsel %vm323_vm0, %v8668_v26, 0.0 }
 0x6cb   :  { %v8670_v30 = vpop.eup %8669  ;;  %1394 = vadd.xlane.f32.xlu0 %v1393_v27 }
 0x6cc   :  { %v1396_v33 = vsel %vm323_vm0, %v8670_v30, 0.0 }
 0x6cd   :  { %v8672_v46 = vpop.eup %8671  ;;  %1397 = vadd.xlane.f32.xlu1 %v1396_v33 }
 0x6ce   :  { %v1399_v47 = vsel %vm323_vm0, %v8672_v46, 0.0 }
 0x6cf   :  { %v8674_v48 = vpop.eup %8673  ;;  %1400 = vadd.xlane.f32.xlu0 %v1399_v47  ;;  %v1641_v47 = vsel %vm1559_vm2, %v926_v24, 0 }
 0x6d0   :  { %v1402_v49 = vsel %vm323_vm0, %v8674_v48, 0.0 }
 0x6d1   :  { %v8676_v50 = vpop.eup %8675  ;;  %1403 = vadd.xlane.f32.xlu1 %v1402_v49 }
 0x6d2   :  { %v1405_v51 = vsel %vm323_vm0, %v8676_v50, 0.0 }
 0x6d3   :  { %v8678_v52 = vpop.eup %8677  ;;  %1406 = vadd.xlane.f32.xlu0 %v1405_v51 }
 0x6d4   :  { %v1408_v53 = vsel %vm323_vm0, %v8678_v52, 0.0 }
 0x6d5   :  { %1409 = vadd.xlane.f32.xlu1 %v1408_v53 }
 0x754   :  { %v1389_v54 = vpop.xlane.xlu0 %1388 }
 0x755   :  { %8679 = vrcp.f32 %v1389_v54 }
 0x756   :  { %v1392_v55 = vpop.xlane.xlu1 %1391 }
 0x757   :  { %8681 = vrcp.f32 %v1392_v55  ;;  %v7167_v55 = vld [vmem:[#allocation10 + $0x2] ss:$0 sm:$0xff] }
 0x758   :  { %v1395_v56 = vpop.xlane.xlu0 %1394 }
 0x759   :  { %8683 = vrcp.f32 %v1395_v56 }
 0x75a   :  { %v1398_v57 = vpop.xlane.xlu1 %1397 }
 0x75b   :  { %8685 = vrcp.f32 %v1398_v57 }
 0x75c   :  { %v1401_v58 = vpop.xlane.xlu0 %1400 }
 0x75d   :  { %8687 = vrcp.f32 %v1401_v58 }
 0x75e   :  { %v1404_v59 = vpop.xlane.xlu1 %1403 }
 0x75f   :  { %v8680_v60 = vpop.eup %8679  ;;  %8689 = vrcp.f32 %v1404_v59 }
 0x760   :  { %v1407_v61 = vpop.xlane.xlu0 %1406  ;;  %v1419_v32 = vmul.f32 %v8680_v60, %v8664_v20 }
 0x761   :  { %v8682_v62 = vpop.eup %8681  ;;  %8691 = vrcp.f32 %v1407_v61 }
 0x762   :  { %v1410_v31 = vpop.xlane.xlu1 %1409  ;;  %v1420_v63 = vmul.f32 %v8682_v62, %v8666_v23 }
 0x763   :  { %v8684_v0 = vpop.eup %8683  ;;  %8693 = vrcp.f32 %v1410_v31 }
 0x764   :  { %v1427_v1 = vpack.c.bf16 %v1420_v63, %v1419_v32  ;;  %v1421_v3 = vmul.f32 %v8684_v0, %v8668_v26  ;;  %v8580_v0 = vld [vmem:[#allocation8 + $0x28] sm:$0xff]  }
 0x765   :  { %v8686_v2 = vpop.eup %8685 }
 0x766   :  { %v1422_v4 = vmul.f32 %v8686_v2, %v8670_v30  ;;  %7879 = vmatprep.mubr.msk.bf16.mxu1 %vm323_vm0, %v1427_v1 }
 0x767   :  { %v8688_v6 = vpop.eup %8687 }
 0x768   :  { %v1428_v7 = vpack.c.bf16 %v1422_v4, %v1421_v3  ;;  %v1423_v9 = vmul.f32 %v8688_v6, %v8672_v46 }
 0x769   :  { %v8690_v8 = vpop.eup %8689 }
 0x76a   :  { %7880 = vmatmul.mubr.msk.bf16.vlgmr.msra.gmra.mrb[40].mxu1 %vm323_vm0, %v1428_v7  ;;  %v1424_v11 = vmul.f32 %v8690_v8, %v8674_v48  ;;  %v8579_v48 = vld [vmem:[#allocation8 + $0x20] sm:$0xff]  }
 0x76b   :  { %v8692_v13 = vpop.eup %8691  ;;  %7884 = vmatpush3.bf16.msra.mxu1 %v9905_v29  ;;  %v8577_v29 = vld [vmem:[#allocation7 + $0x20] sm:$0xff]  }
 0x76c   :  { %7885 = vmatprep.subr.bf16.mxu1 %v9903_v28  ;;  %v1429_v14 = vpack.c.bf16 %v1424_v11, %v1423_v9  ;;  %v1425_v19 = vmul.f32 %v8692_v13, %v8676_v50 }
 0x76d   :  { %v8694_v18 = vpop.eup %8693 }
 0x76e   :  { %v1426_v20 = vmul.f32 %v8694_v18, %v8678_v52  ;;  %7887 = vmatprep.mubr.msk.bf16.mxu1 %vm323_vm0, %v1429_v14  ;;  %v7174_v14 = vld [vmem:[#allocation11 + $0x2] ss:$0 sm:$0xff] }
 0x76f   :  { %7886 = vmatpush3.bf16.msra.mxu1 %v9903_v28  ;;  %v1546_v28 = vld [vmem:[#allocation14 + $0x4] sm:$0xf] }
 0x770   :  { %v1430_v21 = vpack.c.bf16 %v1426_v20, %v1425_v19  ;;  %7911 = vmatprep.subr.bf16.mxu1 %v8575_v17  ;;  %8507 = vmatprep.subr.msk.bf16.mxu0 %vm1559_vm2, %v1546_v28  ;;  %v1561_v23 = vsel %vm1559_vm2, %v1546_v28, 0 }
 0x771   :  { %7892 = vmatpush3.bf16.msra.mxu0 %v1561_v23 }
 0x772   :  { %7888 = vmatmul.mubr.msk.bf16.vlgmr.msra.gmra.mrb[44].mxu1 %vm323_vm0, %v1430_v21  ;;  %8508 = vmatprep.subr.msk.bf16.mxu0 %vm1559_vm2, %v926_v24 }
 0x773   :  { %7912 = vmatpush3.bf16.msra.mxu1 %v8575_v17  ;;  %7915 = vmatprep.mubr.msk.bf16.mxu1 %vm323_vm0, %v9765_v5 }
 0x774   :  { %7913 = vmatprep.subr.bf16.mxu1 %v8576_v16 }
 0x777   :  { %7914 = vmatpush3.bf16.msra.mxu1 %v8576_v16 }
 0x778   :  { %7923 = vmatprep.subr.bf16.mxu1 %v8577_v29 }
 0x77a   :  { %7916 = vmatmul.mubr.msk.bf16.vlgmr.msra.gmra.mrb[48].mxu1 %vm323_vm0, %v9771_v10 }
 0x77b   :  { %7924 = vmatpush3.bf16.msra.mxu1 %v8577_v29  ;;  %7919 = vmatprep.mubr.msk.bf16.mxu1 %vm323_vm0, %v9773_v12 }
 0x77c   :  { %7925 = vmatprep.subr.bf16.mxu1 %v8578_v22 }
 0x77f   :  { %7926 = vmatpush3.bf16.msra.mxu1 %v8578_v22 }
 0x782   :  { %7920 = vmatmul.mubr.msk.bf16.gmra.mrb[52].mxu1 %vm323_vm0, %v9779_v15 }
 0x783   :  { %7927 = vmatprep.mubr.msk.bf16.mxu1 %vm323_vm0, %v9765_v5 }
 0x78a   :  { %7928 = vmatmul.mubr.msk.bf16.vlgmr.msra.gmra.mrb[56].mxu1 %vm323_vm0, %v9771_v10 }
 0x78b   :  { %7931 = vmatprep.mubr.msk.bf16.mxu1 %vm323_vm0, %v9773_v12 }
 0x792   :  { %7932 = vmatmul.mubr.msk.bf16.gmra.mrb[60].mxu1 %vm323_vm0, %v9779_v15 }
 0x83d   :  { %v7881_v25 = vpop.f32.mrb[40].mxu1 }
 0x83e   :  { %v1471_v26 = vpop.f32.mrb[41].mxu1 }
 0x83f   :  { %v7882_v27 = vpop.f32.mrb[42].mxu1 }
 0x840   :  { %v1542_v30 = vpack.c.bf16 %v7882_v27, %v7881_v25  ;;  %v1474_v33 = vpop.f32.mrb[43].mxu1 }
 0x841   :  { %v1541_v46 = vpack.c.bf16 %v1474_v33, %v1471_v26 }
 0x843   :  { %7893 = vmatprep.mubr.msk.bf16.mxu0 %vm597_vm1, %v1541_v46 }
 0x844   :  { %7894 = vmatmul.mubr.msk.bf16.vlgmr.msra.gmra.mrb[32].mxu0 %vm597_vm1, %v1542_v30 }
 0x845   :  { %v7889_v49 = vpop.f32.mrb[44].mxu1  ;;  %7902 = vmatpush3.bf16.msra.mxu0 %v1641_v47 }
 0x846   :  { %v1526_v50 = vpop.f32.mrb[45].mxu1  ;;  %7935 = vmatprep.subr.bf16.mxu0 %v8579_v48 }
 0x847   :  { %v7890_v51 = vpop.f32.mrb[46].mxu1 }
 0x848   :  { %v1544_v52 = vpack.c.bf16 %v7890_v51, %v7889_v49  ;;  %v1529_v53 = vpop.f32.mrb[47].mxu1 }
 0x849   :  { %v1543_v54 = vpack.c.bf16 %v1529_v53, %v1526_v50  ;;  %v7181_v50 = vld [vmem:[#allocation13 + $0x2] ss:$0 sm:$0xff] }
 0x84b   :  { %7897 = vmatprep.mubr.msk.bf16.mxu0 %vm597_vm1, %v1543_v54 }
 0x84c   :  { %7898 = vmatmul.mubr.msk.bf16.gmra.mrb[36].mxu0 %vm597_vm1, %v1544_v52 }
 0x84d   :  { %7903 = vmatprep.mubr.msk.bf16.mxu0 %vm597_vm1, %v922_v39  ;;  %v7917_v56 = vpop.f32.mrb[48].mxu1 }
 0x84e   :  { %v1776_v57 = vadd.f32 %v7917_v56, %v7167_v55  ;;  %v1767_v58 = vpop.f32.mrb[49].mxu1 }
 0x84f   :  { %v1768_v59 = vadd.f32 %v7167_v55, %v1767_v58  ;;  %v7918_v60 = vpop.f32.mrb[50].mxu1 }
 0x850   :  { %v1779_v61 = vadd.f32 %v7918_v60, %v7167_v55  ;;  %v1770_v62 = vpop.f32.mrb[51].mxu1  ;;  %v9959_v32 = vmul.f32 0.35355338, %v1776_v57 }
 0x851   :  { %v1771_v31 = vadd.f32 %v7167_v55, %v1770_v62  ;;  %v1798_v1 = vmul.f32 0.35355338, %v1768_v59 }
 0x852   :  { %v9961_v63 = vmul.f32 0.35355338, %v1779_v61 }
 0x853   :  { %v1799_v2 = vmul.f32 0.35355338, %v1771_v31 }
 0x854   :  { %v1987_v35 = vpack.c.bf16 %v9961_v63, %v9959_v32  ;;  %7904 = vmatmul.mubr.msk.bf16.vlgmr.msra.gmra.mrb[32].mxu0 %vm597_vm1, %v923_v37 }
 0x855   :  { %v1986_v38 = vpack.c.bf16 %v1799_v2, %v1798_v1  ;;  %7907 = vmatprep.mubr.msk.bf16.mxu0 %vm597_vm1, %v924_v45  ;;  %v7921_v39 = vpop.f32.mrb[52].mxu1  ;;  %7936 = vmatpush3.bf16.msra.mxu0 %v8579_v48 }
 0x856   :  { %v1792_v3 = vadd.f32 %v7921_v39, %v7167_v55  ;;  %v1783_v4 = vpop.f32.mrb[53].mxu1  ;;  %7937 = vmatprep.subr.bf16.mxu0 %v8580_v0 }
 0x857   :  { %v1784_v6 = vadd.f32 %v7167_v55, %v1783_v4  ;;  %v7922_v7 = vpop.f32.mrb[54].mxu1  ;;  %7951 = vmatprep.mubr.msk.bf16.mxu1 %vm597_vm1, %v1986_v38 }
 0x858   :  { %v1795_v8 = vadd.f32 %v7922_v7, %v7167_v55  ;;  %v1786_v9 = vpop.f32.mrb[55].mxu1  ;;  %v1804_v36 = vmul.f32 0.35355338, %v1792_v3 }
 0x859   :  { %v1787_v34 = vadd.f32 %v7167_v55, %v1786_v9  ;;  %7938 = vmatpush3.bf16.msra.mxu0 %v8580_v0  ;;  %v1802_v11 = vmul.f32 0.35355338, %v1784_v6 }
 0x85a   :  { %v1805_v37 = vmul.f32 0.35355338, %v1795_v8 }
 0x85b   :  { %v1803_v13 = vmul.f32 0.35355338, %v1787_v34 }
 0x85c   :  { %v1989_v41 = vpack.c.bf16 %v1805_v37, %v1804_v36  ;;  %7908 = vmatmul.mubr.msk.bf16.gmra.mrb[36].mxu0 %vm597_vm1, %v925_v43 }
 0x85d   :  { %v1988_v44 = vpack.c.bf16 %v1803_v13, %v1802_v11  ;;  %v7929_v45 = vpop.f32.mrb[56].mxu1  ;;  %7939 = vmatprep.mubr.msk.bf16.mxu0 %vm323_vm0, %v9765_v5 }
 0x85e   :  { %v1865_v17 = vpop.f32.mrb[57].mxu1  ;;  %v1874_v19 = vadd.f32 %v7929_v45, %v7174_v14 }
 0x85f   :  { %v7930_v18 = vpop.f32.mrb[58].mxu1  ;;  %v1866_v16 = vadd.f32 %v7174_v14, %v1865_v17 }
 0x860   :  { %v1877_v20 = vadd.f32 %v7930_v18, %v7174_v14  ;;  %v1868_v21 = vpop.f32.mrb[59].mxu1 }
 0x861   :  { %v1869_v29 = vadd.f32 %v7174_v14, %v1868_v21 }
 0x862   :  { %v1991_v22 = vpack.c.bf16 %v1877_v20, %v1874_v19 }
 0x863   :  { %v1990_v28 = vpack.c.bf16 %v1869_v29, %v1866_v16 }
 0x864   :  { %7940 = vmatmul.mubr.msk.bf16.vlgmr.msra.gmra.mrb[40].mxu0 %vm323_vm0, %v9771_v10  ;;  %v2008_v47 = vsel %vm597_vm1, %v1991_v22, 0 }
 0x865   :  { %v7933_v40 = vpop.f32.mrb[60].mxu1  ;;  %8509 = vmatprep.subr.msk.bf16.mxu1 %vm597_vm1, %v1990_v28  ;;  %v2005_v42 = vsel %vm597_vm1, %v1990_v28, 0  ;;  %7943 = vmatprep.mubr.msk.bf16.mxu0 %vm323_vm0, %v9773_v12 }
 0x866   :  { %v1881_v43 = vpop.f32.mrb[61].mxu1  ;;  %7948 = vmatpush3.bf16.xpose.msra.mxu1 %v2005_v42  ;;  %v1890_v24 = vadd.f32 %v7933_v40, %v7174_v14 }
 0x867   :  { %v7934_v23 = vpop.f32.mrb[62].mxu1  ;;  %8510 = vmatprep.subr.msk.bf16.mxu1 %vm597_vm1, %v1991_v22  ;;  %v1882_v27 = vadd.f32 %v7174_v14, %v1881_v43 }
 0x868   :  { %v1893_v25 = vadd.f32 %v7934_v23, %v7174_v14  ;;  %v1884_v26 = vpop.f32.mrb[63].mxu1 }
 0x869   :  { %v1885_v30 = vadd.f32 %v7174_v14, %v1884_v26 }
 0x86a   :  { %v1993_v33 = vpack.c.bf16 %v1893_v25, %v1890_v24 }
 0x86b   :  { %v1992_v46 = vpack.c.bf16 %v1885_v30, %v1882_v27 }
 0x86c   :  { %7944 = vmatmul.mubr.msk.bf16.gmra.mrb[44].mxu0 %vm323_vm0, %v9779_v15  ;;  %v2069_v49 = vsel %vm597_vm1, %v1993_v33, 0 }
 0x86d   :  { %8511 = vmatprep.subr.msk.bf16.mxu0 %vm597_vm1, %v1992_v46  ;;  %7959 = vmatprep.mubr.msk.bf16.mxu0 %vm597_vm1, %v1988_v44  ;;  %v2066_v48 = vsel %vm597_vm1, %v1992_v46, 0 }
 0x86e   :  { %7950 = vmatpush3.bf16.xpose.msra.mxu1 %v2008_v47  ;;  %7956 = vmatpush3.bf16.xpose.msra.mxu0 %v2066_v48 }
 0x86f   :  { %8512 = vmatprep.subr.msk.bf16.mxu0 %vm597_vm1, %v1993_v33 }
 0x875   :  { %7952 = vmatmul.mubr.msk.bf16.vlgmr.msra.gmra.mrb[64].mxu1 %vm597_vm1, %v1987_v35 }
 0x876   :  { %7958 = vmatpush3.bf16.xpose.msra.mxu0 %v2069_v49 }
 0x87d   :  { %7960 = vmatmul.mubr.msk.bf16.vlgmr.msra.gmra.mrb[48].mxu0 %vm597_vm1, %v1989_v41 }
 0x937   :  { %v7941_v51 = vpop.f32.mrb[40].mxu0 }
 0x938   :  { %v1964_v52 = vadd.f32 %v7941_v51, %v7181_v50  ;;  %v1955_v53 = vpop.f32.mrb[41].mxu0 }
 0x939   :  { %v1956_v54 = vadd.f32 %v7181_v50, %v1955_v53  ;;  %v7942_v55 = vpop.f32.mrb[42].mxu0 }
 0x93a   :  { %v1967_v56 = vadd.f32 %v7942_v55, %v7181_v50  ;;  %v1958_v57 = vpop.f32.mrb[43].mxu0 }
 0x93b   :  { %v1959_v58 = vadd.f32 %v7181_v50, %v1958_v57 }
 0x93c   :  { %v1995_v59 = vpack.c.bf16 %v1967_v56, %v1964_v52 }
 0x93d   :  { %v1994_v60 = vpack.c.bf16 %v1959_v58, %v1956_v54 }
 0x93f   :  { %7963 = vmatprep.subr.bf16.mxu1 %v1994_v60  ;;  %v7945_v61 = vpop.f32.mrb[44].mxu0 }
 0x940   :  { %7964 = vmatpush3.bf16.msra.mxu1 %v1994_v60  ;;  %v1980_v62 = vadd.f32 %v7945_v61, %v7181_v50  ;;  %v1971_v31 = vpop.f32.mrb[45].mxu0 }
 0x941   :  { %7965 = vmatprep.subr.bf16.mxu1 %v1995_v59  ;;  %v1972_v32 = vadd.f32 %v7181_v50, %v1971_v31  ;;  %v7946_v63 = vpop.f32.mrb[46].mxu0 }
 0x942   :  { %v1983_v0 = vadd.f32 %v7946_v63, %v7181_v50  ;;  %v1974_v1 = vpop.f32.mrb[47].mxu0 }
 0x943   :  { %v1975_v2 = vadd.f32 %v7181_v50, %v1974_v1  ;;  %v2327_v1 = vld [vmem:[#allocation14 + $0x8] sm:$0xf] }
 0x944   :  { %7966 = vmatpush3.bf16.msra.mxu1 %v1995_v59  ;;  %v9997_v35 = vpack.c.bf16 %v1983_v0, %v1980_v62  ;;  %8513 = vmatprep.subr.msk.bf16.mxu0 %vm1559_vm2, %v2327_v1 }
 0x945   :  { %v9999_v38 = vpack.c.bf16 %v1975_v2, %v1972_v32 }
 0x947   :  { %7971 = vmatprep.subr.bf16.mxu1 %v9999_v38 }
 0x948   :  { %v7953_v39 = vpop.f32.mrb[64].mxu1 }
 0x949   :  { %v2044_v3 = vpop.f32.mrb[65].mxu1  ;;  %v2126_v9 = vsel %vm323_vm0, %v7953_v39, -inf }
 0x94a   :  { %v7954_v4 = vpop.f32.mrb[66].mxu1  ;;  %v2120_v6 = vsel %vm323_vm0, %v2044_v3, -inf }
 0x94b   :  { %2121 = vmax.xlane.f32.xlu0 %v2120_v6  ;;  %v2047_v7 = vpop.f32.mrb[67].mxu1  ;;  %v2129_v36 = vsel %vm323_vm0, %v7954_v4, -inf }
 0x94c   :  { %v2123_v8 = vsel %vm323_vm0, %v2047_v7, -inf }
 0x94d   :  { %2124 = vmax.xlane.f32.xlu1 %v2123_v8 }
 0x94f   :  { %2127 = vmax.xlane.f32.xlu0 %v2126_v9 }
 0x950   :  { %v7961_v34 = vpop.f32.mrb[48].mxu0 }
 0x951   :  { %2130 = vmax.xlane.f32.xlu1 %v2129_v36  ;;  %v2105_v37 = vpop.f32.mrb[49].mxu0  ;;  %v2138_v45 = vsel %vm323_vm0, %v7961_v34, -inf }
 0x952   :  { %v7962_v11 = vpop.f32.mrb[50].mxu0  ;;  %v2132_v13 = vsel %vm323_vm0, %v2105_v37, -inf }
 0x953   :  { %2133 = vmax.xlane.f32.xlu0 %v2132_v13  ;;  %v2108_v41 = vpop.f32.mrb[51].mxu0  ;;  %v2141_v14 = vsel %vm323_vm0, %v7962_v11, -inf }
 0x954   :  { %v2135_v44 = vsel %vm323_vm0, %v2108_v41, -inf }
 0x955   :  { %2136 = vmax.xlane.f32.xlu1 %v2135_v44 }
 0x957   :  { %2139 = vmax.xlane.f32.xlu0 %v2138_v45 }
 0x959   :  { %2142 = vmax.xlane.f32.xlu1 %v2141_v14 }
 0x9d8   :  { %v2122_v17 = vpop.xlane.xlu0 %2121 }
 0x9d9   :  { %v2144_v18 = vsub.f32 %v2044_v3, %v2122_v17 }
 0x9da   :  { %v2125_v19 = vpop.xlane.xlu1 %2124 }
 0x9db   :  { %v2152_v20 = vmul.f32 1.442695, %v2144_v18  ;;  %v2145_v21 = vsub.f32 %v2047_v7, %v2125_v19 }
 0x9dc   :  { %v2128_v16 = vpop.xlane.xlu0 %2127 }
 0x9dd   :  { %8695 = vpow2.f32 %v2152_v20  ;;  %v2154_v29 = vmul.f32 1.442695, %v2145_v21  ;;  %v2146_v22 = vsub.f32 %v7953_v39, %v2128_v16 }
 0x9de   :  { %v2131_v28 = vpop.xlane.xlu1 %2130 }
 0x9df   :  { %8697 = vpow2.f32 %v2154_v29  ;;  %v2156_v40 = vmul.f32 1.442695, %v2146_v22  ;;  %v2147_v42 = vsub.f32 %v7954_v4, %v2131_v28 }
 0x9e0   :  { %v2134_v43 = vpop.xlane.xlu0 %2133 }
 0x9e1   :  { %8699 = vpow2.f32 %v2156_v40  ;;  %v2158_v23 = vmul.f32 1.442695, %v2147_v42  ;;  %v2148_v24 = vsub.f32 %v2105_v37, %v2134_v43  ;;  %v2341_v43 = vsel %vm1559_vm2, %v2327_v1, 0 }
 0x9e2   :  { %v2137_v25 = vpop.xlane.xlu1 %2136  ;;  %7980 = vmatpush3.bf16.msra.mxu0 %v2341_v43 }
 0x9e3   :  { %8701 = vpow2.f32 %v2158_v23  ;;  %v2160_v26 = vmul.f32 1.442695, %v2148_v24  ;;  %v2149_v27 = vsub.f32 %v2108_v41, %v2137_v25  ;;  %v8583_v23 = vld [vmem:[#allocation5 + $0x30] sm:$0xff]   ;;  %v8584_v24 = vld [vmem:[#allocation5 + $0x38] sm:$0xff]  }
 0x9e4   :  { %v2140_v30 = vpop.xlane.xlu0 %2139 }
 0x9e5   :  { %8703 = vpow2.f32 %v2160_v26  ;;  %v2162_v33 = vmul.f32 1.442695, %v2149_v27  ;;  %v2150_v46 = vsub.f32 %v7961_v34, %v2140_v30 }
 0x9e6   :  { %v2143_v47 = vpop.xlane.xlu1 %2142 }
 0x9e7   :  { %v8696_v48 = vpop.eup %8695  ;;  %8705 = vpow2.f32 %v2162_v33  ;;  %v2164_v49 = vmul.f32 1.442695, %v2150_v46  ;;  %v2151_v50 = vsub.f32 %v7962_v11, %v2143_v47  ;;  %v8582_v46 = vld [vmem:[#allocation7 + $0x38] sm:$0xff]  }
 0x9e8   :  { %v2168_v51 = vsel %vm323_vm0, %v8696_v48, 0.0 }
 0x9e9   :  { %v8698_v52 = vpop.eup %8697  ;;  %8707 = vpow2.f32 %v2164_v49  ;;  %v2166_v53 = vmul.f32 1.442695, %v2151_v50  ;;  %2169 = vadd.xlane.f32.xlu0 %v2168_v51 }
 0x9ea   :  { %v2171_v54 = vsel %vm323_vm0, %v8698_v52, 0.0 }
 0x9eb   :  { %v8700_v55 = vpop.eup %8699  ;;  %8709 = vpow2.f32 %v2166_v53  ;;  %2172 = vadd.xlane.f32.xlu1 %v2171_v54  ;;  %v8585_v53 = vld [vmem:[#allocation8 + $0x30] sm:$0xff]   ;;  %v8586_v54 = vld [vmem:[#allocation8 + $0x38] sm:$0xff]  }
 0x9ec   :  { %v2174_v56 = vsel %vm323_vm0, %v8700_v55, 0.0 }
 0x9ed   :  { %v8702_v57 = vpop.eup %8701  ;;  %2175 = vadd.xlane.f32.xlu0 %v2174_v56 }
 0x9ee   :  { %v2177_v58 = vsel %vm323_vm0, %v8702_v57, 0.0 }
 0x9ef   :  { %v8704_v59 = vpop.eup %8703  ;;  %2178 = vadd.xlane.f32.xlu1 %v2177_v58 }
 0x9f0   :  { %v2180_v60 = vsel %vm323_vm0, %v8704_v59, 0.0 }
 0x9f1   :  { %v8706_v61 = vpop.eup %8705  ;;  %2181 = vadd.xlane.f32.xlu0 %v2180_v60 }
 0x9f2   :  { %v2183_v62 = vsel %vm323_vm0, %v8706_v61, 0.0 }
 0x9f3   :  { %v8708_v31 = vpop.eup %8707  ;;  %2184 = vadd.xlane.f32.xlu1 %v2183_v62 }
 0x9f4   :  { %v2186_v32 = vsel %vm323_vm0, %v8708_v31, 0.0 }
 0x9f5   :  { %v8710_v63 = vpop.eup %8709  ;;  %2187 = vadd.xlane.f32.xlu0 %v2186_v32 }
 0x9f6   :  { %v2189_v0 = vsel %vm323_vm0, %v8710_v63, 0.0 }
 0x9f7   :  { %2190 = vadd.xlane.f32.xlu1 %v2189_v0 }
 0xa76   :  { %v2170_v2 = vpop.xlane.xlu0 %2169 }
 0xa77   :  { %8711 = vrcp.f32 %v2170_v2 }
 0xa78   :  { %v2173_v39 = vpop.xlane.xlu1 %2172 }
 0xa79   :  { %8713 = vrcp.f32 %v2173_v39 }
 0xa7a   :  { %v2176_v3 = vpop.xlane.xlu0 %2175 }
 0xa7b   :  { %8715 = vrcp.f32 %v2176_v3 }
 0xa7c   :  { %v2179_v4 = vpop.xlane.xlu1 %2178 }
 0xa7d   :  { %8717 = vrcp.f32 %v2179_v4 }
 0xa7e   :  { %v2182_v6 = vpop.xlane.xlu0 %2181 }
 0xa7f   :  { %8719 = vrcp.f32 %v2182_v6 }
 0xa80   :  { %v2185_v7 = vpop.xlane.xlu1 %2184 }
 0xa81   :  { %v8712_v8 = vpop.eup %8711  ;;  %8721 = vrcp.f32 %v2185_v7 }
 0xa82   :  { %v2188_v9 = vpop.xlane.xlu0 %2187  ;;  %v2200_v37 = vmul.f32 %v8712_v8, %v8696_v48 }
 0xa83   :  { %v8714_v34 = vpop.eup %8713  ;;  %8723 = vrcp.f32 %v2188_v9 }
 0xa84   :  { %v2191_v36 = vpop.xlane.xlu1 %2190  ;;  %v2201_v11 = vmul.f32 %v8714_v34, %v8698_v52 }
 0xa85   :  { %v8716_v13 = vpop.eup %8715  ;;  %8725 = vrcp.f32 %v2191_v36 }
 0xa86   :  { %v2208_v41 = vpack.c.bf16 %v2201_v11, %v2200_v37  ;;  %v2202_v45 = vmul.f32 %v8716_v13, %v8700_v55 }
 0xa87   :  { %v8718_v44 = vpop.eup %8717 }
 0xa88   :  { %v2203_v14 = vmul.f32 %v8718_v44, %v8702_v57  ;;  %7967 = vmatprep.mubr.msk.bf16.mxu1 %vm323_vm0, %v2208_v41  ;;  %v7207_v41 = vld [vmem:[#allocation11 + $0x3] ss:$0 sm:$0xff] }
 0xa89   :  { %v8720_v17 = vpop.eup %8719 }
 0xa8a   :  { %v2209_v18 = vpack.c.bf16 %v2203_v14, %v2202_v45  ;;  %v2204_v20 = vmul.f32 %v8720_v17, %v8704_v59 }
 0xa8b   :  { %v8722_v19 = vpop.eup %8721 }
 0xa8c   :  { %7968 = vmatmul.mubr.msk.bf16.vlgmr.msra.gmra.mrb[68].mxu1 %vm323_vm0, %v2209_v18  ;;  %v2205_v21 = vmul.f32 %v8722_v19, %v8706_v61 }
 0xa8d   :  { %v8724_v16 = vpop.eup %8723  ;;  %7972 = vmatpush3.bf16.msra.mxu1 %v9999_v38  ;;  %v8581_v38 = vld [vmem:[#allocation7 + $0x30] sm:$0xff]  }
 0xa8e   :  { %7973 = vmatprep.subr.bf16.mxu1 %v9997_v35  ;;  %v2210_v29 = vpack.c.bf16 %v2205_v21, %v2204_v20  ;;  %v2206_v28 = vmul.f32 %v8724_v16, %v8708_v31  ;;  %8001 = vmatprep.subr.bf16.mxu0 %v8581_v38 }
 0xa8f   :  { %v8726_v22 = vpop.eup %8725 }
 0xa90   :  { %v2207_v40 = vmul.f32 %v8726_v22, %v8710_v63  ;;  %7975 = vmatprep.mubr.msk.bf16.mxu1 %vm323_vm0, %v2210_v29 }
 0xa91   :  { %7974 = vmatpush3.bf16.msra.mxu1 %v9997_v35 }
 0xa92   :  { %v2211_v42 = vpack.c.bf16 %v2207_v40, %v2206_v28  ;;  %7989 = vmatprep.subr.bf16.mxu1 %v8583_v23 }
 0xa94   :  { %7976 = vmatmul.mubr.msk.bf16.vlgmr.msra.gmra.mrb[72].mxu1 %vm323_vm0, %v2211_v42 }
 0xa95   :  { %7993 = vmatprep.mubr.msk.bf16.mxu1 %vm323_vm0, %v9765_v5  ;;  %7990 = vmatpush3.bf16.msra.mxu1 %v8583_v23 }
 0xa96   :  { %7991 = vmatprep.subr.bf16.mxu1 %v8584_v24 }
 0xa99   :  { %7992 = vmatpush3.bf16.msra.mxu1 %v8584_v24 }
 0xa9a   :  { %8013 = vmatprep.subr.bf16.mxu1 %v8585_v53 }
 0xa9c   :  { %7994 = vmatmul.mubr.msk.bf16.vlgmr.msra.gmra.mrb[76].mxu1 %vm323_vm0, %v9771_v10 }
 0xa9d   :  { %7997 = vmatprep.mubr.msk.bf16.mxu1 %vm323_vm0, %v9773_v12  ;;  %8014 = vmatpush3.bf16.msra.mxu1 %v8585_v53 }
 0xa9e   :  { %8015 = vmatprep.subr.bf16.mxu1 %v8586_v54 }
 0xaa1   :  { %8016 = vmatpush3.bf16.msra.mxu1 %v8586_v54 }
 0xaa4   :  { %7998 = vmatmul.mubr.msk.bf16.gmra.mrb[80].mxu1 %vm323_vm0, %v9779_v15 }
 0xaa5   :  { %8017 = vmatprep.mubr.msk.bf16.mxu1 %vm323_vm0, %v9765_v5 }
 0xaac   :  { %8018 = vmatmul.mubr.msk.bf16.vlgmr.msra.gmra.mrb[84].mxu1 %vm323_vm0, %v9771_v10 }
 0xaad   :  { %8021 = vmatprep.mubr.msk.bf16.mxu1 %vm323_vm0, %v9773_v12 }
 0xab4   :  { %8022 = vmatmul.mubr.msk.bf16.gmra.mrb[88].mxu1 %vm323_vm0, %v9779_v15 }
 0xb5f   :  { %v7969_v35 = vpop.f32.mrb[68].mxu1 }
 0xb60   :  { %v2252_v25 = vpop.f32.mrb[69].mxu1 }
 0xb61   :  { %v7970_v26 = vpop.f32.mrb[70].mxu1 }
 0xb62   :  { %v2323_v27 = vpack.c.bf16 %v7970_v26, %v7969_v35  ;;  %v2255_v30 = vpop.f32.mrb[71].mxu1 }
 0xb63   :  { %v2322_v33 = vpack.c.bf16 %v2255_v30, %v2252_v25 }
 0xb65   :  { %7981 = vmatprep.mubr.msk.bf16.mxu0 %vm597_vm1, %v2322_v33  ;;  %v7214_v33 = vld [vmem:[#allocation13 + $0x3] ss:$0 sm:$0xff] }
 0xb66   :  { %7982 = vmatmul.mubr.msk.bf16.vlgmr.msra.gmra.mrb[32].mxu0 %vm597_vm1, %v2323_v27 }
 0xb67   :  { %v7977_v47 = vpop.f32.mrb[72].mxu1  ;;  %8002 = vmatpush3.bf16.msra.mxu0 %v8581_v38 }
 0xb68   :  { %v2307_v48 = vpop.f32.mrb[73].mxu1  ;;  %8003 = vmatprep.subr.bf16.mxu0 %v8582_v46 }
 0xb69   :  { %v7978_v49 = vpop.f32.mrb[74].mxu1 }
 0xb6a   :  { %v2325_v50 = vpack.c.bf16 %v7978_v49, %v7977_v47  ;;  %v2310_v51 = vpop.f32.mrb[75].mxu1 }
 0xb6b   :  { %v2324_v52 = vpack.c.bf16 %v2310_v51, %v2307_v48  ;;  %8004 = vmatpush3.bf16.msra.mxu0 %v8582_v46 }
 0xb6d   :  { %7985 = vmatprep.mubr.msk.bf16.mxu0 %vm597_vm1, %v2324_v52 }
 0xb6e   :  { %7986 = vmatmul.mubr.msk.bf16.gmra.mrb[36].mxu0 %vm597_vm1, %v2325_v50 }
 0xb6f   :  { %8005 = vmatprep.mubr.msk.bf16.mxu0 %vm323_vm0, %v9765_v5  ;;  %v7995_v55 = vpop.f32.mrb[76].mxu1  ;;  %v7200_v5 = vld [vmem:[#allocation10 + $0x3] ss:$0 sm:$0xff] }
 0xb70   :  { %v2484_v56 = vadd.f32 %v7995_v55, %v7200_v5  ;;  %v2475_v57 = vpop.f32.mrb[77].mxu1 }
 0xb71   :  { %v2476_v58 = vadd.f32 %v7200_v5, %v2475_v57  ;;  %v7996_v59 = vpop.f32.mrb[78].mxu1 }
 0xb72   :  { %v2508_v60 = vmul.f32 0.35355338, %v2484_v56  ;;  %v2487_v61 = vadd.f32 %v7996_v59, %v7200_v5  ;;  %v2478_v62 = vpop.f32.mrb[79].mxu1 }
 0xb73   :  { %v2506_v31 = vmul.f32 0.35355338, %v2476_v58  ;;  %v2479_v32 = vadd.f32 %v7200_v5, %v2478_v62 }
 0xb74   :  { %v2509_v63 = vmul.f32 0.35355338, %v2487_v61 }
 0xb75   :  { %v2507_v0 = vmul.f32 0.35355338, %v2479_v32 }
 0xb76   :  { %8006 = vmatmul.mubr.msk.bf16.vlgmr.msra.gmra.mrb[52].mxu0 %vm323_vm0, %v9771_v10  ;;  %v2695_v10 = vpack.c.bf16 %v2509_v63, %v2508_v60 }
 0xb77   :  { %8009 = vmatprep.mubr.msk.bf16.mxu0 %vm323_vm0, %v9773_v12  ;;  %v7999_v1 = vpop.f32.mrb[80].mxu1  ;;  %v2694_v2 = vpack.c.bf16 %v2507_v0, %v2506_v31 }
 0xb78   :  { %v2500_v39 = vadd.f32 %v7999_v1, %v7200_v5  ;;  %v2491_v3 = vpop.f32.mrb[81].mxu1 }
 0xb79   :  { %v2492_v12 = vadd.f32 %v7200_v5, %v2491_v3  ;;  %v8000_v4 = vpop.f32.mrb[82].mxu1 }
 0xb7a   :  { %v2512_v6 = vmul.f32 0.35355338, %v2500_v39  ;;  %v2503_v7 = vadd.f32 %v8000_v4, %v7200_v5  ;;  %v2494_v8 = vpop.f32.mrb[83].mxu1 }
 0xb7b   :  { %v2510_v9 = vmul.f32 0.35355338, %v2492_v12  ;;  %v2495_v34 = vadd.f32 %v7200_v5, %v2494_v8 }
 0xb7c   :  { %v2513_v36 = vmul.f32 0.35355338, %v2503_v7 }
 0xb7d   :  { %v2511_v37 = vmul.f32 0.35355338, %v2495_v34 }
 0xb7e   :  { %8010 = vmatmul.mubr.msk.bf16.gmra.mrb[56].mxu0 %vm323_vm0, %v9779_v15  ;;  %v2697_v11 = vpack.c.bf16 %v2513_v36, %v2512_v6 }
 0xb7f   :  { %8029 = vmatprep.mubr.msk.bf16.mxu0 %vm597_vm1, %v2694_v2  ;;  %v2696_v13 = vpack.c.bf16 %v2511_v37, %v2510_v9  ;;  %v8019_v46 = vpop.f32.mrb[84].mxu1 }
 0xb80   :  { %v2672_v47 = vadd.f32 %v8019_v46, %v7214_v33  ;;  %v2663_v48 = vpop.f32.mrb[85].mxu1 }
 0xb81   :  { %8037 = vmatprep.mubr.msk.bf16.mxu1 %vm597_vm1, %v2696_v13  ;;  %v2664_v49 = vadd.f32 %v7214_v33, %v2663_v48  ;;  %v8020_v50 = vpop.f32.mrb[86].mxu1 }
 0xb82   :  { %v2675_v51 = vadd.f32 %v8020_v50, %v7214_v33  ;;  %v2666_v52 = vpop.f32.mrb[87].mxu1 }
 0xb83   :  { %v2667_v53 = vadd.f32 %v7214_v33, %v2666_v52 }
 0xb84   :  { %v2703_v54 = vpack.c.bf16 %v2675_v51, %v2672_v47 }
 0xb85   :  { %v2702_v55 = vpack.c.bf16 %v2667_v53, %v2664_v49 }
 0xb87   :  { %v8023_v5 = vpop.f32.mrb[88].mxu1 }
 0xb88   :  { %v2688_v56 = vadd.f32 %v8023_v5, %v7214_v33  ;;  %v2679_v57 = vpop.f32.mrb[89].mxu1 }
 0xb89   :  { %v2680_v58 = vadd.f32 %v7214_v33, %v2679_v57  ;;  %v8024_v59 = vpop.f32.mrb[90].mxu1  ;;  %v3035_v57 = vld [vmem:[#allocation14 + $0xc] sm:$0xf] }
 0xb8a   :  { %v2691_v60 = vadd.f32 %v8024_v59, %v7214_v33  ;;  %v2682_v61 = vpop.f32.mrb[91].mxu1 }
 0xb8b   :  { %v2683_v62 = vadd.f32 %v7214_v33, %v2682_v61 }
 0xb8c   :  { %v2705_v31 = vpack.c.bf16 %v2691_v60, %v2688_v56 }
 0xb8d   :  { %v2704_v32 = vpack.c.bf16 %v2683_v62, %v2680_v58 }
 0xc49   :  { %v8007_v15 = vpop.f32.mrb[52].mxu0 }
 0xc4a   :  { %v2573_v44 = vpop.f32.mrb[53].mxu0  ;;  %v2582_v14 = vadd.f32 %v8007_v15, %v7207_v41 }
 0xc4b   :  { %v8008_v45 = vpop.f32.mrb[54].mxu0  ;;  %v2574_v19 = vadd.f32 %v7207_v41, %v2573_v44 }
 0xc4c   :  { %v2585_v17 = vadd.f32 %v8008_v45, %v7207_v41  ;;  %v2576_v18 = vpop.f32.mrb[55].mxu0 }
 0xc4d   :  { %v2577_v20 = vadd.f32 %v7207_v41, %v2576_v18 }
 0xc4e   :  { %v2699_v21 = vpack.c.bf16 %v2585_v17, %v2582_v14 }
 0xc4f   :  { %v2698_v16 = vpack.c.bf16 %v2577_v20, %v2574_v19 }
 0xc50   :  { %v2716_v26 = vsel %vm597_vm1, %v2699_v21, 0 }
 0xc51   :  { %v8011_v29 = vpop.f32.mrb[56].mxu0  ;;  %8514 = vmatprep.subr.msk.bf16.mxu0 %vm597_vm1, %v2698_v16  ;;  %v2713_v22 = vsel %vm597_vm1, %v2698_v16, 0 }
 0xc52   :  { %v2589_v28 = vpop.f32.mrb[57].mxu0  ;;  %8026 = vmatpush3.bf16.xpose.msra.mxu0 %v2713_v22  ;;  %v2598_v42 = vadd.f32 %v8011_v29, %v7207_v41 }
 0xc53   :  { %v8012_v40 = vpop.f32.mrb[58].mxu0  ;;  %8515 = vmatprep.subr.msk.bf16.mxu0 %vm597_vm1, %v2699_v21  ;;  %v2590_v23 = vadd.f32 %v7207_v41, %v2589_v28 }
 0xc54   :  { %v2601_v43 = vadd.f32 %v8012_v40, %v7207_v41  ;;  %v2592_v38 = vpop.f32.mrb[59].mxu0 }
 0xc55   :  { %v2593_v24 = vadd.f32 %v7207_v41, %v2592_v38 }
 0xc56   :  { %v2701_v35 = vpack.c.bf16 %v2601_v43, %v2598_v42 }
 0xc57   :  { %v2700_v25 = vpack.c.bf16 %v2593_v24, %v2590_v23 }
 0xc58   :  { %v2777_v30 = vsel %vm597_vm1, %v2701_v35, 0 }
 0xc59   :  { %8516 = vmatprep.subr.msk.bf16.mxu1 %vm597_vm1, %v2700_v25  ;;  %v2774_v27 = vsel %vm597_vm1, %v2700_v25, 0 }
 0xc5a   :  { %8028 = vmatpush3.bf16.xpose.msra.mxu0 %v2716_v26  ;;  %8034 = vmatpush3.bf16.xpose.msra.mxu1 %v2774_v27 }
 0xc5b   :  { %8517 = vmatprep.subr.msk.bf16.mxu1 %vm597_vm1, %v2701_v35  ;;  %8041 = vmatprep.subr.bf16.mxu0 %v2702_v55 }
 0xc61   :  { %8030 = vmatmul.mubr.msk.bf16.vlgmr.msra.gmra.mrb[60].mxu0 %vm597_vm1, %v2695_v10 }
 0xc62   :  { %8036 = vmatpush3.bf16.xpose.msra.mxu1 %v2777_v30  ;;  %8042 = vmatpush3.bf16.msra.mxu0 %v2702_v55 }
 0xc63   :  { %8043 = vmatprep.subr.bf16.mxu0 %v2703_v54  ;;  %8049 = vmatprep.subr.bf16.mxu1 %v2704_v32 }
 0xc66   :  { %8044 = vmatpush3.bf16.msra.mxu0 %v2703_v54 }
 0xc67   :  { %8518 = vmatprep.subr.msk.bf16.mxu0 %vm1559_vm2, %v3035_v57 }
 0xc69   :  { %8038 = vmatmul.mubr.msk.bf16.vlgmr.msra.gmra.mrb[92].mxu1 %vm597_vm1, %v2697_v11 }
 0xc6a   :  { %8050 = vmatpush3.bf16.msra.mxu1 %v2704_v32 }
 0xc6b   :  { %8051 = vmatprep.subr.bf16.mxu1 %v2705_v31 }
 0xc6e   :  { %8052 = vmatpush3.bf16.msra.mxu1 %v2705_v31 }
 0xd34   :  { %v8031_v63 = vpop.f32.mrb[60].mxu0 }
 0xd35   :  { %v2752_v0 = vpop.f32.mrb[61].mxu0  ;;  %v2834_v3 = vsel %vm323_vm0, %v8031_v63, -inf }
 0xd36   :  { %v8032_v10 = vpop.f32.mrb[62].mxu0  ;;  %v2828_v1 = vsel %vm323_vm0, %v2752_v0, -inf }
 0xd37   :  { %2829 = vmax.xlane.f32.xlu0 %v2828_v1  ;;  %v2755_v2 = vpop.f32.mrb[63].mxu0  ;;  %v2837_v4 = vsel %vm323_vm0, %v8032_v10, -inf }
 0xd38   :  { %v2831_v39 = vsel %vm323_vm0, %v2755_v2, -inf }
 0xd39   :  { %2832 = vmax.xlane.f32.xlu1 %v2831_v39 }
 0xd3b   :  { %2835 = vmax.xlane.f32.xlu0 %v2834_v3 }
 0xd3c   :  { %v8039_v12 = vpop.f32.mrb[92].mxu1 }
 0xd3d   :  { %v2813_v6 = vpop.f32.mrb[93].mxu1  ;;  %2838 = vmax.xlane.f32.xlu1 %v2837_v4  ;;  %v2846_v36 = vsel %vm323_vm0, %v8039_v12, -inf }
 0xd3e   :  { %v8040_v7 = vpop.f32.mrb[94].mxu1  ;;  %v2840_v8 = vsel %vm323_vm0, %v2813_v6, -inf }
 0xd3f   :  { %v2816_v9 = vpop.f32.mrb[95].mxu1  ;;  %2841 = vmax.xlane.f32.xlu0 %v2840_v8  ;;  %v2849_v37 = vsel %vm323_vm0, %v8040_v7, -inf }
 0xd40   :  { %v2843_v34 = vsel %vm323_vm0, %v2816_v9, -inf }
 0xd41   :  { %2844 = vmax.xlane.f32.xlu1 %v2843_v34 }
 0xd43   :  { %2847 = vmax.xlane.f32.xlu0 %v2846_v36 }
 0xd45   :  { %2850 = vmax.xlane.f32.xlu1 %v2849_v37 }
 0xdc4   :  { %v2830_v11 = vpop.xlane.xlu0 %2829 }
 0xdc5   :  { %v2852_v13 = vsub.f32 %v2752_v0, %v2830_v11 }
 0xdc6   :  { %v2833_v15 = vpop.xlane.xlu1 %2832 }
 0xdc7   :  { %v2860_v41 = vmul.f32 1.442695, %v2852_v13  ;;  %v2853_v44 = vsub.f32 %v2755_v2, %v2833_v15 }
 0xdc8   :  { %v2836_v45 = vpop.xlane.xlu0 %2835 }
 0xdc9   :  { %8727 = vpow2.f32 %v2860_v41  ;;  %v2862_v14 = vmul.f32 1.442695, %v2853_v44  ;;  %v2854_v17 = vsub.f32 %v8031_v63, %v2836_v45  ;;  %v3049_v45 = vsel %vm1559_vm2, %v3035_v57, 0 }
 0xdca   :  { %v2839_v18 = vpop.xlane.xlu1 %2838 }
 0xdcb   :  { %8729 = vpow2.f32 %v2862_v14  ;;  %v2864_v19 = vmul.f32 1.442695, %v2854_v17  ;;  %v2855_v20 = vsub.f32 %v8032_v10, %v2839_v18 }
 0xdcc   :  { %v2842_v21 = vpop.xlane.xlu0 %2841 }
 0xdcd   :  { %8731 = vpow2.f32 %v2864_v19  ;;  %v2866_v16 = vmul.f32 1.442695, %v2855_v20  ;;  %v2856_v29 = vsub.f32 %v2813_v6, %v2842_v21 }
 0xdce   :  { %v2845_v22 = vpop.xlane.xlu1 %2844 }
 0xdcf   :  { %8733 = vpow2.f32 %v2866_v16  ;;  %v2868_v28 = vmul.f32 1.442695, %v2856_v29  ;;  %v2857_v40 = vsub.f32 %v2816_v9, %v2845_v22 }
 0xdd0   :  { %v2848_v42 = vpop.xlane.xlu0 %2847 }
 0xdd1   :  { %8735 = vpow2.f32 %v2868_v28  ;;  %v2870_v43 = vmul.f32 1.442695, %v2857_v40  ;;  %v2858_v38 = vsub.f32 %v8039_v12, %v2848_v42 }
 0xdd2   :  { %v2851_v23 = vpop.xlane.xlu1 %2850 }
 0xdd3   :  { %v8728_v24 = vpop.eup %8727  ;;  %8737 = vpow2.f32 %v2870_v43  ;;  %v2872_v35 = vmul.f32 1.442695, %v2858_v38  ;;  %v2859_v25 = vsub.f32 %v8040_v7, %v2851_v23  ;;  %v7233_v43 = vld [vmem:[#allocation16] ss:$0 sm:$0xff] }
 0xdd4   :  { %v2876_v26 = vsel %vm323_vm0, %v8728_v24, 0.0 }
 0xdd5   :  { %v8730_v27 = vpop.eup %8729  ;;  %8739 = vpow2.f32 %v2872_v35  ;;  %v2874_v30 = vmul.f32 1.442695, %v2859_v25  ;;  %2877 = vadd.xlane.f32.xlu0 %v2876_v26 }
 0xdd6   :  { %v2879_v33 = vsel %vm323_vm0, %v8730_v27, 0.0 }
 0xdd7   :  { %v8732_v46 = vpop.eup %8731  ;;  %8741 = vpow2.f32 %v2874_v30  ;;  %2880 = vadd.xlane.f32.xlu1 %v2879_v33  ;;  %v8951_v33 = vld [vmem:[#allocation2] sm:$0xff] }
 0xdd8   :  { %v2882_v47 = vsel %vm323_vm0, %v8732_v46, 0.0 }
 0xdd9   :  { %v8734_v48 = vpop.eup %8733  ;;  %2883 = vadd.xlane.f32.xlu0 %v2882_v47 }
 0xdda   :  { %v2885_v49 = vsel %vm323_vm0, %v8734_v48, 0.0 }
 0xddb   :  { %v8736_v50 = vpop.eup %8735  ;;  %2886 = vadd.xlane.f32.xlu1 %v2885_v49 }
 0xddc   :  { %v2888_v51 = vsel %vm323_vm0, %v8736_v50, 0.0 }
 0xddd   :  { %v8738_v52 = vpop.eup %8737  ;;  %2889 = vadd.xlane.f32.xlu0 %v2888_v51 }
 0xdde   :  { %v2891_v53 = vsel %vm323_vm0, %v8738_v52, 0.0 }
 0xddf   :  { %v8740_v54 = vpop.eup %8739  ;;  %2892 = vadd.xlane.f32.xlu1 %v2891_v53 }
 0xde0   :  { %v2894_v55 = vsel %vm323_vm0, %v8740_v54, 0.0 }
 0xde1   :  { %v8742_v5 = vpop.eup %8741  ;;  %2895 = vadd.xlane.f32.xlu0 %v2894_v55 }
 0xde2   :  { %v2897_v56 = vsel %vm323_vm0, %v8742_v5, 0.0 }
 0xde3   :  { %2898 = vadd.xlane.f32.xlu1 %v2897_v56 }
 0xe62   :  { %v2878_v58 = vpop.xlane.xlu0 %2877 }
 0xe63   :  { %8743 = vrcp.f32 %v2878_v58 }
 0xe64   :  { %v2881_v59 = vpop.xlane.xlu1 %2880 }
 0xe65   :  { %8745 = vrcp.f32 %v2881_v59 }
 0xe66   :  { %v2884_v60 = vpop.xlane.xlu0 %2883 }
 0xe67   :  { %8747 = vrcp.f32 %v2884_v60 }
 0xe68   :  { %v2887_v61 = vpop.xlane.xlu1 %2886 }
 0xe69   :  { %8749 = vrcp.f32 %v2887_v61 }
 0xe6a   :  { %v2890_v62 = vpop.xlane.xlu0 %2889 }
 0xe6b   :  { %8751 = vrcp.f32 %v2890_v62 }
 0xe6c   :  { %v2893_v31 = vpop.xlane.xlu1 %2892 }
 0xe6d   :  { %v8744_v32 = vpop.eup %8743  ;;  %8753 = vrcp.f32 %v2893_v31 }
 0xe6e   :  { %v2896_v63 = vpop.xlane.xlu0 %2895  ;;  %v2908_v1 = vmul.f32 %v8744_v32, %v8728_v24  ;;  %v8955_v32 = vld [vmem:[#allocation2 + $0x20] sm:$0xff] }
 0xe6f   :  { %v8746_v0 = vpop.eup %8745  ;;  %8755 = vrcp.f32 %v2896_v63 }
 0xe70   :  { %v2899_v10 = vpop.xlane.xlu1 %2898  ;;  %v2909_v2 = vmul.f32 %v8746_v0, %v8730_v27 }
 0xe71   :  { %v8748_v39 = vpop.eup %8747  ;;  %8757 = vrcp.f32 %v2899_v10  ;;  %v8956_v10 = vld [vmem:[#allocation2 + $0x28] sm:$0xff] }
 0xe72   :  { %v2916_v3 = vpack.c.bf16 %v2909_v2, %v2908_v1  ;;  %v2910_v4 = vmul.f32 %v8748_v39, %v8732_v46  ;;  %v8957_v2 = vld [vmem:[#allocation2 + $0x30] sm:$0xff] }
 0xe73   :  { %v8750_v12 = vpop.eup %8749 }
 0xe74   :  { %v2911_v6 = vmul.f32 %v8750_v12, %v8734_v48  ;;  %8045 = vmatprep.mubr.msk.bf16.mxu0 %vm323_vm0, %v2916_v3  ;;  %v8952_v48 = vld [vmem:[#allocation2 + $0x8] sm:$0xff]  ;;  %v8958_v12 = vld [vmem:[#allocation2 + $0x38] sm:$0xff] }
 0xe75   :  { %v8752_v7 = vpop.eup %8751 }
 0xe76   :  { %v2917_v8 = vpack.c.bf16 %v2911_v6, %v2910_v4  ;;  %v2912_v34 = vmul.f32 %v8752_v7, %v8736_v50  ;;  %v8953_v50 = vld [vmem:[#allocation2 + $0x10] sm:$0xff] }
 0xe77   :  { %v8754_v9 = vpop.eup %8753 }
 0xe78   :  { %8046 = vmatmul.mubr.msk.bf16.vlgmr.msra.gmra.mrb[64].mxu0 %vm323_vm0, %v2917_v8  ;;  %v2913_v36 = vmul.f32 %v8754_v9, %v8738_v52 }
 0xe79   :  { %v8756_v37 = vpop.eup %8755  ;;  %8058 = vmatpush3.bf16.msra.mxu0 %v3049_v45 }
 0xe7a   :  { %v2918_v11 = vpack.c.bf16 %v2913_v36, %v2912_v34  ;;  %v2914_v15 = vmul.f32 %v8756_v37, %v8740_v54  ;;  %v8954_v54 = vld [vmem:[#allocation2 + $0x18] sm:$0xff] }
 0xe7b   :  { %v8758_v13 = vpop.eup %8757 }
 0xe7c   :  { %v2915_v41 = vmul.f32 %v8758_v13, %v8742_v5  ;;  %8053 = vmatprep.mubr.msk.bf16.mxu1 %vm323_vm0, %v2918_v11 }
 0xe7e   :  { %v2919_v44 = vpack.c.bf16 %v2915_v41, %v2914_v15 }
 0xe80   :  { %8054 = vmatmul.mubr.msk.bf16.vlgmr.msra.gmra.mrb[96].mxu1 %vm323_vm0, %v2919_v44 }
 0xf4b   :  { %v8047_v14 = vpop.f32.mrb[64].mxu0 }
 0xf4c   :  { %v2960_v17 = vpop.f32.mrb[65].mxu0 }
 0xf4d   :  { %v8048_v18 = vpop.f32.mrb[66].mxu0 }
 0xf4e   :  { %v3031_v19 = vpack.c.bf16 %v8048_v18, %v8047_v14  ;;  %v2963_v20 = vpop.f32.mrb[67].mxu0 }
 0xf4f   :  { %v3030_v21 = vpack.c.bf16 %v2963_v20, %v2960_v17 }
 0xf51   :  { %8059 = vmatprep.mubr.msk.bf16.mxu0 %vm597_vm1, %v3030_v21 }
 0xf52   :  { %8060 = vmatmul.mubr.msk.bf16.vlgmr.msra.gmra.mrb[32].mxu0 %vm597_vm1, %v3031_v19 }
 0xf53   :  { %v8055_v16 = vpop.f32.mrb[96].mxu1 }
 0xf54   :  { %v3015_v29 = vpop.f32.mrb[97].mxu1 }
 0xf55   :  { %v8056_v22 = vpop.f32.mrb[98].mxu1 }
 0xf56   :  { %v3033_v28 = vpack.c.bf16 %v8056_v22, %v8055_v16  ;;  %v3018_v40 = vpop.f32.mrb[99].mxu1 }
 0xf57   :  { %v3032_v42 = vpack.c.bf16 %v3018_v40, %v3015_v29 }
 0xf59   :  { %8063 = vmatprep.mubr.msk.bf16.mxu0 %vm597_vm1, %v3032_v42 }
 0xf5a   :  { %8064 = vmatmul.mubr.msk.bf16.gmra.mrb[36].mxu0 %vm597_vm1, %v3033_v28 }
0x1025   :  { %v8061_v38 = vpop.f32.mrb[32].mxu0 }
0x1026   :  { %v3085_v23 = vpop.f32.mrb[33].mxu0  ;;  %v3133_v24 = vadd.f32 %v8061_v38, %v7233_v43 }
0x1027   :  { %v3131_v35 = vadd.f32 %v7233_v43, %v3085_v23  ;;  %v8062_v25 = vpop.f32.mrb[34].mxu0 }
0x1028   :  { %v3088_v26 = vpop.f32.mrb[35].mxu0  ;;  %v3134_v27 = vadd.f32 %v8062_v25, %v7233_v43  ;;  %v3141_v51 = vadd.f32 %v8953_v50, %v3133_v24 }
0x1029   :  { %v3132_v30 = vadd.f32 %v7233_v43, %v3088_v26  ;;  %v3139_v46 = vadd.f32 %v8951_v33, %v3131_v35 }
0x102a   :  { %v3142_v55 = vadd.f32 %v8954_v54, %v3134_v27  ;;  %v3155_v59 = vsel %vm323_vm0, %v3141_v51, 0.0  ;;  %v8588_v54 = vld [vmem:[#allocation20 + $0x8] sm:$0xff]  }
0x102b   :  { %v3149_v47 = vsel %vm323_vm0, %v3139_v46, 0.0  ;;  %v3140_v49 = vadd.f32 %v8952_v48, %v3132_v30 }
0x102c   :  { %3150 = vadd.xlane.f32.xlu0 %v3149_v47  ;;  %v3158_v31 = vsel %vm323_vm0, %v3142_v55, 0.0 }
0x102d   :  { %v8065_v52 = vpop.f32.mrb[36].mxu0  ;;  %v3152_v53 = vsel %vm323_vm0, %v3140_v49, 0.0 }
0x102e   :  { %3153 = vadd.xlane.f32.xlu1 %v3152_v53  ;;  %v3101_v5 = vpop.f32.mrb[37].mxu0  ;;  %v3137_v56 = vadd.f32 %v8065_v52, %v7233_v43  ;;  %v8587_v53 = vld [vmem:[#allocation20] sm:$0xff]  }
0x102f   :  { %v3135_v57 = vadd.f32 %v7233_v43, %v3101_v5  ;;  %v8066_v58 = vpop.f32.mrb[38].mxu0  ;;  %8067 = vmatprep.subr.bf16.mxu1 %v8587_v53  ;;  %v8590_v5 = vld [vmem:[#allocation23 + $0x8] sm:$0xff]  }
0x1030   :  { %3156 = vadd.xlane.f32.xlu0 %v3155_v59  ;;  %v3104_v60 = vpop.f32.mrb[39].mxu0  ;;  %v3138_v61 = vadd.f32 %v8066_v58, %v7233_v43  ;;  %v3145_v39 = vadd.f32 %v8957_v2, %v3137_v56  ;;  %8068 = vmatpush3.bf16.msra.mxu1 %v8587_v53  ;;  %v8591_v56 = vld [vmem:[#allocation23 + $0x10] sm:$0xff]   ;;  %v8593_v58 = vld [vmem:[#allocation23 + $0x20] sm:$0xff]   ;;  %v8594_v59 = vld [vmem:[#allocation23 + $0x28] sm:$0xff]  }
0x1031   :  { %v3136_v62 = vadd.f32 %v7233_v43, %v3104_v60  ;;  %v3143_v63 = vadd.f32 %v8955_v32, %v3135_v57  ;;  %8069 = vmatprep.subr.bf16.mxu1 %v8588_v54  ;;  %v8592_v57 = vld [vmem:[#allocation23 + $0x18] sm:$0xff]  }
0x1032   :  { %3159 = vadd.xlane.f32.xlu1 %v3158_v31  ;;  %v3146_v4 = vadd.f32 %v8958_v12, %v3138_v61  ;;  %v3167_v6 = vsel %vm323_vm0, %v3145_v39, 0.0 }
0x1033   :  { %v3161_v0 = vsel %vm323_vm0, %v3143_v63, 0.0  ;;  %v3144_v1 = vadd.f32 %v8956_v10, %v3136_v62 }
0x1034   :  { %3162 = vadd.xlane.f32.xlu0 %v3161_v0  ;;  %v3170_v7 = vsel %vm323_vm0, %v3146_v4, 0.0  ;;  %8070 = vmatpush3.bf16.msra.mxu1 %v8588_v54 }
0x1035   :  { %v3164_v3 = vsel %vm323_vm0, %v3144_v1, 0.0 }
0x1036   :  { %3165 = vadd.xlane.f32.xlu1 %v3164_v3 }
0x1038   :  { %3168 = vadd.xlane.f32.xlu0 %v3167_v6 }
0x103a   :  { %3171 = vadd.xlane.f32.xlu1 %v3170_v7 }
0x10b9   :  { %v3151_v8 = vpop.xlane.xlu0 %3150 }
0x10ba   :  { %v3174_v9 = vmul.f32 0.03125, %v3151_v8 }
0x10bb   :  { %v3154_v34 = vpop.xlane.xlu1 %3153 }
0x10bc   :  { %v10101_v36 = vsub.f32 %v3139_v46, %v3174_v9  ;;  %v3175_v37 = vmul.f32 0.03125, %v3154_v34 }
0x10bd   :  { %v3157_v11 = vpop.xlane.xlu0 %3156 }
0x10be   :  { %v10103_v13 = vsub.f32 %v3140_v49, %v3175_v37  ;;  %v3176_v15 = vmul.f32 0.03125, %v3157_v11  ;;  %v3190_v41 = vmul.f32 %v10101_v36, %v10101_v36 }
0x10bf   :  { %v3160_v44 = vpop.xlane.xlu1 %3159 }
0x10c0   :  { %v10107_v45 = vsub.f32 %v3141_v51, %v3176_v15  ;;  %v3177_v14 = vmul.f32 0.03125, %v3160_v44  ;;  %v3198_v17 = vsel %vm323_vm0, %v3190_v41, 0.0  ;;  %v3191_v18 = vmul.f32 %v10103_v13, %v10103_v13  ;;  %v7234_v41 = vld [vmem:[#allocation17] ss:$0 sm:$0xff] }
0x10c1   :  { %3199 = vadd.xlane.f32.xlu0 %v3198_v17  ;;  %v3163_v19 = vpop.xlane.xlu0 %3162 }
0x10c2   :  { %v10112_v20 = vsub.f32 %v3142_v55, %v3177_v14  ;;  %v3178_v21 = vmul.f32 0.03125, %v3163_v19  ;;  %v3201_v16 = vsel %vm323_vm0, %v3191_v18, 0.0  ;;  %v3192_v29 = vmul.f32 %v10107_v45, %v10107_v45  ;;  %v8589_v55 = vld [vmem:[#allocation23] sm:$0xff]  }
0x10c3   :  { %3202 = vadd.xlane.f32.xlu1 %v3201_v16  ;;  %v3166_v22 = vpop.xlane.xlu1 %3165  ;;  %8079 = vmatprep.subr.bf16.mxu0 %v8589_v55 }
0x10c4   :  { %v10117_v28 = vsub.f32 %v3143_v63, %v3178_v21  ;;  %v3179_v40 = vmul.f32 0.03125, %v3166_v22  ;;  %v3204_v42 = vsel %vm323_vm0, %v3192_v29, 0.0  ;;  %v3193_v43 = vmul.f32 %v10112_v20, %v10112_v20  ;;  %8080 = vmatpush3.bf16.msra.mxu0 %v8589_v55  ;;  %v7235_v22 = vld [vmem:[#allocation19] ss:$0 sm:$0xff] }
0x10c5   :  { %3205 = vadd.xlane.f32.xlu0 %v3204_v42  ;;  %v3169_v38 = vpop.xlane.xlu0 %3168  ;;  %8081 = vmatprep.subr.bf16.mxu0 %v8590_v5 }
0x10c6   :  { %v10122_v23 = vsub.f32 %v3144_v1, %v3179_v40  ;;  %v3180_v24 = vmul.f32 0.03125, %v3169_v38  ;;  %v3207_v35 = vsel %vm323_vm0, %v3193_v43, 0.0  ;;  %v3194_v25 = vmul.f32 %v10117_v28, %v10117_v28 }
0x10c7   :  { %3208 = vadd.xlane.f32.xlu1 %v3207_v35  ;;  %v3172_v26 = vpop.xlane.xlu1 %3171 }
0x10c8   :  { %v10127_v27 = vsub.f32 %v3145_v39, %v3180_v24  ;;  %v3181_v30 = vmul.f32 0.03125, %v3172_v26  ;;  %v3210_v33 = vsel %vm323_vm0, %v3194_v25, 0.0  ;;  %v3195_v46 = vmul.f32 %v10122_v23, %v10122_v23  ;;  %8082 = vmatpush3.bf16.msra.mxu0 %v8590_v5 }
0x10c9   :  { %3211 = vadd.xlane.f32.xlu0 %v3210_v33  ;;  %8083 = vmatprep.subr.bf16.mxu0 %v8591_v56 }
0x10ca   :  { %v10132_v47 = vsub.f32 %v3146_v4, %v3181_v30  ;;  %v3213_v48 = vsel %vm323_vm0, %v3195_v46, 0.0  ;;  %v3196_v49 = vmul.f32 %v10127_v27, %v10127_v27 }
0x10cb   :  { %3214 = vadd.xlane.f32.xlu1 %v3213_v48 }
0x10cc   :  { %v3216_v50 = vsel %vm323_vm0, %v3196_v49, 0.0  ;;  %v3197_v51 = vmul.f32 %v10132_v47, %v10132_v47  ;;  %8084 = vmatpush3.bf16.msra.mxu0 %v8591_v56 }
0x10cd   :  { %3217 = vadd.xlane.f32.xlu0 %v3216_v50  ;;  %8085 = vmatprep.subr.bf16.mxu0 %v8592_v57 }
0x10ce   :  { %v3219_v52 = vsel %vm323_vm0, %v3197_v51, 0.0 }
0x10cf   :  { %3220 = vadd.xlane.f32.xlu1 %v3219_v52 }
0x10d0   :  { %8086 = vmatpush3.bf16.msra.mxu0 %v8592_v57 }
0x10d1   :  { %8087 = vmatprep.subr.bf16.mxu0 %v8593_v58 }
0x10d4   :  { %8088 = vmatpush3.bf16.msra.mxu0 %v8593_v58 }
0x10d5   :  { %8089 = vmatprep.subr.bf16.mxu0 %v8594_v59 }
0x10d8   :  { %8090 = vmatpush3.bf16.msra.mxu0 %v8594_v59  ;;  %v8595_v59 = vld [vmem:[#allocation23 + $0x30] sm:$0xff]  }
0x10d9   :  { %8091 = vmatprep.subr.bf16.mxu0 %v8595_v59 }
0x10dc   :  { %8092 = vmatpush3.bf16.msra.mxu0 %v8595_v59 }
0x114e   :  { %v3200_v60 = vpop.xlane.xlu0 %3199 }
0x114f   :  { %v3222_v61 = vmul.f32 0.03125, %v3200_v60  ;;  %v7236_v60 = vld [vmem:[#allocation22] ss:$0 sm:$0xff] }
0x1150   :  { %v3203_v62 = vpop.xlane.xlu1 %3202 }
0x1151   :  { %v3230_v31 = vadd.f32 1e-05, %v3222_v61  ;;  %v3223_v32 = vmul.f32 0.03125, %v3203_v62 }
0x1152   :  { %v3206_v63 = vpop.xlane.xlu0 %3205 }
0x1153   :  { %8759 = vrsqrt.f32 %v3230_v31  ;;  %v3231_v0 = vadd.f32 1e-05, %v3223_v32  ;;  %v3224_v10 = vmul.f32 0.03125, %v3206_v63 }
0x1154   :  { %v3209_v1 = vpop.xlane.xlu1 %3208 }
0x1155   :  { %8761 = vrsqrt.f32 %v3231_v0  ;;  %v3232_v2 = vadd.f32 1e-05, %v3224_v10  ;;  %v3225_v39 = vmul.f32 0.03125, %v3209_v1 }
0x1156   :  { %v3212_v3 = vpop.xlane.xlu0 %3211 }
0x1157   :  { %8763 = vrsqrt.f32 %v3232_v2  ;;  %v3233_v12 = vadd.f32 1e-05, %v3225_v39  ;;  %v3226_v4 = vmul.f32 0.03125, %v3212_v3 }
0x1158   :  { %v3215_v6 = vpop.xlane.xlu1 %3214 }
0x1159   :  { %8765 = vrsqrt.f32 %v3233_v12  ;;  %v3234_v7 = vadd.f32 1e-05, %v3226_v4  ;;  %v3227_v8 = vmul.f32 0.03125, %v3215_v6 }
0x115a   :  { %v3218_v9 = vpop.xlane.xlu0 %3217 }
0x115b   :  { %8767 = vrsqrt.f32 %v3234_v7  ;;  %v3235_v34 = vadd.f32 1e-05, %v3227_v8  ;;  %v3228_v37 = vmul.f32 0.03125, %v3218_v9 }
0x115c   :  { %v3221_v11 = vpop.xlane.xlu1 %3220 }
0x115d   :  { %v8760_v15 = vpop.eup %8759  ;;  %8769 = vrsqrt.f32 %v3235_v34  ;;  %v3236_v44 = vadd.f32 1e-05, %v3228_v37  ;;  %v3229_v14 = vmul.f32 0.03125, %v3221_v11 }
0x115e   :  { %v3246_v17 = vmul.f32 %v8760_v15, %v10101_v36 }
0x115f   :  { %v8762_v18 = vpop.eup %8761  ;;  %8771 = vrsqrt.f32 %v3236_v44  ;;  %v3237_v19 = vadd.f32 1e-05, %v3229_v14 }
0x1160   :  { %v3247_v21 = vmul.f32 %v8762_v18, %v10103_v13  ;;  %v3260_v16 = vmul.f32 %v7234_v41, %v3246_v17 }
0x1161   :  { %v8764_v29 = vpop.eup %8763  ;;  %8773 = vrsqrt.f32 %v3237_v19 }
0x1162   :  { %v3248_v40 = vmul.f32 %v8764_v29, %v10107_v45  ;;  %v3261_v42 = vmul.f32 %v7234_v41, %v3247_v21  ;;  %v10145_v35 = vadd.f32 %v7235_v22, %v3260_v16  ;;  %v7243_v16 = vld [vmem:[#allocation25] ss:$0 sm:$0xff] }
0x1163   :  { %v8766_v43 = vpop.eup %8765 }
0x1164   :  { %v3262_v38 = vmul.f32 %v7234_v41, %v3248_v40  ;;  %v3249_v24 = vmul.f32 %v8766_v43, %v10112_v20  ;;  %v10147_v25 = vadd.f32 %v7235_v22, %v3261_v42 }
0x1165   :  { %v8768_v36 = vpop.eup %8767 }
0x1166   :  { %v3263_v26 = vmul.f32 %v7234_v41, %v3249_v24  ;;  %v3282_v13 = vpack.c.bf16 %v10147_v25, %v10145_v35  ;;  %v3250_v30 = vmul.f32 %v8768_v36, %v10117_v28  ;;  %v10153_v45 = vadd.f32 %v7235_v22, %v3262_v38 }
0x1167   :  { %v8770_v33 = vpop.eup %8769 }
0x1168   :  { %8071 = vmatprep.mubr.msk.bf16.mxu1 %vm323_vm0, %v3282_v13  ;;  %v10155_v46 = vadd.f32 %v7235_v22, %v3263_v26  ;;  %v3251_v20 = vmul.f32 %v8770_v33, %v10122_v23  ;;  %v3264_v48 = vmul.f32 %v7234_v41, %v3250_v30 }
0x1169   :  { %v8772_v49 = vpop.eup %8771 }
0x116a   :  { %v3283_v50 = vpack.c.bf16 %v10155_v46, %v10153_v45  ;;  %v3265_v51 = vmul.f32 %v7234_v41, %v3251_v20  ;;  %v3252_v52 = vmul.f32 %v8772_v49, %v10127_v27  ;;  %v10162_v28 = vadd.f32 %v7235_v22, %v3264_v48 }
0x116b   :  { %v8774_v53 = vpop.eup %8773 }
0x116c   :  { %8072 = vmatmul.mubr.msk.bf16.vlgmr.msra.gmra.mrb[100].mxu1 %vm323_vm0, %v3283_v50  ;;  %v10164_v54 = vadd.f32 %v7235_v22, %v3265_v51  ;;  %v3253_v55 = vmul.f32 %v8774_v53, %v10132_v47  ;;  %v3266_v5 = vmul.f32 %v7234_v41, %v3252_v52  ;;  %v8596_v47 = vld [vmem:[#allocation23 + $0x38] sm:$0xff]  }
0x116d   :  { %8093 = vmatprep.subr.bf16.mxu0 %v8596_v47 }
0x116e   :  { %v3284_v23 = vpack.c.bf16 %v10164_v54, %v10162_v28  ;;  %v3267_v56 = vmul.f32 %v7234_v41, %v3253_v55  ;;  %v10170_v57 = vadd.f32 %v7235_v22, %v3266_v5  ;;  %8094 = vmatpush3.bf16.msra.mxu0 %v8596_v47 }
0x1170   :  { %8075 = vmatprep.mubr.msk.bf16.mxu1 %vm323_vm0, %v3284_v23  ;;  %v10172_v58 = vadd.f32 %v7235_v22, %v3267_v56 }
0x1172   :  { %v3285_v27 = vpack.c.bf16 %v10172_v58, %v10170_v57 }
0x1174   :  { %8076 = vmatmul.mubr.msk.bf16.gmra.mrb[104].mxu1 %vm323_vm0, %v3285_v27 }
0x123f   :  { %v8073_v61 = vpop.f32.mrb[100].mxu1 }
0x1240   :  { %v3364_v62 = vadd.f32 %v8073_v61, %v7236_v60  ;;  %v3355_v31 = vpop.f32.mrb[101].mxu1 }
0x1241   :  { %v3356_v32 = vadd.f32 %v7236_v60, %v3355_v31  ;;  %v8074_v63 = vpop.f32.mrb[102].mxu1 }
0x1242   :  { %v3367_v0 = vadd.f32 %v8074_v63, %v7236_v60  ;;  %v3358_v10 = vpop.f32.mrb[103].mxu1  ;;  %v3388_v2 = vmax.f32 %v3364_v62, 0.0 }
0x1243   :  { %v3359_v1 = vadd.f32 %v7236_v60, %v3358_v10  ;;  %v3386_v3 = vmax.f32 %v3356_v32, 0.0 }
0x1244   :  { %v3389_v39 = vmax.f32 %v3367_v0, 0.0 }
0x1245   :  { %v3387_v12 = vmax.f32 %v3359_v1, 0.0 }
0x1246   :  { %v3395_v4 = vpack.c.bf16 %v3389_v39, %v3388_v2 }
0x1247   :  { %v3394_v6 = vpack.c.bf16 %v3387_v12, %v3386_v3  ;;  %v8077_v7 = vpop.f32.mrb[104].mxu1 }
0x1248   :  { %v3380_v8 = vadd.f32 %v8077_v7, %v7236_v60  ;;  %v3371_v9 = vpop.f32.mrb[105].mxu1 }
0x1249   :  { %v3372_v34 = vadd.f32 %v7236_v60, %v3371_v9  ;;  %v8078_v37 = vpop.f32.mrb[106].mxu1  ;;  %8095 = vmatprep.mubr.bf16.mxu0 %v3394_v6 }
0x124a   :  { %v3383_v11 = vadd.f32 %v8078_v37, %v7236_v60  ;;  %v3374_v15 = vpop.f32.mrb[107].mxu1  ;;  %8096 = vmatmul.mubr.bf16.vlgmr.msra.gmra.mrb[68].mxu0 %v3395_v4  ;;  %v3392_v44 = vmax.f32 %v3380_v8, 0.0 }
0x124b   :  { %v3375_v41 = vadd.f32 %v7236_v60, %v3374_v15  ;;  %v3390_v17 = vmax.f32 %v3372_v34, 0.0 }
0x124c   :  { %v3393_v14 = vmax.f32 %v3383_v11, 0.0 }
0x124d   :  { %v3391_v18 = vmax.f32 %v3375_v41, 0.0 }
0x124e   :  { %v3397_v19 = vpack.c.bf16 %v3393_v14, %v3392_v44 }
0x124f   :  { %v3396_v21 = vpack.c.bf16 %v3391_v18, %v3390_v17 }
0x1251   :  { %8099 = vmatprep.mubr.bf16.mxu0 %v3396_v21 }
0x1252   :  { %8100 = vmatmul.mubr.bf16.gmra.mrb[72].mxu0 %v3397_v19 }
0x131d   :  { %v8097_v29 = vpop.f32.mrb[68].mxu0 }
0x131e   :  { %v3503_v22 = vpop.f32.mrb[69].mxu0  ;;  %v3512_v40 = vadd.f32 %v8097_v29, %v7243_v16 }
0x131f   :  { %v3504_v42 = vadd.f32 %v7243_v16, %v3503_v22  ;;  %v8098_v43 = vpop.f32.mrb[70].mxu0 }
0x1320   :  { %v3506_v38 = vpop.f32.mrb[71].mxu0  ;;  %v3515_v24 = vadd.f32 %v8098_v43, %v7243_v16  ;;  %v3536_v33 = vadd.f32 %v3512_v40, %v10153_v45 }
0x1321   :  { %v3507_v36 = vadd.f32 %v7243_v16, %v3506_v38  ;;  %v3534_v26 = vadd.f32 %v3504_v42, %v10145_v35 }
0x1322   :  { %v3537_v49 = vadd.f32 %v3515_v24, %v10155_v46  ;;  %v3550_v55 = vsel %vm323_vm0, %v3536_v33, 0.0 }
0x1323   :  { %v3544_v13 = vsel %vm323_vm0, %v3534_v26, 0.0  ;;  %v3535_v30 = vadd.f32 %v3507_v36, %v10147_v25 }
0x1324   :  { %3545 = vadd.xlane.f32.xlu0 %v3544_v13  ;;  %v3553_v25 = vsel %vm323_vm0, %v3537_v49, 0.0  ;;  %v8599_v13 = vld [vmem:[#allocation8 + $0x40] sm:$0xff]  }
0x1325   :  { %v8101_v20 = vpop.f32.mrb[72].mxu0  ;;  %v3547_v48 = vsel %vm323_vm0, %v3535_v30, 0.0  ;;  %8127 = vmatprep.subr.bf16.mxu0 %v8599_v13 }
0x1326   :  { %3548 = vadd.xlane.f32.xlu1 %v3547_v48  ;;  %v3519_v50 = vpop.f32.mrb[73].mxu0  ;;  %v3528_v51 = vadd.f32 %v8101_v20, %v7243_v16  ;;  %8128 = vmatpush3.bf16.msra.mxu0 %v8599_v13  ;;  %v10233_v20 = vld [vmem:[#allocation7 + $0x40] sm:$0xff]  }
0x1327   :  { %v3520_v52 = vadd.f32 %v7243_v16, %v3519_v50  ;;  %v8102_v53 = vpop.f32.mrb[74].mxu0 }
0x1328   :  { %3551 = vadd.xlane.f32.xlu0 %v3550_v55  ;;  %v3522_v35 = vpop.f32.mrb[75].mxu0  ;;  %v3531_v5 = vadd.f32 %v8102_v53, %v7243_v16  ;;  %v3540_v27 = vadd.f32 %v3528_v51, %v10170_v57 }
0x1329   :  { %v3523_v23 = vadd.f32 %v7243_v16, %v3522_v35  ;;  %v3538_v45 = vadd.f32 %v3520_v52, %v10162_v28 }
0x132a   :  { %3554 = vadd.xlane.f32.xlu1 %v3553_v25  ;;  %v3541_v47 = vadd.f32 %v3531_v5, %v10172_v58  ;;  %v3562_v60 = vsel %vm323_vm0, %v3540_v27, 0.0 }
0x132b   :  { %v3556_v56 = vsel %vm323_vm0, %v3538_v45, 0.0  ;;  %v3539_v46 = vadd.f32 %v3523_v23, %v10164_v54 }
0x132c   :  { %3557 = vadd.xlane.f32.xlu0 %v3556_v56  ;;  %v3565_v61 = vsel %vm323_vm0, %v3541_v47, 0.0 }
0x132d   :  { %v3559_v59 = vsel %vm323_vm0, %v3539_v46, 0.0 }
0x132e   :  { %3560 = vadd.xlane.f32.xlu1 %v3559_v59 }
0x1330   :  { %3563 = vadd.xlane.f32.xlu0 %v3562_v60 }
0x1332   :  { %3566 = vadd.xlane.f32.xlu1 %v3565_v61 }
0x13b1   :  { %v3546_v28 = vpop.xlane.xlu0 %3545 }
0x13b2   :  { %v3568_v62 = vmul.f32 0.03125, %v3546_v28 }
0x13b3   :  { %v3549_v31 = vpop.xlane.xlu1 %3548 }
0x13b4   :  { %v10193_v32 = vsub.f32 %v3534_v26, %v3568_v62  ;;  %v3569_v54 = vmul.f32 0.03125, %v3549_v31  ;;  %v8597_v26 = vld [vmem:[#allocation5 + $0x40] sm:$0xff]  }
0x13b5   :  { %v3552_v63 = vpop.xlane.xlu0 %3551  ;;  %8103 = vmatprep.subr.bf16.mxu1 %v8597_v26 }
0x13b6   :  { %v10195_v57 = vsub.f32 %v3535_v30, %v3569_v54  ;;  %v3570_v0 = vmul.f32 0.03125, %v3552_v63  ;;  %v3584_v58 = vmul.f32 %v10193_v32, %v10193_v32  ;;  %8104 = vmatpush3.bf16.msra.mxu1 %v8597_v26  ;;  %v8598_v30 = vld [vmem:[#allocation5 + $0x48] sm:$0xff]   ;;  %v7252_v54 = vld [vmem:[#allocation26] ss:$0 sm:$0xff] }
0x13b7   :  { %v3555_v10 = vpop.xlane.xlu1 %3554  ;;  %8105 = vmatprep.subr.bf16.mxu1 %v8598_v30 }
0x13b8   :  { %v10199_v1 = vsub.f32 %v3536_v33, %v3570_v0  ;;  %v3571_v2 = vmul.f32 0.03125, %v3555_v10  ;;  %v3592_v39 = vsel %vm323_vm0, %v3584_v58, 0.0  ;;  %v3585_v3 = vmul.f32 %v10195_v57, %v10195_v57  ;;  %v8600_v33 = vld [vmem:[#allocation8 + $0x48] sm:$0xff]  }
0x13b9   :  { %3593 = vadd.xlane.f32.xlu0 %v3592_v39  ;;  %v3558_v12 = vpop.xlane.xlu0 %3557  ;;  %8129 = vmatprep.subr.bf16.mxu0 %v8600_v33 }
0x13ba   :  { %v10204_v4 = vsub.f32 %v3537_v49, %v3571_v2  ;;  %v3572_v6 = vmul.f32 0.03125, %v3558_v12  ;;  %v3595_v7 = vsel %vm323_vm0, %v3585_v3, 0.0  ;;  %v3586_v8 = vmul.f32 %v10199_v1, %v10199_v1  ;;  %8106 = vmatpush3.bf16.msra.mxu1 %v8598_v30  ;;  %8130 = vmatpush3.bf16.msra.mxu0 %v8600_v33 }
0x13bb   :  { %3596 = vadd.xlane.f32.xlu1 %v3595_v7  ;;  %v3561_v9 = vpop.xlane.xlu1 %3560  ;;  %8115 = vmatprep.subr.bf16.mxu1 %v10233_v20 }
0x13bc   :  { %v10209_v34 = vsub.f32 %v3538_v45, %v3572_v6  ;;  %v3573_v37 = vmul.f32 0.03125, %v3561_v9  ;;  %v3598_v11 = vsel %vm323_vm0, %v3586_v8, 0.0  ;;  %v3587_v15 = vmul.f32 %v10204_v4, %v10204_v4  ;;  %v7253_v6 = vld [vmem:[#allocation28] ss:$0 sm:$0xff] }
0x13bd   :  { %3599 = vadd.xlane.f32.xlu0 %v3598_v11  ;;  %v3564_v41 = vpop.xlane.xlu0 %3563 }
0x13be   :  { %v10214_v44 = vsub.f32 %v3539_v46, %v3573_v37  ;;  %v3574_v14 = vmul.f32 0.03125, %v3564_v41  ;;  %v3601_v17 = vsel %vm323_vm0, %v3587_v15, 0.0  ;;  %v3588_v18 = vmul.f32 %v10209_v34, %v10209_v34 }
0x13bf   :  { %3602 = vadd.xlane.f32.xlu1 %v3601_v17  ;;  %v3567_v19 = vpop.xlane.xlu1 %3566 }
0x13c0   :  { %v10219_v21 = vsub.f32 %v3540_v27, %v3574_v14  ;;  %v3575_v16 = vmul.f32 0.03125, %v3567_v19  ;;  %v3604_v29 = vsel %vm323_vm0, %v3588_v18, 0.0  ;;  %v3589_v22 = vmul.f32 %v10214_v44, %v10214_v44 }
0x13c1   :  { %3605 = vadd.xlane.f32.xlu0 %v3604_v29 }
0x13c2   :  { %v10224_v40 = vsub.f32 %v3541_v47, %v3575_v16  ;;  %v3607_v42 = vsel %vm323_vm0, %v3589_v22, 0.0  ;;  %v3590_v43 = vmul.f32 %v10219_v21, %v10219_v21 }
0x13c3   :  { %3608 = vadd.xlane.f32.xlu1 %v3607_v42 }
0x13c4   :  { %v3610_v38 = vsel %vm323_vm0, %v3590_v43, 0.0  ;;  %v3591_v24 = vmul.f32 %v10224_v40, %v10224_v40  ;;  %v8602_v43 = vld [vmem:[#allocation7 + $0x48] sm:$0xff]  }
0x13c5   :  { %3611 = vadd.xlane.f32.xlu0 %v3610_v38 }
0x13c6   :  { %v3613_v36 = vsel %vm323_vm0, %v3591_v24, 0.0 }
0x13c7   :  { %3614 = vadd.xlane.f32.xlu1 %v3613_v36 }
0x1446   :  { %v3594_v48 = vpop.xlane.xlu0 %3593 }
0x1447   :  { %v3616_v49 = vmul.f32 0.03125, %v3594_v48 }
0x1448   :  { %v3597_v50 = vpop.xlane.xlu1 %3596 }
0x1449   :  { %v3624_v51 = vadd.f32 1e-05, %v3616_v49  ;;  %v3617_v52 = vmul.f32 0.03125, %v3597_v50  ;;  %v7268_v50 = vld [vmem:[#allocation13 + $0x4] ss:$0 sm:$0xff] }
0x144a   :  { %v3600_v53 = vpop.xlane.xlu0 %3599 }
0x144b   :  { %8775 = vrsqrt.f32 %v3624_v51  ;;  %v3625_v55 = vadd.f32 1e-05, %v3617_v52  ;;  %v3618_v35 = vmul.f32 0.03125, %v3600_v53 }
0x144c   :  { %v3603_v5 = vpop.xlane.xlu1 %3602 }
0x144d   :  { %8777 = vrsqrt.f32 %v3625_v55  ;;  %v3626_v23 = vadd.f32 1e-05, %v3618_v35  ;;  %v3619_v25 = vmul.f32 0.03125, %v3603_v5 }
0x144e   :  { %v3606_v45 = vpop.xlane.xlu0 %3605 }
0x144f   :  { %8779 = vrsqrt.f32 %v3626_v23  ;;  %v3627_v56 = vadd.f32 1e-05, %v3619_v25  ;;  %v3620_v46 = vmul.f32 0.03125, %v3606_v45 }
0x1450   :  { %v3609_v27 = vpop.xlane.xlu1 %3608 }
0x1451   :  { %8781 = vrsqrt.f32 %v3627_v56  ;;  %v3628_v59 = vadd.f32 1e-05, %v3620_v46  ;;  %v3621_v47 = vmul.f32 0.03125, %v3609_v27 }
0x1452   :  { %v3612_v60 = vpop.xlane.xlu0 %3611 }
0x1453   :  { %8783 = vrsqrt.f32 %v3628_v59  ;;  %v3629_v61 = vadd.f32 1e-05, %v3621_v47  ;;  %v3622_v28 = vmul.f32 0.03125, %v3612_v60 }
0x1454   :  { %v3615_v62 = vpop.xlane.xlu1 %3614 }
0x1455   :  { %v8776_v31 = vpop.eup %8775  ;;  %8785 = vrsqrt.f32 %v3629_v61  ;;  %v3630_v63 = vadd.f32 1e-05, %v3622_v28  ;;  %v3623_v0 = vmul.f32 0.03125, %v3615_v62 }
0x1456   :  { %v3640_v58 = vmul.f32 %v8776_v31, %v10193_v32 }
0x1457   :  { %v8778_v10 = vpop.eup %8777  ;;  %8787 = vrsqrt.f32 %v3630_v63  ;;  %v3631_v2 = vadd.f32 1e-05, %v3623_v0 }
0x1458   :  { %v3654_v39 = vmul.f32 %v7252_v54, %v3640_v58  ;;  %v3641_v3 = vmul.f32 %v8778_v10, %v10195_v57 }
0x1459   :  { %v8780_v12 = vpop.eup %8779  ;;  %8789 = vrsqrt.f32 %v3631_v2 }
0x145a   :  { %v3655_v7 = vmul.f32 %v7252_v54, %v3641_v3  ;;  %v3642_v8 = vmul.f32 %v8780_v12, %v10199_v1  ;;  %v10239_v37 = vadd.f32 %v7253_v6, %v3654_v39 }
0x145b   :  { %v8782_v9 = vpop.eup %8781 }
0x145c   :  { %v10241_v11 = vadd.f32 %v7253_v6, %v3655_v7  ;;  %v3656_v15 = vmul.f32 %v7252_v54, %v3642_v8  ;;  %v3643_v32 = vmul.f32 %v8782_v9, %v10204_v4 }
0x145d   :  { %v8784_v41 = vpop.eup %8783 }
0x145e   :  { %v10246_v14 = vpack.c.bf16 %v10241_v11, %v10239_v37  ;;  %v3657_v57 = vmul.f32 %v7252_v54, %v3643_v32  ;;  %v3644_v17 = vmul.f32 %v8784_v41, %v10209_v34  ;;  %v10249_v19 = vadd.f32 %v7253_v6, %v3656_v15 }
0x145f   :  { %v8786_v18 = vpop.eup %8785 }
0x1460   :  { %v10251_v1 = vadd.f32 %v7253_v6, %v3657_v57  ;;  %v3658_v16 = vmul.f32 %v7252_v54, %v3644_v17  ;;  %v3645_v29 = vmul.f32 %v8786_v18, %v10214_v44  ;;  %8107 = vmatprep.mubr.msk.bf16.mxu1 %vm323_vm0, %v10246_v14  ;;  %8131 = vmatprep.mubr.msk.bf16.mxu0 %vm323_vm0, %v10246_v14 }
0x1461   :  { %v8788_v4 = vpop.eup %8787 }
0x1462   :  { %v10260_v22 = vpack.c.bf16 %v10251_v1, %v10249_v19  ;;  %v3659_v34 = vmul.f32 %v7252_v54, %v3645_v29  ;;  %v3646_v42 = vmul.f32 %v8788_v4, %v10219_v21  ;;  %v10263_v24 = vadd.f32 %v7253_v6, %v3658_v16 }
0x1463   :  { %v8790_v38 = vpop.eup %8789 }
0x1464   :  { %v10265_v36 = vadd.f32 %v7253_v6, %v3659_v34  ;;  %v3660_v44 = vmul.f32 %v7252_v54, %v3646_v42  ;;  %v3647_v26 = vmul.f32 %v8790_v38, %v10224_v40  ;;  %8108 = vmatmul.mubr.msk.bf16.vlgmr.msra.gmra.mrb[108].mxu1 %vm323_vm0, %v10260_v22  ;;  %8132 = vmatmul.mubr.msk.bf16.vlgmr.msra.gmra.mrb[76].mxu0 %vm323_vm0, %v10260_v22 }
0x1465   :  { %8116 = vmatpush3.bf16.msra.mxu1 %v10233_v20  ;;  %v7254_v20 = vld [vmem:[#allocation10 + $0x4] ss:$0 sm:$0xff] }
0x1466   :  { %v10275_v21 = vpack.c.bf16 %v10265_v36, %v10263_v24  ;;  %v3661_v13 = vmul.f32 %v7252_v54, %v3647_v26  ;;  %8117 = vmatprep.subr.bf16.mxu1 %v8602_v43  ;;  %v10277_v30 = vadd.f32 %v7253_v6, %v3660_v44 }
0x1468   :  { %v10279_v33 = vadd.f32 %v7253_v6, %v3661_v13  ;;  %8111 = vmatprep.mubr.msk.bf16.mxu1 %vm323_vm0, %v10275_v21  ;;  %8135 = vmatprep.mubr.msk.bf16.mxu0 %vm323_vm0, %v10275_v21  ;;  %v7261_v13 = vld [vmem:[#allocation11 + $0x4] ss:$0 sm:$0xff] }
0x1469   :  { %8118 = vmatpush3.bf16.msra.mxu1 %v8602_v43 }
0x146a   :  { %v10287_v40 = vpack.c.bf16 %v10279_v33, %v10277_v30 }
0x146c   :  { %8112 = vmatmul.mubr.msk.bf16.gmra.mrb[112].mxu1 %vm323_vm0, %v10287_v40  ;;  %8136 = vmatmul.mubr.msk.bf16.gmra.mrb[80].mxu0 %vm323_vm0, %v10287_v40 }
0x146d   :  { %8119 = vmatprep.mubr.msk.bf16.mxu1 %vm323_vm0, %v10246_v14 }
0x1474   :  { %8120 = vmatmul.mubr.msk.bf16.vlgmr.msra.gmra.mrb[116].mxu1 %vm323_vm0, %v10260_v22 }
0x1475   :  { %8123 = vmatprep.mubr.msk.bf16.mxu1 %vm323_vm0, %v10275_v21 }
0x147c   :  { %8124 = vmatmul.mubr.msk.bf16.gmra.mrb[120].mxu1 %vm323_vm0, %v10287_v40 }
0x1537   :  { %v8109_v48 = vpop.f32.mrb[108].mxu1  ;;  %v8133_v49 = vpop.f32.mrb[76].mxu0 }
0x1538   :  { %v3760_v51 = vadd.f32 %v8109_v48, %v7254_v20  ;;  %v3751_v52 = vpop.f32.mrb[109].mxu1  ;;  %v3939_v53 = vpop.f32.mrb[77].mxu0  ;;  %v3948_v23 = vadd.f32 %v8133_v49, %v7268_v50 }
0x1539   :  { %v3752_v55 = vadd.f32 %v7254_v20, %v3751_v52  ;;  %v8110_v35 = vpop.f32.mrb[110].mxu1  ;;  %v8134_v5 = vpop.f32.mrb[78].mxu0  ;;  %v3940_v27 = vadd.f32 %v7268_v50, %v3939_v53 }
0x153a   :  { %v3763_v25 = vadd.f32 %v8110_v35, %v7254_v20  ;;  %v3951_v45 = vadd.f32 %v8134_v5, %v7268_v50  ;;  %v3754_v56 = vpop.f32.mrb[111].mxu1  ;;  %v3942_v46 = vpop.f32.mrb[79].mxu0  ;;  %v10301_v60 = vmul.f32 0.35355338, %v3760_v51 }
0x153b   :  { %v3755_v59 = vadd.f32 %v7254_v20, %v3754_v56  ;;  %v3943_v47 = vadd.f32 %v7268_v50, %v3942_v46  ;;  %v3782_v62 = vmul.f32 0.35355338, %v3752_v55 }
0x153c   :  { %v10303_v61 = vmul.f32 0.35355338, %v3763_v25  ;;  %v10305_v28 = vpack.c.bf16 %v3951_v45, %v3948_v23 }
0x153d   :  { %v3783_v31 = vmul.f32 0.35355338, %v3755_v59  ;;  %v10307_v54 = vpack.c.bf16 %v3943_v47, %v3940_v27 }
0x153e   :  { %v3971_v63 = vpack.c.bf16 %v10303_v61, %v10301_v60 }
0x153f   :  { %v3970_v0 = vpack.c.bf16 %v3783_v31, %v3782_v62  ;;  %v8113_v58 = vpop.f32.mrb[112].mxu1  ;;  %v8137_v10 = vpop.f32.mrb[80].mxu0 }
0x1540   :  { %v3776_v2 = vadd.f32 %v8113_v58, %v7254_v20  ;;  %v3964_v39 = vadd.f32 %v8137_v10, %v7268_v50  ;;  %v3767_v3 = vpop.f32.mrb[113].mxu1  ;;  %v3955_v12 = vpop.f32.mrb[81].mxu0  ;;  %v8604_v10 = vld [vmem:[#allocation5 + $0x58] sm:$0xff]  }
0x1541   :  { %v3768_v6 = vadd.f32 %v7254_v20, %v3767_v3  ;;  %v8114_v7 = vpop.f32.mrb[114].mxu1  ;;  %v8138_v8 = vpop.f32.mrb[82].mxu0  ;;  %8143 = vmatprep.mubr.msk.bf16.mxu1 %vm597_vm1, %v3970_v0  ;;  %v3956_v57 = vadd.f32 %v7268_v50, %v3955_v12  ;;  %v8603_v0 = vld [vmem:[#allocation5 + $0x50] sm:$0xff]  }
0x1542   :  { %v3779_v9 = vadd.f32 %v8114_v7, %v7254_v20  ;;  %v3967_v15 = vadd.f32 %v8138_v8, %v7268_v50  ;;  %v3770_v32 = vpop.f32.mrb[115].mxu1  ;;  %v3958_v41 = vpop.f32.mrb[83].mxu0  ;;  %v3788_v16 = vmul.f32 0.35355338, %v3776_v2  ;;  %v8606_v2 = vld [vmem:[#allocation8 + $0x58] sm:$0xff]  }
0x1543   :  { %v3771_v17 = vadd.f32 %v7254_v20, %v3770_v32  ;;  %v3959_v18 = vadd.f32 %v7268_v50, %v3958_v41  ;;  %v3786_v34 = vmul.f32 0.35355338, %v3768_v6 }
0x1544   :  { %v3789_v29 = vmul.f32 0.35355338, %v3779_v9  ;;  %v10312_v4 = vpack.c.bf16 %v3967_v15, %v3964_v39 }
0x1545   :  { %v3787_v42 = vmul.f32 0.35355338, %v3771_v17  ;;  %v10314_v43 = vpack.c.bf16 %v3959_v18, %v3956_v57 }
0x1546   :  { %v3973_v38 = vpack.c.bf16 %v3789_v29, %v3788_v16  ;;  %v7283_v16 = vld [vmem:[#allocation10 + $0x5] ss:$0 sm:$0xff] }
0x1547   :  { %v3972_v44 = vpack.c.bf16 %v3787_v42, %v3786_v34  ;;  %v8121_v26 = vpop.f32.mrb[116].mxu1 }
0x1548   :  { %v3849_v48 = vpop.f32.mrb[117].mxu1  ;;  %v3858_v51 = vadd.f32 %v8121_v26, %v7261_v13 }
0x1549   :  { %v8122_v49 = vpop.f32.mrb[118].mxu1  ;;  %8151 = vmatprep.mubr.msk.bf16.mxu0 %vm597_vm1, %v3972_v44  ;;  %v3850_v50 = vadd.f32 %v7261_v13, %v3849_v48 }
0x154a   :  { %v3861_v52 = vadd.f32 %v8122_v49, %v7261_v13  ;;  %v3852_v20 = vpop.f32.mrb[119].mxu1 }
0x154b   :  { %v3853_v53 = vadd.f32 %v7261_v13, %v3852_v20 }
0x154c   :  { %v3975_v55 = vpack.c.bf16 %v3861_v52, %v3858_v51 }
0x154d   :  { %v3974_v35 = vpack.c.bf16 %v3853_v53, %v3850_v50 }
0x154e   :  { %v3992_v62 = vsel %vm597_vm1, %v3975_v55, 0 }
0x154f   :  { %v8125_v5 = vpop.f32.mrb[120].mxu1  ;;  %8519 = vmatprep.subr.msk.bf16.mxu1 %vm597_vm1, %v3974_v35  ;;  %v3989_v23 = vsel %vm597_vm1, %v3974_v35, 0 }
0x1550   :  { %v3865_v25 = vpop.f32.mrb[121].mxu1  ;;  %8140 = vmatpush3.bf16.xpose.msra.mxu1 %v3989_v23  ;;  %v3874_v56 = vadd.f32 %v8125_v5, %v7261_v13 }
0x1551   :  { %v8126_v45 = vpop.f32.mrb[122].mxu1  ;;  %8520 = vmatprep.subr.msk.bf16.mxu1 %vm597_vm1, %v3975_v55  ;;  %v3866_v59 = vadd.f32 %v7261_v13, %v3865_v25 }
0x1552   :  { %v3877_v46 = vadd.f32 %v8126_v45, %v7261_v13  ;;  %v3868_v27 = vpop.f32.mrb[123].mxu1 }
0x1553   :  { %v3869_v47 = vadd.f32 %v7261_v13, %v3868_v27 }
0x1554   :  { %v3977_v60 = vpack.c.bf16 %v3877_v46, %v3874_v56 }
0x1555   :  { %v3976_v61 = vpack.c.bf16 %v3869_v47, %v3866_v59 }
0x1556   :  { %v4053_v58 = vsel %vm597_vm1, %v3977_v60, 0 }
0x1557   :  { %8521 = vmatprep.subr.msk.bf16.mxu0 %vm597_vm1, %v3976_v61  ;;  %v4050_v31 = vsel %vm597_vm1, %v3976_v61, 0 }
0x1558   :  { %8142 = vmatpush3.bf16.xpose.msra.mxu1 %v3992_v62  ;;  %8148 = vmatpush3.bf16.xpose.msra.mxu0 %v4050_v31 }
0x1559   :  { %8522 = vmatprep.subr.msk.bf16.mxu0 %vm597_vm1, %v3977_v60  ;;  %8155 = vmatprep.subr.bf16.mxu1 %v10307_v54 }
0x155f   :  { %8144 = vmatmul.mubr.msk.bf16.vlgmr.msra.gmra.mrb[124].mxu1 %vm597_vm1, %v3971_v63  ;;  %v8605_v63 = vld [vmem:[#allocation8 + $0x50] sm:$0xff]  }
0x1560   :  { %8150 = vmatpush3.bf16.xpose.msra.mxu0 %v4053_v58  ;;  %8156 = vmatpush3.bf16.msra.mxu1 %v10307_v54  ;;  %v7297_v58 = vld [vmem:[#allocation13 + $0x5] ss:$0 sm:$0xff] }
0x1561   :  { %8157 = vmatprep.subr.bf16.mxu1 %v10305_v28  ;;  %8171 = vmatprep.subr.bf16.mxu0 %v8603_v0 }
0x1564   :  { %8158 = vmatpush3.bf16.msra.mxu1 %v10305_v28 }
0x1565   :  { %8163 = vmatprep.subr.bf16.mxu1 %v10314_v43 }
0x1567   :  { %8152 = vmatmul.mubr.msk.bf16.vlgmr.msra.gmra.mrb[84].mxu0 %vm597_vm1, %v3973_v38 }
0x1568   :  { %8172 = vmatpush3.bf16.msra.mxu0 %v8603_v0  ;;  %8175 = vmatprep.mubr.msk.bf16.mxu0 %vm323_vm0, %v10246_v14 }
0x1569   :  { %8173 = vmatprep.subr.bf16.mxu0 %v8604_v10 }
0x156c   :  { %8174 = vmatpush3.bf16.msra.mxu0 %v8604_v10 }
0x156d   :  { %8195 = vmatprep.subr.bf16.mxu0 %v8605_v63 }
0x156f   :  { %8176 = vmatmul.mubr.msk.bf16.vlgmr.msra.gmra.mrb[88].mxu0 %vm323_vm0, %v10260_v22 }
0x1570   :  { %8179 = vmatprep.mubr.msk.bf16.mxu0 %vm323_vm0, %v10275_v21  ;;  %8196 = vmatpush3.bf16.msra.mxu0 %v8605_v63 }
0x1571   :  { %8197 = vmatprep.subr.bf16.mxu0 %v8606_v2 }
0x1574   :  { %8198 = vmatpush3.bf16.msra.mxu0 %v8606_v2 }
0x1577   :  { %8180 = vmatmul.mubr.msk.bf16.gmra.mrb[92].mxu0 %vm323_vm0, %v10287_v40 }
0x1578   :  { %8199 = vmatprep.mubr.msk.bf16.mxu0 %vm323_vm0, %v10246_v14 }
0x157f   :  { %8200 = vmatmul.mubr.msk.bf16.vlgmr.msra.gmra.mrb[96].mxu0 %vm323_vm0, %v10260_v22 }
0x1580   :  { %8203 = vmatprep.mubr.msk.bf16.mxu0 %vm323_vm0, %v10275_v21 }
0x1587   :  { %8204 = vmatmul.mubr.msk.bf16.gmra.mrb[100].mxu0 %vm323_vm0, %v10287_v40 }
0x1632   :  { %v10348_v28 = vpop.f32.mrb[124].mxu1 }
0x1633   :  { %v10350_v54 = vpop.f32.mrb[125].mxu1  ;;  %v4110_v7 = vsel %vm323_vm0, %v10348_v28, -inf }
0x1634   :  { %v10352_v39 = vpop.f32.mrb[126].mxu1  ;;  %v4104_v3 = vsel %vm323_vm0, %v10350_v54, -inf }
0x1635   :  { %4105 = vmax.xlane.f32.xlu0 %v4104_v3  ;;  %v10356_v12 = vpop.f32.mrb[127].mxu1  ;;  %v4113_v9 = vsel %vm323_vm0, %v10352_v39, -inf }
0x1636   :  { %v4107_v6 = vsel %vm323_vm0, %v10356_v12, -inf }
0x1637   :  { %4108 = vmax.xlane.f32.xlu1 %v4107_v6 }
0x1639   :  { %4111 = vmax.xlane.f32.xlu0 %v4110_v7 }
0x163a   :  { %v10362_v8 = vpop.f32.mrb[84].mxu0 }
0x163b   :  { %4114 = vmax.xlane.f32.xlu1 %v4113_v9  ;;  %v10366_v15 = vpop.f32.mrb[85].mxu0  ;;  %v4122_v18 = vsel %vm323_vm0, %v10362_v8, -inf }
0x163c   :  { %v10368_v32 = vpop.f32.mrb[86].mxu0  ;;  %v4116_v41 = vsel %vm323_vm0, %v10366_v15, -inf }
0x163d   :  { %4117 = vmax.xlane.f32.xlu0 %v4116_v41  ;;  %v10372_v57 = vpop.f32.mrb[87].mxu0  ;;  %v4125_v34 = vsel %vm323_vm0, %v10368_v32, -inf }
0x163e   :  { %v4119_v17 = vsel %vm323_vm0, %v10372_v57, -inf }
0x163f   :  { %4120 = vmax.xlane.f32.xlu1 %v4119_v17 }
0x1641   :  { %4123 = vmax.xlane.f32.xlu0 %v4122_v18 }
0x1642   :  { %v8177_v29 = vpop.f32.mrb[88].mxu0 }
0x1643   :  { %v4380_v42 = vadd.f32 %v8177_v29, %v7283_v16  ;;  %v4371_v38 = vpop.f32.mrb[89].mxu0  ;;  %4126 = vmax.xlane.f32.xlu1 %v4125_v34 }
0x1644   :  { %v4372_v44 = vadd.f32 %v7283_v16, %v4371_v38  ;;  %v8178_v26 = vpop.f32.mrb[90].mxu0 }
0x1645   :  { %v4383_v13 = vadd.f32 %v8178_v26, %v7283_v16  ;;  %v4374_v48 = vpop.f32.mrb[91].mxu0  ;;  %v10380_v51 = vmul.f32 0.35355338, %v4380_v42 }
0x1646   :  { %v4375_v49 = vadd.f32 %v7283_v16, %v4374_v48  ;;  %v10384_v20 = vmul.f32 0.35355338, %v4372_v44 }
0x1647   :  { %v10382_v52 = vmul.f32 0.35355338, %v4383_v13 }
0x1648   :  { %v10386_v50 = vmul.f32 0.35355338, %v4375_v49 }
0x1649   :  { %v4591_v53 = vpack.c.bf16 %v10382_v52, %v10380_v51 }
0x164a   :  { %v4590_v55 = vpack.c.bf16 %v10386_v50, %v10384_v20  ;;  %v8181_v35 = vpop.f32.mrb[92].mxu0 }
0x164b   :  { %v4396_v5 = vadd.f32 %v8181_v35, %v7283_v16  ;;  %v4387_v23 = vpop.f32.mrb[93].mxu0 }
0x164c   :  { %v4388_v25 = vadd.f32 %v7283_v16, %v4387_v23  ;;  %v8182_v45 = vpop.f32.mrb[94].mxu0 }
0x164d   :  { %v4399_v56 = vadd.f32 %v8182_v45, %v7283_v16  ;;  %v4390_v46 = vpop.f32.mrb[95].mxu0  ;;  %v10392_v59 = vmul.f32 0.35355338, %v4396_v5 }
0x164e   :  { %v4391_v27 = vadd.f32 %v7283_v16, %v4390_v46  ;;  %v4406_v60 = vmul.f32 0.35355338, %v4388_v25 }
0x164f   :  { %v10394_v47 = vmul.f32 0.35355338, %v4399_v56 }
0x1650   :  { %v4407_v61 = vmul.f32 0.35355338, %v4391_v27 }
0x1651   :  { %v4593_v62 = vpack.c.bf16 %v10394_v47, %v10392_v59 }
0x1652   :  { %v4592_v31 = vpack.c.bf16 %v4407_v61, %v4406_v60  ;;  %v8201_v0 = vpop.f32.mrb[96].mxu0 }
0x1653   :  { %v4559_v10 = vpop.f32.mrb[97].mxu0  ;;  %v4568_v2 = vadd.f32 %v8201_v0, %v7297_v58 }
0x1654   :  { %v8202_v63 = vpop.f32.mrb[98].mxu0  ;;  %8219 = vmatprep.mubr.msk.bf16.mxu0 %vm597_vm1, %v4592_v31  ;;  %v4560_v7 = vadd.f32 %v7297_v58, %v4559_v10 }
0x1655   :  { %v4571_v3 = vadd.f32 %v8202_v63, %v7297_v58  ;;  %v4562_v6 = vpop.f32.mrb[99].mxu0 }
0x1656   :  { %v4563_v9 = vadd.f32 %v7297_v58, %v4562_v6 }
0x1657   :  { %v10399_v41 = vpack.c.bf16 %v4571_v3, %v4568_v2 }
0x1658   :  { %v10401_v17 = vpack.c.bf16 %v4563_v9, %v4560_v7 }
0x165a   :  { %v8205_v18 = vpop.f32.mrb[100].mxu0 }
0x165b   :  { %v4584_v16 = vadd.f32 %v8205_v18, %v7297_v58  ;;  %v4575_v29 = vpop.f32.mrb[101].mxu0 }
0x165c   :  { %v8206_v34 = vpop.f32.mrb[102].mxu0  ;;  %v4576_v44 = vadd.f32 %v7297_v58, %v4575_v29 }
0x165d   :  { %v4587_v42 = vadd.f32 %v8206_v34, %v7297_v58  ;;  %v4578_v38 = vpop.f32.mrb[103].mxu0 }
0x165e   :  { %v4579_v26 = vadd.f32 %v7297_v58, %v4578_v38 }
0x165f   :  { %v10403_v13 = vpack.c.bf16 %v4587_v42, %v4584_v16 }
0x1660   :  { %v10405_v48 = vpack.c.bf16 %v4579_v26, %v4576_v44 }
0x16c2   :  { %v4106_v49 = vpop.xlane.xlu0 %4105 }
0x16c3   :  { %v4128_v35 = vsub.f32 %v10350_v54, %v4106_v49 }
0x16c4   :  { %v4109_v5 = vpop.xlane.xlu1 %4108 }
0x16c5   :  { %v4136_v23 = vmul.f32 1.442695, %v4128_v35  ;;  %v4129_v25 = vsub.f32 %v10356_v12, %v4109_v5 }
0x16c6   :  { %v4112_v45 = vpop.xlane.xlu0 %4111 }
0x16c7   :  { %8791 = vpow2.f32 %v4136_v23  ;;  %v4138_v56 = vmul.f32 1.442695, %v4129_v25  ;;  %v4130_v46 = vsub.f32 %v10348_v28, %v4112_v45 }
0x16c8   :  { %v4115_v27 = vpop.xlane.xlu1 %4114 }
0x16c9   :  { %8793 = vpow2.f32 %v4138_v56  ;;  %v4140_v60 = vmul.f32 1.442695, %v4130_v46  ;;  %v4131_v61 = vsub.f32 %v10352_v39, %v4115_v27 }
0x16ca   :  { %v4118_v31 = vpop.xlane.xlu0 %4117 }
0x16cb   :  { %8795 = vpow2.f32 %v4140_v60  ;;  %v4142_v0 = vmul.f32 1.442695, %v4131_v61  ;;  %v4132_v58 = vsub.f32 %v10366_v15, %v4118_v31 }
0x16cc   :  { %v4121_v54 = vpop.xlane.xlu1 %4120 }
0x16cd   :  { %8797 = vpow2.f32 %v4142_v0  ;;  %v4144_v10 = vmul.f32 1.442695, %v4132_v58  ;;  %v4133_v12 = vsub.f32 %v10372_v57, %v4121_v54 }
0x16ce   :  { %v4124_v63 = vpop.xlane.xlu0 %4123 }
0x16cf   :  { %8799 = vpow2.f32 %v4144_v10  ;;  %v4146_v2 = vmul.f32 1.442695, %v4133_v12  ;;  %v4134_v28 = vsub.f32 %v10362_v8, %v4124_v63 }
0x16d0   :  { %v4127_v3 = vpop.xlane.xlu1 %4126 }
0x16d1   :  { %v8792_v6 = vpop.eup %8791  ;;  %8801 = vpow2.f32 %v4146_v2  ;;  %v4148_v7 = vmul.f32 1.442695, %v4134_v28  ;;  %v4135_v39 = vsub.f32 %v10368_v32, %v4127_v3 }
0x16d2   :  { %v4152_v9 = vsel %vm323_vm0, %v8792_v6, 0.0 }
0x16d3   :  { %v8794_v18 = vpop.eup %8793  ;;  %8803 = vpow2.f32 %v4148_v7  ;;  %v4150_v15 = vmul.f32 1.442695, %v4135_v39  ;;  %4153 = vadd.xlane.f32.xlu0 %v4152_v9 }
0x16d4   :  { %v4155_v16 = vsel %vm323_vm0, %v8794_v18, 0.0 }
0x16d5   :  { %v8796_v57 = vpop.eup %8795  ;;  %8805 = vpow2.f32 %v4150_v15  ;;  %4156 = vadd.xlane.f32.xlu1 %v4155_v16 }
0x16d6   :  { %v4158_v29 = vsel %vm323_vm0, %v8796_v57, 0.0 }
0x16d7   :  { %v8798_v8 = vpop.eup %8797  ;;  %4159 = vadd.xlane.f32.xlu0 %v4158_v29 }
0x16d8   :  { %v4161_v34 = vsel %vm323_vm0, %v8798_v8, 0.0 }
0x16d9   :  { %v8800_v42 = vpop.eup %8799  ;;  %4162 = vadd.xlane.f32.xlu1 %v4161_v34 }
0x16da   :  { %v4164_v32 = vsel %vm323_vm0, %v8800_v42, 0.0 }
0x16db   :  { %v8802_v38 = vpop.eup %8801  ;;  %4165 = vadd.xlane.f32.xlu0 %v4164_v32  ;;  %v8608_v32 = vld [vmem:[#allocation7 + $0x58] sm:$0xff]  }
0x16dc   :  { %v4167_v44 = vsel %vm323_vm0, %v8802_v38, 0.0 }
0x16dd   :  { %v8804_v26 = vpop.eup %8803  ;;  %4168 = vadd.xlane.f32.xlu1 %v4167_v44 }
0x16de   :  { %v4170_v49 = vsel %vm323_vm0, %v8804_v26, 0.0 }
0x16df   :  { %v8806_v35 = vpop.eup %8805  ;;  %4171 = vadd.xlane.f32.xlu0 %v4170_v49 }
0x16e0   :  { %v4173_v5 = vsel %vm323_vm0, %v8806_v35, 0.0 }
0x16e1   :  { %4174 = vadd.xlane.f32.xlu1 %v4173_v5 }
0x1760   :  { %v4154_v23 = vpop.xlane.xlu0 %4153 }
0x1761   :  { %8807 = vrcp.f32 %v4154_v23 }
0x1762   :  { %v4157_v25 = vpop.xlane.xlu1 %4156 }
0x1763   :  { %8809 = vrcp.f32 %v4157_v25  ;;  %v7290_v25 = vld [vmem:[#allocation11 + $0x5] ss:$0 sm:$0xff] }
0x1764   :  { %v4160_v45 = vpop.xlane.xlu0 %4159 }
0x1765   :  { %8811 = vrcp.f32 %v4160_v45 }
0x1766   :  { %v4163_v56 = vpop.xlane.xlu1 %4162 }
0x1767   :  { %8813 = vrcp.f32 %v4163_v56 }
0x1768   :  { %v4166_v46 = vpop.xlane.xlu0 %4165 }
0x1769   :  { %8815 = vrcp.f32 %v4166_v46 }
0x176a   :  { %v4169_v27 = vpop.xlane.xlu1 %4168 }
0x176b   :  { %v8808_v60 = vpop.eup %8807  ;;  %8817 = vrcp.f32 %v4169_v27 }
0x176c   :  { %v4172_v61 = vpop.xlane.xlu0 %4171  ;;  %v4184_v58 = vmul.f32 %v8808_v60, %v8792_v6 }
0x176d   :  { %v8810_v31 = vpop.eup %8809  ;;  %8819 = vrcp.f32 %v4172_v61 }
0x176e   :  { %v4175_v0 = vpop.xlane.xlu1 %4174  ;;  %v4185_v54 = vmul.f32 %v8810_v31, %v8794_v18  ;;  %v8607_v18 = vld [vmem:[#allocation7 + $0x50] sm:$0xff]  }
0x176f   :  { %v8812_v10 = vpop.eup %8811  ;;  %8821 = vrcp.f32 %v4175_v0 }
0x1770   :  { %v4192_v12 = vpack.c.bf16 %v4185_v54, %v4184_v58  ;;  %v4186_v2 = vmul.f32 %v8812_v10, %v8796_v57 }
0x1771   :  { %v8814_v63 = vpop.eup %8813 }
0x1772   :  { %v4187_v28 = vmul.f32 %v8814_v63, %v8798_v8  ;;  %8159 = vmatprep.mubr.msk.bf16.mxu1 %vm323_vm0, %v4192_v12 }
0x1773   :  { %v8816_v3 = vpop.eup %8815 }
0x1774   :  { %v4193_v7 = vpack.c.bf16 %v4187_v28, %v4186_v2  ;;  %v4188_v9 = vmul.f32 %v8816_v3, %v8800_v42 }
0x1775   :  { %v8818_v39 = vpop.eup %8817 }
0x1776   :  { %8160 = vmatmul.mubr.msk.bf16.vlgmr.msra.gmra.mrb[128].mxu1 %vm323_vm0, %v4193_v7  ;;  %v4189_v15 = vmul.f32 %v8818_v39, %v8802_v38 }
0x1777   :  { %v8820_v16 = vpop.eup %8819  ;;  %8164 = vmatpush3.bf16.msra.mxu1 %v10314_v43 }
0x1778   :  { %8165 = vmatprep.subr.bf16.mxu1 %v10312_v4  ;;  %v4194_v6 = vpack.c.bf16 %v4189_v15, %v4188_v9  ;;  %v4190_v34 = vmul.f32 %v8820_v16, %v8804_v26 }
0x1779   :  { %v8822_v29 = vpop.eup %8821 }
0x177a   :  { %v4191_v57 = vmul.f32 %v8822_v29, %v8806_v35  ;;  %8167 = vmatprep.mubr.msk.bf16.mxu1 %vm323_vm0, %v4194_v6 }
0x177b   :  { %8166 = vmatpush3.bf16.msra.mxu1 %v10312_v4 }
0x177c   :  { %v4195_v8 = vpack.c.bf16 %v4191_v57, %v4190_v34  ;;  %8183 = vmatprep.subr.bf16.mxu1 %v8607_v18 }
0x177e   :  { %8168 = vmatmul.mubr.msk.bf16.vlgmr.msra.gmra.mrb[132].mxu1 %vm323_vm0, %v4195_v8 }
0x177f   :  { %8184 = vmatpush3.bf16.msra.mxu1 %v8607_v18  ;;  %8187 = vmatprep.mubr.msk.bf16.mxu1 %vm323_vm0, %v10246_v14 }
0x1780   :  { %8185 = vmatprep.subr.bf16.mxu1 %v8608_v32 }
0x1783   :  { %8186 = vmatpush3.bf16.msra.mxu1 %v8608_v32 }
0x1786   :  { %8188 = vmatmul.mubr.msk.bf16.vlgmr.msra.gmra.mrb[136].mxu1 %vm323_vm0, %v10260_v22 }
0x1787   :  { %8191 = vmatprep.mubr.msk.bf16.mxu1 %vm323_vm0, %v10275_v21 }
0x178e   :  { %8192 = vmatmul.mubr.msk.bf16.gmra.mrb[140].mxu1 %vm323_vm0, %v10287_v40 }
0x178f   :  { %8211 = vmatprep.mubr.msk.bf16.mxu1 %vm597_vm1, %v4590_v55 }
0x1849   :  { %v10442_v4 = vpop.f32.mrb[128].mxu1 }
0x184a   :  { %v10444_v43 = vpop.f32.mrb[129].mxu1 }
0x184b   :  { %v10446_v42 = vpop.f32.mrb[130].mxu1 }
0x184c   :  { %v4307_v38 = vpack.c.bf16 %v10446_v42, %v10442_v4  ;;  %v10450_v44 = vpop.f32.mrb[131].mxu1 }
0x184d   :  { %v4306_v26 = vpack.c.bf16 %v10450_v44, %v10444_v43 }
0x1851   :  { %v10454_v49 = vpop.f32.mrb[132].mxu1 }
0x1852   :  { %v10456_v35 = vpop.f32.mrb[133].mxu1 }
0x1853   :  { %v10458_v20 = vpop.f32.mrb[134].mxu1 }
0x1854   :  { %v4309_v50 = vpack.c.bf16 %v10458_v20, %v10454_v49  ;;  %v10462_v55 = vpop.f32.mrb[135].mxu1 }
0x1855   :  { %v4308_v5 = vpack.c.bf16 %v10462_v55, %v10456_v35 }
0x1859   :  { %v8189_v23 = vpop.f32.mrb[136].mxu1 }
0x185a   :  { %v4469_v45 = vpop.f32.mrb[137].mxu1  ;;  %v4478_v46 = vadd.f32 %v8189_v23, %v7290_v25 }
0x185b   :  { %v8190_v56 = vpop.f32.mrb[138].mxu1  ;;  %v4470_v61 = vadd.f32 %v7290_v25, %v4469_v45 }
0x185c   :  { %v4481_v27 = vadd.f32 %v8190_v56, %v7290_v25  ;;  %v4472_v60 = vpop.f32.mrb[139].mxu1 }
0x185d   :  { %v4473_v31 = vadd.f32 %v7290_v25, %v4472_v60 }
0x185e   :  { %v4595_v0 = vpack.c.bf16 %v4481_v27, %v4478_v46 }
0x185f   :  { %v4594_v58 = vpack.c.bf16 %v4473_v31, %v4470_v61 }
0x1860   :  { %v4612_v16 = vsel %vm597_vm1, %v4595_v0, 0 }
0x1861   :  { %v8193_v54 = vpop.f32.mrb[140].mxu1  ;;  %8523 = vmatprep.subr.msk.bf16.mxu1 %vm597_vm1, %v4594_v58  ;;  %v4609_v10 = vsel %vm597_vm1, %v4594_v58, 0 }
0x1862   :  { %v4485_v12 = vpop.f32.mrb[141].mxu1  ;;  %8208 = vmatpush3.bf16.xpose.msra.mxu1 %v4609_v10  ;;  %v4494_v2 = vadd.f32 %v8193_v54, %v7290_v25 }
0x1863   :  { %v8194_v63 = vpop.f32.mrb[142].mxu1  ;;  %8524 = vmatprep.subr.msk.bf16.mxu1 %vm597_vm1, %v4595_v0  ;;  %v4486_v7 = vadd.f32 %v7290_v25, %v4485_v12 }
0x1864   :  { %v4497_v28 = vadd.f32 %v8194_v63, %v7290_v25  ;;  %v4488_v3 = vpop.f32.mrb[143].mxu1 }
0x1865   :  { %v4489_v39 = vadd.f32 %v7290_v25, %v4488_v3 }
0x1866   :  { %v4597_v9 = vpack.c.bf16 %v4497_v28, %v4494_v2 }
0x1867   :  { %v4596_v15 = vpack.c.bf16 %v4489_v39, %v4486_v7 }
0x1868   :  { %v4673_v18 = vsel %vm597_vm1, %v4597_v9, 0 }
0x1869   :  { %8525 = vmatprep.subr.msk.bf16.mxu0 %vm597_vm1, %v4596_v15  ;;  %v4670_v6 = vsel %vm597_vm1, %v4596_v15, 0 }
0x186a   :  { %8210 = vmatpush3.bf16.xpose.msra.mxu1 %v4612_v16  ;;  %8216 = vmatpush3.bf16.xpose.msra.mxu0 %v4670_v6 }
0x186b   :  { %8526 = vmatprep.subr.msk.bf16.mxu0 %vm597_vm1, %v4597_v9  ;;  %8223 = vmatprep.subr.bf16.mxu1 %v10401_v17 }
0x1871   :  { %8212 = vmatmul.mubr.msk.bf16.vlgmr.msra.gmra.mrb[144].mxu1 %vm597_vm1, %v4591_v53 }
0x1872   :  { %8218 = vmatpush3.bf16.xpose.msra.mxu0 %v4673_v18  ;;  %8224 = vmatpush3.bf16.msra.mxu1 %v10401_v17 }
0x1873   :  { %8225 = vmatprep.subr.bf16.mxu1 %v10399_v41 }
0x1876   :  { %8226 = vmatpush3.bf16.msra.mxu1 %v10399_v41 }
0x1877   :  { %8231 = vmatprep.subr.bf16.mxu1 %v10405_v48 }
0x1879   :  { %8220 = vmatmul.mubr.msk.bf16.vlgmr.msra.gmra.mrb[104].mxu0 %vm597_vm1, %v4593_v62 }
0x1944   :  { %v8213_v29 = vpop.f32.mrb[144].mxu1 }
0x1945   :  { %v4648_v51 = vpop.f32.mrb[145].mxu1  ;;  %v4730_v57 = vsel %vm323_vm0, %v8213_v29, -inf }
0x1946   :  { %v8214_v52 = vpop.f32.mrb[146].mxu1  ;;  %v4724_v53 = vsel %vm323_vm0, %v4648_v51, -inf }
0x1947   :  { %4725 = vmax.xlane.f32.xlu0 %v4724_v53  ;;  %v4651_v34 = vpop.f32.mrb[147].mxu1  ;;  %v4733_v8 = vsel %vm323_vm0, %v8214_v52, -inf }
0x1948   :  { %v4727_v17 = vsel %vm323_vm0, %v4651_v34, -inf }
0x1949   :  { %4728 = vmax.xlane.f32.xlu1 %v4727_v17 }
0x194b   :  { %4731 = vmax.xlane.f32.xlu0 %v4730_v57 }
0x194c   :  { %v8221_v41 = vpop.f32.mrb[104].mxu0 }
0x194d   :  { %v4709_v32 = vpop.f32.mrb[105].mxu0  ;;  %4734 = vmax.xlane.f32.xlu1 %v4733_v8  ;;  %v4742_v25 = vsel %vm323_vm0, %v8221_v41, -inf }
0x194e   :  { %v8222_v59 = vpop.f32.mrb[106].mxu0  ;;  %v4736_v47 = vsel %vm323_vm0, %v4709_v32, -inf }
0x194f   :  { %v4712_v62 = vpop.f32.mrb[107].mxu0  ;;  %4737 = vmax.xlane.f32.xlu0 %v4736_v47  ;;  %v4745_v45 = vsel %vm323_vm0, %v8222_v59, -inf }
0x1950   :  { %v4739_v23 = vsel %vm323_vm0, %v4712_v62, -inf }
0x1951   :  { %4740 = vmax.xlane.f32.xlu1 %v4739_v23 }
0x1953   :  { %4743 = vmax.xlane.f32.xlu0 %v4742_v25 }
0x1955   :  { %4746 = vmax.xlane.f32.xlu1 %v4745_v45 }
0x19d4   :  { %v4726_v56 = vpop.xlane.xlu0 %4725 }
0x19d5   :  { %v4748_v46 = vsub.f32 %v4648_v51, %v4726_v56 }
0x19d6   :  { %v4729_v27 = vpop.xlane.xlu1 %4728 }
0x19d7   :  { %v4756_v60 = vmul.f32 1.442695, %v4748_v46  ;;  %v4749_v61 = vsub.f32 %v4651_v34, %v4729_v27 }
0x19d8   :  { %v4732_v31 = vpop.xlane.xlu0 %4731 }
0x19d9   :  { %8823 = vpow2.f32 %v4756_v60  ;;  %v4758_v0 = vmul.f32 1.442695, %v4749_v61  ;;  %v4750_v58 = vsub.f32 %v8213_v29, %v4732_v31 }
0x19da   :  { %v4735_v54 = vpop.xlane.xlu1 %4734 }
0x19db   :  { %8825 = vpow2.f32 %v4758_v0  ;;  %v4760_v10 = vmul.f32 1.442695, %v4750_v58  ;;  %v4751_v12 = vsub.f32 %v8214_v52, %v4735_v54 }
0x19dc   :  { %v4738_v63 = vpop.xlane.xlu0 %4737 }
0x19dd   :  { %8827 = vpow2.f32 %v4760_v10  ;;  %v4762_v2 = vmul.f32 1.442695, %v4751_v12  ;;  %v4752_v28 = vsub.f32 %v4709_v32, %v4738_v63 }
0x19de   :  { %v4741_v3 = vpop.xlane.xlu1 %4740 }
0x19df   :  { %8829 = vpow2.f32 %v4762_v2  ;;  %v4764_v7 = vmul.f32 1.442695, %v4752_v28  ;;  %v4753_v39 = vsub.f32 %v4712_v62, %v4741_v3 }
0x19e0   :  { %v4744_v9 = vpop.xlane.xlu0 %4743 }
0x19e1   :  { %8831 = vpow2.f32 %v4764_v7  ;;  %v4766_v15 = vmul.f32 1.442695, %v4753_v39  ;;  %v4754_v16 = vsub.f32 %v8221_v41, %v4744_v9 }
0x19e2   :  { %v4747_v6 = vpop.xlane.xlu1 %4746 }
0x19e3   :  { %v8824_v18 = vpop.eup %8823  ;;  %8833 = vpow2.f32 %v4766_v15  ;;  %v4768_v29 = vmul.f32 1.442695, %v4754_v16  ;;  %v4755_v51 = vsub.f32 %v8222_v59, %v4747_v6 }
0x19e4   :  { %v4772_v53 = vsel %vm323_vm0, %v8824_v18, 0.0 }
0x19e5   :  { %v8826_v52 = vpop.eup %8825  ;;  %8835 = vpow2.f32 %v4768_v29  ;;  %v4770_v34 = vmul.f32 1.442695, %v4755_v51  ;;  %4773 = vadd.xlane.f32.xlu0 %v4772_v53 }
0x19e6   :  { %v4775_v17 = vsel %vm323_vm0, %v8826_v52, 0.0 }
0x19e7   :  { %v8828_v57 = vpop.eup %8827  ;;  %8837 = vpow2.f32 %v4770_v34  ;;  %4776 = vadd.xlane.f32.xlu1 %v4775_v17 }
0x19e8   :  { %v4778_v8 = vsel %vm323_vm0, %v8828_v57, 0.0 }
0x19e9   :  { %v8830_v32 = vpop.eup %8829  ;;  %4779 = vadd.xlane.f32.xlu0 %v4778_v8 }
0x19ea   :  { %v4781_v41 = vsel %vm323_vm0, %v8830_v32, 0.0 }
0x19eb   :  { %v8832_v47 = vpop.eup %8831  ;;  %4782 = vadd.xlane.f32.xlu1 %v4781_v41  ;;  %v8610_v41 = vld [vmem:[#allocation5 + $0x68] sm:$0xff]  }
0x19ec   :  { %v4784_v59 = vsel %vm323_vm0, %v8832_v47, 0.0 }
0x19ed   :  { %v8834_v62 = vpop.eup %8833  ;;  %4785 = vadd.xlane.f32.xlu0 %v4784_v59 }
0x19ee   :  { %v4787_v23 = vsel %vm323_vm0, %v8834_v62, 0.0 }
0x19ef   :  { %v8836_v25 = vpop.eup %8835  ;;  %4788 = vadd.xlane.f32.xlu1 %v4787_v23 }
0x19f0   :  { %v4790_v45 = vsel %vm323_vm0, %v8836_v25, 0.0 }
0x19f1   :  { %v8838_v56 = vpop.eup %8837  ;;  %4791 = vadd.xlane.f32.xlu0 %v4790_v45 }
0x19f2   :  { %v4793_v46 = vsel %vm323_vm0, %v8838_v56, 0.0 }
0x19f3   :  { %4794 = vadd.xlane.f32.xlu1 %v4793_v46 }
0x1a72   :  { %v4774_v27 = vpop.xlane.xlu0 %4773 }
0x1a73   :  { %8839 = vrcp.f32 %v4774_v27 }
0x1a74   :  { %v4777_v60 = vpop.xlane.xlu1 %4776 }
0x1a75   :  { %8841 = vrcp.f32 %v4777_v60 }
0x1a76   :  { %v4780_v61 = vpop.xlane.xlu0 %4779 }
0x1a77   :  { %8843 = vrcp.f32 %v4780_v61  ;;  %v8613_v61 = vld [vmem:[#allocation8 + $0x60] sm:$0xff]  }
0x1a78   :  { %v4783_v31 = vpop.xlane.xlu1 %4782 }
0x1a79   :  { %8845 = vrcp.f32 %v4783_v31 }
0x1a7a   :  { %v4786_v0 = vpop.xlane.xlu0 %4785 }
0x1a7b   :  { %8847 = vrcp.f32 %v4786_v0 }
0x1a7c   :  { %v4789_v58 = vpop.xlane.xlu1 %4788 }
0x1a7d   :  { %v8840_v54 = vpop.eup %8839  ;;  %8849 = vrcp.f32 %v4789_v58 }
0x1a7e   :  { %v4792_v10 = vpop.xlane.xlu0 %4791  ;;  %v4804_v2 = vmul.f32 %v8840_v54, %v8824_v18 }
0x1a7f   :  { %v8842_v12 = vpop.eup %8841  ;;  %8851 = vrcp.f32 %v4792_v10 }
0x1a80   :  { %v4795_v63 = vpop.xlane.xlu1 %4794  ;;  %v4805_v28 = vmul.f32 %v8842_v12, %v8826_v52  ;;  %v8609_v52 = vld [vmem:[#allocation5 + $0x60] sm:$0xff]  }
0x1a81   :  { %v8844_v3 = vpop.eup %8843  ;;  %8853 = vrcp.f32 %v4795_v63  ;;  %v7320_v63 = vld [vmem:[#allocation10 + $0x6] ss:$0 sm:$0xff] }
0x1a82   :  { %v4812_v7 = vpack.c.bf16 %v4805_v28, %v4804_v2  ;;  %v4806_v9 = vmul.f32 %v8844_v3, %v8828_v57 }
0x1a83   :  { %v8846_v39 = vpop.eup %8845 }
0x1a84   :  { %v4807_v15 = vmul.f32 %v8846_v39, %v8830_v32  ;;  %8227 = vmatprep.mubr.msk.bf16.mxu1 %vm323_vm0, %v4812_v7 }
0x1a85   :  { %v8848_v16 = vpop.eup %8847 }
0x1a86   :  { %v4813_v6 = vpack.c.bf16 %v4807_v15, %v4806_v9  ;;  %v4808_v51 = vmul.f32 %v8848_v16, %v8832_v47  ;;  %v8612_v47 = vld [vmem:[#allocation7 + $0x68] sm:$0xff]  }
0x1a87   :  { %v8850_v29 = vpop.eup %8849 }
0x1a88   :  { %8228 = vmatmul.mubr.msk.bf16.vlgmr.msra.gmra.mrb[148].mxu1 %vm323_vm0, %v4813_v6  ;;  %v4809_v53 = vmul.f32 %v8850_v29, %v8834_v62  ;;  %v4311_v62 = vld [vmem:[#allocation14 + $0x10] sm:$0xf] }
0x1a89   :  { %v8852_v34 = vpop.eup %8851  ;;  %8232 = vmatpush3.bf16.msra.mxu1 %v10405_v48  ;;  %v8611_v48 = vld [vmem:[#allocation7 + $0x60] sm:$0xff]   ;;  %v5025_v60 = vsel %vm1559_vm2, %v4311_v62, 0 }
0x1a8a   :  { %8233 = vmatprep.subr.bf16.mxu1 %v10403_v13  ;;  %v4814_v18 = vpack.c.bf16 %v4809_v53, %v4808_v51  ;;  %v4810_v8 = vmul.f32 %v8852_v34, %v8836_v25  ;;  %v8614_v51 = vld [vmem:[#allocation8 + $0x68] sm:$0xff]  }
0x1a8b   :  { %v8854_v17 = vpop.eup %8853 }
0x1a8c   :  { %v4811_v57 = vmul.f32 %v8854_v17, %v8838_v56  ;;  %8235 = vmatprep.mubr.msk.bf16.mxu1 %vm323_vm0, %v4814_v18 }
0x1a8d   :  { %8234 = vmatpush3.bf16.msra.mxu1 %v10403_v13  ;;  %v4931_v13 = vld [vmem:[#allocation14 + $0x14] sm:$0xf] }
0x1a8e   :  { %v4815_v32 = vpack.c.bf16 %v4811_v57, %v4810_v8  ;;  %8259 = vmatprep.subr.bf16.mxu1 %v8609_v52  ;;  %8527 = vmatprep.subr.msk.bf16.mxu0 %vm1559_vm2, %v4931_v13  ;;  %v4945_v59 = vsel %vm1559_vm2, %v4931_v13, 0 }
0x1a8f   :  { %8240 = vmatpush3.bf16.msra.mxu0 %v4945_v59 }
0x1a90   :  { %8236 = vmatmul.mubr.msk.bf16.vlgmr.msra.gmra.mrb[152].mxu1 %vm323_vm0, %v4815_v32  ;;  %8528 = vmatprep.subr.msk.bf16.mxu0 %vm1559_vm2, %v4311_v62 }
0x1a91   :  { %8260 = vmatpush3.bf16.msra.mxu1 %v8609_v52  ;;  %8263 = vmatprep.mubr.msk.bf16.mxu1 %vm323_vm0, %v10246_v14 }
0x1a92   :  { %8261 = vmatprep.subr.bf16.mxu1 %v8610_v41 }
0x1a95   :  { %8262 = vmatpush3.bf16.msra.mxu1 %v8610_v41 }
0x1a96   :  { %8271 = vmatprep.subr.bf16.mxu1 %v8611_v48 }
0x1a98   :  { %8264 = vmatmul.mubr.msk.bf16.vlgmr.msra.gmra.mrb[156].mxu1 %vm323_vm0, %v10260_v22 }
0x1a99   :  { %8267 = vmatprep.mubr.msk.bf16.mxu1 %vm323_vm0, %v10275_v21  ;;  %8272 = vmatpush3.bf16.msra.mxu1 %v8611_v48 }
0x1a9a   :  { %8273 = vmatprep.subr.bf16.mxu1 %v8612_v47 }
0x1a9d   :  { %8274 = vmatpush3.bf16.msra.mxu1 %v8612_v47  ;;  %v7327_v47 = vld [vmem:[#allocation11 + $0x6] ss:$0 sm:$0xff] }
0x1aa0   :  { %8268 = vmatmul.mubr.msk.bf16.gmra.mrb[160].mxu1 %vm323_vm0, %v10287_v40 }
0x1aa1   :  { %8275 = vmatprep.mubr.msk.bf16.mxu1 %vm323_vm0, %v10246_v14 }
0x1aa8   :  { %8276 = vmatmul.mubr.msk.bf16.vlgmr.msra.gmra.mrb[164].mxu1 %vm323_vm0, %v10260_v22 }
0x1aa9   :  { %8279 = vmatprep.mubr.msk.bf16.mxu1 %vm323_vm0, %v10275_v21 }
0x1ab0   :  { %8280 = vmatmul.mubr.msk.bf16.gmra.mrb[168].mxu1 %vm323_vm0, %v10287_v40 }
0x1b5b   :  { %v8229_v23 = vpop.f32.mrb[148].mxu1 }
0x1b5c   :  { %v4856_v25 = vpop.f32.mrb[149].mxu1 }
0x1b5d   :  { %v8230_v45 = vpop.f32.mrb[150].mxu1 }
0x1b5e   :  { %v4927_v56 = vpack.c.bf16 %v8230_v45, %v8229_v23  ;;  %v4859_v46 = vpop.f32.mrb[151].mxu1 }
0x1b5f   :  { %v4926_v27 = vpack.c.bf16 %v4859_v46, %v4856_v25 }
0x1b61   :  { %8241 = vmatprep.mubr.msk.bf16.mxu0 %vm597_vm1, %v4926_v27 }
0x1b62   :  { %8242 = vmatmul.mubr.msk.bf16.vlgmr.msra.gmra.mrb[108].mxu0 %vm597_vm1, %v4927_v56 }
0x1b63   :  { %v8237_v31 = vpop.f32.mrb[152].mxu1  ;;  %8250 = vmatpush3.bf16.msra.mxu0 %v5025_v60 }
0x1b64   :  { %v4911_v0 = vpop.f32.mrb[153].mxu1  ;;  %8283 = vmatprep.subr.bf16.mxu0 %v8613_v61 }
0x1b65   :  { %v8238_v58 = vpop.f32.mrb[154].mxu1 }
0x1b66   :  { %v4929_v54 = vpack.c.bf16 %v8238_v58, %v8237_v31  ;;  %v4914_v10 = vpop.f32.mrb[155].mxu1 }
0x1b67   :  { %v4928_v12 = vpack.c.bf16 %v4914_v10, %v4911_v0 }
0x1b69   :  { %8245 = vmatprep.mubr.msk.bf16.mxu0 %vm597_vm1, %v4928_v12 }
0x1b6a   :  { %8246 = vmatmul.mubr.msk.bf16.gmra.mrb[112].mxu0 %vm597_vm1, %v4929_v54 }
0x1b6b   :  { %8251 = vmatprep.mubr.msk.bf16.mxu0 %vm597_vm1, %v4306_v26  ;;  %v8265_v2 = vpop.f32.mrb[156].mxu1 }
0x1b6c   :  { %v5160_v28 = vadd.f32 %v8265_v2, %v7320_v63  ;;  %v5151_v3 = vpop.f32.mrb[157].mxu1 }
0x1b6d   :  { %v5152_v7 = vadd.f32 %v7320_v63, %v5151_v3  ;;  %v8266_v39 = vpop.f32.mrb[158].mxu1 }
0x1b6e   :  { %v5163_v9 = vadd.f32 %v8266_v39, %v7320_v63  ;;  %v5154_v15 = vpop.f32.mrb[159].mxu1  ;;  %v10538_v6 = vmul.f32 0.35355338, %v5160_v28 }
0x1b6f   :  { %v5155_v16 = vadd.f32 %v7320_v63, %v5154_v15  ;;  %v5182_v53 = vmul.f32 0.35355338, %v5152_v7  ;;  %v7334_v7 = vld [vmem:[#allocation13 + $0x6] ss:$0 sm:$0xff] }
0x1b70   :  { %v10540_v29 = vmul.f32 0.35355338, %v5163_v9 }
0x1b71   :  { %v5183_v34 = vmul.f32 0.35355338, %v5155_v16 }
0x1b72   :  { %v5371_v43 = vpack.c.bf16 %v10540_v29, %v10538_v6  ;;  %8252 = vmatmul.mubr.msk.bf16.vlgmr.msra.gmra.mrb[108].mxu0 %vm597_vm1, %v4307_v38 }
0x1b73   :  { %v5370_v44 = vpack.c.bf16 %v5183_v34, %v5182_v53  ;;  %8255 = vmatprep.mubr.msk.bf16.mxu0 %vm597_vm1, %v4308_v5  ;;  %v8269_v26 = vpop.f32.mrb[160].mxu1  ;;  %8284 = vmatpush3.bf16.msra.mxu0 %v8613_v61 }
0x1b74   :  { %v5176_v18 = vadd.f32 %v8269_v26, %v7320_v63  ;;  %v5167_v52 = vpop.f32.mrb[161].mxu1  ;;  %8285 = vmatprep.subr.bf16.mxu0 %v8614_v51 }
0x1b75   :  { %v5168_v17 = vadd.f32 %v7320_v63, %v5167_v52  ;;  %v8270_v8 = vpop.f32.mrb[162].mxu1  ;;  %8299 = vmatprep.mubr.msk.bf16.mxu1 %vm597_vm1, %v5370_v44 }
0x1b76   :  { %v5179_v57 = vadd.f32 %v8270_v8, %v7320_v63  ;;  %v5170_v32 = vpop.f32.mrb[163].mxu1  ;;  %v5188_v42 = vmul.f32 0.35355338, %v5176_v18 }
0x1b77   :  { %v5171_v4 = vadd.f32 %v7320_v63, %v5170_v32  ;;  %8286 = vmatpush3.bf16.msra.mxu0 %v8614_v51  ;;  %v5186_v41 = vmul.f32 0.35355338, %v5168_v17 }
0x1b78   :  { %v5189_v38 = vmul.f32 0.35355338, %v5179_v57 }
0x1b79   :  { %v5187_v48 = vmul.f32 0.35355338, %v5171_v4 }
0x1b7a   :  { %v5373_v35 = vpack.c.bf16 %v5189_v38, %v5188_v42  ;;  %8256 = vmatmul.mubr.msk.bf16.gmra.mrb[112].mxu0 %vm597_vm1, %v4309_v50 }
0x1b7b   :  { %v5372_v55 = vpack.c.bf16 %v5187_v48, %v5186_v41  ;;  %v8277_v5 = vpop.f32.mrb[164].mxu1  ;;  %8287 = vmatprep.mubr.msk.bf16.mxu0 %vm323_vm0, %v10246_v14 }
0x1b7c   :  { %v5249_v13 = vpop.f32.mrb[165].mxu1  ;;  %v5258_v62 = vadd.f32 %v8277_v5, %v7327_v47 }
0x1b7d   :  { %v8278_v59 = vpop.f32.mrb[166].mxu1  ;;  %v5250_v45 = vadd.f32 %v7327_v47, %v5249_v13 }
0x1b7e   :  { %v5261_v23 = vadd.f32 %v8278_v59, %v7327_v47  ;;  %v5252_v25 = vpop.f32.mrb[167].mxu1 }
0x1b7f   :  { %v5253_v56 = vadd.f32 %v7327_v47, %v5252_v25 }
0x1b80   :  { %v5375_v46 = vpack.c.bf16 %v5261_v23, %v5258_v62 }
0x1b81   :  { %v5374_v27 = vpack.c.bf16 %v5253_v56, %v5250_v45 }
0x1b82   :  { %8288 = vmatmul.mubr.msk.bf16.vlgmr.msra.gmra.mrb[116].mxu0 %vm323_vm0, %v10260_v22  ;;  %v5392_v63 = vsel %vm597_vm1, %v5375_v46, 0 }
0x1b83   :  { %v8281_v49 = vpop.f32.mrb[168].mxu1  ;;  %8291 = vmatprep.mubr.msk.bf16.mxu0 %vm323_vm0, %v10275_v21  ;;  %8529 = vmatprep.subr.msk.bf16.mxu1 %vm597_vm1, %v5374_v27  ;;  %v5389_v20 = vsel %vm597_vm1, %v5374_v27, 0 }
0x1b84   :  { %v5265_v50 = vpop.f32.mrb[169].mxu1  ;;  %8296 = vmatpush3.bf16.xpose.msra.mxu1 %v5389_v20  ;;  %v5274_v61 = vadd.f32 %v8281_v49, %v7327_v47 }
0x1b85   :  { %v8282_v60 = vpop.f32.mrb[170].mxu1  ;;  %8530 = vmatprep.subr.msk.bf16.mxu1 %vm597_vm1, %v5375_v46  ;;  %v5266_v58 = vadd.f32 %v7327_v47, %v5265_v50 }
0x1b86   :  { %v5277_v31 = vadd.f32 %v8282_v60, %v7327_v47  ;;  %v5268_v0 = vpop.f32.mrb[171].mxu1 }
0x1b87   :  { %v5269_v54 = vadd.f32 %v7327_v47, %v5268_v0 }
0x1b88   :  { %v5377_v10 = vpack.c.bf16 %v5277_v31, %v5274_v61 }
0x1b89   :  { %v5376_v12 = vpack.c.bf16 %v5269_v54, %v5266_v58 }
0x1b8a   :  { %8292 = vmatmul.mubr.msk.bf16.gmra.mrb[120].mxu0 %vm323_vm0, %v10287_v40  ;;  %v5453_v28 = vsel %vm597_vm1, %v5377_v10, 0 }
0x1b8b   :  { %8531 = vmatprep.subr.msk.bf16.mxu0 %vm597_vm1, %v5376_v12  ;;  %8307 = vmatprep.mubr.msk.bf16.mxu0 %vm597_vm1, %v5372_v55  ;;  %v5450_v2 = vsel %vm597_vm1, %v5376_v12, 0 }
0x1b8c   :  { %8298 = vmatpush3.bf16.xpose.msra.mxu1 %v5392_v63  ;;  %8304 = vmatpush3.bf16.xpose.msra.mxu0 %v5450_v2 }
0x1b8d   :  { %8532 = vmatprep.subr.msk.bf16.mxu0 %vm597_vm1, %v5377_v10 }
0x1b93   :  { %8300 = vmatmul.mubr.msk.bf16.vlgmr.msra.gmra.mrb[172].mxu1 %vm597_vm1, %v5371_v43 }
0x1b94   :  { %8306 = vmatpush3.bf16.xpose.msra.mxu0 %v5453_v28 }
0x1b9b   :  { %8308 = vmatmul.mubr.msk.bf16.vlgmr.msra.gmra.mrb[124].mxu0 %vm597_vm1, %v5373_v35 }
0x1c55   :  { %v8289_v3 = vpop.f32.mrb[116].mxu0 }
0x1c56   :  { %v5339_v39 = vpop.f32.mrb[117].mxu0  ;;  %v5348_v15 = vadd.f32 %v8289_v3, %v7334_v7 }
0x1c57   :  { %v8290_v9 = vpop.f32.mrb[118].mxu0  ;;  %v5340_v29 = vadd.f32 %v7334_v7, %v5339_v39 }
0x1c58   :  { %v5351_v16 = vadd.f32 %v8290_v9, %v7334_v7  ;;  %v5342_v6 = vpop.f32.mrb[119].mxu0 }
0x1c59   :  { %v5343_v51 = vadd.f32 %v7334_v7, %v5342_v6 }
0x1c5a   :  { %v5379_v53 = vpack.c.bf16 %v5351_v16, %v5348_v15 }
0x1c5b   :  { %v5378_v34 = vpack.c.bf16 %v5343_v51, %v5340_v29 }
0x1c5d   :  { %v8293_v44 = vpop.f32.mrb[120].mxu0  ;;  %8311 = vmatprep.subr.bf16.mxu1 %v5378_v34 }
0x1c5e   :  { %v5364_v26 = vadd.f32 %v8293_v44, %v7334_v7  ;;  %v5355_v43 = vpop.f32.mrb[121].mxu0  ;;  %8312 = vmatpush3.bf16.msra.mxu1 %v5378_v34 }
0x1c5f   :  { %v8294_v18 = vpop.f32.mrb[122].mxu0  ;;  %8313 = vmatprep.subr.bf16.mxu1 %v5379_v53  ;;  %v5356_v8 = vadd.f32 %v7334_v7, %v5355_v43 }
0x1c60   :  { %v5367_v52 = vadd.f32 %v8294_v18, %v7334_v7  ;;  %v5358_v17 = vpop.f32.mrb[123].mxu0 }
0x1c61   :  { %v5359_v57 = vadd.f32 %v7334_v7, %v5358_v17 }
0x1c62   :  { %v10576_v32 = vpack.c.bf16 %v5367_v52, %v5364_v26  ;;  %8314 = vmatpush3.bf16.msra.mxu1 %v5379_v53 }
0x1c63   :  { %v10578_v4 = vpack.c.bf16 %v5359_v57, %v5356_v8 }
0x1c65   :  { %8319 = vmatprep.subr.bf16.mxu1 %v10578_v4 }
0x1c66   :  { %v8301_v42 = vpop.f32.mrb[172].mxu1 }
0x1c67   :  { %v5428_v38 = vpop.f32.mrb[173].mxu1  ;;  %v5510_v5 = vsel %vm323_vm0, %v8301_v42, -inf }
0x1c68   :  { %v8302_v41 = vpop.f32.mrb[174].mxu1  ;;  %v5504_v48 = vsel %vm323_vm0, %v5428_v38, -inf }
0x1c69   :  { %5505 = vmax.xlane.f32.xlu0 %v5504_v48  ;;  %v5431_v35 = vpop.f32.mrb[175].mxu1  ;;  %v5513_v13 = vsel %vm323_vm0, %v8302_v41, -inf }
0x1c6a   :  { %v5507_v55 = vsel %vm323_vm0, %v5431_v35, -inf }
0x1c6b   :  { %5508 = vmax.xlane.f32.xlu1 %v5507_v55 }
0x1c6d   :  { %5511 = vmax.xlane.f32.xlu0 %v5510_v5  ;;  %v10597_v5 = vld [vmem:[#allocation14 + $0x18] sm:$0xf] }
0x1c6e   :  { %v8309_v47 = vpop.f32.mrb[124].mxu0  ;;  %8533 = vmatprep.subr.msk.bf16.mxu0 %vm1559_vm2, %v10597_v5 }
0x1c6f   :  { %5514 = vmax.xlane.f32.xlu1 %v5513_v13  ;;  %v5489_v59 = vpop.f32.mrb[125].mxu0  ;;  %v5522_v56 = vsel %vm323_vm0, %v8309_v47, -inf }
0x1c70   :  { %v8310_v62 = vpop.f32.mrb[126].mxu0  ;;  %v5516_v23 = vsel %vm323_vm0, %v5489_v59, -inf }
0x1c71   :  { %5517 = vmax.xlane.f32.xlu0 %v5516_v23  ;;  %v5492_v25 = vpop.f32.mrb[127].mxu0  ;;  %v5525_v46 = vsel %vm323_vm0, %v8310_v62, -inf }
0x1c72   :  { %v5519_v45 = vsel %vm323_vm0, %v5492_v25, -inf }
0x1c73   :  { %5520 = vmax.xlane.f32.xlu1 %v5519_v45 }
0x1c75   :  { %5523 = vmax.xlane.f32.xlu0 %v5522_v56 }
0x1c77   :  { %5526 = vmax.xlane.f32.xlu1 %v5525_v46 }
0x1cf6   :  { %v5506_v27 = vpop.xlane.xlu0 %5505 }
0x1cf7   :  { %v5528_v49 = vsub.f32 %v5428_v38, %v5506_v27 }
0x1cf8   :  { %v5509_v20 = vpop.xlane.xlu1 %5508 }
0x1cf9   :  { %v5536_v50 = vmul.f32 1.442695, %v5528_v49  ;;  %v5529_v60 = vsub.f32 %v5431_v35, %v5509_v20 }
0x1cfa   :  { %v5512_v61 = vpop.xlane.xlu0 %5511 }
0x1cfb   :  { %8855 = vpow2.f32 %v5536_v50  ;;  %v5538_v31 = vmul.f32 1.442695, %v5529_v60  ;;  %v5530_v0 = vsub.f32 %v8301_v42, %v5512_v61 }
0x1cfc   :  { %v5515_v58 = vpop.xlane.xlu1 %5514 }
0x1cfd   :  { %8857 = vpow2.f32 %v5538_v31  ;;  %v5540_v54 = vmul.f32 1.442695, %v5530_v0  ;;  %v5531_v10 = vsub.f32 %v8302_v41, %v5515_v58 }
0x1cfe   :  { %v5518_v12 = vpop.xlane.xlu0 %5517 }
0x1cff   :  { %8859 = vpow2.f32 %v5540_v54  ;;  %v5542_v63 = vmul.f32 1.442695, %v5531_v10  ;;  %v5532_v2 = vsub.f32 %v5489_v59, %v5518_v12 }
0x1d00   :  { %v5521_v28 = vpop.xlane.xlu1 %5520 }
0x1d01   :  { %8861 = vpow2.f32 %v5542_v63  ;;  %v5544_v3 = vmul.f32 1.442695, %v5532_v2  ;;  %v5533_v7 = vsub.f32 %v5492_v25, %v5521_v28 }
0x1d02   :  { %v5524_v39 = vpop.xlane.xlu0 %5523 }
0x1d03   :  { %8863 = vpow2.f32 %v5544_v3  ;;  %v5546_v9 = vmul.f32 1.442695, %v5533_v7  ;;  %v5534_v15 = vsub.f32 %v8309_v47, %v5524_v39  ;;  %v8615_v3 = vld [vmem:[#allocation5 + $0x70] sm:$0xff]  }
0x1d04   :  { %v5527_v16 = vpop.xlane.xlu1 %5526 }
0x1d05   :  { %v8856_v6 = vpop.eup %8855  ;;  %8865 = vpow2.f32 %v5546_v9  ;;  %v5548_v29 = vmul.f32 1.442695, %v5534_v15  ;;  %v5535_v51 = vsub.f32 %v8310_v62, %v5527_v16  ;;  %v8616_v16 = vld [vmem:[#allocation5 + $0x78] sm:$0xff]  }
0x1d06   :  { %v5552_v53 = vsel %vm323_vm0, %v8856_v6, 0.0 }
0x1d07   :  { %v8858_v34 = vpop.eup %8857  ;;  %8867 = vpow2.f32 %v5548_v29  ;;  %v5550_v44 = vmul.f32 1.442695, %v5535_v51  ;;  %5553 = vadd.xlane.f32.xlu0 %v5552_v53  ;;  %v8619_v29 = vld [vmem:[#allocation7 + $0x70] sm:$0xff]  }
0x1d08   :  { %v5555_v26 = vsel %vm323_vm0, %v8858_v34, 0.0 }
0x1d09   :  { %v8860_v43 = vpop.eup %8859  ;;  %8869 = vpow2.f32 %v5550_v44  ;;  %5556 = vadd.xlane.f32.xlu1 %v5555_v26 }
0x1d0a   :  { %v5558_v18 = vsel %vm323_vm0, %v8860_v43, 0.0 }
0x1d0b   :  { %v8862_v52 = vpop.eup %8861  ;;  %5559 = vadd.xlane.f32.xlu0 %v5558_v18  ;;  %v8620_v18 = vld [vmem:[#allocation7 + $0x78] sm:$0xff]  }
0x1d0c   :  { %v5561_v17 = vsel %vm323_vm0, %v8862_v52, 0.0 }
0x1d0d   :  { %v8864_v8 = vpop.eup %8863  ;;  %5562 = vadd.xlane.f32.xlu1 %v5561_v17 }
0x1d0e   :  { %v5564_v57 = vsel %vm323_vm0, %v8864_v8, 0.0 }
0x1d0f   :  { %v8866_v42 = vpop.eup %8865  ;;  %5565 = vadd.xlane.f32.xlu0 %v5564_v57 }
0x1d10   :  { %v5567_v38 = vsel %vm323_vm0, %v8866_v42, 0.0 }
0x1d11   :  { %v8868_v41 = vpop.eup %8867  ;;  %5568 = vadd.xlane.f32.xlu1 %v5567_v38 }
0x1d12   :  { %v5570_v48 = vsel %vm323_vm0, %v8868_v41, 0.0 }
0x1d13   :  { %v8870_v35 = vpop.eup %8869  ;;  %5571 = vadd.xlane.f32.xlu0 %v5570_v48 }
0x1d14   :  { %v5573_v55 = vsel %vm323_vm0, %v8870_v35, 0.0 }
0x1d15   :  { %5574 = vadd.xlane.f32.xlu1 %v5573_v55 }
0x1d94   :  { %v5554_v47 = vpop.xlane.xlu0 %5553 }
0x1d95   :  { %8871 = vrcp.f32 %v5554_v47 }
0x1d96   :  { %v5557_v13 = vpop.xlane.xlu1 %5556 }
0x1d97   :  { %8873 = vrcp.f32 %v5557_v13 }
0x1d98   :  { %v5560_v59 = vpop.xlane.xlu0 %5559 }
0x1d99   :  { %8875 = vrcp.f32 %v5560_v59 }
0x1d9a   :  { %v5563_v62 = vpop.xlane.xlu1 %5562 }
0x1d9b   :  { %8877 = vrcp.f32 %v5563_v62 }
0x1d9c   :  { %v5566_v23 = vpop.xlane.xlu0 %5565 }
0x1d9d   :  { %8879 = vrcp.f32 %v5566_v23 }
0x1d9e   :  { %v5569_v25 = vpop.xlane.xlu1 %5568 }
0x1d9f   :  { %v8872_v45 = vpop.eup %8871  ;;  %8881 = vrcp.f32 %v5569_v25 }
0x1da0   :  { %v5572_v56 = vpop.xlane.xlu0 %5571  ;;  %v5584_v49 = vmul.f32 %v8872_v45, %v8856_v6  ;;  %v8618_v6 = vld [vmem:[#allocation8 + $0x78] sm:$0xff]  }
0x1da1   :  { %v8874_v46 = vpop.eup %8873  ;;  %8883 = vrcp.f32 %v5572_v56 }
0x1da2   :  { %v5575_v27 = vpop.xlane.xlu1 %5574  ;;  %v5585_v20 = vmul.f32 %v8874_v46, %v8858_v34 }
0x1da3   :  { %v8876_v50 = vpop.eup %8875  ;;  %8885 = vrcp.f32 %v5575_v27 }
0x1da4   :  { %v5592_v60 = vpack.c.bf16 %v5585_v20, %v5584_v49  ;;  %v5586_v31 = vmul.f32 %v8876_v50, %v8860_v43 }
0x1da5   :  { %v8878_v61 = vpop.eup %8877 }
0x1da6   :  { %v5587_v0 = vmul.f32 %v8878_v61, %v8862_v52  ;;  %8315 = vmatprep.mubr.msk.bf16.mxu1 %vm323_vm0, %v5592_v60 }
0x1da7   :  { %v8880_v58 = vpop.eup %8879 }
0x1da8   :  { %v5593_v54 = vpack.c.bf16 %v5587_v0, %v5586_v31  ;;  %v5588_v12 = vmul.f32 %v8880_v58, %v8864_v8 }
0x1da9   :  { %v8882_v10 = vpop.eup %8881 }
0x1daa   :  { %8316 = vmatmul.mubr.msk.bf16.vlgmr.msra.gmra.mrb[176].mxu1 %vm323_vm0, %v5593_v54  ;;  %v5589_v63 = vmul.f32 %v8882_v10, %v8866_v42 }
0x1dab   :  { %v8884_v2 = vpop.eup %8883  ;;  %8320 = vmatpush3.bf16.msra.mxu1 %v10578_v4  ;;  %v8617_v4 = vld [vmem:[#allocation8 + $0x70] sm:$0xff]  }
0x1dac   :  { %8321 = vmatprep.subr.bf16.mxu1 %v10576_v32  ;;  %v5594_v28 = vpack.c.bf16 %v5589_v63, %v5588_v12  ;;  %v5590_v39 = vmul.f32 %v8884_v2, %v8868_v41  ;;  %v7353_v41 = vld [vmem:[#allocation10 + $0x7] ss:$0 sm:$0xff]  ;;  %v7367_v2 = vld [vmem:[#allocation13 + $0x7] ss:$0 sm:$0xff] }
0x1dad   :  { %v8886_v7 = vpop.eup %8885 }
0x1dae   :  { %v5591_v9 = vmul.f32 %v8886_v7, %v8870_v35  ;;  %8323 = vmatprep.mubr.msk.bf16.mxu1 %vm323_vm0, %v5594_v28 }
0x1daf   :  { %8322 = vmatpush3.bf16.msra.mxu1 %v10576_v32  ;;  %v5725_v32 = vsel %vm1559_vm2, %v10597_v5, 0 }
0x1db0   :  { %v5595_v15 = vpack.c.bf16 %v5591_v9, %v5590_v39  ;;  %8337 = vmatprep.subr.bf16.mxu1 %v8615_v3  ;;  %8328 = vmatpush3.bf16.msra.mxu0 %v5725_v32 }
0x1db1   :  { %8349 = vmatprep.subr.bf16.mxu0 %v8619_v29 }
0x1db2   :  { %8324 = vmatmul.mubr.msk.bf16.vlgmr.msra.gmra.mrb[180].mxu1 %vm323_vm0, %v5595_v15 }
0x1db3   :  { %8338 = vmatpush3.bf16.msra.mxu1 %v8615_v3  ;;  %8341 = vmatprep.mubr.msk.bf16.mxu1 %vm323_vm0, %v10246_v14 }
0x1db4   :  { %8339 = vmatprep.subr.bf16.mxu1 %v8616_v16 }
0x1db7   :  { %8340 = vmatpush3.bf16.msra.mxu1 %v8616_v16 }
0x1db8   :  { %8361 = vmatprep.subr.bf16.mxu1 %v8617_v4 }
0x1dba   :  { %8342 = vmatmul.mubr.msk.bf16.vlgmr.msra.gmra.mrb[184].mxu1 %vm323_vm0, %v10260_v22 }
0x1dbb   :  { %8345 = vmatprep.mubr.msk.bf16.mxu1 %vm323_vm0, %v10275_v21  ;;  %8362 = vmatpush3.bf16.msra.mxu1 %v8617_v4 }
0x1dbc   :  { %8363 = vmatprep.subr.bf16.mxu1 %v8618_v6 }
0x1dbf   :  { %8364 = vmatpush3.bf16.msra.mxu1 %v8618_v6 }
0x1dc2   :  { %8346 = vmatmul.mubr.msk.bf16.gmra.mrb[188].mxu1 %vm323_vm0, %v10287_v40 }
0x1dc3   :  { %8365 = vmatprep.mubr.msk.bf16.mxu1 %vm323_vm0, %v10246_v14 }
0x1dca   :  { %8366 = vmatmul.mubr.msk.bf16.vlgmr.msra.gmra.mrb[192].mxu1 %vm323_vm0, %v10260_v22 }
0x1dcb   :  { %8369 = vmatprep.mubr.msk.bf16.mxu1 %vm323_vm0, %v10275_v21 }
0x1dd2   :  { %8370 = vmatmul.mubr.msk.bf16.gmra.mrb[196].mxu1 %vm323_vm0, %v10287_v40 }
0x1e7d   :  { %v8317_v51 = vpop.f32.mrb[176].mxu1 }
0x1e7e   :  { %v5636_v53 = vpop.f32.mrb[177].mxu1 }
0x1e7f   :  { %v8318_v34 = vpop.f32.mrb[178].mxu1 }
0x1e80   :  { %v5707_v44 = vpack.c.bf16 %v8318_v34, %v8317_v51  ;;  %v5639_v26 = vpop.f32.mrb[179].mxu1 }
0x1e81   :  { %v5706_v43 = vpack.c.bf16 %v5639_v26, %v5636_v53 }
0x1e83   :  { %8329 = vmatprep.mubr.msk.bf16.mxu0 %vm597_vm1, %v5706_v43 }
0x1e84   :  { %8330 = vmatmul.mubr.msk.bf16.vlgmr.msra.gmra.mrb[108].mxu0 %vm597_vm1, %v5707_v44 }
0x1e85   :  { %v8325_v52 = vpop.f32.mrb[180].mxu1  ;;  %8350 = vmatpush3.bf16.msra.mxu0 %v8619_v29 }
0x1e86   :  { %v5691_v17 = vpop.f32.mrb[181].mxu1  ;;  %8351 = vmatprep.subr.bf16.mxu0 %v8620_v18 }
0x1e87   :  { %v8326_v8 = vpop.f32.mrb[182].mxu1 }
0x1e88   :  { %v5709_v57 = vpack.c.bf16 %v8326_v8, %v8325_v52  ;;  %v5694_v42 = vpop.f32.mrb[183].mxu1 }
0x1e89   :  { %v5708_v38 = vpack.c.bf16 %v5694_v42, %v5691_v17  ;;  %8352 = vmatpush3.bf16.msra.mxu0 %v8620_v18  ;;  %v7360_v17 = vld [vmem:[#allocation11 + $0x7] ss:$0 sm:$0xff] }
0x1e8b   :  { %8333 = vmatprep.mubr.msk.bf16.mxu0 %vm597_vm1, %v5708_v38 }
0x1e8c   :  { %8334 = vmatmul.mubr.msk.bf16.gmra.mrb[112].mxu0 %vm597_vm1, %v5709_v57 }
0x1e8d   :  { %v8343_v48 = vpop.f32.mrb[184].mxu1  ;;  %8353 = vmatprep.mubr.msk.bf16.mxu0 %vm323_vm0, %v10246_v14 }
0x1e8e   :  { %v5868_v35 = vadd.f32 %v8343_v48, %v7353_v41  ;;  %v5859_v55 = vpop.f32.mrb[185].mxu1 }
0x1e8f   :  { %v5860_v5 = vadd.f32 %v7353_v41, %v5859_v55  ;;  %v8344_v47 = vpop.f32.mrb[186].mxu1 }
0x1e90   :  { %v5871_v13 = vadd.f32 %v8344_v47, %v7353_v41  ;;  %v5862_v59 = vpop.f32.mrb[187].mxu1  ;;  %v10632_v23 = vmul.f32 0.35355338, %v5868_v35 }
0x1e91   :  { %v5863_v62 = vadd.f32 %v7353_v41, %v5862_v59  ;;  %v5890_v45 = vmul.f32 0.35355338, %v5860_v5 }
0x1e92   :  { %v10634_v25 = vmul.f32 0.35355338, %v5871_v13 }
0x1e93   :  { %v5891_v56 = vmul.f32 0.35355338, %v5863_v62 }
0x1e94   :  { %v6079_v46 = vpack.c.bf16 %v10634_v25, %v10632_v23  ;;  %8354 = vmatmul.mubr.msk.bf16.vlgmr.msra.gmra.mrb[128].mxu0 %vm323_vm0, %v10260_v22 }
0x1e95   :  { %v6078_v14 = vpack.c.bf16 %v5891_v56, %v5890_v45  ;;  %v8347_v27 = vpop.f32.mrb[188].mxu1  ;;  %8357 = vmatprep.mubr.msk.bf16.mxu0 %vm323_vm0, %v10275_v21 }
0x1e96   :  { %v5884_v49 = vadd.f32 %v8347_v27, %v7353_v41  ;;  %v5875_v20 = vpop.f32.mrb[189].mxu1 }
0x1e97   :  { %v5876_v50 = vadd.f32 %v7353_v41, %v5875_v20  ;;  %v8348_v60 = vpop.f32.mrb[190].mxu1 }
0x1e98   :  { %v5887_v61 = vadd.f32 %v8348_v60, %v7353_v41  ;;  %v5878_v31 = vpop.f32.mrb[191].mxu1  ;;  %v10642_v58 = vmul.f32 0.35355338, %v5884_v49 }
0x1e99   :  { %v5879_v0 = vadd.f32 %v7353_v41, %v5878_v31  ;;  %v5894_v10 = vmul.f32 0.35355338, %v5876_v50 }
0x1e9a   :  { %v10644_v54 = vmul.f32 0.35355338, %v5887_v61 }
0x1e9b   :  { %v5895_v12 = vmul.f32 0.35355338, %v5879_v0 }
0x1e9c   :  { %v6081_v22 = vpack.c.bf16 %v10644_v54, %v10642_v58  ;;  %8358 = vmatmul.mubr.msk.bf16.gmra.mrb[132].mxu0 %vm323_vm0, %v10287_v40 }
0x1e9d   :  { %v6080_v21 = vpack.c.bf16 %v5895_v12, %v5894_v10  ;;  %v8367_v63 = vpop.f32.mrb[192].mxu1  ;;  %8377 = vmatprep.mubr.msk.bf16.mxu0 %vm597_vm1, %v6078_v14 }
0x1e9e   :  { %v6047_v28 = vpop.f32.mrb[193].mxu1  ;;  %v6056_v7 = vadd.f32 %v8367_v63, %v7367_v2 }
0x1e9f   :  { %v8368_v3 = vpop.f32.mrb[194].mxu1  ;;  %8385 = vmatprep.mubr.msk.bf16.mxu1 %vm597_vm1, %v6080_v21  ;;  %v6048_v15 = vadd.f32 %v7367_v2, %v6047_v28 }
0x1ea0   :  { %v6059_v39 = vadd.f32 %v8368_v3, %v7367_v2  ;;  %v6050_v9 = vpop.f32.mrb[195].mxu1 }
0x1ea1   :  { %v6051_v16 = vadd.f32 %v7367_v2, %v6050_v9 }
0x1ea2   :  { %v6087_v4 = vpack.c.bf16 %v6059_v39, %v6056_v7 }
0x1ea3   :  { %v6086_v6 = vpack.c.bf16 %v6051_v16, %v6048_v15 }
0x1ea5   :  { %v8371_v32 = vpop.f32.mrb[196].mxu1 }
0x1ea6   :  { %v6063_v29 = vpop.f32.mrb[197].mxu1  ;;  %v6072_v40 = vadd.f32 %v8371_v32, %v7367_v2 }
0x1ea7   :  { %v8372_v51 = vpop.f32.mrb[198].mxu1  ;;  %v6064_v44 = vadd.f32 %v7367_v2, %v6063_v29 }
0x1ea8   :  { %v6075_v53 = vadd.f32 %v8372_v51, %v7367_v2  ;;  %v6066_v34 = vpop.f32.mrb[199].mxu1 }
0x1ea9   :  { %v6067_v26 = vadd.f32 %v7367_v2, %v6066_v34 }
0x1eaa   :  { %v6089_v43 = vpack.c.bf16 %v6075_v53, %v6072_v40 }
0x1eab   :  { %v6088_v18 = vpack.c.bf16 %v6067_v26, %v6064_v44 }
0x1f67   :  { %v8355_v52 = vpop.f32.mrb[128].mxu0 }
0x1f68   :  { %v5957_v8 = vpop.f32.mrb[129].mxu0  ;;  %v5966_v42 = vadd.f32 %v8355_v52, %v7360_v17 }
0x1f69   :  { %v8356_v57 = vpop.f32.mrb[130].mxu0  ;;  %v5958_v48 = vadd.f32 %v7360_v17, %v5957_v8 }
0x1f6a   :  { %v5969_v38 = vadd.f32 %v8356_v57, %v7360_v17  ;;  %v5960_v41 = vpop.f32.mrb[131].mxu0 }
0x1f6b   :  { %v5961_v35 = vadd.f32 %v7360_v17, %v5960_v41 }
0x1f6c   :  { %v6083_v55 = vpack.c.bf16 %v5969_v38, %v5966_v42 }
0x1f6d   :  { %v6082_v5 = vpack.c.bf16 %v5961_v35, %v5958_v48 }
0x1f6e   :  { %v6100_v60 = vsel %vm597_vm1, %v6083_v55, 0 }
0x1f6f   :  { %v8359_v47 = vpop.f32.mrb[132].mxu0  ;;  %8534 = vmatprep.subr.msk.bf16.mxu0 %vm597_vm1, %v6082_v5  ;;  %v6097_v13 = vsel %vm597_vm1, %v6082_v5, 0 }
0x1f70   :  { %v5973_v59 = vpop.f32.mrb[133].mxu0  ;;  %8374 = vmatpush3.bf16.xpose.msra.mxu0 %v6097_v13  ;;  %v5982_v45 = vadd.f32 %v8359_v47, %v7360_v17 }
0x1f71   :  { %v8360_v62 = vpop.f32.mrb[134].mxu0  ;;  %8535 = vmatprep.subr.msk.bf16.mxu0 %vm597_vm1, %v6083_v55  ;;  %v5974_v27 = vadd.f32 %v7360_v17, %v5973_v59 }
0x1f72   :  { %v5985_v56 = vadd.f32 %v8360_v62, %v7360_v17  ;;  %v5976_v14 = vpop.f32.mrb[135].mxu0 }
0x1f73   :  { %v5977_v49 = vadd.f32 %v7360_v17, %v5976_v14 }
0x1f74   :  { %v6085_v20 = vpack.c.bf16 %v5985_v56, %v5982_v45 }
0x1f75   :  { %v6084_v50 = vpack.c.bf16 %v5977_v49, %v5974_v27 }
0x1f76   :  { %v6161_v31 = vsel %vm597_vm1, %v6085_v20, 0 }
0x1f77   :  { %8536 = vmatprep.subr.msk.bf16.mxu1 %vm597_vm1, %v6084_v50  ;;  %v6158_v61 = vsel %vm597_vm1, %v6084_v50, 0 }
0x1f78   :  { %8376 = vmatpush3.bf16.xpose.msra.mxu0 %v6100_v60  ;;  %8382 = vmatpush3.bf16.xpose.msra.mxu1 %v6158_v61 }
0x1f79   :  { %8537 = vmatprep.subr.msk.bf16.mxu1 %vm597_vm1, %v6085_v20  ;;  %8389 = vmatprep.subr.bf16.mxu0 %v6086_v6 }
0x1f7f   :  { %8378 = vmatmul.mubr.msk.bf16.vlgmr.msra.gmra.mrb[136].mxu0 %vm597_vm1, %v6079_v46 }
0x1f80   :  { %8384 = vmatpush3.bf16.xpose.msra.mxu1 %v6161_v31  ;;  %8390 = vmatpush3.bf16.msra.mxu0 %v6086_v6 }
0x1f81   :  { %8391 = vmatprep.subr.bf16.mxu0 %v6087_v4  ;;  %8397 = vmatprep.subr.bf16.mxu1 %v6088_v18 }
0x1f84   :  { %8392 = vmatpush3.bf16.msra.mxu0 %v6087_v4 }
0x1f87   :  { %8386 = vmatmul.mubr.msk.bf16.vlgmr.msra.gmra.mrb[200].mxu1 %vm597_vm1, %v6081_v22 }
0x1f88   :  { %8398 = vmatpush3.bf16.msra.mxu1 %v6088_v18 }
0x1f89   :  { %8399 = vmatprep.subr.bf16.mxu1 %v6089_v43 }
0x1f8c   :  { %8400 = vmatpush3.bf16.msra.mxu1 %v6089_v43 }
0x2052   :  { %v8379_v0 = vpop.f32.mrb[136].mxu0 }
0x2053   :  { %v6136_v10 = vpop.f32.mrb[137].mxu0  ;;  %v6218_v21 = vsel %vm323_vm0, %v8379_v0, -inf }
0x2054   :  { %v8380_v23 = vpop.f32.mrb[138].mxu0  ;;  %v6212_v25 = vsel %vm323_vm0, %v6136_v10, -inf }
0x2055   :  { %6213 = vmax.xlane.f32.xlu0 %v6212_v25  ;;  %v6139_v46 = vpop.f32.mrb[139].mxu0  ;;  %v6221_v58 = vsel %vm323_vm0, %v8380_v23, -inf }
0x2056   :  { %v6215_v12 = vsel %vm323_vm0, %v6139_v46, -inf }
0x2057   :  { %6216 = vmax.xlane.f32.xlu1 %v6215_v12 }
0x2059   :  { %6219 = vmax.xlane.f32.xlu0 %v6218_v21 }
0x205a   :  { %v8387_v63 = vpop.f32.mrb[200].mxu1 }
0x205b   :  { %v6197_v54 = vpop.f32.mrb[201].mxu1  ;;  %6222 = vmax.xlane.f32.xlu1 %v6221_v58  ;;  %v6230_v7 = vsel %vm323_vm0, %v8387_v63, -inf }
0x205c   :  { %v8388_v22 = vpop.f32.mrb[202].mxu1  ;;  %v6224_v2 = vsel %vm323_vm0, %v6197_v54, -inf }
0x205d   :  { %v6200_v28 = vpop.f32.mrb[203].mxu1  ;;  %6225 = vmax.xlane.f32.xlu0 %v6224_v2  ;;  %v6233_v39 = vsel %vm323_vm0, %v8388_v22, -inf }
0x205e   :  { %v6227_v3 = vsel %vm323_vm0, %v6200_v28, -inf }
0x205f   :  { %6228 = vmax.xlane.f32.xlu1 %v6227_v3 }
0x2061   :  { %6231 = vmax.xlane.f32.xlu0 %v6230_v7 }
0x2063   :  { %6234 = vmax.xlane.f32.xlu1 %v6233_v39 }
0x20e2   :  { %v6214_v9 = vpop.xlane.xlu0 %6213 }
0x20e3   :  { %v6236_v15 = vsub.f32 %v6136_v10, %v6214_v9 }
0x20e4   :  { %v6217_v16 = vpop.xlane.xlu1 %6216 }
0x20e5   :  { %v6244_v4 = vmul.f32 1.442695, %v6236_v15  ;;  %v6237_v6 = vsub.f32 %v6139_v46, %v6217_v16 }
0x20e6   :  { %v6220_v32 = vpop.xlane.xlu0 %6219 }
0x20e7   :  { %8887 = vpow2.f32 %v6244_v4  ;;  %v6246_v29 = vmul.f32 1.442695, %v6237_v6  ;;  %v6238_v51 = vsub.f32 %v8379_v0, %v6220_v32  ;;  %v6419_v0 = vld [vmem:[#allocation14 + $0x1c] sm:$0xf] }
0x20e8   :  { %v6223_v40 = vpop.xlane.xlu1 %6222  ;;  %8538 = vmatprep.subr.msk.bf16.mxu0 %vm1559_vm2, %v6419_v0 }
0x20e9   :  { %8889 = vpow2.f32 %v6246_v29  ;;  %v6248_v53 = vmul.f32 1.442695, %v6238_v51  ;;  %v6239_v34 = vsub.f32 %v8380_v23, %v6223_v40 }
0x20ea   :  { %v6226_v44 = vpop.xlane.xlu0 %6225 }
0x20eb   :  { %8891 = vpow2.f32 %v6248_v53  ;;  %v6250_v26 = vmul.f32 1.442695, %v6239_v34  ;;  %v6240_v43 = vsub.f32 %v6197_v54, %v6226_v44 }
0x20ec   :  { %v6229_v18 = vpop.xlane.xlu1 %6228 }
0x20ed   :  { %8893 = vpow2.f32 %v6250_v26  ;;  %v6252_v52 = vmul.f32 1.442695, %v6240_v43  ;;  %v6241_v17 = vsub.f32 %v6200_v28, %v6229_v18  ;;  %v6433_v43 = vsel %vm1559_vm2, %v6419_v0, 0 }
0x20ee   :  { %v6232_v8 = vpop.xlane.xlu0 %6231 }
0x20ef   :  { %8895 = vpow2.f32 %v6252_v52  ;;  %v6254_v57 = vmul.f32 1.442695, %v6241_v17  ;;  %v6242_v42 = vsub.f32 %v8387_v63, %v6232_v8 }
0x20f0   :  { %v6235_v38 = vpop.xlane.xlu1 %6234 }
0x20f1   :  { %v8888_v41 = vpop.eup %8887  ;;  %8897 = vpow2.f32 %v6254_v57  ;;  %v6256_v48 = vmul.f32 1.442695, %v6242_v42  ;;  %v6243_v35 = vsub.f32 %v8388_v22, %v6235_v38 }
0x20f2   :  { %v6260_v55 = vsel %vm323_vm0, %v8888_v41, 0.0 }
0x20f3   :  { %v8890_v5 = vpop.eup %8889  ;;  %8899 = vpow2.f32 %v6256_v48  ;;  %v6258_v47 = vmul.f32 1.442695, %v6243_v35  ;;  %6261 = vadd.xlane.f32.xlu0 %v6260_v55 }
0x20f4   :  { %v6263_v13 = vsel %vm323_vm0, %v8890_v5, 0.0 }
0x20f5   :  { %v8892_v59 = vpop.eup %8891  ;;  %8901 = vpow2.f32 %v6258_v47  ;;  %6264 = vadd.xlane.f32.xlu1 %v6263_v13  ;;  %v7386_v47 = vld [vmem:[#allocation16 + $0x1] ss:$0 sm:$0xff] }
0x20f6   :  { %v6266_v62 = vsel %vm323_vm0, %v8892_v59, 0.0 }
0x20f7   :  { %v8894_v45 = vpop.eup %8893  ;;  %6267 = vadd.xlane.f32.xlu0 %v6266_v62 }
0x20f8   :  { %v6269_v56 = vsel %vm323_vm0, %v8894_v45, 0.0 }
0x20f9   :  { %v8896_v14 = vpop.eup %8895  ;;  %6270 = vadd.xlane.f32.xlu1 %v6269_v56 }
0x20fa   :  { %v6272_v27 = vsel %vm323_vm0, %v8896_v14, 0.0 }
0x20fb   :  { %v8898_v49 = vpop.eup %8897  ;;  %6273 = vadd.xlane.f32.xlu0 %v6272_v27 }
0x20fc   :  { %v6275_v20 = vsel %vm323_vm0, %v8898_v49, 0.0 }
0x20fd   :  { %v8900_v50 = vpop.eup %8899  ;;  %6276 = vadd.xlane.f32.xlu1 %v6275_v20 }
0x20fe   :  { %v6278_v60 = vsel %vm323_vm0, %v8900_v50, 0.0 }
0x20ff   :  { %v8902_v61 = vpop.eup %8901  ;;  %6279 = vadd.xlane.f32.xlu0 %v6278_v60 }
0x2100   :  { %v6281_v31 = vsel %vm323_vm0, %v8902_v61, 0.0 }
0x2101   :  { %6282 = vadd.xlane.f32.xlu1 %v6281_v31 }
0x2180   :  { %v6262_v10 = vpop.xlane.xlu0 %6261 }
0x2181   :  { %8903 = vrcp.f32 %v6262_v10 }
0x2182   :  { %v6265_v23 = vpop.xlane.xlu1 %6264 }
0x2183   :  { %8905 = vrcp.f32 %v6265_v23 }
0x2184   :  { %v6268_v25 = vpop.xlane.xlu0 %6267 }
0x2185   :  { %8907 = vrcp.f32 %v6268_v25 }
0x2186   :  { %v6271_v46 = vpop.xlane.xlu1 %6270 }
0x2187   :  { %8909 = vrcp.f32 %v6271_v46 }
0x2188   :  { %v6274_v12 = vpop.xlane.xlu0 %6273 }
0x2189   :  { %8911 = vrcp.f32 %v6274_v12 }
0x218a   :  { %v6277_v21 = vpop.xlane.xlu1 %6276 }
0x218b   :  { %v8904_v63 = vpop.eup %8903  ;;  %8913 = vrcp.f32 %v6277_v21 }
0x218c   :  { %v6280_v58 = vpop.xlane.xlu0 %6279  ;;  %v6292_v2 = vmul.f32 %v8904_v63, %v8888_v41 }
0x218d   :  { %v8906_v54 = vpop.eup %8905  ;;  %8915 = vrcp.f32 %v6280_v58 }
0x218e   :  { %v6283_v22 = vpop.xlane.xlu1 %6282  ;;  %v6293_v28 = vmul.f32 %v8906_v54, %v8890_v5 }
0x218f   :  { %v8908_v3 = vpop.eup %8907  ;;  %8917 = vrcp.f32 %v6283_v22 }
0x2190   :  { %v6300_v7 = vpack.c.bf16 %v6293_v28, %v6292_v2  ;;  %v6294_v9 = vmul.f32 %v8908_v3, %v8892_v59 }
0x2191   :  { %v8910_v39 = vpop.eup %8909 }
0x2192   :  { %v6295_v15 = vmul.f32 %v8910_v39, %v8894_v45  ;;  %8393 = vmatprep.mubr.msk.bf16.mxu0 %vm323_vm0, %v6300_v7 }
0x2193   :  { %v8912_v16 = vpop.eup %8911 }
0x2194   :  { %v6301_v4 = vpack.c.bf16 %v6295_v15, %v6294_v9  ;;  %v6296_v32 = vmul.f32 %v8912_v16, %v8896_v14 }
0x2195   :  { %v8914_v6 = vpop.eup %8913 }
0x2196   :  { %8394 = vmatmul.mubr.msk.bf16.vlgmr.msra.gmra.mrb[140].mxu0 %vm323_vm0, %v6301_v4  ;;  %v6297_v29 = vmul.f32 %v8914_v6, %v8898_v49 }
0x2197   :  { %v8916_v51 = vpop.eup %8915  ;;  %8406 = vmatpush3.bf16.msra.mxu0 %v6433_v43 }
0x2198   :  { %v6302_v40 = vpack.c.bf16 %v6297_v29, %v6296_v32  ;;  %v6298_v34 = vmul.f32 %v8916_v51, %v8900_v50 }
0x2199   :  { %v8918_v53 = vpop.eup %8917 }
0x219a   :  { %v6299_v44 = vmul.f32 %v8918_v53, %v8902_v61  ;;  %8401 = vmatprep.mubr.msk.bf16.mxu1 %vm323_vm0, %v6302_v40 }
0x219c   :  { %v6303_v26 = vpack.c.bf16 %v6299_v44, %v6298_v34 }
0x219e   :  { %8402 = vmatmul.mubr.msk.bf16.vlgmr.msra.gmra.mrb[204].mxu1 %vm323_vm0, %v6303_v26 }
0x2269   :  { %v8395_v18 = vpop.f32.mrb[140].mxu0 }
0x226a   :  { %v6344_v52 = vpop.f32.mrb[141].mxu0 }
0x226b   :  { %v8396_v17 = vpop.f32.mrb[142].mxu0 }
0x226c   :  { %v6415_v8 = vpack.c.bf16 %v8396_v17, %v8395_v18  ;;  %v6347_v57 = vpop.f32.mrb[143].mxu0 }
0x226d   :  { %v6414_v42 = vpack.c.bf16 %v6347_v57, %v6344_v52 }
0x226f   :  { %8407 = vmatprep.mubr.msk.bf16.mxu0 %vm597_vm1, %v6414_v42 }
0x2270   :  { %8408 = vmatmul.mubr.msk.bf16.vlgmr.msra.gmra.mrb[108].mxu0 %vm597_vm1, %v6415_v8 }
0x2271   :  { %v8403_v38 = vpop.f32.mrb[204].mxu1 }
0x2272   :  { %v6399_v41 = vpop.f32.mrb[205].mxu1 }
0x2273   :  { %v8404_v48 = vpop.f32.mrb[206].mxu1 }
0x2274   :  { %v6417_v35 = vpack.c.bf16 %v8404_v48, %v8403_v38  ;;  %v6402_v55 = vpop.f32.mrb[207].mxu1 }
0x2275   :  { %v6416_v5 = vpack.c.bf16 %v6402_v55, %v6399_v41 }
0x2277   :  { %8411 = vmatprep.mubr.msk.bf16.mxu0 %vm597_vm1, %v6416_v5 }
0x2278   :  { %8412 = vmatmul.mubr.msk.bf16.gmra.mrb[112].mxu0 %vm597_vm1, %v6417_v35 }
0x2343   :  { %v8409_v13 = vpop.f32.mrb[108].mxu0 }
0x2344   :  { %v6469_v59 = vpop.f32.mrb[109].mxu0  ;;  %v6518_v62 = vadd.f32 %v8409_v13, %v7386_v47 }
0x2345   :  { %v6516_v45 = vadd.f32 %v7386_v47, %v6469_v59  ;;  %v8410_v56 = vpop.f32.mrb[110].mxu0 }
0x2346   :  { %v6472_v14 = vpop.f32.mrb[111].mxu0  ;;  %v6519_v49 = vadd.f32 %v8410_v56, %v7386_v47  ;;  %v6526_v50 = vadd.f32 %v6518_v62, %v10249_v19 }
0x2347   :  { %v6524_v27 = vadd.f32 %v6516_v45, %v10239_v37  ;;  %v6517_v20 = vadd.f32 %v7386_v47, %v6472_v14 }
0x2348   :  { %v6527_v31 = vadd.f32 %v6519_v49, %v10251_v1  ;;  %v6542_v37 = vsel %vm323_vm0, %v6526_v50, 0.0 }
0x2349   :  { %v6525_v60 = vadd.f32 %v6517_v20, %v10241_v11  ;;  %v6536_v61 = vsel %vm323_vm0, %v6524_v27, 0.0  ;;  %v8621_v20 = vld [vmem:[#allocation20 + $0x10] sm:$0xff]  }
0x234a   :  { %6537 = vadd.xlane.f32.xlu0 %v6536_v61  ;;  %v6545_v58 = vsel %vm323_vm0, %v6527_v31, 0.0  ;;  %8415 = vmatprep.subr.bf16.mxu1 %v8621_v20  ;;  %v8624_v61 = vld [vmem:[#allocation23 + $0x48] sm:$0xff]  }
0x234b   :  { %v8413_v0 = vpop.f32.mrb[112].mxu0  ;;  %v6539_v10 = vsel %vm323_vm0, %v6525_v60, 0.0  ;;  %8416 = vmatpush3.bf16.msra.mxu1 %v8621_v20 }
0x234c   :  { %6540 = vadd.xlane.f32.xlu1 %v6539_v10  ;;  %v6485_v23 = vpop.f32.mrb[113].mxu0  ;;  %v6522_v25 = vadd.f32 %v8413_v0, %v7386_v47  ;;  %v8626_v0 = vld [vmem:[#allocation23 + $0x58] sm:$0xff]   ;;  %v8627_v10 = vld [vmem:[#allocation23 + $0x60] sm:$0xff]  }
0x234d   :  { %v6520_v46 = vadd.f32 %v7386_v47, %v6485_v23  ;;  %v8414_v12 = vpop.f32.mrb[114].mxu0  ;;  %v8628_v23 = vld [vmem:[#allocation23 + $0x68] sm:$0xff]  }
0x234e   :  { %6543 = vadd.xlane.f32.xlu0 %v6542_v37  ;;  %v6488_v21 = vpop.f32.mrb[115].mxu0  ;;  %v6523_v11 = vadd.f32 %v8414_v12, %v7386_v47  ;;  %v6530_v1 = vadd.f32 %v6522_v25, %v10277_v30 }
0x234f   :  { %v6528_v19 = vadd.f32 %v6520_v46, %v10263_v24  ;;  %v6521_v63 = vadd.f32 %v7386_v47, %v6488_v21 }
0x2350   :  { %6546 = vadd.xlane.f32.xlu1 %v6545_v58  ;;  %v6531_v2 = vadd.f32 %v6523_v11, %v10279_v33  ;;  %v6554_v3 = vsel %vm323_vm0, %v6530_v1, 0.0 }
0x2351   :  { %v6529_v54 = vadd.f32 %v6521_v63, %v10265_v36  ;;  %v6548_v22 = vsel %vm323_vm0, %v6528_v19, 0.0 }
0x2352   :  { %6549 = vadd.xlane.f32.xlu0 %v6548_v22  ;;  %v6557_v24 = vsel %vm323_vm0, %v6531_v2, 0.0 }
0x2353   :  { %v6551_v28 = vsel %vm323_vm0, %v6529_v54, 0.0 }
0x2354   :  { %6552 = vadd.xlane.f32.xlu1 %v6551_v28 }
0x2356   :  { %6555 = vadd.xlane.f32.xlu0 %v6554_v3 }
0x2358   :  { %6558 = vadd.xlane.f32.xlu1 %v6557_v24 }
0x23d7   :  { %v6538_v7 = vpop.xlane.xlu0 %6537 }
0x23d8   :  { %v6560_v39 = vmul.f32 0.03125, %v6538_v7 }
0x23d9   :  { %v6541_v9 = vpop.xlane.xlu1 %6540 }
0x23da   :  { %v10710_v30 = vsub.f32 %v6524_v27, %v6560_v39  ;;  %v6561_v36 = vmul.f32 0.03125, %v6541_v9 }
0x23db   :  { %v6544_v15 = vpop.xlane.xlu0 %6543 }
0x23dc   :  { %v10712_v16 = vsub.f32 %v6525_v60, %v6561_v36  ;;  %v6562_v4 = vmul.f32 0.03125, %v6544_v15  ;;  %v6576_v33 = vmul.f32 %v10710_v30, %v10710_v30  ;;  %v8623_v60 = vld [vmem:[#allocation23 + $0x40] sm:$0xff]  }
0x23dd   :  { %v6547_v6 = vpop.xlane.xlu1 %6546  ;;  %8427 = vmatprep.subr.bf16.mxu0 %v8623_v60 }
0x23de   :  { %v10716_v32 = vsub.f32 %v6526_v50, %v6562_v4  ;;  %v6563_v29 = vmul.f32 0.03125, %v6547_v6  ;;  %v6584_v51 = vsel %vm323_vm0, %v6576_v33, 0.0  ;;  %v6577_v40 = vmul.f32 %v10712_v16, %v10712_v16  ;;  %v8622_v50 = vld [vmem:[#allocation20 + $0x18] sm:$0xff]   ;;  %8428 = vmatpush3.bf16.msra.mxu0 %v8623_v60 }
0x23df   :  { %6585 = vadd.xlane.f32.xlu0 %v6584_v51  ;;  %v6550_v53 = vpop.xlane.xlu0 %6549  ;;  %8417 = vmatprep.subr.bf16.mxu1 %v8622_v50  ;;  %v7387_v33 = vld [vmem:[#allocation17 + $0x1] ss:$0 sm:$0xff] }
0x23e0   :  { %v10721_v34 = vsub.f32 %v6527_v31, %v6563_v29  ;;  %v6564_v44 = vmul.f32 0.03125, %v6550_v53  ;;  %v6587_v26 = vsel %vm323_vm0, %v6577_v40, 0.0  ;;  %v6578_v43 = vmul.f32 %v10716_v32, %v10716_v32  ;;  %8418 = vmatpush3.bf16.msra.mxu1 %v8622_v50  ;;  %8429 = vmatprep.subr.bf16.mxu0 %v8624_v61  ;;  %v8625_v31 = vld [vmem:[#allocation23 + $0x50] sm:$0xff]  }
0x23e1   :  { %6588 = vadd.xlane.f32.xlu1 %v6587_v26  ;;  %v6553_v18 = vpop.xlane.xlu1 %6552 }
0x23e2   :  { %v10726_v52 = vsub.f32 %v6528_v19, %v6564_v44  ;;  %v6565_v17 = vmul.f32 0.03125, %v6553_v18  ;;  %v6590_v8 = vsel %vm323_vm0, %v6578_v43, 0.0  ;;  %v6579_v57 = vmul.f32 %v10721_v34, %v10721_v34  ;;  %8430 = vmatpush3.bf16.msra.mxu0 %v8624_v61  ;;  %v7388_v18 = vld [vmem:[#allocation19 + $0x1] ss:$0 sm:$0xff] }
0x23e3   :  { %6591 = vadd.xlane.f32.xlu0 %v6590_v8  ;;  %v6556_v42 = vpop.xlane.xlu0 %6555  ;;  %8431 = vmatprep.subr.bf16.mxu0 %v8625_v31 }
0x23e4   :  { %v10731_v38 = vsub.f32 %v6529_v54, %v6565_v17  ;;  %v6566_v41 = vmul.f32 0.03125, %v6556_v42  ;;  %v6593_v48 = vsel %vm323_vm0, %v6579_v57, 0.0  ;;  %v6580_v35 = vmul.f32 %v10726_v52, %v10726_v52 }
0x23e5   :  { %6594 = vadd.xlane.f32.xlu1 %v6593_v48  ;;  %v6559_v55 = vpop.xlane.xlu1 %6558 }
0x23e6   :  { %v10736_v5 = vsub.f32 %v6530_v1, %v6566_v41  ;;  %v6567_v47 = vmul.f32 0.03125, %v6559_v55  ;;  %v6596_v13 = vsel %vm323_vm0, %v6580_v35, 0.0  ;;  %v6581_v59 = vmul.f32 %v10731_v38, %v10731_v38  ;;  %8432 = vmatpush3.bf16.msra.mxu0 %v8625_v31 }
0x23e7   :  { %6597 = vadd.xlane.f32.xlu0 %v6596_v13  ;;  %8433 = vmatprep.subr.bf16.mxu0 %v8626_v0 }
0x23e8   :  { %v10741_v62 = vsub.f32 %v6531_v2, %v6567_v47  ;;  %v6599_v45 = vsel %vm323_vm0, %v6581_v59, 0.0  ;;  %v6582_v56 = vmul.f32 %v10736_v5, %v10736_v5 }
0x23e9   :  { %6600 = vadd.xlane.f32.xlu1 %v6599_v45 }
0x23ea   :  { %v6602_v14 = vsel %vm323_vm0, %v6582_v56, 0.0  ;;  %v6583_v27 = vmul.f32 %v10741_v62, %v10741_v62  ;;  %8434 = vmatpush3.bf16.msra.mxu0 %v8626_v0 }
0x23eb   :  { %6603 = vadd.xlane.f32.xlu0 %v6602_v14  ;;  %8435 = vmatprep.subr.bf16.mxu0 %v8627_v10 }
0x23ec   :  { %v6605_v49 = vsel %vm323_vm0, %v6583_v27, 0.0 }
0x23ed   :  { %6606 = vadd.xlane.f32.xlu1 %v6605_v49 }
0x23ee   :  { %8436 = vmatpush3.bf16.msra.mxu0 %v8627_v10  ;;  %v8629_v10 = vld [vmem:[#allocation23 + $0x70] sm:$0xff]  }
0x23ef   :  { %8437 = vmatprep.subr.bf16.mxu0 %v8628_v23 }
0x23f2   :  { %8438 = vmatpush3.bf16.msra.mxu0 %v8628_v23  ;;  %v8630_v23 = vld [vmem:[#allocation23 + $0x78] sm:$0xff]  }
0x23f3   :  { %8439 = vmatprep.subr.bf16.mxu0 %v8629_v10 }
0x23f6   :  { %8440 = vmatpush3.bf16.msra.mxu0 %v8629_v10 }
0x23f7   :  { %8441 = vmatprep.subr.bf16.mxu0 %v8630_v23 }
0x23fa   :  { %8442 = vmatpush3.bf16.msra.mxu0 %v8630_v23 }
0x246c   :  { %v6586_v25 = vpop.xlane.xlu0 %6585 }
0x246d   :  { %v6608_v46 = vmul.f32 0.03125, %v6586_v25  ;;  %v7389_v25 = vld [vmem:[#allocation22 + $0x1] ss:$0 sm:$0xff] }
0x246e   :  { %v6589_v12 = vpop.xlane.xlu1 %6588 }
0x246f   :  { %v6616_v37 = vadd.f32 1e-05, %v6608_v46  ;;  %v6609_v21 = vmul.f32 0.03125, %v6589_v12 }
0x2470   :  { %v6592_v19 = vpop.xlane.xlu0 %6591 }
0x2471   :  { %8919 = vrsqrt.f32 %v6616_v37  ;;  %v6617_v11 = vadd.f32 1e-05, %v6609_v21  ;;  %v6610_v63 = vmul.f32 0.03125, %v6592_v19 }
0x2472   :  { %v6595_v58 = vpop.xlane.xlu1 %6594 }
0x2473   :  { %8921 = vrsqrt.f32 %v6617_v11  ;;  %v6618_v1 = vadd.f32 1e-05, %v6610_v63  ;;  %v6611_v54 = vmul.f32 0.03125, %v6595_v58 }
0x2474   :  { %v6598_v22 = vpop.xlane.xlu0 %6597 }
0x2475   :  { %8923 = vrsqrt.f32 %v6618_v1  ;;  %v6619_v2 = vadd.f32 1e-05, %v6611_v54  ;;  %v6612_v28 = vmul.f32 0.03125, %v6598_v22 }
0x2476   :  { %v6601_v3 = vpop.xlane.xlu1 %6600 }
0x2477   :  { %8925 = vrsqrt.f32 %v6619_v2  ;;  %v6620_v24 = vadd.f32 1e-05, %v6612_v28  ;;  %v6613_v7 = vmul.f32 0.03125, %v6601_v3 }
0x2478   :  { %v6604_v39 = vpop.xlane.xlu0 %6603 }
0x2479   :  { %8927 = vrsqrt.f32 %v6620_v24  ;;  %v6621_v9 = vadd.f32 1e-05, %v6613_v7  ;;  %v6614_v36 = vmul.f32 0.03125, %v6604_v39 }
0x247a   :  { %v6607_v15 = vpop.xlane.xlu1 %6606 }
0x247b   :  { %v8920_v4 = vpop.eup %8919  ;;  %8929 = vrsqrt.f32 %v6621_v9  ;;  %v6622_v6 = vadd.f32 1e-05, %v6614_v36  ;;  %v6615_v29 = vmul.f32 0.03125, %v6607_v15 }
0x247c   :  { %v6632_v51 = vmul.f32 %v8920_v4, %v10710_v30 }
0x247d   :  { %v8922_v40 = vpop.eup %8921  ;;  %8931 = vrsqrt.f32 %v6622_v6  ;;  %v6623_v53 = vadd.f32 1e-05, %v6615_v29 }
0x247e   :  { %v6633_v44 = vmul.f32 %v8922_v40, %v10712_v16  ;;  %v6646_v26 = vmul.f32 %v7387_v33, %v6632_v51 }
0x247f   :  { %v8924_v43 = vpop.eup %8923  ;;  %8933 = vrsqrt.f32 %v6623_v53 }
0x2480   :  { %v6634_v17 = vmul.f32 %v8924_v43, %v10716_v32  ;;  %v6647_v8 = vmul.f32 %v7387_v33, %v6633_v44  ;;  %v10754_v48 = vadd.f32 %v7388_v18, %v6646_v26  ;;  %v7396_v26 = vld [vmem:[#allocation25 + $0x1] ss:$0 sm:$0xff] }
0x2481   :  { %v8926_v57 = vpop.eup %8925 }
0x2482   :  { %v6648_v42 = vmul.f32 %v7387_v33, %v6634_v17  ;;  %v6635_v41 = vmul.f32 %v8926_v57, %v10721_v34  ;;  %v10756_v35 = vadd.f32 %v7388_v18, %v6647_v8 }
0x2483   :  { %v8928_v30 = vpop.eup %8927 }
0x2484   :  { %v6649_v55 = vmul.f32 %v7387_v33, %v6635_v41  ;;  %v6636_v47 = vmul.f32 %v8928_v30, %v10726_v52  ;;  %v6668_v16 = vpack.c.bf16 %v10756_v35, %v10754_v48  ;;  %v10763_v32 = vadd.f32 %v7388_v18, %v6648_v42 }
0x2485   :  { %v8930_v13 = vpop.eup %8929 }
0x2486   :  { %v6637_v59 = vmul.f32 %v8930_v13, %v10731_v38  ;;  %8419 = vmatprep.mubr.msk.bf16.mxu1 %vm323_vm0, %v6668_v16  ;;  %v10765_v45 = vadd.f32 %v7388_v18, %v6649_v55  ;;  %v6650_v34 = vmul.f32 %v7387_v33, %v6636_v47 }
0x2487   :  { %v8932_v56 = vpop.eup %8931 }
0x2488   :  { %v6638_v14 = vmul.f32 %v8932_v56, %v10736_v5  ;;  %v6669_v27 = vpack.c.bf16 %v10765_v45, %v10763_v32  ;;  %v6651_v52 = vmul.f32 %v7387_v33, %v6637_v59  ;;  %v10772_v38 = vadd.f32 %v7388_v18, %v6650_v34 }
0x2489   :  { %v8934_v49 = vpop.eup %8933 }
0x248a   :  { %v6639_v20 = vmul.f32 %v8934_v49, %v10741_v62  ;;  %8420 = vmatmul.mubr.msk.bf16.vlgmr.msra.gmra.mrb[208].mxu1 %vm323_vm0, %v6669_v27  ;;  %v10774_v50 = vadd.f32 %v7388_v18, %v6651_v52  ;;  %v6652_v60 = vmul.f32 %v7387_v33, %v6638_v14 }
0x248c   :  { %v6670_v61 = vpack.c.bf16 %v10774_v50, %v10772_v38  ;;  %v6653_v31 = vmul.f32 %v7387_v33, %v6639_v20  ;;  %v10779_v5 = vadd.f32 %v7388_v18, %v6652_v60 }
0x248e   :  { %8423 = vmatprep.mubr.msk.bf16.mxu1 %vm323_vm0, %v6670_v61  ;;  %v10781_v0 = vadd.f32 %v7388_v18, %v6653_v31 }
0x2490   :  { %v6671_v62 = vpack.c.bf16 %v10781_v0, %v10779_v5 }
0x2492   :  { %8424 = vmatmul.mubr.msk.bf16.gmra.mrb[212].mxu1 %vm323_vm0, %v6671_v62 }
0x255d   :  { %v8421_v46 = vpop.f32.mrb[208].mxu1 }
0x255e   :  { %v6752_v12 = vadd.f32 %v8421_v46, %v7389_v25  ;;  %v6743_v37 = vpop.f32.mrb[209].mxu1 }
0x255f   :  { %v6744_v21 = vadd.f32 %v7389_v25, %v6743_v37  ;;  %v8422_v19 = vpop.f32.mrb[210].mxu1 }
0x2560   :  { %v6755_v11 = vadd.f32 %v8422_v19, %v7389_v25  ;;  %v6746_v63 = vpop.f32.mrb[211].mxu1  ;;  %v6776_v1 = vmax.f32 %v6752_v12, 0.0 }
0x2561   :  { %v6747_v58 = vadd.f32 %v7389_v25, %v6746_v63  ;;  %v6774_v22 = vmax.f32 %v6744_v21, 0.0 }
0x2562   :  { %v6777_v54 = vmax.f32 %v6755_v11, 0.0 }
0x2563   :  { %v6775_v2 = vmax.f32 %v6747_v58, 0.0 }
0x2564   :  { %v6783_v28 = vpack.c.bf16 %v6777_v54, %v6776_v1 }
0x2565   :  { %v6782_v3 = vpack.c.bf16 %v6775_v2, %v6774_v22  ;;  %v8425_v24 = vpop.f32.mrb[212].mxu1 }
0x2566   :  { %v6768_v7 = vadd.f32 %v8425_v24, %v7389_v25  ;;  %v6759_v39 = vpop.f32.mrb[213].mxu1 }
0x2567   :  { %v6760_v9 = vadd.f32 %v7389_v25, %v6759_v39  ;;  %v8426_v36 = vpop.f32.mrb[214].mxu1  ;;  %8443 = vmatprep.mubr.bf16.mxu0 %v6782_v3 }
0x2568   :  { %v6771_v15 = vadd.f32 %v8426_v36, %v7389_v25  ;;  %v6762_v4 = vpop.f32.mrb[215].mxu1  ;;  %8444 = vmatmul.mubr.bf16.vlgmr.msra.gmra.mrb[144].mxu0 %v6783_v28  ;;  %v6780_v6 = vmax.f32 %v6768_v7, 0.0 }
0x2569   :  { %v6763_v33 = vadd.f32 %v7389_v25, %v6762_v4  ;;  %v6778_v51 = vmax.f32 %v6760_v9, 0.0 }
0x256a   :  { %v6781_v29 = vmax.f32 %v6771_v15, 0.0 }
0x256b   :  { %v6779_v40 = vmax.f32 %v6763_v33, 0.0 }
0x256c   :  { %v6785_v53 = vpack.c.bf16 %v6781_v29, %v6780_v6 }
0x256d   :  { %v6784_v44 = vpack.c.bf16 %v6779_v40, %v6778_v51 }
0x256f   :  { %8447 = vmatprep.mubr.bf16.mxu0 %v6784_v44 }
0x2570   :  { %8448 = vmatmul.mubr.bf16.gmra.mrb[148].mxu0 %v6785_v53 }
0x263b   :  { %v8445_v43 = vpop.f32.mrb[144].mxu0 }
0x263c   :  { %v6902_v18 = vadd.f32 %v8445_v43, %v7396_v26  ;;  %v6893_v17 = vpop.f32.mrb[145].mxu0 }
0x263d   :  { %v6894_v8 = vadd.f32 %v7396_v26, %v6893_v17  ;;  %v8446_v57 = vpop.f32.mrb[146].mxu0 }
0x263e   :  { %v6926_v42 = vadd.f32 %v6902_v18, %v10763_v32  ;;  %v6905_v41 = vadd.f32 %v8446_v57, %v7396_v26  ;;  %v6896_v30 = vpop.f32.mrb[147].mxu0 }
0x263f   :  { %v6897_v55 = vadd.f32 %v7396_v26, %v6896_v30  ;;  %v6924_v47 = vadd.f32 %v6894_v8, %v10754_v48 }
0x2640   :  { %v6927_v16 = vadd.f32 %v6905_v41, %v10765_v45  ;;  %v6942_v13 = vsel %vm323_vm0, %v6926_v42, 0.0 }
0x2641   :  { %6943 = vadd.xlane.f32.xlu0 %v6942_v13  ;;  %v6925_v59 = vadd.f32 %v6897_v55, %v10756_v35  ;;  %v6936_v27 = vsel %vm323_vm0, %v6924_v47, 0.0 }
0x2642   :  { %v6945_v34 = vsel %vm323_vm0, %v6927_v16, 0.0 }
0x2643   :  { %6946 = vadd.xlane.f32.xlu1 %v6945_v34  ;;  %v8449_v56 = vpop.f32.mrb[148].mxu0  ;;  %v6939_v48 = vsel %vm323_vm0, %v6925_v59, 0.0 }
0x2644   :  { %v6909_v14 = vpop.f32.mrb[149].mxu0  ;;  %v6918_v32 = vadd.f32 %v8449_v56, %v7396_v26 }
0x2645   :  { %v6910_v52 = vadd.f32 %v7396_v26, %v6909_v14  ;;  %6937 = vadd.xlane.f32.xlu0 %v6936_v27  ;;  %v8450_v49 = vpop.f32.mrb[150].mxu0 }
0x2646   :  { %v6912_v20 = vpop.f32.mrb[151].mxu0  ;;  %v6921_v60 = vadd.f32 %v8450_v49, %v7396_v26  ;;  %v6930_v35 = vadd.f32 %v6918_v32, %v10779_v5 }
0x2647   :  { %v6928_v45 = vadd.f32 %v6910_v52, %v10772_v38  ;;  %v6913_v61 = vadd.f32 %v7396_v26, %v6912_v20  ;;  %6940 = vadd.xlane.f32.xlu1 %v6939_v48 }
0x2648   :  { %v6931_v10 = vadd.f32 %v6921_v60, %v10781_v0  ;;  %v6954_v25 = vsel %vm323_vm0, %v6930_v35, 0.0 }
0x2649   :  { %v6929_v31 = vadd.f32 %v6913_v61, %v10774_v50  ;;  %v6948_v62 = vsel %vm323_vm0, %v6928_v45, 0.0 }
0x264a   :  { %6949 = vadd.xlane.f32.xlu0 %v6948_v62  ;;  %v6957_v38 = vsel %vm323_vm0, %v6931_v10, 0.0 }
0x264b   :  { %v6951_v23 = vsel %vm323_vm0, %v6929_v31, 0.0 }
0x264c   :  { %6952 = vadd.xlane.f32.xlu1 %v6951_v23  ;;  %v7405_v23 = vld [vmem:[#allocation26 + $0x1] ss:$0 sm:$0xff] }
0x264e   :  { %6955 = vadd.xlane.f32.xlu0 %v6954_v25 }
0x2650   :  { %6958 = vadd.xlane.f32.xlu1 %v6957_v38 }
0x26ce   :  { %v6944_v46 = vpop.xlane.xlu0 %6943 }
0x26cf   :  { %v6962_v12 = vmul.f32 0.03125, %v6944_v46 }
0x26d0   :  { %v6947_v37 = vpop.xlane.xlu1 %6946 }
0x26d1   :  { %v10802_v5 = vsub.f32 %v6926_v42, %v6962_v12  ;;  %v6963_v50 = vmul.f32 0.03125, %v6947_v37 }
0x26d2   :  { %v6938_v21 = vpop.xlane.xlu0 %6937 }
0x26d3   :  { %v10804_v19 = vsub.f32 %v6927_v16, %v6963_v50  ;;  %v6960_v11 = vmul.f32 0.03125, %v6938_v21  ;;  %v6978_v0 = vmul.f32 %v10802_v5, %v10802_v5  ;;  %v7406_v50 = vld [vmem:[#allocation28 + $0x1] ss:$0 sm:$0xff] }
0x26d4   :  { %v6941_v63 = vpop.xlane.xlu1 %6940 }
0x26d5   :  { %v10808_v58 = vsub.f32 %v6924_v47, %v6960_v11  ;;  %v6961_v1 = vmul.f32 0.03125, %v6941_v63  ;;  %v6990_v54 = vsel %vm323_vm0, %v6978_v0, 0.0  ;;  %v6979_v22 = vmul.f32 %v10804_v19, %v10804_v19 }
0x26d6   :  { %6991 = vadd.xlane.f32.xlu0 %v6990_v54 }
0x26d7   :  { %v10813_v2 = vsub.f32 %v6925_v59, %v6961_v1  ;;  %v6950_v28 = vpop.xlane.xlu0 %6949  ;;  %v6993_v3 = vsel %vm323_vm0, %v6979_v22, 0.0  ;;  %v6976_v24 = vmul.f32 %v10808_v58, %v10808_v58 }
0x26d8   :  { %v6964_v7 = vmul.f32 0.03125, %v6950_v28  ;;  %6994 = vadd.xlane.f32.xlu1 %v6993_v3 }
0x26d9   :  { %v6953_v39 = vpop.xlane.xlu1 %6952  ;;  %v6984_v9 = vsel %vm323_vm0, %v6976_v24, 0.0  ;;  %v6977_v36 = vmul.f32 %v10813_v2, %v10813_v2 }
0x26da   :  { %v10821_v15 = vsub.f32 %v6928_v45, %v6964_v7  ;;  %v6965_v4 = vmul.f32 0.03125, %v6953_v39  ;;  %6985 = vadd.xlane.f32.xlu0 %v6984_v9 }
0x26db   :  { %v6956_v33 = vpop.xlane.xlu0 %6955  ;;  %v6987_v6 = vsel %vm323_vm0, %v6977_v36, 0.0 }
0x26dc   :  { %v10824_v29 = vsub.f32 %v6929_v31, %v6965_v4  ;;  %v6966_v51 = vmul.f32 0.03125, %v6956_v33  ;;  %6988 = vadd.xlane.f32.xlu1 %v6987_v6  ;;  %v6980_v40 = vmul.f32 %v10821_v15, %v10821_v15 }
0x26dd   :  { %v6959_v53 = vpop.xlane.xlu1 %6958 }
0x26de   :  { %v10828_v44 = vsub.f32 %v6930_v35, %v6966_v51  ;;  %v6967_v26 = vmul.f32 0.03125, %v6959_v53  ;;  %v6996_v43 = vsel %vm323_vm0, %v6980_v40, 0.0  ;;  %v6981_v18 = vmul.f32 %v10824_v29, %v10824_v29 }
0x26df   :  { %6997 = vadd.xlane.f32.xlu0 %v6996_v43 }
0x26e0   :  { %v10833_v17 = vsub.f32 %v6931_v10, %v6967_v26  ;;  %v6999_v8 = vsel %vm323_vm0, %v6981_v18, 0.0  ;;  %v6982_v57 = vmul.f32 %v10828_v44, %v10828_v44 }
0x26e1   :  { %7000 = vadd.xlane.f32.xlu1 %v6999_v8 }
0x26e2   :  { %v7002_v42 = vsel %vm323_vm0, %v6982_v57, 0.0  ;;  %v6983_v41 = vmul.f32 %v10833_v17, %v10833_v17 }
0x26e3   :  { %7003 = vadd.xlane.f32.xlu0 %v7002_v42 }
0x26e4   :  { %v7005_v30 = vsel %vm323_vm0, %v6983_v41, 0.0 }
0x26e5   :  { %7006 = vadd.xlane.f32.xlu1 %v7005_v30 }
0x2763   :  { %v6992_v55 = vpop.xlane.xlu0 %6991 }
0x2764   :  { %v7010_v47 = vmul.f32 0.03125, %v6992_v55 }
0x2765   :  { %v6995_v16 = vpop.xlane.xlu1 %6994 }
0x2766   :  { %v7018_v13 = vadd.f32 1e-05, %v7010_v47  ;;  %v7011_v59 = vmul.f32 0.03125, %v6995_v16 }
0x2767   :  { %v6986_v34 = vpop.xlane.xlu0 %6985 }
0x2768   :  { %8935 = vrsqrt.f32 %v7018_v13  ;;  %v7019_v56 = vadd.f32 1e-05, %v7011_v59  ;;  %v7008_v14 = vmul.f32 0.03125, %v6986_v34 }
0x2769   :  { %v6989_v27 = vpop.xlane.xlu1 %6988 }
0x276a   :  { %8937 = vrsqrt.f32 %v7019_v56  ;;  %v7016_v32 = vadd.f32 1e-05, %v7008_v14  ;;  %v7009_v52 = vmul.f32 0.03125, %v6989_v27 }
0x276c   :  { %8939 = vrsqrt.f32 %v7016_v32  ;;  %v7017_v49 = vadd.f32 1e-05, %v7009_v52  ;;  %v6998_v20 = vpop.xlane.xlu0 %6997 }
0x276d   :  { %v7012_v48 = vmul.f32 0.03125, %v6998_v20 }
0x276e   :  { %8941 = vrsqrt.f32 %v7017_v49  ;;  %v7001_v45 = vpop.xlane.xlu1 %7000 }
0x276f   :  { %v7020_v60 = vadd.f32 1e-05, %v7012_v48  ;;  %v7013_v61 = vmul.f32 0.03125, %v7001_v45 }
0x2770   :  { %v7004_v35 = vpop.xlane.xlu0 %7003 }
0x2771   :  { %8943 = vrsqrt.f32 %v7020_v60  ;;  %v7021_v31 = vadd.f32 1e-05, %v7013_v61  ;;  %v7014_v62 = vmul.f32 0.03125, %v7004_v35 }
0x2772   :  { %v8936_v10 = vpop.eup %8935  ;;  %v7007_v25 = vpop.xlane.xlu1 %7006 }
0x2773   :  { %v7034_v38 = vmul.f32 %v8936_v10, %v10802_v5  ;;  %8945 = vrsqrt.f32 %v7021_v31  ;;  %v7022_v46 = vadd.f32 1e-05, %v7014_v62  ;;  %v7015_v12 = vmul.f32 0.03125, %v7007_v25 }
0x2774   :  { %v8938_v37 = vpop.eup %8937 }
0x2775   :  { %v7048_v21 = vmul.f32 %v7405_v23, %v7034_v38  ;;  %v7035_v11 = vmul.f32 %v8938_v37, %v10804_v19  ;;  %8947 = vrsqrt.f32 %v7022_v46  ;;  %v7023_v0 = vadd.f32 1e-05, %v7015_v12 }
0x2776   :  { %v8940_v63 = vpop.eup %8939 }
0x2777   :  { %v7062_v1 = vadd.f32 %v7406_v50, %v7048_v21  ;;  %v7049_v54 = vmul.f32 %v7405_v23, %v7035_v11  ;;  %v7032_v22 = vmul.f32 %v8940_v63, %v10808_v58  ;;  %8949 = vrsqrt.f32 %v7023_v0 }
0x2778   :  { %v8942_v28 = vpop.eup %8941 }
0x2779   :  { %7070 = vst.msk [vmem:[#allocation29 + $0x10] sm:$0xff] %vm323_vm0, %v7062_v1  ;;  %v7063_v5 = vadd.f32 %v7406_v50, %v7049_v54  ;;  %v7046_v3 = vmul.f32 %v7405_v23, %v7032_v22  ;;  %v7033_v24 = vmul.f32 %v8942_v28, %v10813_v2 }
0x277b   :  { %v8944_v7 = vpop.eup %8943  ;;  %7071 = vst.msk [vmem:[#allocation29 + $0x18] sm:$0xff] %vm323_vm0, %v7063_v5  ;;  %v7060_v39 = vadd.f32 %v7406_v50, %v7046_v3  ;;  %v7047_v19 = vmul.f32 %v7405_v23, %v7033_v24 }
0x277c   :  { %v7036_v9 = vmul.f32 %v8944_v7, %v10821_v15 }
0x277d   :  { %v8946_v36 = vpop.eup %8945  ;;  %7068 = vst.msk [vmem:[#allocation29] sm:$0xff] %vm323_vm0, %v7060_v39  ;;  %v7061_v4 = vadd.f32 %v7406_v50, %v7047_v19 }
0x277e   :  { %v7050_v58 = vmul.f32 %v7405_v23, %v7036_v9  ;;  %v7037_v33 = vmul.f32 %v8946_v36, %v10824_v29 }
0x277f   :  { %v8948_v6 = vpop.eup %8947  ;;  %7069 = vst.msk [vmem:[#allocation29 + $0x8] sm:$0xff] %vm323_vm0, %v7061_v4 }
0x2780   :  { %v7064_v51 = vadd.f32 %v7406_v50, %v7050_v58  ;;  %v7051_v40 = vmul.f32 %v7405_v23, %v7037_v33  ;;  %v7038_v2 = vmul.f32 %v8948_v6, %v10828_v44 }
0x2781   :  { %v8950_v53 = vpop.eup %8949 }
0x2782   :  { %7072 = vst.msk [vmem:[#allocation29 + $0x20] sm:$0xff] %vm323_vm0, %v7064_v51  ;;  %v7065_v26 = vadd.f32 %v7406_v50, %v7051_v40  ;;  %v7052_v43 = vmul.f32 %v7405_v23, %v7038_v2  ;;  %v7039_v15 = vmul.f32 %v8950_v53, %v10833_v17 }
0x2784   :  { %7073 = vst.msk [vmem:[#allocation29 + $0x28] sm:$0xff] %vm323_vm0, %v7065_v26  ;;  %v7066_v18 = vadd.f32 %v7406_v50, %v7052_v43  ;;  %v7053_v29 = vmul.f32 %v7405_v23, %v7039_v15 }
0x2786   :  { %7074 = vst.msk [vmem:[#allocation29 + $0x30] sm:$0xff] %vm323_vm0, %v7066_v18  ;;  %v7067_v8 = vadd.f32 %v7406_v50, %v7053_v29 }
0x2788   :  { %7075 = vst.msk [vmem:[#allocation29 + $0x38] sm:$0xff] %vm323_vm0, %v7067_v8 }
0x2789   :  { %9344 = shalt.err (!%p9341_p0)
}
0x278a   :  { %s10899_s24 = sld [smem:[#allocation42_spill]] }
0x2790   :  { %s9345_s18 = scalar_lea.hbm %s10899_s24, 1024 }
0x2791   :  { %p9346_p1 = scmp.ne.s32.totalorder %s10899_s24, %s9345_s18  ;;  %p9349_p2 = scmp.lt.u32.totalorder %s9345_s18, %s10899_s24 }
0x2793   :  { %p9351_p3 = pnand %p9349_p2, %p9346_p1 }
0x2795   :  { %9354 = shalt.err (!%p9351_p3)
}
0x2796   :  { %7087 = dma.vmem_to_hbm [thread:$0]  %s7082_s26, 1024, %s10899_s24, [#allocation4], %s9388_s15, %s9388_s15, %s9389_s27  }
0x2797   :  { %9373 = dma.done.wait [#allocation4], 1024  }
0x2798   :  { %9374 = vsyncadd [#allocation4], 4294966272 }
0x2799   :  { %7091 = vsyncpa [#allocation3], 1 }
0x279a   :  { %7092 = vsyncpa [#allocation6], 1 }
0x279b   :  { %7093 = vsyncpa [#allocation9], 1 }
0x279c   :  { %7094 = vsyncpa [#allocation12], 1 }
0x279d   :  { %7095 = vsyncpa [#allocation15], 1 }
0x279e   :  { %7096 = vsyncpa [#allocation18], 1 }
0x279f   :  { %7097 = vsyncpa [#allocation21], 1 }
0x27a0   :  { %7098 = vsyncpa [#allocation24], 1 }
0x27a1   :  { %7099 = vsyncpa [#allocation27], 1 }
0x27a2   :  { %7100 = vsyncpa [#allocation4], 1 }

</bundles_post_ra>
